<compile_context>
chip_gen: v7x
topology: tpu7x:2x2x1
jax: 0.10.0
libtpu: 0.0.40
codegen_flags: <defaults>
</compile_context>

<pallas_src>
import functools

import jax
import jax.numpy as jnp
from jax.experimental import pallas as pl
from jax.experimental.pallas import tpu as pltpu

C_IN = 2048   # fixed by the module (Conv2d(2048, 512, 1))
C_HID = 512


def attention_kernel(x_ref, w1_ref, b1_ref, w2_ref, b2_ref, o_ref, scale_ref,
                     *, hw_valid, chunk):
    """One batch tile: x (Bt, HWp, C_IN) f32 -> pooled (Bt, 1, C_IN) f32."""
    Bt, HWp, C = x_ref.shape
    n_chunks = HWp // chunk

    # ---- conv1 (+ folded eval-mode BN) -> ReLU -> conv2 (512 -> 1) -------------
    # bf16 MXU matmul, f32 accumulation; reshape is a free relayout since HWp % 8 == 0.
    xb = x_ref[...].reshape(Bt * HWp, C).astype(jnp.bfloat16)
    h = jnp.dot(xb, w1_ref[...], preferred_element_type=jnp.float32)    # (Bt*HWp, 512)
    h = jnp.maximum(h + b1_ref[...], 0.0)
    # conv2 as a VPU multiply + lane reduction (lane-dense, frees the MXU slot).
    a = jnp.sum(h * w2_ref[...], axis=-1, keepdims=True) + b2_ref[0]    # (Bt*HWp, 1)
    a = a.reshape(Bt, HWp, 1)

    if hw_valid != HWp:
        # mask padded spatial rows out of the softmax
        rows = jax.lax.broadcasted_iota(jnp.int32, (1, HWp, 1), 1)
        a = jnp.where(rows < hw_valid, a, -jnp.inf)

    # ---- softmax over the flattened spatial axis (torch: Softmax(dim=1)) -------
    m = jnp.max(a, axis=1, keepdims=True)                       # (Bt, 1, 1)
    p = jnp.exp(a - m)                                          # (Bt, HWp, 1)
    l = jnp.sum(p, axis=1, keepdims=True)                       # (Bt, 1, 1)
    scale_ref[...] = 1.0 + p * pl.reciprocal(l, approx=True)    # 1 + attn

    # ---- x + x*attn, AdaptiveMaxPool2d(1) as a running max over HW chunks ------
    # (never materializes the full (Bt, HWp, 2048) f32 `y` temporary)
    def body(c, acc):
        start = pl.multiple_of(c * chunk, chunk)
        xc = x_ref[:, pl.ds(start, chunk), :]                   # (Bt, chunk, C) f32
        sc = scale_ref[:, pl.ds(start, chunk), :]               # (Bt, chunk, 1)
        yc = xc * sc
        if hw_valid != HWp:
            rows = jax.lax.broadcasted_iota(jnp.int32, (1, chunk, 1), 1) + c * chunk
            yc = jnp.where(rows < hw_valid, yc, -jnp.inf)       # exclude padded rows
        return jnp.maximum(acc, jnp.max(yc, axis=1, keepdims=True))

    acc0 = jnp.full((Bt, 1, C), -jnp.inf, dtype=jnp.float32)
    o_ref[...] = jax.lax.fori_loop(0, n_chunks, body, acc0)


def fold_params(params):
    """Fold eval-mode BN into conv1 and prepare MXU/VPU-friendly parameter layouts."""
    w1, b1, bn_scale, bn_shift, w2, b2 = params
    w1f = (w1 * bn_scale).astype(jnp.bfloat16)                  # (C_IN, C_HID), per-out-channel BN scale
    b1f = (b1 * bn_scale + bn_shift).astype(jnp.float32)        # (1, C_HID) fused bias
    w2r = w2.reshape(1, C_HID).astype(jnp.float32)              # (1, C_HID) row for VPU reduce
    b2f = jnp.asarray(b2, jnp.float32).reshape(1)               # (1,) scalar for SMEM
    return w1f, b1f, w2r, b2f


def attention_forward_nhwc(x_flat, params):
    """x_flat: (B, HW, 2048) float32 channels-last -> (B, 2048) float32."""
    B, HW, C = x_flat.shape
    assert C == C_IN
    w1f, b1f, w2r, b2f = fold_params(params)

    # Pad the flattened spatial axis to a multiple of 8 (sublane); padded rows are
    # masked inside the kernel (softmax and max-pool).
    HWp = ((HW + 7) // 8) * 8
    if HWp != HW:
        x_flat = jnp.pad(x_flat, ((0, 0), (0, HWp - HW), (0, 0)))

    # ---- generation-aware VMEM budget -------------------------------------------
    try:
        vmem_cap = int(getattr(pltpu.get_tpu_info(), "vmem_capacity_bytes",
                               64 * 1024 * 1024))
    except Exception:
        vmem_cap = 64 * 1024 * 1024          # conservative (v7x-sized) fallback
    budget = (3 * vmem_cap) // 4             # leave headroom for compiler scratch/sems

    def vmem_est(bt, n_xbuf):
        per_b = (HWp * (C_IN * 4 * n_xbuf    # x pipeline buffers (f32)
                        + C_IN * 2           # bf16 copy feeding the MXU
                        + C_HID * 4          # h (f32)
                        + 4 * 128 * 4)       # lane-padded logits / softmax temps / scale
                 + 2 * C_IN * 4)             # pooled output block (double buffered)
        fixed = (2 * C_IN * C_HID * 2        # w1 bf16 (worst case: double buffered)
                 + 16 * C_HID * 4            # b1 / w2 rows
                 + (1 << 20))                # chunk temporaries + misc slack
        return bt * per_b + fixed

    # TODO(synk): add an HW-tiled two-pass variant ('arbitrary' spatial grid axis with
    # running softmax stats) for spatial sizes too large for a single VMEM block.
    assert vmem_est(1, 2) <= budget, (
        f"HW={HW} too large for a single VMEM block on this chip "
        f"(need {vmem_est(1, 2)} bytes, budget {budget})")

    # ---- batch tile: as big as the budget allows, but keep the grid >= 2 steps so
    # both v7x TensorCores get work (no-op on single-core v5e/v6e). ----------------
    bt_cap = 1
    while bt_cap + 1 <= B and vmem_est(bt_cap + 1, 2) <= budget:
        bt_cap += 1
    if B >= 2:
        bt_cap = min(bt_cap, B // 2)
    bt = max(d for d in range(1, bt_cap + 1) if B % d == 0)
    grid = (B // bt,)

    # Deepen the x pipeline to 3 buffers when VMEM and the grid length allow.
    n_xbuf = 3 if (grid[0] > 3 and vmem_est(bt, 3) <= budget) else 2

    est = vmem_est(bt, n_xbuf)
    vmem_limit = int(min(budget, max(est * 3 // 2, 32 * 1024 * 1024)))

    # Max-pool chunk: <= 128 rows, multiple of 8, divides HWp.
    chunk = HWp if HWp <= 128 else max(c for c in (128, 64, 32, 16, 8) if HWp % c == 0)

    try:
        cost = pl.CostEstimate(
            flops=int(2 * B * HWp * C_IN * C_HID + 2 * B * HWp * C_HID
                      + 4 * B * HWp * C_IN),
            transcendentals=int(B * HWp),
            bytes_accessed=int(B * HWp * C_IN * 4 + C_IN * C_HID * 2 + B * C_IN * 4),
        )
    except Exception:
        cost = None

    def build(use_pipeline_mode):
        def spec(shape, index_map, buffers=None):
            if use_pipeline_mode and buffers is not None:
                return pl.BlockSpec(shape, index_map, pipeline_mode=pl.Buffered(buffers))
            return pl.BlockSpec(shape, index_map)

        in_specs = [
            spec((bt, HWp, C_IN), lambda i: (i, 0, 0),
                 n_xbuf if n_xbuf != 2 else None),                 # x (batch-tiled)
            spec((C_IN, C_HID), lambda i: (0, 0), 1),              # folded conv1+BN (bf16)
            spec((1, C_HID), lambda i: (0, 0), 1),                 # fused bias (f32)
            spec((1, C_HID), lambda i: (0, 0), 1),                 # conv2 weight row (f32)
            pl.BlockSpec(memory_space=pltpu.MemorySpace.SMEM),     # conv2 bias (scalar)
        ]
        return pl.pallas_call(
            functools.partial(attention_kernel, hw_valid=HW, chunk=chunk),
            out_shape=jax.ShapeDtypeStruct((B, 1, C_IN), jnp.float32),
            grid=grid,
            in_specs=in_specs,
            out_specs=pl.BlockSpec((bt, 1, C_IN), lambda i: (i, 0, 0)),
            scratch_shapes=[pltpu.VMEM((bt, HWp, 1), jnp.float32)],   # 1 + attn
            compiler_params=pltpu.CompilerParams(
                dimension_semantics=("parallel",),
                vmem_limit_bytes=vmem_limit),
            cost_estimate=cost,
        )

    try:
        out = build(True)(x_flat, w1f, b1f, w2r, b2f)
    except Exception:
        # pipeline_mode / pl.Buffered not supported on this jax version: use defaults.
        out = build(False)(x_flat, w1f, b1f, w2r, b2f)
    return out.reshape(B, C_IN)


def attention_forward(x_nchw, params):
    """Convenience NCHW entry point (matches the torch module's input layout).

    Prefer attention_forward_nhwc with channels-last data to avoid this extra HBM pass.
    """
    B, C, H, W = x_nchw.shape
    assert C == C_IN
    x = jnp.transpose(x_nchw, (0, 2, 3, 1)).reshape(B, H * W, C)
    return attention_forward_nhwc(x, params)


def init_params(key):
    """Deterministic synthetic parameters matching the module's shapes."""
    k1, k2, k3, k4, k5, k6 = jax.random.split(key, 6)
    # Conv2d(2048, 512, 1): weight (512, 2048, 1, 1) -> stored transposed as (2048, 512)
    w1 = jax.random.normal(k1, (C_IN, C_HID), jnp.float32) * 0.02
    b1 = jax.random.normal(k2, (1, C_HID), jnp.float32) * 0.02
    # BatchNorm2d(512), eval-mode fold of (gamma, beta, running_mean, running_var, eps)
    gamma = 1.0 + 0.1 * jax.random.normal(k3, (1, C_HID), jnp.float32)
    beta = 0.1 * jax.random.normal(k4, (1, C_HID), jnp.float32)
    running_mean = jnp.zeros((1, C_HID), jnp.float32)
    running_var = jnp.ones((1, C_HID), jnp.float32)
    eps = 1e-5
    bn_scale = gamma / jnp.sqrt(running_var + eps)
    bn_shift = beta - running_mean * bn_scale
    # TODO(synk): BatchNorm is implemented in eval mode (running stats); training-mode
    # batch statistics would require a cross-batch reduction pass before ReLU.
    # Conv2d(512, 1, 1): weight (1, 512, 1, 1) -> stored transposed as (512, 1)
    w2 = jax.random.normal(k5, (C_HID, 1), jnp.float32) * 0.05
    b2 = jax.random.normal(k6, (1, 1), jnp.float32) * 0.05
    return (w1, b1, bn_scale, bn_shift, w2, b2)


def reference_forward(x_nchw, params):
    """Pure-JAX f32 reference of the PyTorch forward (eval-mode BN)."""
    w1, b1, bn_scale, bn_shift, w2, b2 = params
    B, C, H, W = x_nchw.shape
    xf = jnp.transpose(x_nchw, (0, 2, 3, 1)).reshape(B, H * W, C)
    h = jnp.einsum("bsc,ch->bsh", xf, w1) + b1
    h = jnp.maximum(h * bn_scale + bn_shift, 0.0)
    a = jnp.einsum("bsh,ho->bso", h, w2)[..., 0] + b2[0, 0]            # (B, HW)
    attn = jax.nn.softmax(a, axis=1)[..., None]                         # (B, HW, 1)
    y = xf * (1.0 + attn)
    return jnp.max(y, axis=1)                                           # (B, C)


if __name__ == "__main__":
    key = jax.random.PRNGKey(0)
    kx, kp = jax.random.split(key)
    params = init_params(kp)

    # 7x7 exercises the HW-padding + masking path (49 -> 56); 8x8 the unpadded path.
    for (B, H, W) in ((2, 7, 7), (2, 8, 8)):
        kx, sub = jax.random.split(kx)
        x_nchw = jax.random.normal(sub, (B, C_IN, H, W), jnp.float32)
        out = jax.block_until_ready(attention_forward(x_nchw, params))
        ref = reference_forward(x_nchw, params)
        assert out.shape == (B, C_IN)
        # bf16 matmul + approx reciprocal -> compare against the f32 reference loosely
        assert jnp.allclose(out, ref, rtol=1e-2, atol=1e-2), \
            f"mismatch vs pure-JAX reference at H=W={H}"

    print("KERNEL_OK")
</pallas_src>

<mosaic_0001>
module attributes {stable_mosaic.version = 11 : i64} {
  func.func @attention_kernel(%arg0: i32, %arg1: memref<1x56x2048xf32, #tpu.memory_space<vmem>>, %arg2: memref<2048x512xbf16, #tpu.memory_space<vmem>>, %arg3: memref<1x512xf32, #tpu.memory_space<vmem>>, %arg4: memref<1x512xf32, #tpu.memory_space<vmem>>, %arg5: memref<1xf32, #tpu.memory_space<smem>>, %arg6: memref<1x1x2048xf32, #tpu.memory_space<vmem>>, %arg7: memref<1x56x1xf32, #tpu.memory_space<vmem>>) attributes {dimension_semantics = [#tpu.dimension_semantics<parallel>], iteration_bounds = array<i64: 2>, scalar_prefetch = 0 : i64, scratch_operands = 1 : i64, tpu.core_type = #tpu.core_type<tc>, window_params = [{transform_indices = @transform_0, window_bounds = array<i64: 1, 56, 2048>}, {pipeline_mode = #tpu.pipeline_mode<synchronous>, transform_indices = @transform_1, window_bounds = array<i64: 2048, 512>}, {pipeline_mode = #tpu.pipeline_mode<synchronous>, transform_indices = @transform_2, window_bounds = array<i64: 1, 512>}, {pipeline_mode = #tpu.pipeline_mode<synchronous>, transform_indices = @transform_3, window_bounds = array<i64: 1, 512>}, {transform_indices = @transform_4, window_bounds = array<i64: 1>}, {transform_indices = @transform_5, window_bounds = array<i64: 1, 1, 2048>}]} {
    %c0 = arith.constant 0 : index
    %c0_0 = arith.constant 0 : index
    %c0_1 = arith.constant 0 : index
    %0 = vector.load %arg1[%c0, %c0_0, %c0_1] : memref<1x56x2048xf32, #tpu.memory_space<vmem>>, vector<1x56x2048xf32>
    %1 = vector.shape_cast %0 : vector<1x56x2048xf32> to vector<56x2048xf32>
    %2 = arith.truncf %1 : vector<56x2048xf32> to vector<56x2048xbf16>
    %c0_2 = arith.constant 0 : index
    %c0_3 = arith.constant 0 : index
    %3 = vector.load %arg2[%c0_2, %c0_3] : memref<2048x512xbf16, #tpu.memory_space<vmem>>, vector<2048x512xbf16>
    %cst = arith.constant dense<0.000000e+00> : vector<56x512xf32>
    %4 = tpu.matmul %2, %3, %cst {dimension_numbers = #tpu.dot_dimension_numbers<[1], [0], [0], [1], [0, 0, 1, 1], [], []>} : vector<56x2048xbf16>, vector<2048x512xbf16>, vector<56x512xf32> -> vector<56x512xf32>
    %c0_4 = arith.constant 0 : index
    %c0_5 = arith.constant 0 : index
    %5 = vector.load %arg3[%c0_4, %c0_5] : memref<1x512xf32, #tpu.memory_space<vmem>>, vector<1x512xf32>
    %6 = vector.broadcast %5 : vector<1x512xf32> to vector<56x512xf32>
    %7 = arith.addf %4, %6 : vector<56x512xf32>
    %cst_6 = arith.constant 0.000000e+00 : f32
    %8 = vector.broadcast %cst_6 : f32 to vector<56x512xf32>
    %9 = arith.maximumf %7, %8 : vector<56x512xf32>
    %c0_7 = arith.constant 0 : index
    %c0_8 = arith.constant 0 : index
    %10 = vector.load %arg4[%c0_7, %c0_8] : memref<1x512xf32, #tpu.memory_space<vmem>>, vector<1x512xf32>
    %11 = vector.broadcast %10 : vector<1x512xf32> to vector<56x512xf32>
    %12 = arith.mulf %9, %11 : vector<56x512xf32>
    %cst_9 = arith.constant dense<0.000000e+00> : vector<56xf32>
    %13 = vector.multi_reduction <add>, %12, %cst_9 [1] : vector<56x512xf32> to vector<56xf32>
    %14 = vector.shape_cast %13 : vector<56xf32> to vector<56x1xf32>
    %c0_10 = arith.constant 0 : index
    %15 = memref.load %arg5[%c0_10] : memref<1xf32, #tpu.memory_space<smem>>
    %16 = vector.broadcast %15 : f32 to vector<56x1xf32>
    %17 = arith.addf %14, %16 : vector<56x1xf32>
    %18 = vector.shape_cast %17 : vector<56x1xf32> to vector<1x56x1xf32>
    %19 = tpu.iota {dimensions = array<i32: 1>} : vector<1x56x1xi32>
    %c49_i32 = arith.constant 49 : i32
    %20 = vector.broadcast %c49_i32 : i32 to vector<1x56x1xi32>
    %21 = arith.cmpi slt, %19, %20 : vector<1x56x1xi32>
    %cst_11 = arith.constant 0xFF800000 : f32
    %22 = vector.broadcast %cst_11 : f32 to vector<1x56x1xf32>
    %23 = arith.select %21, %18, %22 : vector<1x56x1xi1>, vector<1x56x1xf32>
    %cst_12 = arith.constant dense<0xFF800000> : vector<1x1xf32>
    %24 = vector.multi_reduction <maximumf>, %23, %cst_12 [1] : vector<1x56x1xf32> to vector<1x1xf32>
    %25 = vector.shape_cast %24 : vector<1x1xf32> to vector<1x1x1xf32>
    %26 = vector.broadcast %25 : vector<1x1x1xf32> to vector<1x56x1xf32>
    %27 = arith.subf %23, %26 : vector<1x56x1xf32>
    %28 = math.exp %27 : vector<1x56x1xf32>
    %cst_13 = arith.constant dense<0.000000e+00> : vector<1x1xf32>
    %29 = vector.multi_reduction <add>, %28, %cst_13 [1] : vector<1x56x1xf32> to vector<1x1xf32>
    %30 = vector.shape_cast %29 : vector<1x1xf32> to vector<1x1x1xf32>
    %31 = tpu.reciprocal %30 {approx = true} : vector<1x1x1xf32> -> vector<1x1x1xf32>
    %32 = vector.broadcast %31 : vector<1x1x1xf32> to vector<1x56x1xf32>
    %33 = arith.mulf %28, %32 : vector<1x56x1xf32>
    %cst_14 = arith.constant 1.000000e+00 : f32
    %34 = vector.broadcast %cst_14 : f32 to vector<1x56x1xf32>
    %35 = arith.addf %34, %33 : vector<1x56x1xf32>
    %c0_15 = arith.constant 0 : index
    %c0_16 = arith.constant 0 : index
    %c0_17 = arith.constant 0 : index
    %36 = vector.load %arg7[%c0_15, %c0_16, %c0_17] : memref<1x56x1xf32, #tpu.memory_space<vmem>>, vector<1x56x1xf32>
    tpu.vector_store %arg7[%c0_15, %c0_16, %c0_17], %35 {strides = array<i32>} : memref<1x56x1xf32, #tpu.memory_space<vmem>>, vector<1x56x1xf32>,
    %cst_18 = arith.constant 0xFF800000 : f32
    %37 = vector.broadcast %cst_18 : f32 to vector<1x1x2048xf32>
    %c0_i32 = arith.constant 0 : i32
    %c56_i32 = arith.constant 56 : i32
    %38 = arith.muli %c0_i32, %c56_i32 : i32
    %39 = tpu.assume_multiple %38, 56 : i32
    %c0_19 = arith.constant 0 : index
    %40 = arith.index_cast %39 : i32 to index
    %c0_20 = arith.constant 0 : index
    %41 = vector.load %arg1[%c0_19, %40, %c0_20] : memref<1x56x2048xf32, #tpu.memory_space<vmem>>, vector<1x56x2048xf32>
    %c0_21 = arith.constant 0 : index
    %42 = arith.index_cast %39 : i32 to index
    %c0_22 = arith.constant 0 : index
    %43 = vector.load %arg7[%c0_21, %42, %c0_22] : memref<1x56x1xf32, #tpu.memory_space<vmem>>, vector<1x56x1xf32>
    %44 = vector.broadcast %43 : vector<1x56x1xf32> to vector<1x56x2048xf32>
    %45 = arith.mulf %41, %44 : vector<1x56x2048xf32>
    %46 = tpu.iota {dimensions = array<i32: 1>} : vector<1x56x1xi32>
    %c56_i32_23 = arith.constant 56 : i32
    %47 = arith.muli %c0_i32, %c56_i32_23 : i32
    %48 = vector.broadcast %47 : i32 to vector<1x56x1xi32>
    %49 = arith.addi %46, %48 : vector<1x56x1xi32>
    %c49_i32_24 = arith.constant 49 : i32
    %50 = vector.broadcast %c49_i32_24 : i32 to vector<1x56x1xi32>
    %51 = arith.cmpi slt, %49, %50 : vector<1x56x1xi32>
    %cst_25 = arith.constant 0xFF800000 : f32
    %52 = vector.shape_cast %51 : vector<1x56x1xi1> to vector<1x56x1xi1>
    %53 = vector.broadcast %52 : vector<1x56x1xi1> to vector<1x56x2048xi1>
    %54 = vector.broadcast %cst_25 : f32 to vector<1x56x2048xf32>
    %55 = arith.select %53, %45, %54 : vector<1x56x2048xi1>, vector<1x56x2048xf32>
    %cst_26 = arith.constant dense<0xFF800000> : vector<1x2048xf32>
    %56 = vector.multi_reduction <maximumf>, %55, %cst_26 [1] : vector<1x56x2048xf32> to vector<1x2048xf32>
    %57 = vector.shape_cast %56 : vector<1x2048xf32> to vector<1x1x2048xf32>
    %58 = arith.maximumf %37, %57 : vector<1x1x2048xf32>
    %c1_i32 = arith.constant 1 : i32
    %c0_27 = arith.constant 0 : index
    %c0_28 = arith.constant 0 : index
    %c0_29 = arith.constant 0 : index
    %59 = vector.load %arg6[%c0_27, %c0_28, %c0_29] : memref<1x1x2048xf32, #tpu.memory_space<vmem>>, vector<1x1x2048xf32>
    tpu.vector_store %arg6[%c0_27, %c0_28, %c0_29], %58 {strides = array<i32>} : memref<1x1x2048xf32, #tpu.memory_space<vmem>>, vector<1x1x2048xf32>,
    return
  }
  func.func @transform_0(%arg0: i32) -> (i32, i32, i32) {
    %c0_i32 = arith.constant 0 : i32
    %c0_i32_0 = arith.constant 0 : i32
    %c0_i32_1 = arith.constant 0 : i32
    return %arg0, %c0_i32, %c0_i32_0 : i32, i32, i32
  }
  func.func @transform_1(%arg0: i32) -> (i32, i32) {
    %c0_i32 = arith.constant 0 : i32
    %c0_i32_0 = arith.constant 0 : i32
    %c0_i32_1 = arith.constant 0 : i32
    return %c0_i32, %c0_i32_0 : i32, i32
  }
  func.func @transform_2(%arg0: i32) -> (i32, i32) {
    %c0_i32 = arith.constant 0 : i32
    %c0_i32_0 = arith.constant 0 : i32
    %c0_i32_1 = arith.constant 0 : i32
    return %c0_i32, %c0_i32_0 : i32, i32
  }
  func.func @transform_3(%arg0: i32) -> (i32, i32) {
    %c0_i32 = arith.constant 0 : i32
    %c0_i32_0 = arith.constant 0 : i32
    %c0_i32_1 = arith.constant 0 : i32
    return %c0_i32, %c0_i32_0 : i32, i32
  }
  func.func @transform_4(%arg0: i32) -> i32 {
    %c0_i32 = arith.constant 0 : i32
    %c0_i32_0 = arith.constant 0 : i32
    return %c0_i32 : i32
  }
  func.func @transform_5(%arg0: i32) -> (i32, i32, i32) {
    %c0_i32 = arith.constant 0 : i32
    %c0_i32_0 = arith.constant 0 : i32
    %c0_i32_1 = arith.constant 0 : i32
    return %arg0, %c0_i32, %c0_i32_0 : i32, i32, i32
  }
}

module attributes {stable_mosaic.version = 11 : i64} {
  func.func @attention_kernel(%arg0: i32, %arg1: memref<1x56x2048xf32, #tpu.memory_space<vmem>>, %arg2: memref<2048x512xbf16, #tpu.memory_space<vmem>>, %arg3: memref<1x512xf32, #tpu.memory_space<vmem>>, %arg4: memref<1x512xf32, #tpu.memory_space<vmem>>, %arg5: memref<1xf32, #tpu.memory_space<smem>>, %arg6: memref<1x1x2048xf32, #tpu.memory_space<vmem>>, %arg7: memref<1x56x1xf32, #tpu.memory_space<vmem>>) attributes {dimension_semantics = [#tpu.dimension_semantics<parallel>], iteration_bounds = array<i64: 2>, scalar_prefetch = 0 : i64, scratch_operands = 1 : i64, tpu.core_type = #tpu.core_type<tc>, window_params = [{transform_indices = @transform_0, window_bounds = array<i64: 1, 56, 2048>}, {pipeline_mode = #tpu.pipeline_mode<synchronous>, transform_indices = @transform_1, window_bounds = array<i64: 2048, 512>}, {pipeline_mode = #tpu.pipeline_mode<synchronous>, transform_indices = @transform_2, window_bounds = array<i64: 1, 512>}, {pipeline_mode = #tpu.pipeline_mode<synchronous>, transform_indices = @transform_3, window_bounds = array<i64: 1, 512>}, {transform_indices = @transform_4, window_bounds = array<i64: 1>}, {transform_indices = @transform_5, window_bounds = array<i64: 1, 1, 2048>}]} {
    %c0 = arith.constant 0 : index
    %c0_0 = arith.constant 0 : index
    %c0_1 = arith.constant 0 : index
    %0 = vector.load %arg1[%c0, %c0_0, %c0_1] : memref<1x56x2048xf32, #tpu.memory_space<vmem>>, vector<1x56x2048xf32>
    %1 = vector.shape_cast %0 : vector<1x56x2048xf32> to vector<56x2048xf32>
    %2 = arith.truncf %1 : vector<56x2048xf32> to vector<56x2048xbf16>
    %c0_2 = arith.constant 0 : index
    %c0_3 = arith.constant 0 : index
    %3 = vector.load %arg2[%c0_2, %c0_3] : memref<2048x512xbf16, #tpu.memory_space<vmem>>, vector<2048x512xbf16>
    %cst = arith.constant dense<0.000000e+00> : vector<56x512xf32>
    %4 = tpu.matmul %2, %3, %cst {dimension_numbers = #tpu.dot_dimension_numbers<[1], [0], [0], [1], [0, 0, 1, 1], [], []>} : vector<56x2048xbf16>, vector<2048x512xbf16>, vector<56x512xf32> -> vector<56x512xf32>
    %c0_4 = arith.constant 0 : index
    %c0_5 = arith.constant 0 : index
    %5 = vector.load %arg3[%c0_4, %c0_5] : memref<1x512xf32, #tpu.memory_space<vmem>>, vector<1x512xf32>
    %6 = vector.broadcast %5 : vector<1x512xf32> to vector<56x512xf32>
    %7 = arith.addf %4, %6 : vector<56x512xf32>
    %cst_6 = arith.constant 0.000000e+00 : f32
    %8 = vector.broadcast %cst_6 : f32 to vector<56x512xf32>
    %9 = arith.maximumf %7, %8 : vector<56x512xf32>
    %c0_7 = arith.constant 0 : index
    %c0_8 = arith.constant 0 : index
    %10 = vector.load %arg4[%c0_7, %c0_8] : memref<1x512xf32, #tpu.memory_space<vmem>>, vector<1x512xf32>
    %11 = vector.broadcast %10 : vector<1x512xf32> to vector<56x512xf32>
    %12 = arith.mulf %9, %11 : vector<56x512xf32>
    %cst_9 = arith.constant dense<0.000000e+00> : vector<56xf32>
    %13 = vector.multi_reduction <add>, %12, %cst_9 [1] : vector<56x512xf32> to vector<56xf32>
    %14 = vector.shape_cast %13 : vector<56xf32> to vector<56x1xf32>
    %c0_10 = arith.constant 0 : index
    %15 = memref.load %arg5[%c0_10] : memref<1xf32, #tpu.memory_space<smem>>
    %16 = vector.broadcast %15 : f32 to vector<56x1xf32>
    %17 = arith.addf %14, %16 : vector<56x1xf32>
    %18 = vector.shape_cast %17 : vector<56x1xf32> to vector<1x56x1xf32>
    %19 = tpu.iota {dimensions = array<i32: 1>} : vector<1x56x1xi32>
    %c49_i32 = arith.constant 49 : i32
    %20 = vector.broadcast %c49_i32 : i32 to vector<1x56x1xi32>
    %21 = arith.cmpi slt, %19, %20 : vector<1x56x1xi32>
    %cst_11 = arith.constant 0xFF800000 : f32
    %22 = vector.broadcast %cst_11 : f32 to vector<1x56x1xf32>
    %23 = arith.select %21, %18, %22 : vector<1x56x1xi1>, vector<1x56x1xf32>
    %cst_12 = arith.constant dense<0xFF800000> : vector<1x1xf32>
    %24 = vector.multi_reduction <maximumf>, %23, %cst_12 [1] : vector<1x56x1xf32> to vector<1x1xf32>
    %25 = vector.shape_cast %24 : vector<1x1xf32> to vector<1x1x1xf32>
    %26 = vector.broadcast %25 : vector<1x1x1xf32> to vector<1x56x1xf32>
    %27 = arith.subf %23, %26 : vector<1x56x1xf32>
    %28 = math.exp %27 : vector<1x56x1xf32>
    %cst_13 = arith.constant dense<0.000000e+00> : vector<1x1xf32>
    %29 = vector.multi_reduction <add>, %28, %cst_13 [1] : vector<1x56x1xf32> to vector<1x1xf32>
    %30 = vector.shape_cast %29 : vector<1x1xf32> to vector<1x1x1xf32>
    %31 = tpu.reciprocal %30 {approx = true} : vector<1x1x1xf32> -> vector<1x1x1xf32>
    %32 = vector.broadcast %31 : vector<1x1x1xf32> to vector<1x56x1xf32>
    %33 = arith.mulf %28, %32 : vector<1x56x1xf32>
    %cst_14 = arith.constant 1.000000e+00 : f32
    %34 = vector.broadcast %cst_14 : f32 to vector<1x56x1xf32>
    %35 = arith.addf %34, %33 : vector<1x56x1xf32>
    %c0_15 = arith.constant 0 : index
    %c0_16 = arith.constant 0 : index
    %c0_17 = arith.constant 0 : index
    %36 = vector.load %arg7[%c0_15, %c0_16, %c0_17] : memref<1x56x1xf32, #tpu.memory_space<vmem>>, vector<1x56x1xf32>
    tpu.vector_store %arg7[%c0_15, %c0_16, %c0_17], %35 {strides = array<i32>} : memref<1x56x1xf32, #tpu.memory_space<vmem>>, vector<1x56x1xf32>,
    %cst_18 = arith.constant 0xFF800000 : f32
    %37 = vector.broadcast %cst_18 : f32 to vector<1x1x2048xf32>
    %c0_i32 = arith.constant 0 : i32
    %c56_i32 = arith.constant 56 : i32
    %38 = arith.muli %c0_i32, %c56_i32 : i32
    %39 = tpu.assume_multiple %38, 56 : i32
    %c0_19 = arith.constant 0 : index
    %40 = arith.index_cast %39 : i32 to index
    %c0_20 = arith.constant 0 : index
    %41 = vector.load %arg1[%c0_19, %40, %c0_20] : memref<1x56x2048xf32, #tpu.memory_space<vmem>>, vector<1x56x2048xf32>
    %c0_21 = arith.constant 0 : index
    %42 = arith.index_cast %39 : i32 to index
    %c0_22 = arith.constant 0 : index
    %43 = vector.load %arg7[%c0_21, %42, %c0_22] : memref<1x56x1xf32, #tpu.memory_space<vmem>>, vector<1x56x1xf32>
    %44 = vector.broadcast %43 : vector<1x56x1xf32> to vector<1x56x2048xf32>
    %45 = arith.mulf %41, %44 : vector<1x56x2048xf32>
    %46 = tpu.iota {dimensions = array<i32: 1>} : vector<1x56x1xi32>
    %c56_i32_23 = arith.constant 56 : i32
    %47 = arith.muli %c0_i32, %c56_i32_23 : i32
    %48 = vector.broadcast %47 : i32 to vector<1x56x1xi32>
    %49 = arith.addi %46, %48 : vector<1x56x1xi32>
    %c49_i32_24 = arith.constant 49 : i32
    %50 = vector.broadcast %c49_i32_24 : i32 to vector<1x56x1xi32>
    %51 = arith.cmpi slt, %49, %50 : vector<1x56x1xi32>
    %cst_25 = arith.constant 0xFF800000 : f32
    %52 = vector.shape_cast %51 : vector<1x56x1xi1> to vector<1x56x1xi1>
    %53 = vector.broadcast %52 : vector<1x56x1xi1> to vector<1x56x2048xi1>
    %54 = vector.broadcast %cst_25 : f32 to vector<1x56x2048xf32>
    %55 = arith.select %53, %45, %54 : vector<1x56x2048xi1>, vector<1x56x2048xf32>
    %cst_26 = arith.constant dense<0xFF800000> : vector<1x2048xf32>
    %56 = vector.multi_reduction <maximumf>, %55, %cst_26 [1] : vector<1x56x2048xf32> to vector<1x2048xf32>
    %57 = vector.shape_cast %56 : vector<1x2048xf32> to vector<1x1x2048xf32>
    %58 = arith.maximumf %37, %57 : vector<1x1x2048xf32>
    %c1_i32 = arith.constant 1 : i32
    %c0_27 = arith.constant 0 : index
    %c0_28 = arith.constant 0 : index
    %c0_29 = arith.constant 0 : index
    %59 = vector.load %arg6[%c0_27, %c0_28, %c0_29] : memref<1x1x2048xf32, #tpu.memory_space<vmem>>, vector<1x1x2048xf32>
    tpu.vector_store %arg6[%c0_27, %c0_28, %c0_29], %58 {strides = array<i32>} : memref<1x1x2048xf32, #tpu.memory_space<vmem>>, vector<1x1x2048xf32>,
    return
  }
  func.func @transform_0(%arg0: i32) -> (i32, i32, i32) {
    %c0_i32 = arith.constant 0 : i32
    %c0_i32_0 = arith.constant 0 : i32
    %c0_i32_1 = arith.constant 0 : i32
    return %arg0, %c0_i32, %c0_i32_0 : i32, i32, i32
  }
  func.func @transform_1(%arg0: i32) -> (i32, i32) {
    %c0_i32 = arith.constant 0 : i32
    %c0_i32_0 = arith.constant 0 : i32
    %c0_i32_1 = arith.constant 0 : i32
    return %c0_i32, %c0_i32_0 : i32, i32
  }
  func.func @transform_2(%arg0: i32) -> (i32, i32) {
    %c0_i32 = arith.constant 0 : i32
    %c0_i32_0 = arith.constant 0 : i32
    %c0_i32_1 = arith.constant 0 : i32
    return %c0_i32, %c0_i32_0 : i32, i32
  }
  func.func @transform_3(%arg0: i32) -> (i32, i32) {
    %c0_i32 = arith.constant 0 : i32
    %c0_i32_0 = arith.constant 0 : i32
    %c0_i32_1 = arith.constant 0 : i32
    return %c0_i32, %c0_i32_0 : i32, i32
  }
  func.func @transform_4(%arg0: i32) -> i32 {
    %c0_i32 = arith.constant 0 : i32
    %c0_i32_0 = arith.constant 0 : i32
    return %c0_i32 : i32
  }
  func.func @transform_5(%arg0: i32) -> (i32, i32, i32) {
    %c0_i32 = arith.constant 0 : i32
    %c0_i32_0 = arith.constant 0 : i32
    %c0_i32_1 = arith.constant 0 : i32
    return %arg0, %c0_i32, %c0_i32_0 : i32, i32, i32
  }
}

</mosaic_0001>

<bundles_post_ra>
// kernel: tpu_custom_call.1
= control target key start
LH: loop header
LB: loop body
LE: loop exit
PB: predicated region body
PF: predicated region fallthrough
CT: control target
= control target key end

     0   :  { %s8621_s0 = inlined_call_operand.hbm [shape: f32[2,56,2048], index: 0, kind: input, shape index: {}]   ;;  %s8622_s1 = inlined_call_operand.hbm [shape: bf16[2048,512], index: 1, kind: input, shape index: {}]   ;;  %s8623_s2 = inlined_call_operand.hbm [shape: f32[1,512], index: 2, kind: input, shape index: {}]   ;;  %s8624_s3 = inlined_call_operand.hbm [shape: f32[1,512], index: 3, kind: input, shape index: {}]   ;;  %s8625_s4 = inlined_call_operand.<no memory space> [shape: f32[1], index: 4, kind: input, shape index: {}]   ;;  %s8626_s5 = inlined_call_operand.hbm [shape: f32[2,1,2048], index: 5, kind: output, shape index: {}]  }
   0x1   :  { %10 = sst [smem:[#allocation3]] %s8625_s4 }
   0x2   :  { %11 = vsyncpa [#allocation5], 0 }
   0x3   :  { %13 = vsyncpa [#allocation5 + $0x1], 0 }
   0x4   :  { %14 = vsyncpa [#allocation8], 0 }
   0x5   :  { %15 = vsyncpa [#allocation11], 0 }
   0x6   :  { %16 = vsyncpa [#allocation6], 0 }
   0x7   :  { %18 = vsyncpa [#allocation6 + $0x1], 0  ;;  %s7619_s20 = smov 0   ;;  %s7621_s21 = smov 0  }
   0x8   :  { %s7623_s22 = smov 0   ;;  %s7625_s23 = smov 0  }
   0x9 LB: > { %s7640_s4 = sadd.s32 4294967295, %s7573_s23   ;;  %s5721_s24 = sadd.s32 4294967294, %s7573_s23   ;;  %s7573_s23 = sphi %s7625_s23, %s8786_s23   ;;  %s7569_s22 = sphi %s7623_s22, %s8785_s22   ;;  %s7565_s21 = sphi %s7621_s21, %s8784_s21   ;;  %s7561_s20 = sphi %s7619_s20, %s8783_s20  }
   0xa   : > { %p44_p0 = scmp.ne.s32.totalorder %s7565_s21, %s7561_s20  ;;  %p8627_p1 = scmp.eq.s32.totalorder %s7640_s4, 0 }
   0xb   : > { %p158_p3 = scmp.eq.s32.totalorder %s5721_s24, 1  ;;  %p5722_p5 = scmp.ge.s32.totalorder %s7573_s23, 1 }
   0xc   : > { %p7649_p4 = por %p8627_p1, %p44_p0  ;;  %p165_p7 = scmp.lt.s32.totalorder %s7573_s23, 3 }
   0xd   : > { %p7654_p6 = por %p158_p3, %p44_p0  ;;  %s7575_s28 = smov [#allocation7]  }
   0xe   : > { %s8631_s25 = scalar_select %p7649_p4, 1, 0 }
   0xf   : > { %s8632_s26 = scalar_select %p7654_p6, 1, 0 }
  0x10   : > { %p7659_p8 = pnand %p5722_p5, %p165_p7  ;;  %s177_s29 = sshll.u32 %s7575_s28, 4  ;;  %s7663_s29 = int_to_ptr.vmem [resolvable:$true] %s177_s29 }
  0x11   : > { %s7576_s6 = smov [#allocation9]   ;;  %s7577_s8 = smov [#allocation10]  }
  0x12   : > { %s8633_s27 = scalar_select %p7659_p8, 1, 0 }
  0x13   : > { %p6522_p9 = pneg %p7659_p8  ;;  %s191_s7 = sshll.u32 %s7576_s6, 4  ;;  %s7674_s7 = int_to_ptr.vmem [resolvable:$true] %s191_s7 }
  0x14   : > { %s7676_s9 = sshll.u32 %s7577_s8, 4  ;;  %s7385_s12 = scalar_lea.hbm %s8622_s1, 65536  ;;  %s203_s9 = int_to_ptr.vmem [resolvable:$true] %s7676_s9 }
  0x15   : > { %p7670_p11 = pnand %p6522_p9, %p8627_p1  ;;  %p7386_p12 = scmp.ne.s32.totalorder %s8622_s1, %s7385_s12 }
  0x16   : > { %p7392_p5 = scmp.lt.u32.totalorder %s7385_s12, %s8622_s1 }
  0x17   : > { %p7686_p13 = pneg %p7670_p11 }
  0x19   : > { %p7388_p0 = pnand %p7686_p13, %p7386_p12 }
  0x1b   : > { %p7389_p3 = pneg %p7388_p0 }
  0x1d   : > { %p7394_p7 = pnand %p7392_p5, %p7389_p3 }
  0x1f   : > { %7397 = shalt.err (!%p7394_p7)
}
  0x20   : > { %s7398_s18 = scalar_lea.vmem %s7663_s29, 65536  ;;  %p7406_p2 = scmp.lt.s32.totalorder %s7663_s29, %s7663_s29 }
  0x21   : > { %p7399_p9 = scmp.ne.s32.totalorder %s7663_s29, %s7398_s18  ;;  %p7407_p6 = scmp.lt.s32.totalorder %s7398_s18, %s7398_s18 }
  0x23   : > { %p7401_p10 = pnand %p7399_p9, %p7686_p13  ;;  %p7408_p12 = por %p7407_p6, %p7406_p2 }
  0x25   : > { %p7402_p1 = pneg %p7401_p10 }
  0x27   : > { %p7409_p0 = pnand %p7408_p12, %p7402_p1 }
  0x29   : > { %7412 = shalt.err (!%p7409_p0)
}
  0x2a   : > { %s7578_s19 = smov 256   ;;  %s7579_s24 = smov 16  }
  0x2b   : > { %6525 = dma.hbm_to_vmem [thread:$0]  (!%p7670_p11), %s8622_s1, 65536, %s7663_s29, [#allocation8], %s7578_s19, %s7578_s19, %s7579_s24  }
  0x2c   : > { %s7413_s11 = scalar_lea.hbm %s8623_s2, 64 }
  0x2d   : > { %p7414_p2 = scmp.ne.s32.totalorder %s8623_s2, %s7413_s11  ;;  %p7420_p10 = scmp.lt.u32.totalorder %s7413_s11, %s8623_s2 }
  0x2f   : > { %p7416_p1 = pnand %p7414_p2, %p7686_p13 }
  0x31   : > { %p7417_p6 = pneg %p7416_p1 }
  0x33   : > { %p7422_p3 = pnand %p7420_p10, %p7417_p6 }
  0x35   : > { %7425 = shalt.err (!%p7422_p3)
}
  0x36   : > { %s7426_s29 = scalar_lea.vmem %s7674_s7, 64  ;;  %p7434_p12 = scmp.lt.s32.totalorder %s7674_s7, %s7674_s7 }
  0x37   : > { %p7427_p5 = scmp.ne.s32.totalorder %s7674_s7, %s7426_s29  ;;  %p7435_p0 = scmp.lt.s32.totalorder %s7426_s29, %s7426_s29 }
  0x39   : > { %p7429_p7 = pnand %p7427_p5, %p7686_p13  ;;  %p7436_p2 = por %p7435_p0, %p7434_p12 }
  0x3b   : > { %p7430_p9 = pneg %p7429_p7 }
  0x3d   : > { %p7437_p1 = pnand %p7436_p2, %p7430_p9 }
  0x3f   : > { %7440 = shalt.err (!%p7437_p1)
}
  0x40   : > { %6528 = dma.hbm_to_vmem [thread:$0]  (!%p7670_p11), %s8623_s2, 64, %s7674_s7, [#allocation8]  }
  0x41   : > { %s7441_s28 = scalar_lea.hbm %s8624_s3, 64 }
  0x42   : > { %p7442_p6 = scmp.ne.s32.totalorder %s8624_s3, %s7441_s28  ;;  %p7448_p5 = scmp.lt.u32.totalorder %s7441_s28, %s8624_s3 }
  0x44   : > { %p7444_p10 = pnand %p7442_p6, %p7686_p13 }
  0x46   : > { %p7445_p3 = pneg %p7444_p10 }
  0x48   : > { %p7450_p7 = pnand %p7448_p5, %p7445_p3 }
  0x4a   : > { %7453 = shalt.err (!%p7450_p7)
}
  0x4b   : > { %s7454_s12 = scalar_lea.vmem %s203_s9, 64  ;;  %p7462_p2 = scmp.lt.s32.totalorder %s203_s9, %s203_s9 }
  0x4c   : > { %p7455_p9 = scmp.ne.s32.totalorder %s203_s9, %s7454_s12  ;;  %p7463_p1 = scmp.lt.s32.totalorder %s7454_s12, %s7454_s12 }
  0x4e   : > { %p7457_p12 = pnand %p7455_p9, %p7686_p13  ;;  %p7464_p4 = por %p7463_p1, %p7462_p2 }
  0x50   : > { %p7458_p0 = pneg %p7457_p12 }
  0x52   : > { %p7465_p8 = pnand %p7464_p4, %p7458_p0 }
  0x54   : > { %7468 = shalt.err (!%p7465_p8)
}
  0x55   : > { %6531 = dma.hbm_to_vmem [thread:$0]  (!%p7670_p11), %s8624_s3, 64, %s203_s9, [#allocation11]  }
  0x56   : > { %s7750_s15 = sadd.s32 1, %s7573_s23   ;;  %s31_s30 = sadd.s32 1, %s7569_s22 }
  0x57   : > { %s28_s14 = ssub.s32 %s7573_s23, %s7750_s15  ;;  %p38_p8 = scmp.ne.s32.totalorder %s7569_s22, %s7565_s21 }
  0x58   : > { %p29_p4 = scmp.eq.s32.totalorder %s28_s14, 0  ;;  %p39_p13 = scmp.eq.s32.totalorder %s7573_s23, 0 }
  0x59   : > { %p6543_p6 = scmp.lt.s32.totalorder %s7573_s23, 2  ;;  %p8636_p3 = scmp.eq.s32.totalorder %s7640_s4, 1 }
  0x5a   : > { %s7760_s16 = scalar_select %p29_p4, %s7569_s22, %s31_s30  }
  0x5b   : > { %p40_p10 = por %p39_p13, %p38_p8  ;;  %p7764_p5 = por %p8636_p3, %p38_p8 }
  0x5c   : > { %s216_s17 = sand.u32 1, %s7569_s22   ;;  %s6504_s18 = smul.u32 14336, %s7573_s23 }
  0x5d   : > { %s6503_s9 = smul.u32 896, %s216_s17  ;;  %p7775_p11 = pnand %p6543_p6, %p40_p10 }
  0x5e   : > { %s7773_s28 = scalar_lea.hbm %s8621_s0, %s6504_s18  ;;  %s7781_s11 = scalar_lea.sflag [#allocation5], %s216_s17 }
  0x5f   : > { %s220_s8 = scalar_lea.vmem [#allocation4], %s6503_s9  ;;  %s7469_s12 = scalar_lea.hbm %s7773_s28, 14336 }
  0x60   : > { %s227_s10 = sshll.u32 %s220_s8, 4  ;;  %p7470_p7 = scmp.ne.s32.totalorder %s7773_s28, %s7469_s12  ;;  %s7779_s10 = int_to_ptr.vmem [resolvable:$true] %s227_s10 }
  0x61   : > { %p7471_p9 = pneg %p7775_p11  ;;  %s7474_s14 = scalar_lea.hbm %s8621_s0, 28672 }
  0x62   : > { %p7475_p2 = scmp.lt.u32.totalorder %s7773_s28, %s8621_s0  ;;  %p7476_p1 = scmp.lt.u32.totalorder %s7474_s14, %s7469_s12 }
  0x63   : > { %p7472_p12 = pnand %p7471_p9, %p7470_p7  ;;  %p7478_p8 = scmp.lt.u32.totalorder %s7469_s12, %s7773_s28 }
  0x64   : > { %p7477_p4 = por %p7476_p1, %p7475_p2 }
  0x65   : > { %p7473_p0 = pneg %p7472_p12 }
  0x66   : > { %p7479_p13 = por %p7478_p8, %p7477_p4 }
  0x68   : > { %p7480_p6 = pnand %p7479_p13, %p7473_p0 }
  0x6a   : > { %7483 = shalt.err (!%p7480_p6)
}
  0x6b   : > { %s7484_s17 = scalar_lea.vmem %s7779_s10, 14336  ;;  %s7580_s9 = smov [#allocation4]  }
  0x6c   : > { %p7485_p10 = scmp.ne.s32.totalorder %s7779_s10, %s7484_s17  ;;  %s7489_s19 = sshll.u32 %s7580_s9, 4  ;;  %s7490_s19 = int_to_ptr.vmem [resolvable:$false] %s7489_s19 }
  0x6d   : > { %s7491_s24 = scalar_lea.vmem %s7490_s19, 28672  ;;  %p7492_p12 = scmp.lt.s32.totalorder %s7779_s10, %s7490_s19 }
  0x6e   : > { %p7487_p3 = pnand %p7485_p10, %p7471_p9  ;;  %p7493_p2 = scmp.lt.s32.totalorder %s7491_s24, %s7484_s17 }
  0x70   : > { %p7488_p7 = pneg %p7487_p3  ;;  %p7494_p1 = por %p7493_p2, %p7492_p12 }
  0x72   : > { %p7495_p4 = pnand %p7494_p1, %p7488_p7 }
  0x74   : > { %7498 = shalt.err (!%p7495_p4)
}
  0x75   : > { %s7581_s8 = smov 2048   ;;  %s7582_s12 = smov 128  }
  0x76   : > { %6535 = dma.hbm_to_vmem [thread:$0]  (!%p7775_p11), %s7773_s28, 14336, %s7779_s10, %s7781_s11, %s7581_s8, %s7581_s8, %s7582_s12  }
  0x77   : > { %p8639_p9 = scmp.ne.s32.totalorder %s8633_s27, 0 }
  0x79   : > { %239 = sbr.rel (%p8639_p9) target bundleno = 1372 (0x55c), region = 40 }
  0x80   : > { %s7812_s7 = sand.u32 1, %s7565_s21   ;;  %p8640_p0 = scmp.ne.s32.totalorder %s8631_s25, 0 }
  0x81   : > { %s6505_s13 = smul.u32 896, %s7812_s7  ;;  %s242_s14 = scalar_lea.sflag [#allocation5], %s7812_s7 }
  0x83   : > { %s7816_s30 = scalar_lea.vmem [#allocation4], %s6505_s13 }
  0x84   : > { %7544 = dma.done.wait (%p8640_p0), %s242_s14, 14336  }
  0x85   : > { %7546 = vsyncadd (%p8640_p0), %s242_s14, 4294952960  ;;  %p8641_p11 = scmp.eq.s32.totalorder %s7640_s4, 0 }
  0x87   : > { %7548 = dma.done.wait (%p8641_p11), [#allocation8], 65600   ;;  %p8642_p8 = pmov %p8641_p11 }
  0x89   : > { %7550 = vsyncadd (%p8642_p8), [#allocation8], 4294901696  ;;  %p8643_p13 = pmov %p8642_p8 }
  0x8a   : > { %p8644_p6 = pmov %p8642_p8 }
  0x8b   : > { %7552 = dma.done.wait (%p8643_p13), [#allocation11], 64  }
  0x8c   : > { %7554 = vsyncadd (%p8644_p6), [#allocation11], 4294967232  ;;  %v6591_v0 = vld [vmem:[#allocation7 + $0x4] ss:$16 sps:$4 sm:$0xff]   ;;  %v6593_v1 = vld [vmem:[#allocation7 + $0xc] ss:$16 sps:$4 sm:$0xff]  }
  0x8d   : > { %3554 = vmatprep.subr.bf16.mxu0 %v6591_v0  ;;  %v6595_v2 = vld [vmem:[#allocation7] ss:$16 sps:$4 sm:$0xff]   ;;  %v6596_v3 = vld [vmem:[#allocation7 + $0x8] ss:$16 sps:$4 sm:$0xff]   ;;  %4122 = vmatprep.subr.bf16.mxu1 %v6593_v1  ;;  %v6597_v4 = vld [vmem:[#allocation7 + $0x24] ss:$16 sps:$4 sm:$0xff]  }
  0x8e   : > { %3555 = vmatpush1.bf16.msra.mxu0 %v6595_v2  ;;  %4123 = vmatpush1.bf16.msra.mxu1 %v6596_v3  ;;  %v6599_v5 = vld [vmem:[#allocation7 + $0x2c] ss:$16 sps:$4 sm:$0xff]   ;;  %v6601_v6 = vld [vmem:[#allocation7 + $0x20] ss:$16 sps:$4 sm:$0xff]   ;;  %v6602_v7 = vld [vmem:[#allocation7 + $0x28] ss:$16 sps:$4 sm:$0xff]  }
  0x8f   : > { %3556 = vmatprep.subr.bf16.mxu0 %v6597_v4  ;;  %4124 = vmatprep.subr.bf16.mxu1 %v6599_v5  ;;  %v6603_v8 = vld [vmem:[#allocation7 + $0x44] ss:$16 sps:$4 sm:$0xff]   ;;  %v6605_v9 = vld [vmem:[#allocation7 + $0x4c] ss:$16 sps:$4 sm:$0xff]   ;;  %v6607_v10 = vld [vmem:[#allocation7 + $0x40] ss:$16 sps:$4 sm:$0xff]  }
  0x90   : > { %v6608_v11 = vld [vmem:[#allocation7 + $0x48] ss:$16 sps:$4 sm:$0xff]   ;;  %v6609_v12 = vld [vmem:[#allocation7 + $0x64] ss:$16 sps:$4 sm:$0xff]   ;;  %v6611_v13 = vld [vmem:[#allocation7 + $0x6c] ss:$16 sps:$4 sm:$0xff]  }
  0x91   : > { %v6613_v14 = vld [vmem:[#allocation7 + $0x60] ss:$16 sps:$4 sm:$0xff]   ;;  %v6614_v15 = vld [vmem:[#allocation7 + $0x68] ss:$16 sps:$4 sm:$0xff]   ;;  %v6615_v16 = vld [vmem:[#allocation7 + $0x84] ss:$16 sps:$4 sm:$0xff]  }
  0x92   : > { %3557 = vmatpush1.bf16.msra.mxu0 %v6601_v6  ;;  %4125 = vmatpush1.bf16.msra.mxu1 %v6602_v7  ;;  %v6617_v17 = vld [vmem:[#allocation7 + $0x8c] ss:$16 sps:$4 sm:$0xff]   ;;  %v6619_v18 = vld [vmem:[#allocation7 + $0x80] ss:$16 sps:$4 sm:$0xff]   ;;  %v6620_v19 = vld [vmem:[#allocation7 + $0x88] ss:$16 sps:$4 sm:$0xff]  }
  0x93   : > { %3558 = vmatprep.subr.bf16.mxu0 %v6603_v8  ;;  %4126 = vmatprep.subr.bf16.mxu1 %v6605_v9  ;;  %v6621_v20 = vld [vmem:[#allocation7 + $0xa4] ss:$16 sps:$4 sm:$0xff]   ;;  %v6623_v21 = vld [vmem:[#allocation7 + $0xac] ss:$16 sps:$4 sm:$0xff]   ;;  %v6625_v22 = vld [vmem:[#allocation7 + $0xa0] ss:$16 sps:$4 sm:$0xff]  }
  0x94   : > { %v6626_v23 = vld [vmem:[#allocation7 + $0xa8] ss:$16 sps:$4 sm:$0xff]   ;;  %v6627_v24 = vld [vmem:[#allocation7 + $0xc4] ss:$16 sps:$4 sm:$0xff]   ;;  %v6629_v25 = vld [vmem:[#allocation7 + $0xcc] ss:$16 sps:$4 sm:$0xff]  }
  0x95   : > { %v6631_v26 = vld [vmem:[#allocation7 + $0xc0] ss:$16 sps:$4 sm:$0xff]   ;;  %v6632_v27 = vld [vmem:[#allocation7 + $0xc8] ss:$16 sps:$4 sm:$0xff]   ;;  %v6633_v28 = vld [vmem:[#allocation7 + $0xe4] ss:$16 sps:$4 sm:$0xff]  }
  0x96   : > { %3559 = vmatpush1.bf16.msra.mxu0 %v6607_v10  ;;  %4127 = vmatpush1.bf16.msra.mxu1 %v6608_v11  ;;  %v6635_v29 = vld [vmem:[#allocation7 + $0xec] ss:$16 sps:$4 sm:$0xff]   ;;  %v6637_v30 = vld [vmem:[#allocation7 + $0xe0] ss:$16 sps:$4 sm:$0xff]   ;;  %v6638_v31 = vld [vmem:[#allocation7 + $0xe8] ss:$16 sps:$4 sm:$0xff]  }
  0x97   : > { %3560 = vmatprep.subr.bf16.mxu0 %v6609_v12  ;;  %4128 = vmatprep.subr.bf16.mxu1 %v6611_v13  ;;  %v6639_v32 = vld [vmem:[#allocation7 + $0x104] ss:$16 sps:$4 sm:$0xff]   ;;  %v6641_v33 = vld [vmem:[#allocation7 + $0x10c] ss:$16 sps:$4 sm:$0xff]   ;;  %v6643_v34 = vld [vmem:[#allocation7 + $0x100] ss:$16 sps:$4 sm:$0xff]  }
  0x98   : > { %v6644_v35 = vld [vmem:[#allocation7 + $0x108] ss:$16 sps:$4 sm:$0xff]   ;;  %v6645_v36 = vld [vmem:[#allocation7 + $0x124] ss:$16 sps:$4 sm:$0xff]   ;;  %v6647_v37 = vld [vmem:[#allocation7 + $0x12c] ss:$16 sps:$4 sm:$0xff]  }
  0x99   : > { %v6649_v38 = vld [vmem:[#allocation7 + $0x120] ss:$16 sps:$4 sm:$0xff]   ;;  %v6650_v39 = vld [vmem:[#allocation7 + $0x128] ss:$16 sps:$4 sm:$0xff]   ;;  %v6651_v40 = vld [vmem:[#allocation7 + $0x144] ss:$16 sps:$4 sm:$0xff]  }
  0x9a   : > { %3561 = vmatpush1.bf16.msra.mxu0 %v6613_v14  ;;  %4129 = vmatpush1.bf16.msra.mxu1 %v6614_v15  ;;  %v6653_v41 = vld [vmem:[#allocation7 + $0x14c] ss:$16 sps:$4 sm:$0xff]   ;;  %v6655_v42 = vld [vmem:[#allocation7 + $0x140] ss:$16 sps:$4 sm:$0xff]   ;;  %v6656_v43 = vld [vmem:[#allocation7 + $0x148] ss:$16 sps:$4 sm:$0xff]  }
  0x9b   : > { %3562 = vmatprep.subr.bf16.mxu0 %v6615_v16  ;;  %4130 = vmatprep.subr.bf16.mxu1 %v6617_v17  ;;  %v6657_v44 = vld [vmem:[#allocation7 + $0x164] ss:$16 sps:$4 sm:$0xff]   ;;  %v6659_v45 = vld [vmem:[#allocation7 + $0x16c] ss:$16 sps:$4 sm:$0xff]   ;;  %v6661_v48 = vld [vmem:[#allocation7 + $0x160] ss:$16 sps:$4 sm:$0xff]  }
  0x9c   : > { %v285_v46 = vld [vmem:[%s7816_s30 + $0x8] sm:$0xff]  ;;  %v6663_v51 = vld [vmem:[#allocation7 + $0x184] ss:$16 sps:$4 sm:$0xff]   ;;  %v6667_v53 = vld [vmem:[#allocation7 + $0x180] ss:$16 sps:$4 sm:$0xff]   ;;  %s4803_s25 = sld [smem:[#allocation3]] }
  0x9d   : > { %v301_v47 = vld [vmem:[%s7816_s30 + $0x88] sm:$0xff]  ;;  %v6669_v55 = vld [vmem:[#allocation7 + $0x1a4] ss:$16 sps:$4 sm:$0xff]   ;;  %v6673_v57 = vld [vmem:[#allocation7 + $0x1a0] ss:$16 sps:$4 sm:$0xff]   ;;  %vm4894_vm1 = vcmask 7168  }
  0x9e   : > { %3563 = vmatpush1.bf16.msra.mxu0 %v6619_v18  ;;  %4131 = vmatpush1.bf16.msra.mxu1 %v6620_v19  ;;  %v6662_v49 = vld [vmem:[#allocation7 + $0x168] ss:$16 sps:$4 sm:$0xff]   ;;  %v397_v50 = vpack.c.bf16 %v301_v47, %v285_v46  ;;  %v6665_v52 = vld [vmem:[#allocation7 + $0x18c] ss:$16 sps:$4 sm:$0xff]   ;;  %v6675_v59 = vld [vmem:[#allocation7 + $0x1c4] ss:$16 sps:$4 sm:$0xff]  }
  0x9f   : > { %3564 = vmatprep.subr.bf16.mxu0 %v6621_v20  ;;  %4132 = vmatprep.subr.bf16.mxu1 %v6623_v21  ;;  %v6668_v54 = vld [vmem:[#allocation7 + $0x188] ss:$16 sps:$4 sm:$0xff]   ;;  %v6671_v56 = vld [vmem:[#allocation7 + $0x1ac] ss:$16 sps:$4 sm:$0xff]   ;;  %v6679_v61 = vld [vmem:[#allocation7 + $0x1c0] ss:$16 sps:$4 sm:$0xff]  }
  0xa0   : > { %3586 = vmatprep.mubr.bf16.mxu0 %v397_v50  ;;  %4154 = vmatprep.mubr.bf16.mxu1 %v397_v50  ;;  %v6674_v58 = vld [vmem:[#allocation7 + $0x1a8] ss:$16 sps:$4 sm:$0xff]   ;;  %v6677_v60 = vld [vmem:[#allocation7 + $0x1cc] ss:$16 sps:$4 sm:$0xff]   ;;  %v6681_v63 = vld [vmem:[#allocation7 + $0x1e4] ss:$16 sps:$4 sm:$0xff]  }
  0xa1   : > { %v6680_v62 = vld [vmem:[#allocation7 + $0x1c8] ss:$16 sps:$4 sm:$0xff]   ;;  %v6683_v0 = vld [vmem:[#allocation7 + $0x1ec] ss:$16 sps:$4 sm:$0xff]   ;;  %v6685_v1 = vld [vmem:[#allocation7 + $0x1e0] ss:$16 sps:$4 sm:$0xff]  }
  0xa2   : > { %3565 = vmatpush1.bf16.msra.mxu0 %v6625_v22  ;;  %4133 = vmatpush1.bf16.msra.mxu1 %v6626_v23  ;;  %v6686_v2 = vld [vmem:[#allocation7 + $0x1e8] ss:$16 sps:$4 sm:$0xff]   ;;  %v6689_v3 = vld [vmem:[#allocation7 + $0x204] ss:$16 sps:$4 sm:$0xff]   ;;  %v6692_v6 = vld [vmem:[#allocation7 + $0x20c] ss:$16 sps:$4 sm:$0xff]  }
  0xa3   : > { %3566 = vmatprep.subr.bf16.mxu0 %v6627_v24  ;;  %4134 = vmatprep.subr.bf16.mxu1 %v6629_v25  ;;  %v284_v4 = vld [vmem:[%s7816_s30] sm:$0xff]  ;;  %v6690_v8 = vld [vmem:[#allocation7 + $0x208] ss:$16 sps:$4 sm:$0xff]   ;;  %v6698_v11 = vld [vmem:[#allocation7 + $0x22c] ss:$16 sps:$4 sm:$0xff]   ;;  %s5732_s27 = sshll.u32 %s7812_s7, 4 }
  0xa4   : > { %v300_v5 = vld [vmem:[%s7816_s30 + $0x80] sm:$0xff]  ;;  %v6696_v13 = vld [vmem:[#allocation7 + $0x228] ss:$16 sps:$4 sm:$0xff]   ;;  %v6704_v15 = vld [vmem:[#allocation7 + $0x24c] ss:$16 sps:$4 sm:$0xff]   ;;  %s6250_s28 = sshll.u32 %s7640_s4, 8 }
  0xa5   : > { %v6687_v7 = vld [vmem:[#allocation7 + $0x200] ss:$16 sps:$4 sm:$0xff]   ;;  %v396_v9 = vpack.c.bf16 %v300_v5, %v284_v4  ;;  %v6695_v10 = vld [vmem:[#allocation7 + $0x224] ss:$16 sps:$4 sm:$0xff]   ;;  %v317_v16 = vld [vmem:[%s7816_s30 + $0x108] sm:$0xff]  ;;  %s283_s6 = scalar_lea.vmem [#allocation12], %s5732_s27  ;;  %s8577_s17 = scalar_lea.hbm %s8626_s5, %s6250_s28 }
  0xa6   : > { %3567 = vmatpush1.bf16.msra.mxu0 %v6631_v26  ;;  %4135 = vmatpush1.bf16.msra.mxu1 %v6632_v27  ;;  %v6693_v12 = vld [vmem:[#allocation7 + $0x220] ss:$16 sps:$4 sm:$0xff]   ;;  %v6701_v14 = vld [vmem:[#allocation7 + $0x244] ss:$16 sps:$4 sm:$0xff]   ;;  %v333_v17 = vld [vmem:[%s7816_s30 + $0x188] sm:$0xff]  ;;  %s5622_s10 = sshll.u32 %s283_s6, 4  ;;  %s8579_s10 = int_to_ptr.vmem [resolvable:$true] %s5622_s10 }
  0xa7   : > { %3568 = vmatprep.subr.bf16.mxu0 %v6633_v28  ;;  %4136 = vmatprep.subr.bf16.mxu1 %v6635_v29  ;;  %v6699_v18 = vld [vmem:[#allocation7 + $0x240] ss:$16 sps:$4 sm:$0xff]   ;;  %v6702_v19 = vld [vmem:[#allocation7 + $0x248] ss:$16 sps:$4 sm:$0xff]   ;;  %v413_v20 = vpack.c.bf16 %v333_v17, %v317_v16  ;;  %v6707_v21 = vld [vmem:[#allocation7 + $0x264] ss:$16 sps:$4 sm:$0xff]  }
  0xa8   : > { %v6710_v22 = vld [vmem:[#allocation7 + $0x26c] ss:$16 sps:$4 sm:$0xff]   ;;  %v316_v23 = vld [vmem:[%s7816_s30 + $0x100] sm:$0xff]  ;;  %v6708_v26 = vld [vmem:[#allocation7 + $0x268] ss:$16 sps:$4 sm:$0xff]   ;;  %s5608_s4 = scalar_lea.sflag [#allocation6], %s7812_s7 }
  0xa9   : > { %v332_v24 = vld [vmem:[%s7816_s30 + $0x180] sm:$0xff]  ;;  %v6716_v29 = vld [vmem:[#allocation7 + $0x28c] ss:$16 sps:$4 sm:$0xff]   ;;  %v6750_v4 = vld [vmem:[#allocation7 + $0x348] ss:$16 sps:$4 sm:$0xff]   ;;  %s7499_s9 = scalar_lea.vmem %s8579_s10, 256 }
  0xaa   : > { %3569 = vmatpush1.bf16.msra.mxu0 %v6637_v30  ;;  %4137 = vmatpush1.bf16.msra.mxu1 %v6638_v31  ;;  %v6705_v25 = vld [vmem:[#allocation7 + $0x260] ss:$16 sps:$4 sm:$0xff]   ;;  %v412_v27 = vpack.c.bf16 %v332_v24, %v316_v23  ;;  %v6713_v28 = vld [vmem:[#allocation7 + $0x284] ss:$16 sps:$4 sm:$0xff]   ;;  %v349_v30 = vld [vmem:[%s7816_s30 + $0x208] sm:$0xff]  ;;  %p7500_p10 = scmp.ne.s32.totalorder %s8579_s10, %s7499_s9  ;;  %s7585_s19 = smov [#allocation12]  }
  0xab   : > { %3570 = vmatprep.subr.bf16.mxu0 %v6639_v32  ;;  %4138 = vmatprep.subr.bf16.mxu1 %v6641_v33  ;;  %v365_v31 = vld [vmem:[%s7816_s30 + $0x288] sm:$0xff]  ;;  %v6711_v32 = vld [vmem:[#allocation7 + $0x280] ss:$16 sps:$4 sm:$0xff]   ;;  %v6755_v5 = vld [vmem:[#allocation7 + $0x364] ss:$16 sps:$4 sm:$0xff]   ;;  %s7503_s24 = sshll.u32 %s7585_s19, 4  ;;  %s7504_s24 = int_to_ptr.vmem [resolvable:$false] %s7503_s24 }
  0xac   : > { %v429_v33 = vpack.c.bf16 %v365_v31, %v349_v30  ;;  %v380_v46 = vld [vmem:[%s7816_s30 + $0x300] sm:$0xff]  ;;  %v6734_v50 = vld [vmem:[#allocation7 + $0x2ec] ss:$16 sps:$4 sm:$0xff]   ;;  %v6768_v16 = vld [vmem:[#allocation7 + $0x3a8] ss:$16 sps:$4 sm:$0xff]   ;;  %p7501_p3 = pnand %p7500_p10, %p7764_p5  ;;  %s7505_s8 = scalar_lea.vmem %s7504_s24, 512 }
  0xad   : > { %v6723_v47 = vld [vmem:[#allocation7 + $0x2c0] ss:$16 sps:$4 sm:$0xff]   ;;  %v6773_v17 = vld [vmem:[#allocation7 + $0x3c4] ss:$16 sps:$4 sm:$0xff]   ;;  %v6780_v24 = vld [vmem:[#allocation7 + $0x3e8] ss:$16 sps:$4 sm:$0xff]   ;;  %p7506_p12 = scmp.lt.s32.totalorder %s8579_s10, %s7504_s24  ;;  %p7507_p2 = scmp.lt.s32.totalorder %s7505_s8, %s7499_s9 }
  0xae   : > { %3571 = vmatpush1.bf16.msra.mxu0 %v6643_v34  ;;  %4139 = vmatpush1.bf16.msra.mxu1 %v6644_v35  ;;  %v6714_v34 = vld [vmem:[#allocation7 + $0x288] ss:$16 sps:$4 sm:$0xff]   ;;  %v6719_v35 = vld [vmem:[#allocation7 + $0x2a4] ss:$16 sps:$4 sm:$0xff]   ;;  %v6777_v23 = vld [vmem:[#allocation7 + $0x3e0] ss:$16 sps:$4 sm:$0xff]   ;;  %p7502_p7 = pneg %p7501_p3 }
  0xaf   : > { %3572 = vmatprep.subr.bf16.mxu0 %v6645_v36  ;;  %4140 = vmatprep.subr.bf16.mxu1 %v6647_v37  ;;  %v6722_v36 = vld [vmem:[#allocation7 + $0x2ac] ss:$16 sps:$4 sm:$0xff]   ;;  %v348_v37 = vld [vmem:[%s7816_s30 + $0x200] sm:$0xff]  ;;  %p7508_p1 = por %p7507_p2, %p7506_p12 }
  0xb0   : > { %v319_v30 = vld [vmem:[%s7816_s30 + $0x118] sm:$0xff] }
  0xb1   : > { %v335_v31 = vld [vmem:[%s7816_s30 + $0x198] sm:$0xff]  ;;  %p7509_p4 = pnand %p7508_p1, %p7502_p7 }
  0xb2   : > { %3573 = vmatpush1.bf16.msra.mxu0 %v6649_v38  ;;  %4141 = vmatpush1.bf16.msra.mxu1 %v6650_v39  ;;  %v364_v38 = vld [vmem:[%s7816_s30 + $0x280] sm:$0xff] }
  0xb3   : > { %3574 = vmatprep.subr.bf16.mxu0 %v6651_v40  ;;  %4142 = vmatprep.subr.bf16.mxu1 %v6653_v41  ;;  %v428_v39 = vpack.c.bf16 %v364_v38, %v348_v37  ;;  %v6717_v40 = vld [vmem:[#allocation7 + $0x2a0] ss:$16 sps:$4 sm:$0xff]   ;;  %v6720_v41 = vld [vmem:[#allocation7 + $0x2a8] ss:$16 sps:$4 sm:$0xff]   ;;  %v415_v37 = vpack.c.bf16 %v335_v31, %v319_v30  ;;  %v6857_v31 = vld [vmem:[#allocation7 + $0x584] ss:$16 sps:$4 sm:$0xff]  }
  0xb4   : > { %v6792_v38 = vld [vmem:[#allocation7 + $0x428] ss:$16 sps:$4 sm:$0xff]  }
  0xb5   : > { %v6852_v30 = vld [vmem:[#allocation7 + $0x568] ss:$16 sps:$4 sm:$0xff]  }
  0xb6   : > { %3575 = vmatpush1.bf16.msra.mxu0 %v6655_v42  ;;  %4143 = vmatpush1.bf16.msra.mxu1 %v6656_v43  ;;  %v381_v42 = vld [vmem:[%s7816_s30 + $0x308] sm:$0xff]  ;;  %v6725_v43 = vld [vmem:[#allocation7 + $0x2c4] ss:$16 sps:$4 sm:$0xff]  }
  0xb7   : > { %3576 = vmatprep.subr.bf16.mxu0 %v6657_v44  ;;  %4144 = vmatprep.subr.bf16.mxu1 %v6659_v45  ;;  %v6728_v44 = vld [vmem:[#allocation7 + $0x2cc] ss:$16 sps:$4 sm:$0xff]   ;;  %v445_v45 = vpack.c.bf16 %v381_v42, %v381_v42 }
  0xb8   : > { %v6800_v42 = vld [vmem:[#allocation7 + $0x44c] ss:$16 sps:$4 sm:$0xff]  }
  0xba   : > { %3577 = vmatpush1.bf16.msra.mxu0 %v6661_v48  ;;  %4145 = vmatpush1.bf16.msra.mxu1 %v6662_v49  ;;  %v6726_v48 = vld [vmem:[#allocation7 + $0x2c8] ss:$16 sps:$4 sm:$0xff]   ;;  %v6731_v49 = vld [vmem:[#allocation7 + $0x2e4] ss:$16 sps:$4 sm:$0xff]  }
  0xbb   : > { %3578 = vmatprep.subr.bf16.mxu0 %v6663_v51  ;;  %4146 = vmatprep.subr.bf16.mxu1 %v6665_v52  ;;  %v444_v51 = vpack.c.bf16 %v380_v46, %v380_v46  ;;  %v287_v52 = vld [vmem:[%s7816_s30 + $0x18] sm:$0xff] }
  0xbc   : > { %v367_v46 = vld [vmem:[%s7816_s30 + $0x298] sm:$0xff] }
  0xbe   : > { %3579 = vmatpush1.bf16.msra.mxu0 %v6667_v53  ;;  %4147 = vmatpush1.bf16.msra.mxu1 %v6668_v54  ;;  %v303_v53 = vld [vmem:[%s7816_s30 + $0x98] sm:$0xff]  ;;  %v6729_v54 = vld [vmem:[#allocation7 + $0x2e0] ss:$16 sps:$4 sm:$0xff]  }
  0xbf   : > { %3580 = vmatprep.subr.bf16.mxu0 %v6669_v55  ;;  %4148 = vmatprep.subr.bf16.mxu1 %v6671_v56  ;;  %v399_v55 = vpack.c.bf16 %v303_v53, %v287_v52  ;;  %v6732_v56 = vld [vmem:[#allocation7 + $0x2e8] ss:$16 sps:$4 sm:$0xff]   ;;  %v6809_v53 = vld [vmem:[#allocation7 + $0x484] ss:$16 sps:$4 sm:$0xff]  }
  0xc0   : > { %v6804_v52 = vld [vmem:[#allocation7 + $0x468] ss:$16 sps:$4 sm:$0xff]  }
  0xc2   : > { %3581 = vmatpush1.bf16.msra.mxu0 %v6673_v57  ;;  %4149 = vmatpush1.bf16.msra.mxu1 %v6674_v58  ;;  %v6737_v57 = vld [vmem:[#allocation7 + $0x304] ss:$16 sps:$4 sm:$0xff]   ;;  %v6740_v58 = vld [vmem:[#allocation7 + $0x30c] ss:$16 sps:$4 sm:$0xff]  }
  0xc3   : > { %3582 = vmatprep.subr.bf16.mxu0 %v6675_v59  ;;  %4150 = vmatprep.subr.bf16.mxu1 %v6677_v60  ;;  %v6735_v59 = vld [vmem:[#allocation7 + $0x300] ss:$16 sps:$4 sm:$0xff]   ;;  %v6738_v60 = vld [vmem:[#allocation7 + $0x308] ss:$16 sps:$4 sm:$0xff]  }
  0xc6   : > { %3583 = vmatpush1.bf16.msra.mxu0 %v6679_v61  ;;  %4151 = vmatpush1.bf16.msra.mxu1 %v6680_v62  ;;  %v6743_v61 = vld [vmem:[#allocation7 + $0x324] ss:$16 sps:$4 sm:$0xff]   ;;  %v6746_v62 = vld [vmem:[#allocation7 + $0x32c] ss:$16 sps:$4 sm:$0xff]  }
  0xc7   : > { %3584 = vmatprep.subr.bf16.mxu0 %v6681_v63  ;;  %4152 = vmatprep.subr.bf16.mxu1 %v6683_v0  ;;  %v6741_v63 = vld [vmem:[#allocation7 + $0x320] ss:$16 sps:$4 sm:$0xff]   ;;  %v6744_v0 = vld [vmem:[#allocation7 + $0x328] ss:$16 sps:$4 sm:$0xff]  }
  0xca   : > { %3585 = vmatpush1.bf16.msra.mxu0 %v6685_v1  ;;  %4153 = vmatpush1.bf16.msra.mxu1 %v6686_v2  ;;  %v6749_v1 = vld [vmem:[#allocation7 + $0x344] ss:$16 sps:$4 sm:$0xff]   ;;  %v6752_v2 = vld [vmem:[#allocation7 + $0x34c] ss:$16 sps:$4 sm:$0xff]  }
  0xcb   : > { %3625 = vmatprep.subr.bf16.mxu0 %v6689_v3  ;;  %4193 = vmatprep.subr.bf16.mxu1 %v6692_v6  ;;  %v6747_v3 = vld [vmem:[#allocation7 + $0x340] ss:$16 sps:$4 sm:$0xff]   ;;  %v6758_v6 = vld [vmem:[#allocation7 + $0x36c] ss:$16 sps:$4 sm:$0xff]  }
  0xcd   : > { %3587 = vmatmul.mubr.bf16.vlgmr.msra.gmra.mrb[0].mxu0 %v396_v9  ;;  %4155 = vmatmul.mubr.bf16.vlgmr.msra.gmra.mrb[0].mxu1 %v396_v9  ;;  %v6761_v9 = vld [vmem:[#allocation7 + $0x384] ss:$16 sps:$4 sm:$0xff]  }
  0xce   : > { %3626 = vmatpush1.bf16.msra.mxu0 %v6687_v7  ;;  %4194 = vmatpush1.bf16.msra.mxu1 %v6690_v8  ;;  %v6753_v7 = vld [vmem:[#allocation7 + $0x360] ss:$16 sps:$4 sm:$0xff]   ;;  %v6756_v8 = vld [vmem:[#allocation7 + $0x368] ss:$16 sps:$4 sm:$0xff]  }
  0xcf   : > { %3627 = vmatprep.subr.bf16.mxu0 %v6695_v10  ;;  %4195 = vmatprep.subr.bf16.mxu1 %v6698_v11  ;;  %v6764_v10 = vld [vmem:[#allocation7 + $0x38c] ss:$16 sps:$4 sm:$0xff]   ;;  %v6759_v11 = vld [vmem:[#allocation7 + $0x380] ss:$16 sps:$4 sm:$0xff]  }
  0xd0   : > { %3596 = vmatprep.mubr.bf16.mxu0 %v413_v20  ;;  %4164 = vmatprep.mubr.bf16.mxu1 %v413_v20  ;;  %v6774_v20 = vld [vmem:[#allocation7 + $0x3c8] ss:$16 sps:$4 sm:$0xff]  }
  0xd2   : > { %3628 = vmatpush1.bf16.msra.mxu0 %v6693_v12  ;;  %4196 = vmatpush1.bf16.msra.mxu1 %v6696_v13  ;;  %v6762_v12 = vld [vmem:[#allocation7 + $0x388] ss:$16 sps:$4 sm:$0xff]   ;;  %v6767_v13 = vld [vmem:[#allocation7 + $0x3a4] ss:$16 sps:$4 sm:$0xff]  }
  0xd3   : > { %3629 = vmatprep.subr.bf16.mxu0 %v6701_v14  ;;  %4197 = vmatprep.subr.bf16.mxu1 %v6704_v15  ;;  %v6770_v14 = vld [vmem:[#allocation7 + $0x3ac] ss:$16 sps:$4 sm:$0xff]   ;;  %v6765_v15 = vld [vmem:[#allocation7 + $0x3a0] ss:$16 sps:$4 sm:$0xff]  }
  0xd5   : > { %3597 = vmatmul.mubr.bf16.gmra.mrb[4].mxu0 %v412_v27  ;;  %4165 = vmatmul.mubr.bf16.gmra.mrb[4].mxu1 %v412_v27  ;;  %v302_v27 = vld [vmem:[%s7816_s30 + $0x90] sm:$0xff] }
  0xd6   : > { %3630 = vmatpush1.bf16.msra.mxu0 %v6699_v18  ;;  %4198 = vmatpush1.bf16.msra.mxu1 %v6702_v19  ;;  %v6776_v18 = vld [vmem:[#allocation7 + $0x3cc] ss:$16 sps:$4 sm:$0xff]   ;;  %v6771_v19 = vld [vmem:[#allocation7 + $0x3c0] ss:$16 sps:$4 sm:$0xff]  }
  0xd7   : > { %3631 = vmatprep.subr.bf16.mxu0 %v6707_v21  ;;  %4199 = vmatprep.subr.bf16.mxu1 %v6710_v22  ;;  %v6779_v21 = vld [vmem:[#allocation7 + $0x3e4] ss:$16 sps:$4 sm:$0xff]   ;;  %v6782_v22 = vld [vmem:[#allocation7 + $0x3ec] ss:$16 sps:$4 sm:$0xff]  }
  0xd8   : > { %3606 = vmatprep.mubr.bf16.mxu0 %v429_v33  ;;  %4174 = vmatprep.mubr.bf16.mxu1 %v429_v33  ;;  %v6786_v33 = vld [vmem:[#allocation7 + $0x408] ss:$16 sps:$4 sm:$0xff]  }
  0xda   : > { %3632 = vmatpush1.bf16.msra.mxu0 %v6705_v25  ;;  %4200 = vmatpush1.bf16.msra.mxu1 %v6708_v26  ;;  %v6785_v25 = vld [vmem:[#allocation7 + $0x404] ss:$16 sps:$4 sm:$0xff]  }
  0xdb   : > { %3633 = vmatprep.subr.bf16.mxu0 %v6713_v28  ;;  %4201 = vmatprep.subr.bf16.mxu1 %v6716_v29  ;;  %v286_v26 = vld [vmem:[%s7816_s30 + $0x10] sm:$0xff]  ;;  %v6788_v28 = vld [vmem:[#allocation7 + $0x40c] ss:$16 sps:$4 sm:$0xff]  }
  0xdc   : > { %v398_v29 = vpack.c.bf16 %v302_v27, %v286_v26  ;;  %v6846_v26 = vld [vmem:[#allocation7 + $0x548] ss:$16 sps:$4 sm:$0xff]   ;;  %v6851_v27 = vld [vmem:[#allocation7 + $0x564] ss:$16 sps:$4 sm:$0xff]  }
  0xdd   : > { %3607 = vmatmul.mubr.bf16.gmra.mrb[8].mxu0 %v428_v39  ;;  %4175 = vmatmul.mubr.bf16.gmra.mrb[8].mxu1 %v428_v39  ;;  %v6797_v39 = vld [vmem:[#allocation7 + $0x444] ss:$16 sps:$4 sm:$0xff]  }
  0xde   : > { %3634 = vmatpush1.bf16.msra.mxu0 %v6711_v32  ;;  %4202 = vmatpush1.bf16.msra.mxu1 %v6714_v34  ;;  %v6783_v32 = vld [vmem:[#allocation7 + $0x400] ss:$16 sps:$4 sm:$0xff]   ;;  %v6791_v34 = vld [vmem:[#allocation7 + $0x424] ss:$16 sps:$4 sm:$0xff]  }
  0xdf   : > { %3635 = vmatprep.subr.bf16.mxu0 %v6719_v35  ;;  %4203 = vmatprep.subr.bf16.mxu1 %v6722_v36  ;;  %v6794_v35 = vld [vmem:[#allocation7 + $0x42c] ss:$16 sps:$4 sm:$0xff]   ;;  %v6789_v36 = vld [vmem:[#allocation7 + $0x420] ss:$16 sps:$4 sm:$0xff]  }
  0xe0   : > { %3616 = vmatprep.mubr.bf16.mxu0 %v445_v45  ;;  %4184 = vmatprep.mubr.bf16.mxu1 %v445_v45  ;;  %v351_v45 = vld [vmem:[%s7816_s30 + $0x218] sm:$0xff] }
  0xe2   : > { %3636 = vmatpush1.bf16.msra.mxu0 %v6717_v40  ;;  %4204 = vmatpush1.bf16.msra.mxu1 %v6720_v41  ;;  %v318_v40 = vld [vmem:[%s7816_s30 + $0x110] sm:$0xff] }
  0xe3   : > { %3637 = vmatprep.subr.bf16.mxu0 %v6725_v43  ;;  %4205 = vmatprep.subr.bf16.mxu1 %v6728_v44  ;;  %v334_v41 = vld [vmem:[%s7816_s30 + $0x190] sm:$0xff] }
  0xe4   : > { %v6795_v43 = vld [vmem:[#allocation7 + $0x440] ss:$16 sps:$4 sm:$0xff]   ;;  %v414_v44 = vpack.c.bf16 %v334_v41, %v318_v40  ;;  %v6872_v40 = vld [vmem:[#allocation7 + $0x5cc] ss:$16 sps:$4 sm:$0xff]  }
  0xe5   : > { %3617 = vmatmul.mubr.bf16.gmra.mrb[12].mxu0 %v444_v51  ;;  %4185 = vmatmul.mubr.bf16.gmra.mrb[12].mxu1 %v444_v51  ;;  %v431_v51 = vpack.c.bf16 %v367_v46, %v351_v45  ;;  %v6867_v41 = vld [vmem:[#allocation7 + $0x5c0] ss:$16 sps:$4 sm:$0xff]   ;;  %v6876_v46 = vld [vmem:[#allocation7 + $0x5e8] ss:$16 sps:$4 sm:$0xff]  }
  0xe6   : > { %3638 = vmatpush1.bf16.msra.mxu0 %v6723_v47  ;;  %4206 = vmatpush1.bf16.msra.mxu1 %v6726_v48  ;;  %v6798_v47 = vld [vmem:[#allocation7 + $0x448] ss:$16 sps:$4 sm:$0xff]   ;;  %v6803_v48 = vld [vmem:[#allocation7 + $0x464] ss:$16 sps:$4 sm:$0xff]   ;;  %v6873_v45 = vld [vmem:[#allocation7 + $0x5e0] ss:$16 sps:$4 sm:$0xff]  }
  0xe7   : > { %3639 = vmatprep.subr.bf16.mxu0 %v6731_v49  ;;  %4207 = vmatprep.subr.bf16.mxu1 %v6734_v50  ;;  %v6806_v49 = vld [vmem:[#allocation7 + $0x46c] ss:$16 sps:$4 sm:$0xff]   ;;  %v6801_v50 = vld [vmem:[#allocation7 + $0x460] ss:$16 sps:$4 sm:$0xff]  }
  0xe8   : > { %3657 = vmatprep.mubr.bf16.mxu0 %v399_v55  ;;  %4225 = vmatprep.mubr.bf16.mxu1 %v399_v55  ;;  %v366_v55 = vld [vmem:[%s7816_s30 + $0x290] sm:$0xff] }
  0xea   : > { %3640 = vmatpush1.bf16.msra.mxu0 %v6729_v54  ;;  %4208 = vmatpush1.bf16.msra.mxu1 %v6732_v56  ;;  %v350_v54 = vld [vmem:[%s7816_s30 + $0x210] sm:$0xff]  ;;  %v6812_v56 = vld [vmem:[#allocation7 + $0x48c] ss:$16 sps:$4 sm:$0xff]  }
  0xeb   : > { %3641 = vmatprep.subr.bf16.mxu0 %v6737_v57  ;;  %4209 = vmatprep.subr.bf16.mxu1 %v6740_v58  ;;  %v6807_v57 = vld [vmem:[#allocation7 + $0x480] ss:$16 sps:$4 sm:$0xff]   ;;  %v6810_v58 = vld [vmem:[#allocation7 + $0x488] ss:$16 sps:$4 sm:$0xff]  }
  0xee   : > { %3642 = vmatpush1.bf16.msra.mxu0 %v6735_v59  ;;  %4210 = vmatpush1.bf16.msra.mxu1 %v6738_v60  ;;  %v430_v59 = vpack.c.bf16 %v366_v55, %v350_v54  ;;  %v383_v60 = vld [vmem:[%s7816_s30 + $0x318] sm:$0xff]  ;;  %v6879_v54 = vld [vmem:[#allocation7 + $0x600] ss:$16 sps:$4 sm:$0xff]  }
  0xef   : > { %3643 = vmatprep.subr.bf16.mxu0 %v6743_v61  ;;  %4211 = vmatprep.subr.bf16.mxu1 %v6746_v62  ;;  %v6815_v61 = vld [vmem:[#allocation7 + $0x4a4] ss:$16 sps:$4 sm:$0xff]   ;;  %v6818_v62 = vld [vmem:[#allocation7 + $0x4ac] ss:$16 sps:$4 sm:$0xff]   ;;  %v6882_v55 = vld [vmem:[#allocation7 + $0x608] ss:$16 sps:$4 sm:$0xff]  }
  0xf2   : > { %3644 = vmatpush1.bf16.msra.mxu0 %v6741_v63  ;;  %4212 = vmatpush1.bf16.msra.mxu1 %v6744_v0  ;;  %v6813_v63 = vld [vmem:[#allocation7 + $0x4a0] ss:$16 sps:$4 sm:$0xff]   ;;  %v447_v0 = vpack.c.bf16 %v383_v60, %v383_v60  ;;  %v6888_v60 = vld [vmem:[#allocation7 + $0x628] ss:$16 sps:$4 sm:$0xff]  }
  0xf3   : > { %3645 = vmatprep.subr.bf16.mxu0 %v6749_v1  ;;  %4213 = vmatprep.subr.bf16.mxu1 %v6752_v2  ;;  %v6816_v1 = vld [vmem:[#allocation7 + $0x4a8] ss:$16 sps:$4 sm:$0xff]   ;;  %v6821_v2 = vld [vmem:[#allocation7 + $0x4c4] ss:$16 sps:$4 sm:$0xff]  }
  0xf6   : > { %3646 = vmatpush1.bf16.msra.mxu0 %v6747_v3  ;;  %4214 = vmatpush1.bf16.msra.mxu1 %v6750_v4  ;;  %v382_v3 = vld [vmem:[%s7816_s30 + $0x310] sm:$0xff]  ;;  %v6824_v4 = vld [vmem:[#allocation7 + $0x4cc] ss:$16 sps:$4 sm:$0xff]  }
  0xf7   : > { %3647 = vmatprep.subr.bf16.mxu0 %v6755_v5  ;;  %4215 = vmatprep.subr.bf16.mxu1 %v6758_v6  ;;  %v6819_v5 = vld [vmem:[#allocation7 + $0x4c0] ss:$16 sps:$4 sm:$0xff]   ;;  %v6822_v6 = vld [vmem:[#allocation7 + $0x4c8] ss:$16 sps:$4 sm:$0xff]  }
  0xfa   : > { %3648 = vmatpush1.bf16.msra.mxu0 %v6753_v7  ;;  %4216 = vmatpush1.bf16.msra.mxu1 %v6756_v8  ;;  %v446_v7 = vpack.c.bf16 %v382_v3, %v382_v3  ;;  %v289_v8 = vld [vmem:[%s7816_s30 + $0x28] sm:$0xff] }
  0xfb   : > { %3649 = vmatprep.subr.bf16.mxu0 %v6761_v9  ;;  %4217 = vmatprep.subr.bf16.mxu1 %v6764_v10  ;;  %v305_v9 = vld [vmem:[%s7816_s30 + $0xa8] sm:$0xff]  ;;  %v6827_v10 = vld [vmem:[#allocation7 + $0x4e4] ss:$16 sps:$4 sm:$0xff]  }
  0xfc   : > { %v369_v3 = vld [vmem:[%s7816_s30 + $0x2a8] sm:$0xff] }
  0xfe   : > { %3650 = vmatpush1.bf16.msra.mxu0 %v6759_v11  ;;  %4218 = vmatpush1.bf16.msra.mxu1 %v6762_v12  ;;  %v6830_v11 = vld [vmem:[#allocation7 + $0x4ec] ss:$16 sps:$4 sm:$0xff]   ;;  %v401_v12 = vpack.c.bf16 %v305_v9, %v289_v8  ;;  %v6897_v8 = vld [vmem:[#allocation7 + $0x660] ss:$16 sps:$4 sm:$0xff]  }
  0xff   : > { %3651 = vmatprep.subr.bf16.mxu0 %v6767_v13  ;;  %4219 = vmatprep.subr.bf16.mxu1 %v6770_v14  ;;  %v6825_v13 = vld [vmem:[#allocation7 + $0x4e0] ss:$16 sps:$4 sm:$0xff]   ;;  %v6828_v14 = vld [vmem:[#allocation7 + $0x4e8] ss:$16 sps:$4 sm:$0xff]  }
 0x102   : > { %3652 = vmatpush1.bf16.msra.mxu0 %v6765_v15  ;;  %4220 = vmatpush1.bf16.msra.mxu1 %v6768_v16  ;;  %v6833_v15 = vld [vmem:[#allocation7 + $0x504] ss:$16 sps:$4 sm:$0xff]   ;;  %v6836_v16 = vld [vmem:[#allocation7 + $0x50c] ss:$16 sps:$4 sm:$0xff]  }
 0x103   : > { %3653 = vmatprep.subr.bf16.mxu0 %v6773_v17  ;;  %4221 = vmatprep.subr.bf16.mxu1 %v6776_v18  ;;  %v6831_v17 = vld [vmem:[#allocation7 + $0x500] ss:$16 sps:$4 sm:$0xff]   ;;  %v6834_v18 = vld [vmem:[#allocation7 + $0x508] ss:$16 sps:$4 sm:$0xff]  }
 0x106   : > { %3654 = vmatpush1.bf16.msra.mxu0 %v6771_v19  ;;  %4222 = vmatpush1.bf16.msra.mxu1 %v6774_v20  ;;  %v6839_v19 = vld [vmem:[#allocation7 + $0x524] ss:$16 sps:$4 sm:$0xff]   ;;  %v6842_v20 = vld [vmem:[#allocation7 + $0x52c] ss:$16 sps:$4 sm:$0xff]  }
 0x107   : > { %3655 = vmatprep.subr.bf16.mxu0 %v6779_v21  ;;  %4223 = vmatprep.subr.bf16.mxu1 %v6782_v22  ;;  %v6837_v21 = vld [vmem:[#allocation7 + $0x520] ss:$16 sps:$4 sm:$0xff]   ;;  %v6840_v22 = vld [vmem:[#allocation7 + $0x528] ss:$16 sps:$4 sm:$0xff]  }
 0x10a   : > { %3656 = vmatpush1.bf16.msra.mxu0 %v6777_v23  ;;  %4224 = vmatpush1.bf16.msra.mxu1 %v6780_v24  ;;  %v6845_v23 = vld [vmem:[#allocation7 + $0x544] ss:$16 sps:$4 sm:$0xff]   ;;  %v6848_v24 = vld [vmem:[#allocation7 + $0x54c] ss:$16 sps:$4 sm:$0xff]  }
 0x10b   : > { %3696 = vmatprep.subr.bf16.mxu0 %v6785_v25  ;;  %4264 = vmatprep.subr.bf16.mxu1 %v6788_v28  ;;  %v6843_v25 = vld [vmem:[#allocation7 + $0x540] ss:$16 sps:$4 sm:$0xff]   ;;  %v6854_v28 = vld [vmem:[#allocation7 + $0x56c] ss:$16 sps:$4 sm:$0xff]  }
 0x10d   : > { %3658 = vmatmul.mubr.bf16.vlgmr.msra.gmra.mrb[0].mxu0 %v398_v29  ;;  %4226 = vmatmul.mubr.bf16.vlgmr.msra.gmra.mrb[0].mxu1 %v398_v29  ;;  %v6849_v29 = vld [vmem:[#allocation7 + $0x560] ss:$16 sps:$4 sm:$0xff]  }
 0x10e   : > { %3697 = vmatpush1.bf16.msra.mxu0 %v6783_v32  ;;  %4265 = vmatpush1.bf16.msra.mxu1 %v6786_v33  ;;  %v6860_v32 = vld [vmem:[#allocation7 + $0x58c] ss:$16 sps:$4 sm:$0xff]   ;;  %v6855_v33 = vld [vmem:[#allocation7 + $0x580] ss:$16 sps:$4 sm:$0xff]  }
 0x10f   : > { %3698 = vmatprep.subr.bf16.mxu0 %v6791_v34  ;;  %4266 = vmatprep.subr.bf16.mxu1 %v6794_v35  ;;  %v6858_v34 = vld [vmem:[#allocation7 + $0x588] ss:$16 sps:$4 sm:$0xff]   ;;  %v6863_v35 = vld [vmem:[#allocation7 + $0x5a4] ss:$16 sps:$4 sm:$0xff]  }
 0x110   : > { %3667 = vmatprep.mubr.bf16.mxu0 %v415_v37  ;;  %4235 = vmatprep.mubr.bf16.mxu1 %v415_v37  ;;  %v6861_v37 = vld [vmem:[#allocation7 + $0x5a0] ss:$16 sps:$4 sm:$0xff]  }
 0x112   : > { %3699 = vmatpush1.bf16.msra.mxu0 %v6789_v36  ;;  %4267 = vmatpush1.bf16.msra.mxu1 %v6792_v38  ;;  %v6866_v36 = vld [vmem:[#allocation7 + $0x5ac] ss:$16 sps:$4 sm:$0xff]   ;;  %v6864_v38 = vld [vmem:[#allocation7 + $0x5a8] ss:$16 sps:$4 sm:$0xff]  }
 0x113   : > { %3700 = vmatprep.subr.bf16.mxu0 %v6797_v39  ;;  %4268 = vmatprep.subr.bf16.mxu1 %v6800_v42  ;;  %v6869_v39 = vld [vmem:[#allocation7 + $0x5c4] ss:$16 sps:$4 sm:$0xff]   ;;  %v6870_v42 = vld [vmem:[#allocation7 + $0x5c8] ss:$16 sps:$4 sm:$0xff]  }
 0x115   : > { %3668 = vmatmul.mubr.bf16.gmra.mrb[4].mxu0 %v414_v44  ;;  %4236 = vmatmul.mubr.bf16.gmra.mrb[4].mxu1 %v414_v44  ;;  %v6878_v44 = vld [vmem:[#allocation7 + $0x5ec] ss:$16 sps:$4 sm:$0xff]  }
 0x116   : > { %3701 = vmatpush1.bf16.msra.mxu0 %v6795_v43  ;;  %4269 = vmatpush1.bf16.msra.mxu1 %v6798_v47  ;;  %v6875_v43 = vld [vmem:[#allocation7 + $0x5e4] ss:$16 sps:$4 sm:$0xff]  }
 0x117   : > { %3702 = vmatprep.subr.bf16.mxu0 %v6803_v48  ;;  %4270 = vmatprep.subr.bf16.mxu1 %v6806_v49  ;;  %v288_v47 = vld [vmem:[%s7816_s30 + $0x20] sm:$0xff] }
 0x118   : > { %3677 = vmatprep.mubr.bf16.mxu0 %v431_v51  ;;  %4245 = vmatprep.mubr.bf16.mxu1 %v431_v51  ;;  %v304_v48 = vld [vmem:[%s7816_s30 + $0xa0] sm:$0xff]  ;;  %v321_v51 = vld [vmem:[%s7816_s30 + $0x128] sm:$0xff] }
 0x119   : > { %v6881_v49 = vld [vmem:[#allocation7 + $0x604] ss:$16 sps:$4 sm:$0xff]  }
 0x11a   : > { %3703 = vmatpush1.bf16.msra.mxu0 %v6801_v50  ;;  %4271 = vmatpush1.bf16.msra.mxu1 %v6804_v52  ;;  %v6884_v50 = vld [vmem:[#allocation7 + $0x60c] ss:$16 sps:$4 sm:$0xff]   ;;  %v400_v52 = vpack.c.bf16 %v304_v48, %v288_v47  ;;  %v6939_v47 = vld [vmem:[#allocation7 + $0x740] ss:$16 sps:$4 sm:$0xff]   ;;  %v6942_v48 = vld [vmem:[#allocation7 + $0x748] ss:$16 sps:$4 sm:$0xff]  }
 0x11b   : > { %3704 = vmatprep.subr.bf16.mxu0 %v6809_v53  ;;  %4272 = vmatprep.subr.bf16.mxu1 %v6812_v56  ;;  %v337_v53 = vld [vmem:[%s7816_s30 + $0x1a8] sm:$0xff]  ;;  %v6887_v56 = vld [vmem:[#allocation7 + $0x624] ss:$16 sps:$4 sm:$0xff]  }
 0x11d   : > { %3678 = vmatmul.mubr.bf16.gmra.mrb[8].mxu0 %v430_v59  ;;  %4246 = vmatmul.mubr.bf16.gmra.mrb[8].mxu1 %v430_v59  ;;  %v417_v59 = vpack.c.bf16 %v337_v53, %v321_v51  ;;  %v6945_v51 = vld [vmem:[#allocation7 + $0x760] ss:$16 sps:$4 sm:$0xff]   ;;  %v6953_v53 = vld [vmem:[#allocation7 + $0x784] ss:$16 sps:$4 sm:$0xff]  }
 0x11e   : > { %3705 = vmatpush1.bf16.msra.mxu0 %v6807_v57  ;;  %4273 = vmatpush1.bf16.msra.mxu1 %v6810_v58  ;;  %v6890_v57 = vld [vmem:[#allocation7 + $0x62c] ss:$16 sps:$4 sm:$0xff]   ;;  %v6885_v58 = vld [vmem:[#allocation7 + $0x620] ss:$16 sps:$4 sm:$0xff]  }
 0x11f   : > { %3706 = vmatprep.subr.bf16.mxu0 %v6815_v61  ;;  %4274 = vmatprep.subr.bf16.mxu1 %v6818_v62  ;;  %v320_v61 = vld [vmem:[%s7816_s30 + $0x120] sm:$0xff] }
 0x120   : > { %3687 = vmatprep.mubr.bf16.mxu0 %v447_v0  ;;  %4255 = vmatprep.mubr.bf16.mxu1 %v447_v0  ;;  %v336_v62 = vld [vmem:[%s7816_s30 + $0x1a0] sm:$0xff]  ;;  %v6896_v0 = vld [vmem:[#allocation7 + $0x64c] ss:$16 sps:$4 sm:$0xff]  }
 0x122   : > { %3707 = vmatpush1.bf16.msra.mxu0 %v6813_v63  ;;  %4275 = vmatpush1.bf16.msra.mxu1 %v6816_v1  ;;  %v6893_v63 = vld [vmem:[#allocation7 + $0x644] ss:$16 sps:$4 sm:$0xff]   ;;  %v353_v1 = vld [vmem:[%s7816_s30 + $0x228] sm:$0xff] }
 0x123   : > { %3708 = vmatprep.subr.bf16.mxu0 %v6821_v2  ;;  %4276 = vmatprep.subr.bf16.mxu1 %v6824_v4  ;;  %v416_v2 = vpack.c.bf16 %v336_v62, %v320_v61  ;;  %v6891_v4 = vld [vmem:[#allocation7 + $0x640] ss:$16 sps:$4 sm:$0xff]   ;;  %v433_v9 = vpack.c.bf16 %v369_v3, %v353_v1  ;;  %v6965_v61 = vld [vmem:[#allocation7 + $0x7c4] ss:$16 sps:$4 sm:$0xff]   ;;  %v6968_v62 = vld [vmem:[#allocation7 + $0x7cc] ss:$16 sps:$4 sm:$0xff]  }
 0x124   : > { %v6971_v1 = vld [vmem:[#allocation7 + $0x7e4] ss:$16 sps:$4 sm:$0xff]   ;;  %v6969_v3 = vld [vmem:[#allocation7 + $0x7e0] ss:$16 sps:$4 sm:$0xff]  }
 0x125   : > { %3688 = vmatmul.mubr.bf16.gmra.mrb[12].mxu0 %v446_v7  ;;  %4256 = vmatmul.mubr.bf16.gmra.mrb[12].mxu1 %v446_v7  ;;  %v6902_v7 = vld [vmem:[#allocation7 + $0x66c] ss:$16 sps:$4 sm:$0xff]  }
 0x126   : > { %3709 = vmatpush1.bf16.msra.mxu0 %v6819_v5  ;;  %4277 = vmatpush1.bf16.msra.mxu1 %v6822_v6  ;;  %v6894_v5 = vld [vmem:[#allocation7 + $0x648] ss:$16 sps:$4 sm:$0xff]   ;;  %v6899_v6 = vld [vmem:[#allocation7 + $0x664] ss:$16 sps:$4 sm:$0xff]  }
 0x127   : > { %3710 = vmatprep.subr.bf16.mxu0 %v6827_v10  ;;  %4278 = vmatprep.subr.bf16.mxu1 %v6830_v11  ;;  %v6900_v10 = vld [vmem:[#allocation7 + $0x668] ss:$16 sps:$4 sm:$0xff]   ;;  %v352_v11 = vld [vmem:[%s7816_s30 + $0x220] sm:$0xff] }
 0x128   : > { %3728 = vmatprep.mubr.bf16.mxu0 %v401_v12  ;;  %4296 = vmatprep.mubr.bf16.mxu1 %v401_v12  ;;  %v368_v12 = vld [vmem:[%s7816_s30 + $0x2a0] sm:$0xff] }
 0x12a   : > { %3711 = vmatpush1.bf16.msra.mxu0 %v6825_v13  ;;  %4279 = vmatpush1.bf16.msra.mxu1 %v6828_v14  ;;  %v6905_v13 = vld [vmem:[#allocation7 + $0x684] ss:$16 sps:$4 sm:$0xff]   ;;  %v6908_v14 = vld [vmem:[#allocation7 + $0x68c] ss:$16 sps:$4 sm:$0xff]  }
 0x12b   : > { %3712 = vmatprep.subr.bf16.mxu0 %v6833_v15  ;;  %4280 = vmatprep.subr.bf16.mxu1 %v6836_v16  ;;  %v432_v15 = vpack.c.bf16 %v368_v12, %v352_v11  ;;  %v385_v16 = vld [vmem:[%s7816_s30 + $0x328] sm:$0xff]  ;;  %v323_v12 = vld [vmem:[%s7816_s30 + $0x138] sm:$0xff] }
 0x12e   : > { %3713 = vmatpush1.bf16.msra.mxu0 %v6831_v17  ;;  %4281 = vmatpush1.bf16.msra.mxu1 %v6834_v18  ;;  %v6903_v17 = vld [vmem:[#allocation7 + $0x680] ss:$16 sps:$4 sm:$0xff]   ;;  %v6906_v18 = vld [vmem:[#allocation7 + $0x688] ss:$16 sps:$4 sm:$0xff]  }
 0x12f   : > { %3714 = vmatprep.subr.bf16.mxu0 %v6839_v19  ;;  %4282 = vmatprep.subr.bf16.mxu1 %v6842_v20  ;;  %v6911_v19 = vld [vmem:[#allocation7 + $0x6a4] ss:$16 sps:$4 sm:$0xff]   ;;  %v6914_v20 = vld [vmem:[#allocation7 + $0x6ac] ss:$16 sps:$4 sm:$0xff]  }
 0x132   : > { %3715 = vmatpush1.bf16.msra.mxu0 %v6837_v21  ;;  %4283 = vmatpush1.bf16.msra.mxu1 %v6840_v22  ;;  %v449_v21 = vpack.c.bf16 %v385_v16, %v385_v16  ;;  %v6909_v22 = vld [vmem:[#allocation7 + $0x6a0] ss:$16 sps:$4 sm:$0xff]  }
 0x133   : > { %3716 = vmatprep.subr.bf16.mxu0 %v6845_v23  ;;  %4284 = vmatprep.subr.bf16.mxu1 %v6848_v24  ;;  %v6912_v23 = vld [vmem:[#allocation7 + $0x6a8] ss:$16 sps:$4 sm:$0xff]   ;;  %v6917_v24 = vld [vmem:[#allocation7 + $0x6c4] ss:$16 sps:$4 sm:$0xff]  }
 0x136   : > { %3717 = vmatpush1.bf16.msra.mxu0 %v6843_v25  ;;  %4285 = vmatpush1.bf16.msra.mxu1 %v6846_v26  ;;  %v384_v25 = vld [vmem:[%s7816_s30 + $0x320] sm:$0xff]  ;;  %v6920_v26 = vld [vmem:[#allocation7 + $0x6cc] ss:$16 sps:$4 sm:$0xff]  }
 0x137   : > { %3718 = vmatprep.subr.bf16.mxu0 %v6851_v27  ;;  %4286 = vmatprep.subr.bf16.mxu1 %v6854_v28  ;;  %v448_v27 = vpack.c.bf16 %v384_v25, %v384_v25  ;;  %v291_v28 = vld [vmem:[%s7816_s30 + $0x38] sm:$0xff] }
 0x13a   : > { %3719 = vmatpush1.bf16.msra.mxu0 %v6849_v29  ;;  %4287 = vmatpush1.bf16.msra.mxu1 %v6852_v30  ;;  %v307_v29 = vld [vmem:[%s7816_s30 + $0xb8] sm:$0xff]  ;;  %v6915_v30 = vld [vmem:[#allocation7 + $0x6c0] ss:$16 sps:$4 sm:$0xff]  }
 0x13b   : > { %3720 = vmatprep.subr.bf16.mxu0 %v6857_v31  ;;  %4288 = vmatprep.subr.bf16.mxu1 %v6860_v32  ;;  %v6918_v31 = vld [vmem:[#allocation7 + $0x6c8] ss:$16 sps:$4 sm:$0xff]   ;;  %v6923_v32 = vld [vmem:[#allocation7 + $0x6e4] ss:$16 sps:$4 sm:$0xff]  }
 0x13e   : > { %3721 = vmatpush1.bf16.msra.mxu0 %v6855_v33  ;;  %4289 = vmatpush1.bf16.msra.mxu1 %v6858_v34  ;;  %v6926_v33 = vld [vmem:[#allocation7 + $0x6ec] ss:$16 sps:$4 sm:$0xff]   ;;  %v403_v34 = vpack.c.bf16 %v307_v29, %v291_v28  ;;  %v6995_v28 = vld [vmem:[#allocation7 + $0x864] ss:$16 sps:$4 sm:$0xff]  }
 0x13f   : > { %3722 = vmatprep.subr.bf16.mxu0 %v6863_v35  ;;  %4290 = vmatprep.subr.bf16.mxu1 %v6866_v36  ;;  %v6921_v35 = vld [vmem:[#allocation7 + $0x6e0] ss:$16 sps:$4 sm:$0xff]   ;;  %v6924_v36 = vld [vmem:[#allocation7 + $0x6e8] ss:$16 sps:$4 sm:$0xff]   ;;  %v6998_v29 = vld [vmem:[#allocation7 + $0x86c] ss:$16 sps:$4 sm:$0xff]  }
 0x142   : > { %3723 = vmatpush1.bf16.msra.mxu0 %v6861_v37  ;;  %4291 = vmatpush1.bf16.msra.mxu1 %v6864_v38  ;;  %v6929_v37 = vld [vmem:[#allocation7 + $0x704] ss:$16 sps:$4 sm:$0xff]   ;;  %v6932_v38 = vld [vmem:[#allocation7 + $0x70c] ss:$16 sps:$4 sm:$0xff]  }
 0x143   : > { %3724 = vmatprep.subr.bf16.mxu0 %v6869_v39  ;;  %4292 = vmatprep.subr.bf16.mxu1 %v6872_v40  ;;  %v6927_v39 = vld [vmem:[#allocation7 + $0x700] ss:$16 sps:$4 sm:$0xff]   ;;  %v6930_v40 = vld [vmem:[#allocation7 + $0x708] ss:$16 sps:$4 sm:$0xff]  }
 0x146   : > { %3725 = vmatpush1.bf16.msra.mxu0 %v6867_v41  ;;  %4293 = vmatpush1.bf16.msra.mxu1 %v6870_v42  ;;  %v6935_v41 = vld [vmem:[#allocation7 + $0x724] ss:$16 sps:$4 sm:$0xff]   ;;  %v6938_v42 = vld [vmem:[#allocation7 + $0x72c] ss:$16 sps:$4 sm:$0xff]  }
 0x147   : > { %3726 = vmatprep.subr.bf16.mxu0 %v6875_v43  ;;  %4294 = vmatprep.subr.bf16.mxu1 %v6878_v44  ;;  %v6933_v43 = vld [vmem:[#allocation7 + $0x720] ss:$16 sps:$4 sm:$0xff]   ;;  %v6936_v44 = vld [vmem:[#allocation7 + $0x728] ss:$16 sps:$4 sm:$0xff]  }
 0x14a   : > { %3727 = vmatpush1.bf16.msra.mxu0 %v6873_v45  ;;  %4295 = vmatpush1.bf16.msra.mxu1 %v6876_v46  ;;  %v6941_v45 = vld [vmem:[#allocation7 + $0x744] ss:$16 sps:$4 sm:$0xff]   ;;  %v6944_v46 = vld [vmem:[#allocation7 + $0x74c] ss:$16 sps:$4 sm:$0xff]  }
 0x14b   : > { %3767 = vmatprep.subr.bf16.mxu0 %v6881_v49  ;;  %4335 = vmatprep.subr.bf16.mxu1 %v6884_v50  ;;  %v6947_v49 = vld [vmem:[#allocation7 + $0x764] ss:$16 sps:$4 sm:$0xff]   ;;  %v6950_v50 = vld [vmem:[#allocation7 + $0x76c] ss:$16 sps:$4 sm:$0xff]  }
 0x14d   : > { %3729 = vmatmul.mubr.bf16.vlgmr.msra.gmra.mrb[0].mxu0 %v400_v52  ;;  %4297 = vmatmul.mubr.bf16.vlgmr.msra.gmra.mrb[0].mxu1 %v400_v52  ;;  %v6948_v52 = vld [vmem:[#allocation7 + $0x768] ss:$16 sps:$4 sm:$0xff]  }
 0x14e   : > { %3768 = vmatpush1.bf16.msra.mxu0 %v6879_v54  ;;  %4336 = vmatpush1.bf16.msra.mxu1 %v6882_v55  ;;  %v6956_v54 = vld [vmem:[#allocation7 + $0x78c] ss:$16 sps:$4 sm:$0xff]   ;;  %v6951_v55 = vld [vmem:[#allocation7 + $0x780] ss:$16 sps:$4 sm:$0xff]  }
 0x14f   : > { %3769 = vmatprep.subr.bf16.mxu0 %v6887_v56  ;;  %4337 = vmatprep.subr.bf16.mxu1 %v6890_v57  ;;  %v6954_v56 = vld [vmem:[#allocation7 + $0x788] ss:$16 sps:$4 sm:$0xff]   ;;  %v6959_v57 = vld [vmem:[#allocation7 + $0x7a4] ss:$16 sps:$4 sm:$0xff]  }
 0x150   : > { %3738 = vmatprep.mubr.bf16.mxu0 %v417_v59  ;;  %4306 = vmatprep.mubr.bf16.mxu1 %v417_v59  ;;  %v6957_v59 = vld [vmem:[#allocation7 + $0x7a0] ss:$16 sps:$4 sm:$0xff]  }
 0x152   : > { %3770 = vmatpush1.bf16.msra.mxu0 %v6885_v58  ;;  %4338 = vmatpush1.bf16.msra.mxu1 %v6888_v60  ;;  %v6962_v58 = vld [vmem:[#allocation7 + $0x7ac] ss:$16 sps:$4 sm:$0xff]   ;;  %v6960_v60 = vld [vmem:[#allocation7 + $0x7a8] ss:$16 sps:$4 sm:$0xff]  }
 0x153   : > { %3771 = vmatprep.subr.bf16.mxu0 %v6893_v63  ;;  %4339 = vmatprep.subr.bf16.mxu1 %v6896_v0  ;;  %v6963_v63 = vld [vmem:[#allocation7 + $0x7c0] ss:$16 sps:$4 sm:$0xff]   ;;  %v6966_v0 = vld [vmem:[#allocation7 + $0x7c8] ss:$16 sps:$4 sm:$0xff]  }
 0x155   : > { %3739 = vmatmul.mubr.bf16.gmra.mrb[4].mxu0 %v416_v2  ;;  %4307 = vmatmul.mubr.bf16.gmra.mrb[4].mxu1 %v416_v2  ;;  %v6974_v2 = vld [vmem:[#allocation7 + $0x7ec] ss:$16 sps:$4 sm:$0xff]  }
 0x156   : > { %3772 = vmatpush1.bf16.msra.mxu0 %v6891_v4  ;;  %4340 = vmatpush1.bf16.msra.mxu1 %v6894_v5  ;;  %v6972_v4 = vld [vmem:[#allocation7 + $0x7e8] ss:$16 sps:$4 sm:$0xff]   ;;  %v6977_v5 = vld [vmem:[#allocation7 + $0x804] ss:$16 sps:$4 sm:$0xff]  }
 0x157   : > { %3773 = vmatprep.subr.bf16.mxu0 %v6899_v6  ;;  %4341 = vmatprep.subr.bf16.mxu1 %v6902_v7  ;;  %v290_v6 = vld [vmem:[%s7816_s30 + $0x30] sm:$0xff] }
 0x158   : > { %3748 = vmatprep.mubr.bf16.mxu0 %v433_v9  ;;  %4316 = vmatprep.mubr.bf16.mxu1 %v433_v9  ;;  %v306_v7 = vld [vmem:[%s7816_s30 + $0xb0] sm:$0xff] }
 0x159   : > { %v6975_v9 = vld [vmem:[#allocation7 + $0x800] ss:$16 sps:$4 sm:$0xff]   ;;  %v402_v11 = vpack.c.bf16 %v306_v7, %v290_v6  ;;  %v7038_v6 = vld [vmem:[#allocation7 + $0x948] ss:$16 sps:$4 sm:$0xff]   ;;  %v7043_v7 = vld [vmem:[#allocation7 + $0x964] ss:$16 sps:$4 sm:$0xff]  }
 0x15a   : > { %3774 = vmatpush1.bf16.msra.mxu0 %v6897_v8  ;;  %4342 = vmatpush1.bf16.msra.mxu1 %v6900_v10  ;;  %v6980_v8 = vld [vmem:[#allocation7 + $0x80c] ss:$16 sps:$4 sm:$0xff]   ;;  %v6978_v10 = vld [vmem:[#allocation7 + $0x808] ss:$16 sps:$4 sm:$0xff]  }
 0x15b   : > { %3775 = vmatprep.subr.bf16.mxu0 %v6905_v13  ;;  %4343 = vmatprep.subr.bf16.mxu1 %v6908_v14  ;;  %v339_v13 = vld [vmem:[%s7816_s30 + $0x1b8] sm:$0xff]  ;;  %v6983_v14 = vld [vmem:[#allocation7 + $0x824] ss:$16 sps:$4 sm:$0xff]  }
 0x15c   : > { %v419_v16 = vpack.c.bf16 %v339_v13, %v323_v12  ;;  %v7052_v12 = vld [vmem:[#allocation7 + $0x98c] ss:$16 sps:$4 sm:$0xff]   ;;  %v7047_v13 = vld [vmem:[#allocation7 + $0x980] ss:$16 sps:$4 sm:$0xff]  }
 0x15d   : > { %3749 = vmatmul.mubr.bf16.gmra.mrb[8].mxu0 %v432_v15  ;;  %4317 = vmatmul.mubr.bf16.gmra.mrb[8].mxu1 %v432_v15  ;;  %v6986_v15 = vld [vmem:[#allocation7 + $0x82c] ss:$16 sps:$4 sm:$0xff]  }
 0x15e   : > { %3776 = vmatpush1.bf16.msra.mxu0 %v6903_v17  ;;  %4344 = vmatpush1.bf16.msra.mxu1 %v6906_v18  ;;  %v6981_v17 = vld [vmem:[#allocation7 + $0x820] ss:$16 sps:$4 sm:$0xff]   ;;  %v6984_v18 = vld [vmem:[#allocation7 + $0x828] ss:$16 sps:$4 sm:$0xff]  }
 0x15f   : > { %3777 = vmatprep.subr.bf16.mxu0 %v6911_v19  ;;  %4345 = vmatprep.subr.bf16.mxu1 %v6914_v20  ;;  %v322_v19 = vld [vmem:[%s7816_s30 + $0x130] sm:$0xff] }
 0x160   : > { %3758 = vmatprep.mubr.bf16.mxu0 %v449_v21  ;;  %4326 = vmatprep.mubr.bf16.mxu1 %v449_v21  ;;  %v338_v20 = vld [vmem:[%s7816_s30 + $0x1b0] sm:$0xff] }
 0x161   : > { %v6989_v21 = vld [vmem:[#allocation7 + $0x844] ss:$16 sps:$4 sm:$0xff]   ;;  %v418_v25 = vpack.c.bf16 %v338_v20, %v322_v19  ;;  %v7064_v20 = vld [vmem:[#allocation7 + $0x9cc] ss:$16 sps:$4 sm:$0xff]  }
 0x162   : > { %3778 = vmatpush1.bf16.msra.mxu0 %v6909_v22  ;;  %4346 = vmatpush1.bf16.msra.mxu1 %v6912_v23  ;;  %v6992_v22 = vld [vmem:[#allocation7 + $0x84c] ss:$16 sps:$4 sm:$0xff]   ;;  %v6987_v23 = vld [vmem:[#allocation7 + $0x840] ss:$16 sps:$4 sm:$0xff]   ;;  %v7061_v19 = vld [vmem:[#allocation7 + $0x9c4] ss:$16 sps:$4 sm:$0xff]  }
 0x163   : > { %3779 = vmatprep.subr.bf16.mxu0 %v6917_v24  ;;  %4347 = vmatprep.subr.bf16.mxu1 %v6920_v26  ;;  %v6990_v24 = vld [vmem:[#allocation7 + $0x848] ss:$16 sps:$4 sm:$0xff]  }
 0x164   : > { %v355_v26 = vld [vmem:[%s7816_s30 + $0x238] sm:$0xff] }
 0x165   : > { %3759 = vmatmul.mubr.bf16.gmra.mrb[12].mxu0 %v448_v27  ;;  %4327 = vmatmul.mubr.bf16.gmra.mrb[12].mxu1 %v448_v27  ;;  %v371_v27 = vld [vmem:[%s7816_s30 + $0x2b8] sm:$0xff] }
 0x166   : > { %3780 = vmatpush1.bf16.msra.mxu0 %v6915_v30  ;;  %4348 = vmatpush1.bf16.msra.mxu1 %v6918_v31  ;;  %v6993_v30 = vld [vmem:[#allocation7 + $0x860] ss:$16 sps:$4 sm:$0xff]   ;;  %v435_v31 = vpack.c.bf16 %v371_v27, %v355_v26  ;;  %v7068_v26 = vld [vmem:[#allocation7 + $0x9e8] ss:$16 sps:$4 sm:$0xff]  }
 0x167   : > { %3781 = vmatprep.subr.bf16.mxu0 %v6923_v32  ;;  %4349 = vmatprep.subr.bf16.mxu1 %v6926_v33  ;;  %v6996_v32 = vld [vmem:[#allocation7 + $0x868] ss:$16 sps:$4 sm:$0xff]   ;;  %v354_v33 = vld [vmem:[%s7816_s30 + $0x230] sm:$0xff]  ;;  %v292_v27 = vld [vmem:[%s7816_s30 + $0x40] sm:$0xff] }
 0x168   : > { %3799 = vmatprep.mubr.bf16.mxu0 %v403_v34  ;;  %4367 = vmatprep.mubr.bf16.mxu1 %v403_v34  ;;  %v370_v34 = vld [vmem:[%s7816_s30 + $0x2b0] sm:$0xff] }
 0x16a   : > { %3782 = vmatpush1.bf16.msra.mxu0 %v6921_v35  ;;  %4350 = vmatpush1.bf16.msra.mxu1 %v6924_v36  ;;  %v7001_v35 = vld [vmem:[#allocation7 + $0x884] ss:$16 sps:$4 sm:$0xff]   ;;  %v7004_v36 = vld [vmem:[#allocation7 + $0x88c] ss:$16 sps:$4 sm:$0xff]  }
 0x16b   : > { %3783 = vmatprep.subr.bf16.mxu0 %v6929_v37  ;;  %4351 = vmatprep.subr.bf16.mxu1 %v6932_v38  ;;  %v6999_v37 = vld [vmem:[#allocation7 + $0x880] ss:$16 sps:$4 sm:$0xff]   ;;  %v434_v38 = vpack.c.bf16 %v370_v34, %v354_v33  ;;  %v341_v33 = vld [vmem:[%s7816_s30 + $0x1c8] sm:$0xff] }
 0x16c   : > { %v7071_v34 = vld [vmem:[#allocation7 + $0xa00] ss:$16 sps:$4 sm:$0xff]  }
 0x16e   : > { %3784 = vmatpush1.bf16.msra.mxu0 %v6927_v39  ;;  %4352 = vmatpush1.bf16.msra.mxu1 %v6930_v40  ;;  %v387_v39 = vld [vmem:[%s7816_s30 + $0x338] sm:$0xff] }
 0x16f   : > { %3785 = vmatprep.subr.bf16.mxu0 %v6935_v41  ;;  %4353 = vmatprep.subr.bf16.mxu1 %v6938_v42  ;;  %v7002_v40 = vld [vmem:[#allocation7 + $0x888] ss:$16 sps:$4 sm:$0xff]   ;;  %v7007_v41 = vld [vmem:[#allocation7 + $0x8a4] ss:$16 sps:$4 sm:$0xff]   ;;  %v7010_v42 = vld [vmem:[#allocation7 + $0x8ac] ss:$16 sps:$4 sm:$0xff]  }
 0x172   : > { %3786 = vmatpush1.bf16.msra.mxu0 %v6933_v43  ;;  %4354 = vmatpush1.bf16.msra.mxu1 %v6936_v44  ;;  %v451_v43 = vpack.c.bf16 %v387_v39, %v387_v39  ;;  %v7005_v44 = vld [vmem:[#allocation7 + $0x8a0] ss:$16 sps:$4 sm:$0xff]  }
 0x173   : > { %3787 = vmatprep.subr.bf16.mxu0 %v6941_v45  ;;  %4355 = vmatprep.subr.bf16.mxu1 %v6944_v46  ;;  %v7008_v45 = vld [vmem:[#allocation7 + $0x8a8] ss:$16 sps:$4 sm:$0xff]   ;;  %v386_v46 = vld [vmem:[%s7816_s30 + $0x330] sm:$0xff] }
 0x176   : > { %3788 = vmatpush1.bf16.msra.mxu0 %v6939_v47  ;;  %4356 = vmatpush1.bf16.msra.mxu1 %v6942_v48  ;;  %v7013_v47 = vld [vmem:[#allocation7 + $0x8c4] ss:$16 sps:$4 sm:$0xff]   ;;  %v7016_v48 = vld [vmem:[#allocation7 + $0x8cc] ss:$16 sps:$4 sm:$0xff]  }
 0x177   : > { %3789 = vmatprep.subr.bf16.mxu0 %v6947_v49  ;;  %4357 = vmatprep.subr.bf16.mxu1 %v6950_v50  ;;  %v7011_v49 = vld [vmem:[#allocation7 + $0x8c0] ss:$16 sps:$4 sm:$0xff]   ;;  %v7014_v50 = vld [vmem:[#allocation7 + $0x8c8] ss:$16 sps:$4 sm:$0xff]  }
 0x17a   : > { %3790 = vmatpush1.bf16.msra.mxu0 %v6945_v51  ;;  %4358 = vmatpush1.bf16.msra.mxu1 %v6948_v52  ;;  %v450_v51 = vpack.c.bf16 %v386_v46, %v386_v46  ;;  %v293_v52 = vld [vmem:[%s7816_s30 + $0x48] sm:$0xff] }
 0x17b   : > { %3791 = vmatprep.subr.bf16.mxu0 %v6953_v53  ;;  %4359 = vmatprep.subr.bf16.mxu1 %v6956_v54  ;;  %v309_v53 = vld [vmem:[%s7816_s30 + $0xc8] sm:$0xff]  ;;  %v7019_v54 = vld [vmem:[#allocation7 + $0x8e4] ss:$16 sps:$4 sm:$0xff]  }
 0x17e   : > { %3792 = vmatpush1.bf16.msra.mxu0 %v6951_v55  ;;  %4360 = vmatpush1.bf16.msra.mxu1 %v6954_v56  ;;  %v7022_v55 = vld [vmem:[#allocation7 + $0x8ec] ss:$16 sps:$4 sm:$0xff]   ;;  %v405_v56 = vpack.c.bf16 %v309_v53, %v293_v52  ;;  %v7089_v52 = vld [vmem:[#allocation7 + $0xa60] ss:$16 sps:$4 sm:$0xff]   ;;  %v7092_v53 = vld [vmem:[#allocation7 + $0xa68] ss:$16 sps:$4 sm:$0xff]  }
 0x17f   : > { %3793 = vmatprep.subr.bf16.mxu0 %v6959_v57  ;;  %4361 = vmatprep.subr.bf16.mxu1 %v6962_v58  ;;  %v7017_v57 = vld [vmem:[#allocation7 + $0x8e0] ss:$16 sps:$4 sm:$0xff]   ;;  %v7020_v58 = vld [vmem:[#allocation7 + $0x8e8] ss:$16 sps:$4 sm:$0xff]  }
 0x182   : > { %3794 = vmatpush1.bf16.msra.mxu0 %v6957_v59  ;;  %4362 = vmatpush1.bf16.msra.mxu1 %v6960_v60  ;;  %v7025_v59 = vld [vmem:[#allocation7 + $0x904] ss:$16 sps:$4 sm:$0xff]   ;;  %v7028_v60 = vld [vmem:[#allocation7 + $0x90c] ss:$16 sps:$4 sm:$0xff]  }
 0x183   : > { %3795 = vmatprep.subr.bf16.mxu0 %v6965_v61  ;;  %4363 = vmatprep.subr.bf16.mxu1 %v6968_v62  ;;  %v7023_v61 = vld [vmem:[#allocation7 + $0x900] ss:$16 sps:$4 sm:$0xff]   ;;  %v7026_v62 = vld [vmem:[#allocation7 + $0x908] ss:$16 sps:$4 sm:$0xff]  }
 0x186   : > { %3796 = vmatpush1.bf16.msra.mxu0 %v6963_v63  ;;  %4364 = vmatpush1.bf16.msra.mxu1 %v6966_v0  ;;  %v7031_v63 = vld [vmem:[#allocation7 + $0x924] ss:$16 sps:$4 sm:$0xff]   ;;  %v7034_v0 = vld [vmem:[#allocation7 + $0x92c] ss:$16 sps:$4 sm:$0xff]  }
 0x187   : > { %3797 = vmatprep.subr.bf16.mxu0 %v6971_v1  ;;  %4365 = vmatprep.subr.bf16.mxu1 %v6974_v2  ;;  %v7029_v1 = vld [vmem:[#allocation7 + $0x920] ss:$16 sps:$4 sm:$0xff]   ;;  %v7032_v2 = vld [vmem:[#allocation7 + $0x928] ss:$16 sps:$4 sm:$0xff]  }
 0x18a   : > { %3798 = vmatpush1.bf16.msra.mxu0 %v6969_v3  ;;  %4366 = vmatpush1.bf16.msra.mxu1 %v6972_v4  ;;  %v7037_v3 = vld [vmem:[#allocation7 + $0x944] ss:$16 sps:$4 sm:$0xff]   ;;  %v7040_v4 = vld [vmem:[#allocation7 + $0x94c] ss:$16 sps:$4 sm:$0xff]  }
 0x18b   : > { %3838 = vmatprep.subr.bf16.mxu0 %v6977_v5  ;;  %4406 = vmatprep.subr.bf16.mxu1 %v6980_v8  ;;  %v7035_v5 = vld [vmem:[#allocation7 + $0x940] ss:$16 sps:$4 sm:$0xff]   ;;  %v7046_v8 = vld [vmem:[#allocation7 + $0x96c] ss:$16 sps:$4 sm:$0xff]  }
 0x18d   : > { %3800 = vmatmul.mubr.bf16.vlgmr.msra.gmra.mrb[0].mxu0 %v402_v11  ;;  %4368 = vmatmul.mubr.bf16.vlgmr.msra.gmra.mrb[0].mxu1 %v402_v11  ;;  %v7049_v11 = vld [vmem:[#allocation7 + $0x984] ss:$16 sps:$4 sm:$0xff]  }
 0x18e   : > { %3839 = vmatpush1.bf16.msra.mxu0 %v6975_v9  ;;  %4407 = vmatpush1.bf16.msra.mxu1 %v6978_v10  ;;  %v7041_v9 = vld [vmem:[#allocation7 + $0x960] ss:$16 sps:$4 sm:$0xff]   ;;  %v7044_v10 = vld [vmem:[#allocation7 + $0x968] ss:$16 sps:$4 sm:$0xff]  }
 0x18f   : > { %3840 = vmatprep.subr.bf16.mxu0 %v6983_v14  ;;  %4408 = vmatprep.subr.bf16.mxu1 %v6986_v15  ;;  %v7050_v14 = vld [vmem:[#allocation7 + $0x988] ss:$16 sps:$4 sm:$0xff]   ;;  %v7055_v15 = vld [vmem:[#allocation7 + $0x9a4] ss:$16 sps:$4 sm:$0xff]  }
 0x190   : > { %3809 = vmatprep.mubr.bf16.mxu0 %v419_v16  ;;  %4377 = vmatprep.mubr.bf16.mxu1 %v419_v16  ;;  %v7058_v16 = vld [vmem:[#allocation7 + $0x9ac] ss:$16 sps:$4 sm:$0xff]  }
 0x192   : > { %3841 = vmatpush1.bf16.msra.mxu0 %v6981_v17  ;;  %4409 = vmatpush1.bf16.msra.mxu1 %v6984_v18  ;;  %v7053_v17 = vld [vmem:[#allocation7 + $0x9a0] ss:$16 sps:$4 sm:$0xff]   ;;  %v7056_v18 = vld [vmem:[#allocation7 + $0x9a8] ss:$16 sps:$4 sm:$0xff]  }
 0x193   : > { %3842 = vmatprep.subr.bf16.mxu0 %v6989_v21  ;;  %4410 = vmatprep.subr.bf16.mxu1 %v6992_v22  ;;  %v7059_v21 = vld [vmem:[#allocation7 + $0x9c0] ss:$16 sps:$4 sm:$0xff]   ;;  %v7062_v22 = vld [vmem:[#allocation7 + $0x9c8] ss:$16 sps:$4 sm:$0xff]  }
 0x195   : > { %3810 = vmatmul.mubr.bf16.gmra.mrb[4].mxu0 %v418_v25  ;;  %4378 = vmatmul.mubr.bf16.gmra.mrb[4].mxu1 %v418_v25  ;;  %v7065_v25 = vld [vmem:[#allocation7 + $0x9e0] ss:$16 sps:$4 sm:$0xff]  }
 0x196   : > { %3843 = vmatpush1.bf16.msra.mxu0 %v6987_v23  ;;  %4411 = vmatpush1.bf16.msra.mxu1 %v6990_v24  ;;  %v7067_v23 = vld [vmem:[#allocation7 + $0x9e4] ss:$16 sps:$4 sm:$0xff]   ;;  %v7070_v24 = vld [vmem:[#allocation7 + $0x9ec] ss:$16 sps:$4 sm:$0xff]  }
 0x197   : > { %3844 = vmatprep.subr.bf16.mxu0 %v6995_v28  ;;  %4412 = vmatprep.subr.bf16.mxu1 %v6998_v29  ;;  %v308_v28 = vld [vmem:[%s7816_s30 + $0xc0] sm:$0xff] }
 0x198   : > { %3819 = vmatprep.mubr.bf16.mxu0 %v435_v31  ;;  %4387 = vmatprep.mubr.bf16.mxu1 %v435_v31  ;;  %v7073_v29 = vld [vmem:[#allocation7 + $0xa04] ss:$16 sps:$4 sm:$0xff]   ;;  %v325_v31 = vld [vmem:[%s7816_s30 + $0x148] sm:$0xff] }
 0x199   : > { %v421_v39 = vpack.c.bf16 %v341_v33, %v325_v31  ;;  %v7137_v31 = vld [vmem:[#allocation7 + $0xb60] ss:$16 sps:$4 sm:$0xff]   ;;  %v7145_v33 = vld [vmem:[#allocation7 + $0xb84] ss:$16 sps:$4 sm:$0xff]  }
 0x19a   : > { %3845 = vmatpush1.bf16.msra.mxu0 %v6993_v30  ;;  %4413 = vmatpush1.bf16.msra.mxu1 %v6996_v32  ;;  %v7076_v30 = vld [vmem:[#allocation7 + $0xa0c] ss:$16 sps:$4 sm:$0xff]   ;;  %v404_v32 = vpack.c.bf16 %v308_v28, %v292_v27  ;;  %v7131_v27 = vld [vmem:[#allocation7 + $0xb40] ss:$16 sps:$4 sm:$0xff]   ;;  %v7134_v28 = vld [vmem:[#allocation7 + $0xb48] ss:$16 sps:$4 sm:$0xff]  }
 0x19b   : > { %3846 = vmatprep.subr.bf16.mxu0 %v7001_v35  ;;  %4414 = vmatprep.subr.bf16.mxu1 %v7004_v36  ;;  %v7074_v35 = vld [vmem:[#allocation7 + $0xa08] ss:$16 sps:$4 sm:$0xff]   ;;  %v7079_v36 = vld [vmem:[#allocation7 + $0xa24] ss:$16 sps:$4 sm:$0xff]  }
 0x19d   : > { %3820 = vmatmul.mubr.bf16.gmra.mrb[8].mxu0 %v434_v38  ;;  %4388 = vmatmul.mubr.bf16.gmra.mrb[8].mxu1 %v434_v38  ;;  %v7077_v38 = vld [vmem:[#allocation7 + $0xa20] ss:$16 sps:$4 sm:$0xff]  }
 0x19e   : > { %3847 = vmatpush1.bf16.msra.mxu0 %v6999_v37  ;;  %4415 = vmatpush1.bf16.msra.mxu1 %v7002_v40  ;;  %v7082_v37 = vld [vmem:[#allocation7 + $0xa2c] ss:$16 sps:$4 sm:$0xff]   ;;  %v7080_v40 = vld [vmem:[#allocation7 + $0xa28] ss:$16 sps:$4 sm:$0xff]  }
 0x19f   : > { %3848 = vmatprep.subr.bf16.mxu0 %v7007_v41  ;;  %4416 = vmatprep.subr.bf16.mxu1 %v7010_v42  ;;  %v7085_v41 = vld [vmem:[#allocation7 + $0xa44] ss:$16 sps:$4 sm:$0xff]  }
 0x1a0   : > { %3829 = vmatprep.mubr.bf16.mxu0 %v451_v43  ;;  %4397 = vmatprep.mubr.bf16.mxu1 %v451_v43  ;;  %v324_v42 = vld [vmem:[%s7816_s30 + $0x140] sm:$0xff] }
 0x1a1   : > { %v340_v43 = vld [vmem:[%s7816_s30 + $0x1c0] sm:$0xff] }
 0x1a2   : > { %3849 = vmatpush1.bf16.msra.mxu0 %v7005_v44  ;;  %4417 = vmatpush1.bf16.msra.mxu1 %v7008_v45  ;;  %v7088_v44 = vld [vmem:[#allocation7 + $0xa4c] ss:$16 sps:$4 sm:$0xff]   ;;  %v420_v46 = vpack.c.bf16 %v340_v43, %v324_v42  ;;  %v7155_v43 = vld [vmem:[#allocation7 + $0xbc0] ss:$16 sps:$4 sm:$0xff]  }
 0x1a3   : > { %3850 = vmatprep.subr.bf16.mxu0 %v7013_v47  ;;  %4418 = vmatprep.subr.bf16.mxu1 %v7016_v48  ;;  %v357_v45 = vld [vmem:[%s7816_s30 + $0x248] sm:$0xff]  ;;  %v7083_v48 = vld [vmem:[#allocation7 + $0xa40] ss:$16 sps:$4 sm:$0xff]  }
 0x1a4   : > { %v373_v47 = vld [vmem:[%s7816_s30 + $0x2c8] sm:$0xff] }
 0x1a5   : > { %3830 = vmatmul.mubr.bf16.gmra.mrb[12].mxu0 %v450_v51  ;;  %4398 = vmatmul.mubr.bf16.gmra.mrb[12].mxu1 %v450_v51  ;;  %v7094_v51 = vld [vmem:[#allocation7 + $0xa6c] ss:$16 sps:$4 sm:$0xff]  }
 0x1a6   : > { %3851 = vmatpush1.bf16.msra.mxu0 %v7011_v49  ;;  %4419 = vmatpush1.bf16.msra.mxu1 %v7014_v50  ;;  %v7086_v49 = vld [vmem:[#allocation7 + $0xa48] ss:$16 sps:$4 sm:$0xff]   ;;  %v7091_v50 = vld [vmem:[#allocation7 + $0xa64] ss:$16 sps:$4 sm:$0xff]   ;;  %v7160_v42 = vld [vmem:[#allocation7 + $0xbcc] ss:$16 sps:$4 sm:$0xff]  }
 0x1a7   : > { %3852 = vmatprep.subr.bf16.mxu0 %v7019_v54  ;;  %4420 = vmatprep.subr.bf16.mxu1 %v7022_v55  ;;  %v437_v54 = vpack.c.bf16 %v373_v47, %v357_v45  ;;  %v7097_v55 = vld [vmem:[#allocation7 + $0xa84] ss:$16 sps:$4 sm:$0xff]   ;;  %v7161_v47 = vld [vmem:[#allocation7 + $0xbe0] ss:$16 sps:$4 sm:$0xff]  }
 0x1a8   : > { %3870 = vmatprep.mubr.bf16.mxu0 %v405_v56  ;;  %4438 = vmatprep.mubr.bf16.mxu1 %v405_v56  ;;  %v356_v56 = vld [vmem:[%s7816_s30 + $0x240] sm:$0xff] }
 0x1a9   : > { %v7163_v45 = vld [vmem:[#allocation7 + $0xbe4] ss:$16 sps:$4 sm:$0xff]  }
 0x1aa   : > { %3853 = vmatpush1.bf16.msra.mxu0 %v7017_v57  ;;  %4421 = vmatpush1.bf16.msra.mxu1 %v7020_v58  ;;  %v372_v57 = vld [vmem:[%s7816_s30 + $0x2c0] sm:$0xff]  ;;  %v7100_v58 = vld [vmem:[#allocation7 + $0xa8c] ss:$16 sps:$4 sm:$0xff]  }
 0x1ab   : > { %3854 = vmatprep.subr.bf16.mxu0 %v7025_v59  ;;  %4422 = vmatprep.subr.bf16.mxu1 %v7028_v60  ;;  %v7095_v59 = vld [vmem:[#allocation7 + $0xa80] ss:$16 sps:$4 sm:$0xff]   ;;  %v7098_v60 = vld [vmem:[#allocation7 + $0xa88] ss:$16 sps:$4 sm:$0xff]  }
 0x1ae   : > { %3855 = vmatpush1.bf16.msra.mxu0 %v7023_v61  ;;  %4423 = vmatpush1.bf16.msra.mxu1 %v7026_v62  ;;  %v436_v61 = vpack.c.bf16 %v372_v57, %v356_v56  ;;  %v389_v62 = vld [vmem:[%s7816_s30 + $0x348] sm:$0xff]  ;;  %v7167_v56 = vld [vmem:[#allocation7 + $0xc00] ss:$16 sps:$4 sm:$0xff]  }
 0x1af   : > { %3856 = vmatprep.subr.bf16.mxu0 %v7031_v63  ;;  %4424 = vmatprep.subr.bf16.mxu1 %v7034_v0  ;;  %v7103_v63 = vld [vmem:[#allocation7 + $0xaa4] ss:$16 sps:$4 sm:$0xff]   ;;  %v7106_v0 = vld [vmem:[#allocation7 + $0xaac] ss:$16 sps:$4 sm:$0xff]   ;;  %v7170_v57 = vld [vmem:[#allocation7 + $0xc08] ss:$16 sps:$4 sm:$0xff]  }
 0x1b2   : > { %3857 = vmatpush1.bf16.msra.mxu0 %v7029_v1  ;;  %4425 = vmatpush1.bf16.msra.mxu1 %v7032_v2  ;;  %v7101_v1 = vld [vmem:[#allocation7 + $0xaa0] ss:$16 sps:$4 sm:$0xff]   ;;  %v453_v2 = vpack.c.bf16 %v389_v62, %v389_v62  ;;  %v7176_v62 = vld [vmem:[#allocation7 + $0xc28] ss:$16 sps:$4 sm:$0xff]  }
 0x1b3   : > { %3858 = vmatprep.subr.bf16.mxu0 %v7037_v3  ;;  %4426 = vmatprep.subr.bf16.mxu1 %v7040_v4  ;;  %v7104_v3 = vld [vmem:[#allocation7 + $0xaa8] ss:$16 sps:$4 sm:$0xff]   ;;  %v7109_v4 = vld [vmem:[#allocation7 + $0xac4] ss:$16 sps:$4 sm:$0xff]  }
 0x1b6   : > { %3859 = vmatpush1.bf16.msra.mxu0 %v7035_v5  ;;  %4427 = vmatpush1.bf16.msra.mxu1 %v7038_v6  ;;  %v388_v5 = vld [vmem:[%s7816_s30 + $0x340] sm:$0xff]  ;;  %v7112_v6 = vld [vmem:[#allocation7 + $0xacc] ss:$16 sps:$4 sm:$0xff]  }
 0x1b7   : > { %3860 = vmatprep.subr.bf16.mxu0 %v7043_v7  ;;  %4428 = vmatprep.subr.bf16.mxu1 %v7046_v8  ;;  %v7107_v7 = vld [vmem:[#allocation7 + $0xac0] ss:$16 sps:$4 sm:$0xff]   ;;  %v7110_v8 = vld [vmem:[#allocation7 + $0xac8] ss:$16 sps:$4 sm:$0xff]  }
 0x1ba   : > { %3861 = vmatpush1.bf16.msra.mxu0 %v7041_v9  ;;  %4429 = vmatpush1.bf16.msra.mxu1 %v7044_v10  ;;  %v452_v9 = vpack.c.bf16 %v388_v5, %v388_v5  ;;  %v295_v10 = vld [vmem:[%s7816_s30 + $0x58] sm:$0xff] }
 0x1bb   : > { %3862 = vmatprep.subr.bf16.mxu0 %v7049_v11  ;;  %4430 = vmatprep.subr.bf16.mxu1 %v7052_v12  ;;  %v311_v11 = vld [vmem:[%s7816_s30 + $0xd8] sm:$0xff]  ;;  %v7115_v12 = vld [vmem:[#allocation7 + $0xae4] ss:$16 sps:$4 sm:$0xff]  }
 0x1bc   : > { %v375_v5 = vld [vmem:[%s7816_s30 + $0x2d8] sm:$0xff] }
 0x1be   : > { %3863 = vmatpush1.bf16.msra.mxu0 %v7047_v13  ;;  %4431 = vmatpush1.bf16.msra.mxu1 %v7050_v14  ;;  %v7118_v13 = vld [vmem:[#allocation7 + $0xaec] ss:$16 sps:$4 sm:$0xff]   ;;  %v407_v14 = vpack.c.bf16 %v311_v11, %v295_v10  ;;  %v7185_v11 = vld [vmem:[#allocation7 + $0xc60] ss:$16 sps:$4 sm:$0xff]  }
 0x1bf   : > { %3864 = vmatprep.subr.bf16.mxu0 %v7055_v15  ;;  %4432 = vmatprep.subr.bf16.mxu1 %v7058_v16  ;;  %v7113_v15 = vld [vmem:[#allocation7 + $0xae0] ss:$16 sps:$4 sm:$0xff]   ;;  %v7116_v16 = vld [vmem:[#allocation7 + $0xae8] ss:$16 sps:$4 sm:$0xff]  }
 0x1c2   : > { %3865 = vmatpush1.bf16.msra.mxu0 %v7053_v17  ;;  %4433 = vmatpush1.bf16.msra.mxu1 %v7056_v18  ;;  %v7121_v17 = vld [vmem:[#allocation7 + $0xb04] ss:$16 sps:$4 sm:$0xff]   ;;  %v7124_v18 = vld [vmem:[#allocation7 + $0xb0c] ss:$16 sps:$4 sm:$0xff]  }
 0x1c3   : > { %3866 = vmatprep.subr.bf16.mxu0 %v7061_v19  ;;  %4434 = vmatprep.subr.bf16.mxu1 %v7064_v20  ;;  %v7119_v19 = vld [vmem:[#allocation7 + $0xb00] ss:$16 sps:$4 sm:$0xff]   ;;  %v7122_v20 = vld [vmem:[#allocation7 + $0xb08] ss:$16 sps:$4 sm:$0xff]  }
 0x1c6   : > { %3867 = vmatpush1.bf16.msra.mxu0 %v7059_v21  ;;  %4435 = vmatpush1.bf16.msra.mxu1 %v7062_v22  ;;  %v7127_v21 = vld [vmem:[#allocation7 + $0xb24] ss:$16 sps:$4 sm:$0xff]   ;;  %v7130_v22 = vld [vmem:[#allocation7 + $0xb2c] ss:$16 sps:$4 sm:$0xff]  }
 0x1c7   : > { %3868 = vmatprep.subr.bf16.mxu0 %v7067_v23  ;;  %4436 = vmatprep.subr.bf16.mxu1 %v7070_v24  ;;  %v7125_v23 = vld [vmem:[#allocation7 + $0xb20] ss:$16 sps:$4 sm:$0xff]   ;;  %v7128_v24 = vld [vmem:[#allocation7 + $0xb28] ss:$16 sps:$4 sm:$0xff]  }
 0x1ca   : > { %3869 = vmatpush1.bf16.msra.mxu0 %v7065_v25  ;;  %4437 = vmatpush1.bf16.msra.mxu1 %v7068_v26  ;;  %v7133_v25 = vld [vmem:[#allocation7 + $0xb44] ss:$16 sps:$4 sm:$0xff]   ;;  %v7136_v26 = vld [vmem:[#allocation7 + $0xb4c] ss:$16 sps:$4 sm:$0xff]  }
 0x1cb   : > { %3909 = vmatprep.subr.bf16.mxu0 %v7073_v29  ;;  %4477 = vmatprep.subr.bf16.mxu1 %v7076_v30  ;;  %v7139_v29 = vld [vmem:[#allocation7 + $0xb64] ss:$16 sps:$4 sm:$0xff]   ;;  %v7142_v30 = vld [vmem:[#allocation7 + $0xb6c] ss:$16 sps:$4 sm:$0xff]  }
 0x1cd   : > { %3871 = vmatmul.mubr.bf16.vlgmr.msra.gmra.mrb[0].mxu0 %v404_v32  ;;  %4439 = vmatmul.mubr.bf16.vlgmr.msra.gmra.mrb[0].mxu1 %v404_v32  ;;  %v7140_v32 = vld [vmem:[#allocation7 + $0xb68] ss:$16 sps:$4 sm:$0xff]  }
 0x1ce   : > { %3910 = vmatpush1.bf16.msra.mxu0 %v7071_v34  ;;  %4478 = vmatpush1.bf16.msra.mxu1 %v7074_v35  ;;  %v7148_v34 = vld [vmem:[#allocation7 + $0xb8c] ss:$16 sps:$4 sm:$0xff]   ;;  %v7143_v35 = vld [vmem:[#allocation7 + $0xb80] ss:$16 sps:$4 sm:$0xff]  }
 0x1cf   : > { %3911 = vmatprep.subr.bf16.mxu0 %v7079_v36  ;;  %4479 = vmatprep.subr.bf16.mxu1 %v7082_v37  ;;  %v7146_v36 = vld [vmem:[#allocation7 + $0xb88] ss:$16 sps:$4 sm:$0xff]   ;;  %v7151_v37 = vld [vmem:[#allocation7 + $0xba4] ss:$16 sps:$4 sm:$0xff]  }
 0x1d0   : > { %3880 = vmatprep.mubr.bf16.mxu0 %v421_v39  ;;  %4448 = vmatprep.mubr.bf16.mxu1 %v421_v39  ;;  %v7149_v39 = vld [vmem:[#allocation7 + $0xba0] ss:$16 sps:$4 sm:$0xff]  }
 0x1d2   : > { %3912 = vmatpush1.bf16.msra.mxu0 %v7077_v38  ;;  %4480 = vmatpush1.bf16.msra.mxu1 %v7080_v40  ;;  %v7154_v38 = vld [vmem:[#allocation7 + $0xbac] ss:$16 sps:$4 sm:$0xff]   ;;  %v7152_v40 = vld [vmem:[#allocation7 + $0xba8] ss:$16 sps:$4 sm:$0xff]  }
 0x1d3   : > { %3913 = vmatprep.subr.bf16.mxu0 %v7085_v41  ;;  %4481 = vmatprep.subr.bf16.mxu1 %v7088_v44  ;;  %v7157_v41 = vld [vmem:[#allocation7 + $0xbc4] ss:$16 sps:$4 sm:$0xff]   ;;  %v7158_v44 = vld [vmem:[#allocation7 + $0xbc8] ss:$16 sps:$4 sm:$0xff]  }
 0x1d5   : > { %3881 = vmatmul.mubr.bf16.gmra.mrb[4].mxu0 %v420_v46  ;;  %4449 = vmatmul.mubr.bf16.gmra.mrb[4].mxu1 %v420_v46  ;;  %v7166_v46 = vld [vmem:[#allocation7 + $0xbec] ss:$16 sps:$4 sm:$0xff]  }
 0x1d6   : > { %3914 = vmatpush1.bf16.msra.mxu0 %v7083_v48  ;;  %4482 = vmatpush1.bf16.msra.mxu1 %v7086_v49  ;;  %v7164_v48 = vld [vmem:[#allocation7 + $0xbe8] ss:$16 sps:$4 sm:$0xff]   ;;  %v294_v49 = vld [vmem:[%s7816_s30 + $0x50] sm:$0xff] }
 0x1d7   : > { %3915 = vmatprep.subr.bf16.mxu0 %v7091_v50  ;;  %4483 = vmatprep.subr.bf16.mxu1 %v7094_v51  ;;  %v310_v50 = vld [vmem:[%s7816_s30 + $0xd0] sm:$0xff] }
 0x1d8   : > { %3890 = vmatprep.mubr.bf16.mxu0 %v437_v54  ;;  %4458 = vmatprep.mubr.bf16.mxu1 %v437_v54  ;;  %v7169_v51 = vld [vmem:[#allocation7 + $0xc04] ss:$16 sps:$4 sm:$0xff]   ;;  %v327_v54 = vld [vmem:[%s7816_s30 + $0x158] sm:$0xff] }
 0x1da   : > { %3916 = vmatpush1.bf16.msra.mxu0 %v7089_v52  ;;  %4484 = vmatpush1.bf16.msra.mxu1 %v7092_v53  ;;  %v7172_v52 = vld [vmem:[#allocation7 + $0xc0c] ss:$16 sps:$4 sm:$0xff]   ;;  %v406_v53 = vpack.c.bf16 %v310_v50, %v294_v49  ;;  %v7227_v49 = vld [vmem:[#allocation7 + $0xd40] ss:$16 sps:$4 sm:$0xff]   ;;  %v7230_v50 = vld [vmem:[#allocation7 + $0xd48] ss:$16 sps:$4 sm:$0xff]  }
 0x1db   : > { %3917 = vmatprep.subr.bf16.mxu0 %v7097_v55  ;;  %4485 = vmatprep.subr.bf16.mxu1 %v7100_v58  ;;  %v343_v55 = vld [vmem:[%s7816_s30 + $0x1d8] sm:$0xff]  ;;  %v7175_v58 = vld [vmem:[#allocation7 + $0xc24] ss:$16 sps:$4 sm:$0xff]  }
 0x1dd   : > { %3891 = vmatmul.mubr.bf16.gmra.mrb[8].mxu0 %v436_v61  ;;  %4459 = vmatmul.mubr.bf16.gmra.mrb[8].mxu1 %v436_v61  ;;  %v7173_v61 = vld [vmem:[#allocation7 + $0xc20] ss:$16 sps:$4 sm:$0xff]  }
 0x1de   : > { %3918 = vmatpush1.bf16.msra.mxu0 %v7095_v59  ;;  %4486 = vmatpush1.bf16.msra.mxu1 %v7098_v60  ;;  %v7178_v59 = vld [vmem:[#allocation7 + $0xc2c] ss:$16 sps:$4 sm:$0xff]   ;;  %v423_v60 = vpack.c.bf16 %v343_v55, %v327_v54  ;;  %v7236_v54 = vld [vmem:[#allocation7 + $0xd68] ss:$16 sps:$4 sm:$0xff]   ;;  %v7241_v55 = vld [vmem:[#allocation7 + $0xd84] ss:$16 sps:$4 sm:$0xff]  }
 0x1df   : > { %3919 = vmatprep.subr.bf16.mxu0 %v7103_v63  ;;  %4487 = vmatprep.subr.bf16.mxu1 %v7106_v0  ;;  %v326_v63 = vld [vmem:[%s7816_s30 + $0x150] sm:$0xff] }
 0x1e0   : > { %3900 = vmatprep.mubr.bf16.mxu0 %v453_v2  ;;  %4468 = vmatprep.mubr.bf16.mxu1 %v453_v2  ;;  %v342_v0 = vld [vmem:[%s7816_s30 + $0x1d0] sm:$0xff]  ;;  %v7184_v2 = vld [vmem:[#allocation7 + $0xc4c] ss:$16 sps:$4 sm:$0xff]  }
 0x1e2   : > { %3920 = vmatpush1.bf16.msra.mxu0 %v7101_v1  ;;  %4488 = vmatpush1.bf16.msra.mxu1 %v7104_v3  ;;  %v7181_v1 = vld [vmem:[#allocation7 + $0xc44] ss:$16 sps:$4 sm:$0xff]   ;;  %v422_v3 = vpack.c.bf16 %v342_v0, %v326_v63  ;;  %v7256_v0 = vld [vmem:[#allocation7 + $0xdcc] ss:$16 sps:$4 sm:$0xff]  }
 0x1e3   : > { %3921 = vmatprep.subr.bf16.mxu0 %v7109_v4  ;;  %4489 = vmatprep.subr.bf16.mxu1 %v7112_v6  ;;  %v359_v4 = vld [vmem:[%s7816_s30 + $0x258] sm:$0xff]  ;;  %v7179_v6 = vld [vmem:[#allocation7 + $0xc40] ss:$16 sps:$4 sm:$0xff]   ;;  %v7253_v63 = vld [vmem:[#allocation7 + $0xdc4] ss:$16 sps:$4 sm:$0xff]  }
 0x1e4   : > { %v439_v10 = vpack.c.bf16 %v375_v5, %v359_v4  ;;  %v7262_v4 = vld [vmem:[#allocation7 + $0xdec] ss:$16 sps:$4 sm:$0xff]   ;;  %v7257_v5 = vld [vmem:[#allocation7 + $0xde0] ss:$16 sps:$4 sm:$0xff]  }
 0x1e5   : > { %3901 = vmatmul.mubr.bf16.gmra.mrb[12].mxu0 %v452_v9  ;;  %4469 = vmatmul.mubr.bf16.gmra.mrb[12].mxu1 %v452_v9  ;;  %v7190_v9 = vld [vmem:[#allocation7 + $0xc6c] ss:$16 sps:$4 sm:$0xff]  }
 0x1e6   : > { %3922 = vmatpush1.bf16.msra.mxu0 %v7107_v7  ;;  %4490 = vmatpush1.bf16.msra.mxu1 %v7110_v8  ;;  %v7182_v7 = vld [vmem:[#allocation7 + $0xc48] ss:$16 sps:$4 sm:$0xff]   ;;  %v7187_v8 = vld [vmem:[#allocation7 + $0xc64] ss:$16 sps:$4 sm:$0xff]  }
 0x1e7   : > { %3923 = vmatprep.subr.bf16.mxu0 %v7115_v12  ;;  %4491 = vmatprep.subr.bf16.mxu1 %v7118_v13  ;;  %v7188_v12 = vld [vmem:[#allocation7 + $0xc68] ss:$16 sps:$4 sm:$0xff]   ;;  %v358_v13 = vld [vmem:[%s7816_s30 + $0x250] sm:$0xff] }
 0x1e8   : > { %3941 = vmatprep.mubr.bf16.mxu0 %v407_v14  ;;  %4509 = vmatprep.mubr.bf16.mxu1 %v407_v14  ;;  %v374_v14 = vld [vmem:[%s7816_s30 + $0x2d0] sm:$0xff] }
 0x1ea   : > { %3924 = vmatpush1.bf16.msra.mxu0 %v7113_v15  ;;  %4492 = vmatpush1.bf16.msra.mxu1 %v7116_v16  ;;  %v7193_v15 = vld [vmem:[#allocation7 + $0xc84] ss:$16 sps:$4 sm:$0xff]   ;;  %v7196_v16 = vld [vmem:[#allocation7 + $0xc8c] ss:$16 sps:$4 sm:$0xff]  }
 0x1eb   : > { %3925 = vmatprep.subr.bf16.mxu0 %v7121_v17  ;;  %4493 = vmatprep.subr.bf16.mxu1 %v7124_v18  ;;  %v438_v17 = vpack.c.bf16 %v374_v14, %v358_v13  ;;  %v391_v18 = vld [vmem:[%s7816_s30 + $0x358] sm:$0xff]  ;;  %v345_v13 = vld [vmem:[%s7816_s30 + $0x1e8] sm:$0xff]  ;;  %v7263_v14 = vld [vmem:[#allocation7 + $0xe00] ss:$16 sps:$4 sm:$0xff]  }
 0x1ee   : > { %3926 = vmatpush1.bf16.msra.mxu0 %v7119_v19  ;;  %4494 = vmatpush1.bf16.msra.mxu1 %v7122_v20  ;;  %v7191_v19 = vld [vmem:[#allocation7 + $0xc80] ss:$16 sps:$4 sm:$0xff]   ;;  %v7194_v20 = vld [vmem:[#allocation7 + $0xc88] ss:$16 sps:$4 sm:$0xff]  }
 0x1ef   : > { %3927 = vmatprep.subr.bf16.mxu0 %v7127_v21  ;;  %4495 = vmatprep.subr.bf16.mxu1 %v7130_v22  ;;  %v7199_v21 = vld [vmem:[#allocation7 + $0xca4] ss:$16 sps:$4 sm:$0xff]   ;;  %v7202_v22 = vld [vmem:[#allocation7 + $0xcac] ss:$16 sps:$4 sm:$0xff]  }
 0x1f2   : > { %3928 = vmatpush1.bf16.msra.mxu0 %v7125_v23  ;;  %4496 = vmatpush1.bf16.msra.mxu1 %v7128_v24  ;;  %v455_v23 = vpack.c.bf16 %v391_v18, %v391_v18  ;;  %v7197_v24 = vld [vmem:[#allocation7 + $0xca0] ss:$16 sps:$4 sm:$0xff]  }
 0x1f3   : > { %3929 = vmatprep.subr.bf16.mxu0 %v7133_v25  ;;  %4497 = vmatprep.subr.bf16.mxu1 %v7136_v26  ;;  %v7200_v25 = vld [vmem:[#allocation7 + $0xca8] ss:$16 sps:$4 sm:$0xff]   ;;  %v390_v26 = vld [vmem:[%s7816_s30 + $0x350] sm:$0xff] }
 0x1f6   : > { %3930 = vmatpush1.bf16.msra.mxu0 %v7131_v27  ;;  %4498 = vmatpush1.bf16.msra.mxu1 %v7134_v28  ;;  %v7205_v27 = vld [vmem:[#allocation7 + $0xcc4] ss:$16 sps:$4 sm:$0xff]   ;;  %v7208_v28 = vld [vmem:[#allocation7 + $0xccc] ss:$16 sps:$4 sm:$0xff]  }
 0x1f7   : > { %3931 = vmatprep.subr.bf16.mxu0 %v7139_v29  ;;  %4499 = vmatprep.subr.bf16.mxu1 %v7142_v30  ;;  %v454_v29 = vpack.c.bf16 %v390_v26, %v390_v26  ;;  %v297_v30 = vld [vmem:[%s7816_s30 + $0x68] sm:$0xff] }
 0x1f8   : > { %v361_v26 = vld [vmem:[%s7816_s30 + $0x268] sm:$0xff] }
 0x1fa   : > { %3932 = vmatpush1.bf16.msra.mxu0 %v7137_v31  ;;  %4500 = vmatpush1.bf16.msra.mxu1 %v7140_v32  ;;  %v313_v31 = vld [vmem:[%s7816_s30 + $0xe8] sm:$0xff]  ;;  %v7203_v32 = vld [vmem:[#allocation7 + $0xcc0] ss:$16 sps:$4 sm:$0xff]  }
 0x1fb   : > { %3933 = vmatprep.subr.bf16.mxu0 %v7145_v33  ;;  %4501 = vmatprep.subr.bf16.mxu1 %v7148_v34  ;;  %v7206_v33 = vld [vmem:[#allocation7 + $0xcc8] ss:$16 sps:$4 sm:$0xff]   ;;  %v7211_v34 = vld [vmem:[#allocation7 + $0xce4] ss:$16 sps:$4 sm:$0xff]  }
 0x1fe   : > { %3934 = vmatpush1.bf16.msra.mxu0 %v7143_v35  ;;  %4502 = vmatpush1.bf16.msra.mxu1 %v7146_v36  ;;  %v7214_v35 = vld [vmem:[#allocation7 + $0xcec] ss:$16 sps:$4 sm:$0xff]   ;;  %v409_v36 = vpack.c.bf16 %v313_v31, %v297_v30  ;;  %v7283_v30 = vld [vmem:[#allocation7 + $0xe64] ss:$16 sps:$4 sm:$0xff]  }
 0x1ff   : > { %3935 = vmatprep.subr.bf16.mxu0 %v7151_v37  ;;  %4503 = vmatprep.subr.bf16.mxu1 %v7154_v38  ;;  %v7209_v37 = vld [vmem:[#allocation7 + $0xce0] ss:$16 sps:$4 sm:$0xff]   ;;  %v7212_v38 = vld [vmem:[#allocation7 + $0xce8] ss:$16 sps:$4 sm:$0xff]   ;;  %v7286_v31 = vld [vmem:[#allocation7 + $0xe6c] ss:$16 sps:$4 sm:$0xff]  }
 0x202   : > { %3936 = vmatpush1.bf16.msra.mxu0 %v7149_v39  ;;  %4504 = vmatpush1.bf16.msra.mxu1 %v7152_v40  ;;  %v7217_v39 = vld [vmem:[#allocation7 + $0xd04] ss:$16 sps:$4 sm:$0xff]   ;;  %v7220_v40 = vld [vmem:[#allocation7 + $0xd0c] ss:$16 sps:$4 sm:$0xff]  }
 0x203   : > { %3937 = vmatprep.subr.bf16.mxu0 %v7157_v41  ;;  %4505 = vmatprep.subr.bf16.mxu1 %v7160_v42  ;;  %v7215_v41 = vld [vmem:[#allocation7 + $0xd00] ss:$16 sps:$4 sm:$0xff]   ;;  %v7218_v42 = vld [vmem:[#allocation7 + $0xd08] ss:$16 sps:$4 sm:$0xff]  }
 0x206   : > { %3938 = vmatpush1.bf16.msra.mxu0 %v7155_v43  ;;  %4506 = vmatpush1.bf16.msra.mxu1 %v7158_v44  ;;  %v7223_v43 = vld [vmem:[#allocation7 + $0xd24] ss:$16 sps:$4 sm:$0xff]   ;;  %v7226_v44 = vld [vmem:[#allocation7 + $0xd2c] ss:$16 sps:$4 sm:$0xff]  }
 0x207   : > { %3939 = vmatprep.subr.bf16.mxu0 %v7163_v45  ;;  %4507 = vmatprep.subr.bf16.mxu1 %v7166_v46  ;;  %v7221_v45 = vld [vmem:[#allocation7 + $0xd20] ss:$16 sps:$4 sm:$0xff]   ;;  %v7224_v46 = vld [vmem:[#allocation7 + $0xd28] ss:$16 sps:$4 sm:$0xff]  }
 0x20a   : > { %3940 = vmatpush1.bf16.msra.mxu0 %v7161_v47  ;;  %4508 = vmatpush1.bf16.msra.mxu1 %v7164_v48  ;;  %v7229_v47 = vld [vmem:[#allocation7 + $0xd44] ss:$16 sps:$4 sm:$0xff]   ;;  %v7232_v48 = vld [vmem:[#allocation7 + $0xd4c] ss:$16 sps:$4 sm:$0xff]  }
 0x20b   : > { %3980 = vmatprep.subr.bf16.mxu0 %v7169_v51  ;;  %4548 = vmatprep.subr.bf16.mxu1 %v7172_v52  ;;  %v7235_v51 = vld [vmem:[#allocation7 + $0xd64] ss:$16 sps:$4 sm:$0xff]   ;;  %v7238_v52 = vld [vmem:[#allocation7 + $0xd6c] ss:$16 sps:$4 sm:$0xff]  }
 0x20d   : > { %3942 = vmatmul.mubr.bf16.vlgmr.msra.gmra.mrb[0].mxu0 %v406_v53  ;;  %4510 = vmatmul.mubr.bf16.vlgmr.msra.gmra.mrb[0].mxu1 %v406_v53  ;;  %v7233_v53 = vld [vmem:[#allocation7 + $0xd60] ss:$16 sps:$4 sm:$0xff]  }
 0x20e   : > { %3981 = vmatpush1.bf16.msra.mxu0 %v7167_v56  ;;  %4549 = vmatpush1.bf16.msra.mxu1 %v7170_v57  ;;  %v7244_v56 = vld [vmem:[#allocation7 + $0xd8c] ss:$16 sps:$4 sm:$0xff]   ;;  %v7239_v57 = vld [vmem:[#allocation7 + $0xd80] ss:$16 sps:$4 sm:$0xff]  }
 0x20f   : > { %3982 = vmatprep.subr.bf16.mxu0 %v7175_v58  ;;  %4550 = vmatprep.subr.bf16.mxu1 %v7178_v59  ;;  %v7242_v58 = vld [vmem:[#allocation7 + $0xd88] ss:$16 sps:$4 sm:$0xff]   ;;  %v7247_v59 = vld [vmem:[#allocation7 + $0xda4] ss:$16 sps:$4 sm:$0xff]  }
 0x210   : > { %3951 = vmatprep.mubr.bf16.mxu0 %v423_v60  ;;  %4519 = vmatprep.mubr.bf16.mxu1 %v423_v60  ;;  %v7250_v60 = vld [vmem:[#allocation7 + $0xdac] ss:$16 sps:$4 sm:$0xff]  }
 0x212   : > { %3983 = vmatpush1.bf16.msra.mxu0 %v7173_v61  ;;  %4551 = vmatpush1.bf16.msra.mxu1 %v7176_v62  ;;  %v7245_v61 = vld [vmem:[#allocation7 + $0xda0] ss:$16 sps:$4 sm:$0xff]   ;;  %v7248_v62 = vld [vmem:[#allocation7 + $0xda8] ss:$16 sps:$4 sm:$0xff]  }
 0x213   : > { %3984 = vmatprep.subr.bf16.mxu0 %v7181_v1  ;;  %4552 = vmatprep.subr.bf16.mxu1 %v7184_v2  ;;  %v7251_v1 = vld [vmem:[#allocation7 + $0xdc0] ss:$16 sps:$4 sm:$0xff]   ;;  %v7254_v2 = vld [vmem:[#allocation7 + $0xdc8] ss:$16 sps:$4 sm:$0xff]  }
 0x215   : > { %3952 = vmatmul.mubr.bf16.gmra.mrb[4].mxu0 %v422_v3  ;;  %4520 = vmatmul.mubr.bf16.gmra.mrb[4].mxu1 %v422_v3  ;;  %v7259_v3 = vld [vmem:[#allocation7 + $0xde4] ss:$16 sps:$4 sm:$0xff]  }
 0x216   : > { %3985 = vmatpush1.bf16.msra.mxu0 %v7179_v6  ;;  %4553 = vmatpush1.bf16.msra.mxu1 %v7182_v7  ;;  %v7260_v6 = vld [vmem:[#allocation7 + $0xde8] ss:$16 sps:$4 sm:$0xff]   ;;  %v296_v7 = vld [vmem:[%s7816_s30 + $0x60] sm:$0xff] }
 0x217   : > { %3986 = vmatprep.subr.bf16.mxu0 %v7187_v8  ;;  %4554 = vmatprep.subr.bf16.mxu1 %v7190_v9  ;;  %v312_v8 = vld [vmem:[%s7816_s30 + $0xe0] sm:$0xff] }
 0x218   : > { %3961 = vmatprep.mubr.bf16.mxu0 %v439_v10  ;;  %4529 = vmatprep.mubr.bf16.mxu1 %v439_v10  ;;  %v7265_v9 = vld [vmem:[#allocation7 + $0xe04] ss:$16 sps:$4 sm:$0xff]   ;;  %v7268_v10 = vld [vmem:[#allocation7 + $0xe0c] ss:$16 sps:$4 sm:$0xff]  }
 0x21a   : > { %3987 = vmatpush1.bf16.msra.mxu0 %v7185_v11  ;;  %4555 = vmatpush1.bf16.msra.mxu1 %v7188_v12  ;;  %v408_v11 = vpack.c.bf16 %v312_v8, %v296_v7  ;;  %v329_v12 = vld [vmem:[%s7816_s30 + $0x168] sm:$0xff]  ;;  %v7323_v7 = vld [vmem:[#allocation7 + $0xf40] ss:$16 sps:$4 sm:$0xff]  }
 0x21b   : > { %3988 = vmatprep.subr.bf16.mxu0 %v7193_v15  ;;  %4556 = vmatprep.subr.bf16.mxu1 %v7196_v16  ;;  %v7266_v15 = vld [vmem:[#allocation7 + $0xe08] ss:$16 sps:$4 sm:$0xff]   ;;  %v7271_v16 = vld [vmem:[#allocation7 + $0xe24] ss:$16 sps:$4 sm:$0xff]   ;;  %v425_v18 = vpack.c.bf16 %v345_v13, %v329_v12 }
 0x21c   : > { %v7326_v8 = vld [vmem:[#allocation7 + $0xf48] ss:$16 sps:$4 sm:$0xff]   ;;  %v7337_v13 = vld [vmem:[#allocation7 + $0xf84] ss:$16 sps:$4 sm:$0xff]  }
 0x21d   : > { %3962 = vmatmul.mubr.bf16.gmra.mrb[8].mxu0 %v438_v17  ;;  %4530 = vmatmul.mubr.bf16.gmra.mrb[8].mxu1 %v438_v17  ;;  %v7274_v17 = vld [vmem:[#allocation7 + $0xe2c] ss:$16 sps:$4 sm:$0xff]   ;;  %v7332_v12 = vld [vmem:[#allocation7 + $0xf68] ss:$16 sps:$4 sm:$0xff]  }
 0x21e   : > { %3989 = vmatpush1.bf16.msra.mxu0 %v7191_v19  ;;  %4557 = vmatpush1.bf16.msra.mxu1 %v7194_v20  ;;  %v7269_v19 = vld [vmem:[#allocation7 + $0xe20] ss:$16 sps:$4 sm:$0xff]   ;;  %v7272_v20 = vld [vmem:[#allocation7 + $0xe28] ss:$16 sps:$4 sm:$0xff]  }
 0x21f   : > { %3990 = vmatprep.subr.bf16.mxu0 %v7199_v21  ;;  %4558 = vmatprep.subr.bf16.mxu1 %v7202_v22  ;;  %v328_v21 = vld [vmem:[%s7816_s30 + $0x160] sm:$0xff] }
 0x220   : > { %3971 = vmatprep.mubr.bf16.mxu0 %v455_v23  ;;  %4539 = vmatprep.mubr.bf16.mxu1 %v455_v23  ;;  %v344_v22 = vld [vmem:[%s7816_s30 + $0x1e0] sm:$0xff] }
 0x221   : > { %v7277_v23 = vld [vmem:[#allocation7 + $0xe44] ss:$16 sps:$4 sm:$0xff]  }
 0x222   : > { %3991 = vmatpush1.bf16.msra.mxu0 %v7197_v24  ;;  %4559 = vmatpush1.bf16.msra.mxu1 %v7200_v25  ;;  %v7280_v24 = vld [vmem:[#allocation7 + $0xe4c] ss:$16 sps:$4 sm:$0xff]   ;;  %v424_v25 = vpack.c.bf16 %v344_v22, %v328_v21  ;;  %v7349_v21 = vld [vmem:[#allocation7 + $0xfc4] ss:$16 sps:$4 sm:$0xff]  }
 0x223   : > { %3992 = vmatprep.subr.bf16.mxu0 %v7205_v27  ;;  %4560 = vmatprep.subr.bf16.mxu1 %v7208_v28  ;;  %v377_v27 = vld [vmem:[%s7816_s30 + $0x2e8] sm:$0xff]  ;;  %v7275_v28 = vld [vmem:[#allocation7 + $0xe40] ss:$16 sps:$4 sm:$0xff]  }
 0x224   : > { %v7352_v22 = vld [vmem:[#allocation7 + $0xfcc] ss:$16 sps:$4 sm:$0xff]  }
 0x225   : > { %3972 = vmatmul.mubr.bf16.gmra.mrb[12].mxu0 %v454_v29  ;;  %4540 = vmatmul.mubr.bf16.gmra.mrb[12].mxu1 %v454_v29  ;;  %v7278_v29 = vld [vmem:[#allocation7 + $0xe48] ss:$16 sps:$4 sm:$0xff]  }
 0x226   : > { %3993 = vmatpush1.bf16.msra.mxu0 %v7203_v32  ;;  %4561 = vmatpush1.bf16.msra.mxu1 %v7206_v33  ;;  %v441_v32 = vpack.c.bf16 %v377_v27, %v361_v26  ;;  %v7281_v33 = vld [vmem:[#allocation7 + $0xe60] ss:$16 sps:$4 sm:$0xff]   ;;  %v7358_v26 = vld [vmem:[#allocation7 + $0xfec] ss:$16 sps:$4 sm:$0xff]  }
 0x227   : > { %3994 = vmatprep.subr.bf16.mxu0 %v7211_v34  ;;  %4562 = vmatprep.subr.bf16.mxu1 %v7214_v35  ;;  %v7284_v34 = vld [vmem:[#allocation7 + $0xe68] ss:$16 sps:$4 sm:$0xff]   ;;  %v360_v35 = vld [vmem:[%s7816_s30 + $0x260] sm:$0xff] }
 0x228   : > { %4012 = vmatprep.mubr.bf16.mxu0 %v409_v36  ;;  %4580 = vmatprep.mubr.bf16.mxu1 %v409_v36  ;;  %v376_v36 = vld [vmem:[%s7816_s30 + $0x2e0] sm:$0xff] }
 0x229   : > { %v7353_v27 = vld [vmem:[#allocation7 + $0xfe0] ss:$16 sps:$4 sm:$0xff]  }
 0x22a   : > { %3995 = vmatpush1.bf16.msra.mxu0 %v7209_v37  ;;  %4563 = vmatpush1.bf16.msra.mxu1 %v7212_v38  ;;  %v7289_v37 = vld [vmem:[#allocation7 + $0xe84] ss:$16 sps:$4 sm:$0xff]   ;;  %v7292_v38 = vld [vmem:[#allocation7 + $0xe8c] ss:$16 sps:$4 sm:$0xff]  }
 0x22b   : > { %3996 = vmatprep.subr.bf16.mxu0 %v7217_v39  ;;  %4564 = vmatprep.subr.bf16.mxu1 %v7220_v40  ;;  %v440_v39 = vpack.c.bf16 %v376_v36, %v360_v35  ;;  %v393_v40 = vld [vmem:[%s7816_s30 + $0x368] sm:$0xff]  ;;  %v7953_v35 = vld [vmem:[%s7816_s30 + $0x170] sm:$0xff] }
 0x22c   : > { %v7956_v36 = vld [vmem:[%s7816_s30 + $0x1f0] sm:$0xff] }
 0x22e   : > { %3997 = vmatpush1.bf16.msra.mxu0 %v7215_v41  ;;  %4565 = vmatpush1.bf16.msra.mxu1 %v7218_v42  ;;  %v7287_v41 = vld [vmem:[#allocation7 + $0xe80] ss:$16 sps:$4 sm:$0xff]   ;;  %v7290_v42 = vld [vmem:[#allocation7 + $0xe88] ss:$16 sps:$4 sm:$0xff]  }
 0x22f   : > { %3998 = vmatprep.subr.bf16.mxu0 %v7223_v43  ;;  %4566 = vmatprep.subr.bf16.mxu1 %v7226_v44  ;;  %v7295_v43 = vld [vmem:[#allocation7 + $0xea4] ss:$16 sps:$4 sm:$0xff]   ;;  %v7298_v44 = vld [vmem:[#allocation7 + $0xeac] ss:$16 sps:$4 sm:$0xff]  }
 0x232   : > { %3999 = vmatpush1.bf16.msra.mxu0 %v7221_v45  ;;  %4567 = vmatpush1.bf16.msra.mxu1 %v7224_v46  ;;  %v457_v45 = vpack.c.bf16 %v393_v40, %v393_v40  ;;  %v7293_v46 = vld [vmem:[#allocation7 + $0xea0] ss:$16 sps:$4 sm:$0xff]  }
 0x233   : > { %4000 = vmatprep.subr.bf16.mxu0 %v7229_v47  ;;  %4568 = vmatprep.subr.bf16.mxu1 %v7232_v48  ;;  %v7296_v47 = vld [vmem:[#allocation7 + $0xea8] ss:$16 sps:$4 sm:$0xff]   ;;  %v392_v48 = vld [vmem:[%s7816_s30 + $0x360] sm:$0xff] }
 0x236   : > { %4001 = vmatpush1.bf16.msra.mxu0 %v7227_v49  ;;  %4569 = vmatpush1.bf16.msra.mxu1 %v7230_v50  ;;  %v7301_v49 = vld [vmem:[#allocation7 + $0xec4] ss:$16 sps:$4 sm:$0xff]   ;;  %v7304_v50 = vld [vmem:[#allocation7 + $0xecc] ss:$16 sps:$4 sm:$0xff]  }
 0x237   : > { %4002 = vmatprep.subr.bf16.mxu0 %v7235_v51  ;;  %4570 = vmatprep.subr.bf16.mxu1 %v7238_v52  ;;  %v456_v51 = vpack.c.bf16 %v392_v48, %v392_v48  ;;  %v7929_v52 = vld [vmem:[%s7816_s30 + $0x78] sm:$0xff]  ;;  %v974_v48 = vlaneseq }
 0x23a   : > { %4003 = vmatpush1.bf16.msra.mxu0 %v7233_v53  ;;  %4571 = vmatpush1.bf16.msra.mxu1 %v7236_v54  ;;  %v7932_v53 = vld [vmem:[%s7816_s30 + $0xf8] sm:$0xff]  ;;  %v7299_v54 = vld [vmem:[#allocation7 + $0xec0] ss:$16 sps:$4 sm:$0xff]  }
 0x23b   : > { %4004 = vmatprep.subr.bf16.mxu0 %v7241_v55  ;;  %4572 = vmatprep.subr.bf16.mxu1 %v7244_v56  ;;  %v7302_v55 = vld [vmem:[#allocation7 + $0xec8] ss:$16 sps:$4 sm:$0xff]   ;;  %v7307_v56 = vld [vmem:[#allocation7 + $0xee4] ss:$16 sps:$4 sm:$0xff]  }
 0x23e   : > { %4005 = vmatpush1.bf16.msra.mxu0 %v7239_v57  ;;  %4573 = vmatpush1.bf16.msra.mxu1 %v7242_v58  ;;  %v7310_v57 = vld [vmem:[#allocation7 + $0xeec] ss:$16 sps:$4 sm:$0xff]   ;;  %v411_v58 = vpack.c.bf16 %v7932_v53, %v7929_v52 }
 0x23f   : > { %4006 = vmatprep.subr.bf16.mxu0 %v7247_v59  ;;  %4574 = vmatprep.subr.bf16.mxu1 %v7250_v60  ;;  %v7305_v59 = vld [vmem:[#allocation7 + $0xee0] ss:$16 sps:$4 sm:$0xff]   ;;  %v7308_v60 = vld [vmem:[#allocation7 + $0xee8] ss:$16 sps:$4 sm:$0xff]  }
 0x242   : > { %4007 = vmatpush1.bf16.msra.mxu0 %v7245_v61  ;;  %4575 = vmatpush1.bf16.msra.mxu1 %v7248_v62  ;;  %v7313_v61 = vld [vmem:[#allocation7 + $0xf04] ss:$16 sps:$4 sm:$0xff]   ;;  %v7316_v62 = vld [vmem:[#allocation7 + $0xf0c] ss:$16 sps:$4 sm:$0xff]  }
 0x243   : > { %4008 = vmatprep.subr.bf16.mxu0 %v7253_v63  ;;  %4576 = vmatprep.subr.bf16.mxu1 %v7256_v0  ;;  %v7311_v63 = vld [vmem:[#allocation7 + $0xf00] ss:$16 sps:$4 sm:$0xff]   ;;  %v7314_v0 = vld [vmem:[#allocation7 + $0xf08] ss:$16 sps:$4 sm:$0xff]  }
 0x246   : > { %4009 = vmatpush1.bf16.msra.mxu0 %v7251_v1  ;;  %4577 = vmatpush1.bf16.msra.mxu1 %v7254_v2  ;;  %v7319_v1 = vld [vmem:[#allocation7 + $0xf24] ss:$16 sps:$4 sm:$0xff]   ;;  %v7322_v2 = vld [vmem:[#allocation7 + $0xf2c] ss:$16 sps:$4 sm:$0xff]  }
 0x247   : > { %4010 = vmatprep.subr.bf16.mxu0 %v7259_v3  ;;  %4578 = vmatprep.subr.bf16.mxu1 %v7262_v4  ;;  %v7317_v3 = vld [vmem:[#allocation7 + $0xf20] ss:$16 sps:$4 sm:$0xff]   ;;  %v7320_v4 = vld [vmem:[#allocation7 + $0xf28] ss:$16 sps:$4 sm:$0xff]  }
 0x24a   : > { %4011 = vmatpush1.bf16.msra.mxu0 %v7257_v5  ;;  %4579 = vmatpush1.bf16.msra.mxu1 %v7260_v6  ;;  %v7325_v5 = vld [vmem:[#allocation7 + $0xf44] ss:$16 sps:$4 sm:$0xff]   ;;  %v7328_v6 = vld [vmem:[#allocation7 + $0xf4c] ss:$16 sps:$4 sm:$0xff]  }
 0x24b   : > { %4051 = vmatprep.subr.bf16.mxu0 %v7265_v9  ;;  %4619 = vmatprep.subr.bf16.mxu1 %v7268_v10  ;;  %v7331_v9 = vld [vmem:[#allocation7 + $0xf64] ss:$16 sps:$4 sm:$0xff]   ;;  %v7334_v10 = vld [vmem:[#allocation7 + $0xf6c] ss:$16 sps:$4 sm:$0xff]  }
 0x24d   : > { %4013 = vmatmul.mubr.bf16.vlgmr.msra.gmra.mrb[0].mxu0 %v408_v11  ;;  %4581 = vmatmul.mubr.bf16.vlgmr.msra.gmra.mrb[0].mxu1 %v408_v11  ;;  %v7329_v11 = vld [vmem:[#allocation7 + $0xf60] ss:$16 sps:$4 sm:$0xff]  }
 0x24e   : > { %4052 = vmatpush1.bf16.msra.mxu0 %v7263_v14  ;;  %4620 = vmatpush1.bf16.msra.mxu1 %v7266_v15  ;;  %v7340_v14 = vld [vmem:[#allocation7 + $0xf8c] ss:$16 sps:$4 sm:$0xff]   ;;  %v7335_v15 = vld [vmem:[#allocation7 + $0xf80] ss:$16 sps:$4 sm:$0xff]  }
 0x24f   : > { %4053 = vmatprep.subr.bf16.mxu0 %v7271_v16  ;;  %4621 = vmatprep.subr.bf16.mxu1 %v7274_v17  ;;  %v7338_v16 = vld [vmem:[#allocation7 + $0xf88] ss:$16 sps:$4 sm:$0xff]   ;;  %v7343_v17 = vld [vmem:[#allocation7 + $0xfa4] ss:$16 sps:$4 sm:$0xff]  }
 0x250   : > { %4022 = vmatprep.mubr.bf16.mxu0 %v425_v18  ;;  %4590 = vmatprep.mubr.bf16.mxu1 %v425_v18  ;;  %v7346_v18 = vld [vmem:[#allocation7 + $0xfac] ss:$16 sps:$4 sm:$0xff]  }
 0x252   : > { %4054 = vmatpush1.bf16.msra.mxu0 %v7269_v19  ;;  %4622 = vmatpush1.bf16.msra.mxu1 %v7272_v20  ;;  %v7341_v19 = vld [vmem:[#allocation7 + $0xfa0] ss:$16 sps:$4 sm:$0xff]   ;;  %v7344_v20 = vld [vmem:[#allocation7 + $0xfa8] ss:$16 sps:$4 sm:$0xff]  }
 0x253   : > { %4055 = vmatprep.subr.bf16.mxu0 %v7277_v23  ;;  %4623 = vmatprep.subr.bf16.mxu1 %v7280_v24  ;;  %v7347_v23 = vld [vmem:[#allocation7 + $0xfc0] ss:$16 sps:$4 sm:$0xff]   ;;  %v7350_v24 = vld [vmem:[#allocation7 + $0xfc8] ss:$16 sps:$4 sm:$0xff]  }
 0x255   : > { %4023 = vmatmul.mubr.bf16.gmra.mrb[4].mxu0 %v424_v25  ;;  %4591 = vmatmul.mubr.bf16.gmra.mrb[4].mxu1 %v424_v25  ;;  %v7355_v25 = vld [vmem:[#allocation7 + $0xfe4] ss:$16 sps:$4 sm:$0xff]  }
 0x256   : > { %4056 = vmatpush1.bf16.msra.mxu0 %v7275_v28  ;;  %4624 = vmatpush1.bf16.msra.mxu1 %v7278_v29  ;;  %v7356_v28 = vld [vmem:[#allocation7 + $0xfe8] ss:$16 sps:$4 sm:$0xff]   ;;  %v7937_v29 = vld [vmem:[%s7816_s30 + $0x70] sm:$0xff] }
 0x257   : > { %4057 = vmatprep.subr.bf16.mxu0 %v7283_v30  ;;  %4625 = vmatprep.subr.bf16.mxu1 %v7286_v31  ;;  %v7940_v30 = vld [vmem:[%s7816_s30 + $0xf0] sm:$0xff]  ;;  %v7943_v31 = vld [vmem:[%s7816_s30 + $0x178] sm:$0xff] }
 0x258   : > { %4032 = vmatprep.mubr.bf16.mxu0 %v441_v32  ;;  %4600 = vmatprep.mubr.bf16.mxu1 %v441_v32  ;;  %v7946_v32 = vld [vmem:[%s7816_s30 + $0x1f8] sm:$0xff] }
 0x25a   : > { %4058 = vmatpush1.bf16.msra.mxu0 %v7281_v33  ;;  %4626 = vmatpush1.bf16.msra.mxu1 %v7284_v34  ;;  %v410_v33 = vpack.c.bf16 %v7940_v30, %v7937_v29  ;;  %v427_v34 = vpack.c.bf16 %v7946_v32, %v7943_v31 }
 0x25b   : > { %4059 = vmatprep.subr.bf16.mxu0 %v7289_v37  ;;  %4627 = vmatprep.subr.bf16.mxu1 %v7292_v38  ;;  %v7959_v37 = vld [vmem:[%s7816_s30 + $0x278] sm:$0xff] }
 0x25c   : > { %v7962_v38 = vld [vmem:[%s7816_s30 + $0x2f8] sm:$0xff] }
 0x25d   : > { %4033 = vmatmul.mubr.bf16.gmra.mrb[8].mxu0 %v440_v39  ;;  %4601 = vmatmul.mubr.bf16.gmra.mrb[8].mxu1 %v440_v39  ;;  %v426_v39 = vpack.c.bf16 %v7956_v36, %v7953_v35  ;;  %v443_v40 = vpack.c.bf16 %v7962_v38, %v7959_v37 }
 0x25e   : > { %4060 = vmatpush1.bf16.msra.mxu0 %v7287_v41  ;;  %4628 = vmatpush1.bf16.msra.mxu1 %v7290_v42  ;;  %v7969_v41 = vld [vmem:[%s7816_s30 + $0x270] sm:$0xff] }
 0x25f   : > { %4061 = vmatprep.subr.bf16.mxu0 %v7295_v43  ;;  %4629 = vmatprep.subr.bf16.mxu1 %v7298_v44  ;;  %v7972_v42 = vld [vmem:[%s7816_s30 + $0x2f0] sm:$0xff]  ;;  %v7975_v43 = vld [vmem:[%s7816_s30 + $0x378] sm:$0xff] }
 0x260   : > { %4042 = vmatprep.mubr.bf16.mxu0 %v457_v45  ;;  %4610 = vmatprep.mubr.bf16.mxu1 %v457_v45  ;;  %v442_v44 = vpack.c.bf16 %v7972_v42, %v7969_v41  ;;  %v459_v45 = vpack.c.bf16 %v7975_v43, %v7975_v43 }
 0x262   : > { %4062 = vmatpush1.bf16.msra.mxu0 %v7293_v46  ;;  %4630 = vmatpush1.bf16.msra.mxu1 %v7296_v47  ;;  %v7982_v46 = vld [vmem:[%s7816_s30 + $0x370] sm:$0xff] }
 0x263   : > { %4063 = vmatprep.subr.bf16.mxu0 %v7301_v49  ;;  %4631 = vmatprep.subr.bf16.mxu1 %v7304_v50  ;;  %v458_v47 = vpack.c.bf16 %v7982_v46, %v7982_v46  ;;  %v7986_v49 = vshrl.u32 %v974_v48, 7 }
 0x265   : > { %4043 = vmatmul.mubr.bf16.gmra.mrb[12].mxu0 %v456_v51  ;;  %4611 = vmatmul.mubr.bf16.gmra.mrb[12].mxu1 %v456_v51  ;;  %v976_v50 = vsub.s32 0, %v7986_v49  ;;  %v984_v51 = vsub.s32 2, %v7986_v49 }
 0x266   : > { %4064 = vmatpush1.bf16.msra.mxu0 %v7299_v54  ;;  %4632 = vmatpush1.bf16.msra.mxu1 %v7302_v55  ;;  %v972_v54 = vld [vmem:[#allocation9] sm:$0xf]  ;;  %v980_v55 = vsub.s32 1, %v7986_v49 }
 0x267   : > { %4065 = vmatprep.subr.bf16.mxu0 %v7307_v56  ;;  %4633 = vmatprep.subr.bf16.mxu1 %v7310_v57  ;;  %v988_v56 = vsub.s32 3, %v7986_v49  ;;  %v7992_v57 = vrot.slane %v972_v54, %v976_v50 }
 0x268   : > { %4083 = vmatprep.mubr.bf16.mxu0 %v411_v58  ;;  %4651 = vmatprep.mubr.bf16.mxu1 %v411_v58  ;;  %v7994_v58 = vrot.slane %v972_v54, %v984_v51 }
 0x26a   : > { %4066 = vmatpush1.bf16.msra.mxu0 %v7305_v59  ;;  %4634 = vmatpush1.bf16.msra.mxu1 %v7308_v60  ;;  %v4718_v59 = vld [vmem:[#allocation10] sm:$0xf]  ;;  %v7996_v60 = vrot.slane %v972_v54, %v980_v55 }
 0x26b   : > { %4067 = vmatprep.subr.bf16.mxu0 %v7313_v61  ;;  %4635 = vmatprep.subr.bf16.mxu1 %v7316_v62  ;;  %v7998_v61 = vrot.slane %v972_v54, %v988_v56 }
 0x26e   : > { %4068 = vmatpush1.bf16.msra.mxu0 %v7311_v63  ;;  %4636 = vmatpush1.bf16.msra.mxu1 %v7314_v0 }
 0x26f   : > { %4069 = vmatprep.subr.bf16.mxu0 %v7319_v1  ;;  %4637 = vmatprep.subr.bf16.mxu1 %v7322_v2  ;;  %v8001_v1 = vrot.slane %v4718_v59, %v976_v50 }
 0x272   : > { %4070 = vmatpush1.bf16.msra.mxu0 %v7317_v3  ;;  %4638 = vmatpush1.bf16.msra.mxu1 %v7320_v4 }
 0x273   : > { %4071 = vmatprep.subr.bf16.mxu0 %v7325_v5  ;;  %4639 = vmatprep.subr.bf16.mxu1 %v7328_v6  ;;  %v8005_v6 = vrot.slane %v4718_v59, %v980_v55 }
 0x276   : > { %4072 = vmatpush1.bf16.msra.mxu0 %v7323_v7  ;;  %4640 = vmatpush1.bf16.msra.mxu1 %v7326_v8 }
 0x277   : > { %4073 = vmatprep.subr.bf16.mxu0 %v7331_v9  ;;  %4641 = vmatprep.subr.bf16.mxu1 %v7334_v10 }
 0x27a   : > { %4074 = vmatpush1.bf16.msra.mxu0 %v7329_v11  ;;  %4642 = vmatpush1.bf16.msra.mxu1 %v7332_v12 }
 0x27b   : > { %4075 = vmatprep.subr.bf16.mxu0 %v7337_v13  ;;  %4643 = vmatprep.subr.bf16.mxu1 %v7340_v14 }
 0x27e   : > { %4076 = vmatpush1.bf16.msra.mxu0 %v7335_v15  ;;  %4644 = vmatpush1.bf16.msra.mxu1 %v7338_v16  ;;  %v8009_v15 = vrot.slane %v4718_v59, %v984_v51 }
 0x27f   : > { %4077 = vmatprep.subr.bf16.mxu0 %v7343_v17  ;;  %4645 = vmatprep.subr.bf16.mxu1 %v7346_v18 }
 0x282   : > { %4078 = vmatpush1.bf16.msra.mxu0 %v7341_v19  ;;  %4646 = vmatpush1.bf16.msra.mxu1 %v7344_v20 }
 0x283   : > { %4079 = vmatprep.subr.bf16.mxu0 %v7349_v21  ;;  %4647 = vmatprep.subr.bf16.mxu1 %v7352_v22 }
 0x286   : > { %4080 = vmatpush1.bf16.msra.mxu0 %v7347_v23  ;;  %4648 = vmatpush1.bf16.msra.mxu1 %v7350_v24 }
 0x287   : > { %4081 = vmatprep.subr.bf16.mxu0 %v7355_v25  ;;  %4649 = vmatprep.subr.bf16.mxu1 %v7358_v26  ;;  %v8017_v26 = vrot.slane %v4718_v59, %v988_v56 }
 0x28a   : > { %4082 = vmatpush1.bf16.msra.mxu0 %v7353_v27  ;;  %4650 = vmatpush1.bf16.msra.mxu1 %v7356_v28 }
 0x28d   : > { %4084 = vmatmul.mubr.bf16.vlgmr.msra.gmra.mrb[0].mxu0 %v410_v33  ;;  %4652 = vmatmul.mubr.bf16.vlgmr.msra.gmra.mrb[0].mxu1 %v410_v33 }
 0x28e   : > { %4093 = vmatprep.mubr.bf16.mxu0 %v427_v34  ;;  %4661 = vmatprep.mubr.bf16.mxu1 %v427_v34 }
 0x295   : > { %4094 = vmatmul.mubr.bf16.gmra.mrb[4].mxu0 %v426_v39  ;;  %4662 = vmatmul.mubr.bf16.gmra.mrb[4].mxu1 %v426_v39 }
 0x296   : > { %4103 = vmatprep.mubr.bf16.mxu0 %v443_v40  ;;  %4671 = vmatprep.mubr.bf16.mxu1 %v443_v40 }
 0x29d   : > { %4104 = vmatmul.mubr.bf16.gmra.mrb[8].mxu0 %v442_v44  ;;  %4672 = vmatmul.mubr.bf16.gmra.mrb[8].mxu1 %v442_v44 }
 0x29e   : > { %4113 = vmatprep.mubr.bf16.mxu0 %v459_v45  ;;  %4681 = vmatprep.mubr.bf16.mxu1 %v459_v45 }
 0x2a5   : > { %4114 = vmatmul.mubr.bf16.gmra.mrb[12].mxu0 %v458_v47  ;;  %4682 = vmatmul.mubr.bf16.gmra.mrb[12].mxu1 %v458_v47 }
 0x360   : > { %v4085_v62 = vpop.f32.mrb[0].mxu0  ;;  %v4653_v63 = vpop.f32.mrb[0].mxu1 }
 0x361   : > { %v6251_v0 = vadd.f32 %v4085_v62, %v7992_v57  ;;  %v6265_v2 = vadd.f32 %v4653_v63, %v7994_v58  ;;  %v4087_v3 = vpop.f32.mrb[1].mxu0  ;;  %v4655_v4 = vpop.f32.mrb[1].mxu1 }
 0x362   : > { %v6252_v5 = vadd.f32 %v4087_v3, %v7996_v60  ;;  %v4089_v7 = vpop.f32.mrb[2].mxu0  ;;  %v4657_v8 = vpop.f32.mrb[2].mxu1  ;;  %v6266_v10 = vadd.f32 %v4655_v4, %v7998_v61 }
 0x363   : > { %v4690_v9 = vmax.f32 %v6251_v0, 0.0  ;;  %v6253_v11 = vadd.f32 %v4089_v7, %v7992_v57  ;;  %v4091_v12 = vpop.f32.mrb[3].mxu0  ;;  %v4659_v13 = vpop.f32.mrb[3].mxu1  ;;  %v4692_v14 = vmax.f32 %v6265_v2, 0.0  ;;  %v6267_v20 = vadd.f32 %v4657_v8, %v7994_v58 }
 0x364   : > { %v4691_v16 = vmax.f32 %v6252_v5, 0.0  ;;  %v6254_v17 = vadd.f32 %v4091_v12, %v7996_v60  ;;  %v6268_v21 = vadd.f32 %v4659_v13, %v7998_v61  ;;  %v4693_v24 = vmax.f32 %v6266_v10, 0.0 }
 0x365   : > { %v4740_v18 = vmul.f32 %v8001_v1, %v4690_v9  ;;  %v4694_v19 = vmax.f32 %v6253_v11, 0.0  ;;  %v4742_v27 = vmul.f32 %v8009_v15, %v4692_v14  ;;  %v4696_v40 = vmax.f32 %v6267_v20, 0.0 }
 0x366   : > { %v4741_v22 = vmul.f32 %v8005_v6, %v4691_v16  ;;  %v4695_v23 = vmax.f32 %v6254_v17, 0.0  ;;  %v4697_v44 = vmax.f32 %v6268_v21, 0.0  ;;  %v4743_v5 = vmul.f32 %v8017_v26, %v4693_v24 }
 0x367   : > { %v4744_v25 = vmul.f32 %v8001_v1, %v4694_v19  ;;  %v4746_v11 = vmul.f32 %v8009_v15, %v4696_v40 }
 0x368   : > { %v4745_v28 = vmul.f32 %v8005_v6, %v4695_v23  ;;  %v4095_v33 = vpop.f32.mrb[4].mxu0  ;;  %v4663_v34 = vpop.f32.mrb[4].mxu1  ;;  %v4768_v39 = vadd.f32 %v4741_v22, %v4740_v18  ;;  %v4747_v18 = vmul.f32 %v8017_v26, %v4697_v44 }
 0x369   : > { %v6255_v45 = vadd.f32 %v4095_v33, %v7992_v57  ;;  %v6269_v47 = vadd.f32 %v4663_v34, %v7994_v58  ;;  %v4097_v48 = vpop.f32.mrb[5].mxu0  ;;  %v4665_v50 = vpop.f32.mrb[5].mxu1 }
 0x36a   : > { %v6256_v51 = vadd.f32 %v4097_v48, %v7996_v60  ;;  %v6270_v54 = vadd.f32 %v4665_v50, %v7998_v61  ;;  %v4099_v55 = vpop.f32.mrb[6].mxu0  ;;  %v4667_v56 = vpop.f32.mrb[6].mxu1  ;;  %v4769_v59 = vadd.f32 %v4768_v39, %v4742_v27  ;;  %v4773_v62 = vadd.f32 %v4745_v28, %v4744_v25 }
 0x36b   : > { %v4698_v63 = vmax.f32 %v6255_v45, 0.0  ;;  %v4700_v0 = vmax.f32 %v6269_v47, 0.0  ;;  %v6257_v2 = vadd.f32 %v4099_v55, %v7992_v57  ;;  %v4101_v3 = vpop.f32.mrb[7].mxu0  ;;  %v4669_v4 = vpop.f32.mrb[7].mxu1  ;;  %v6271_v9 = vadd.f32 %v4667_v56, %v7994_v58 }
 0x36c   : > { %v4699_v7 = vmax.f32 %v6256_v51, 0.0  ;;  %v4701_v8 = vmax.f32 %v6270_v54, 0.0  ;;  %v6258_v10 = vadd.f32 %v4101_v3, %v7996_v60  ;;  %v6272_v14 = vadd.f32 %v4669_v4, %v7998_v61 }
 0x36d   : > { %v4748_v12 = vmul.f32 %v8001_v1, %v4698_v63  ;;  %v4702_v13 = vmax.f32 %v6257_v2, 0.0  ;;  %v4750_v19 = vmul.f32 %v8009_v15, %v4700_v0  ;;  %v4770_v21 = vadd.f32 %v4769_v59, %v4743_v5 }
 0x36e   : > { %v4749_v16 = vmul.f32 %v8005_v6, %v4699_v7  ;;  %v4703_v17 = vmax.f32 %v6258_v10, 0.0  ;;  %v4774_v22 = vadd.f32 %v4773_v62, %v4746_v11  ;;  %v4751_v24 = vmul.f32 %v8017_v26, %v4701_v8 }
 0x36f   : > { %v4752_v20 = vmul.f32 %v8001_v1, %v4702_v13  ;;  %v4704_v25 = vmax.f32 %v6271_v9, 0.0  ;;  %v4705_v34 = vmax.f32 %v6272_v14, 0.0  ;;  %4771 = vadd.xlane.f32.xlu0 %v4770_v21 }
 0x370   : > { %v4778_v23 = vadd.f32 %v4749_v16, %v4748_v12  ;;  %v4753_v27 = vmul.f32 %v8005_v6, %v4703_v17  ;;  %v4105_v28 = vpop.f32.mrb[8].mxu0  ;;  %v4673_v33 = vpop.f32.mrb[8].mxu1  ;;  %v4775_v44 = vadd.f32 %v4774_v22, %v4747_v18 }
 0x371   : > { %v6259_v39 = vadd.f32 %v4105_v28, %v7992_v57  ;;  %v6273_v40 = vadd.f32 %v4673_v33, %v7994_v58  ;;  %v4107_v45 = vpop.f32.mrb[9].mxu0  ;;  %v4675_v47 = vpop.f32.mrb[9].mxu1  ;;  %v4754_v9 = vmul.f32 %v8009_v15, %v4704_v25  ;;  %v4755_v13 = vmul.f32 %v8017_v26, %v4705_v34 }
 0x372   : > { %v4783_v48 = vadd.f32 %v4753_v27, %v4752_v20  ;;  %v6260_v50 = vadd.f32 %v4107_v45, %v7996_v60  ;;  %v6274_v51 = vadd.f32 %v4675_v47, %v7998_v61  ;;  %v4109_v54 = vpop.f32.mrb[10].mxu0  ;;  %v4677_v55 = vpop.f32.mrb[10].mxu1  ;;  %v4779_v56 = vadd.f32 %v4778_v23, %v4750_v19  ;;  %4776 = vadd.xlane.f32.xlu1 %v4775_v44 }
 0x373   : > { %v4706_v59 = vmax.f32 %v6259_v39, 0.0  ;;  %v4708_v62 = vmax.f32 %v6273_v40, 0.0  ;;  %v6261_v63 = vadd.f32 %v4109_v54, %v7992_v57  ;;  %v6275_v0 = vadd.f32 %v4677_v55, %v7994_v58  ;;  %v4111_v2 = vpop.f32.mrb[11].mxu0  ;;  %v4679_v3 = vpop.f32.mrb[11].mxu1 }
 0x374   : > { %v4707_v4 = vmax.f32 %v6260_v50, 0.0  ;;  %v4709_v5 = vmax.f32 %v6274_v51, 0.0  ;;  %v6262_v7 = vadd.f32 %v4111_v2, %v7996_v60  ;;  %v6276_v8 = vadd.f32 %v4679_v3, %v7998_v61 }
 0x375   : > { %v4756_v10 = vmul.f32 %v8001_v1, %v4706_v59  ;;  %v4710_v11 = vmax.f32 %v6261_v63, 0.0  ;;  %v4712_v12 = vmax.f32 %v6275_v0, 0.0  ;;  %v4780_v19 = vadd.f32 %v4779_v56, %v4751_v24 }
 0x376   : > { %v4757_v14 = vmul.f32 %v8005_v6, %v4707_v4  ;;  %v4711_v16 = vmax.f32 %v6262_v7, 0.0  ;;  %v4713_v18 = vmax.f32 %v6276_v8, 0.0  ;;  %v4784_v20 = vadd.f32 %v4783_v48, %v4754_v9 }
 0x377   : > { %v4760_v17 = vmul.f32 %v8001_v1, %v4710_v11  ;;  %v4758_v21 = vmul.f32 %v8009_v15, %v4708_v62  ;;  %v4759_v23 = vmul.f32 %v8017_v26, %v4709_v5  ;;  %v4762_v33 = vmul.f32 %v8009_v15, %v4712_v12  ;;  %4781 = vadd.xlane.f32.xlu1 %v4780_v19 }
 0x378   : > { %v4788_v22 = vadd.f32 %v4757_v14, %v4756_v10  ;;  %v4761_v25 = vmul.f32 %v8005_v6, %v4711_v16  ;;  %v4115_v27 = vpop.f32.mrb[12].mxu0  ;;  %v4683_v28 = vpop.f32.mrb[12].mxu1  ;;  %v4785_v24 = vadd.f32 %v4784_v20, %v4755_v13  ;;  %v4763_v55 = vmul.f32 %v8017_v26, %v4713_v18 }
 0x379   : > { %v6263_v34 = vadd.f32 %v4115_v27, %v7992_v57  ;;  %v6277_v39 = vadd.f32 %v4683_v28, %v7994_v58  ;;  %v4117_v40 = vpop.f32.mrb[13].mxu0  ;;  %v4685_v44 = vpop.f32.mrb[13].mxu1  ;;  %v7583_v10 = vmov 0   ;;  %v8065_v12 = vadd.s32 48, %v7986_v49 }
 0x37a   : > { %v4793_v45 = vadd.f32 %v4761_v25, %v4760_v17  ;;  %v6264_v47 = vadd.f32 %v4117_v40, %v7996_v60  ;;  %v6278_v48 = vadd.f32 %v4685_v44, %v7998_v61  ;;  %v4119_v50 = vpop.f32.mrb[14].mxu0  ;;  %v4687_v51 = vpop.f32.mrb[14].mxu1  ;;  %v4789_v54 = vadd.f32 %v4788_v22, %v4758_v21  ;;  %6590 = vset.pattern.permute.xlu0 %v7583_v10 }
 0x37b   : > { %v4714_v56 = vmax.f32 %v6263_v34, 0.0  ;;  %v4120_v59 = vpop.f32.mrb[15].mxu0  ;;  %v4688_v62 = vpop.f32.mrb[15].mxu1  ;;  %v4716_v63 = vmax.f32 %v6277_v39, 0.0  ;;  %6589 = vset.pattern.permute.xlu1 %v7583_v10  ;;  %v4804_v14 = vstv %s4803_s25  ;;  %vm4826_vm0 = vcmp.lt.s32.totalorder %v8065_v12, 49 }
 0x37c   : > { %v4715_v57 = vmax.f32 %v6264_v47, 0.0  ;;  %v4790_v0 = vadd.f32 %v4789_v54, %v4759_v23  ;;  %v4794_v58 = vadd.f32 %v4793_v45, %v4762_v33  ;;  %v4717_v4 = vmax.f32 %v6278_v48, 0.0 }
 0x37d   : > { %v4764_v2 = vmul.f32 %v8001_v1, %v4714_v56  ;;  %v4766_v61 = vmul.f32 %v8009_v15, %v4716_v63 }
 0x37e   : > { %v4765_v3 = vmul.f32 %v8005_v6, %v4715_v57  ;;  %4791 = vadd.xlane.f32.xlu0 %v4790_v0  ;;  %v4795_v60 = vadd.f32 %v4794_v58, %v4763_v55  ;;  %v4767_v7 = vmul.f32 %v8017_v26, %v4717_v4 }
 0x380   : > { %v4798_v5 = vadd.f32 %v4765_v3, %v4764_v2  ;;  %4796 = vadd.xlane.f32.xlu1 %v4795_v60 }
 0x382   : > { %v4799_v8 = vadd.f32 %v4798_v5, %v4766_v61 }
 0x384   : > { %v4800_v9 = vadd.f32 %v4799_v8, %v4767_v7 }
 0x386   : > { %4801 = vadd.xlane.f32.xlu0 %v4800_v9 }
 0x38a   : > { %4786 = vadd.xlane.f32.xlu0 %v4785_v24 }
 0x3fc   : > { %v4772_v1 = vpop.xlane.xlu0 %4771 }
 0x3fd   : > { %v4805_v21 = vadd.f32 %v4804_v14, %v4772_v1 }
 0x3ff   : > { %v4777_v11 = vpop.xlane.xlu1 %4776 }
 0x400   : > { %v4806_v17 = vadd.f32 %v4804_v14, %v4777_v11 }
 0x404   : > { %v4782_v6 = vpop.xlane.xlu1 %4781 }
 0x405   : > { %v4807_v20 = vadd.f32 %v4804_v14, %v4782_v6 }
 0x40b   : > { %v4792_v13 = vpop.xlane.xlu0 %4791 }
 0x40c   : > { %v4809_v18 = vadd.f32 %v4804_v14, %v4792_v13 }
 0x40d   : > { %v4797_v15 = vpop.xlane.xlu1 %4796 }
 0x40e   : > { %v4810_v16 = vadd.f32 %v4804_v14, %v4797_v15  ;;  %v4834_v28 = vmax.f32 %v4805_v21, %v4809_v18 }
 0x410   : > { %v4835_v22 = vmax.f32 %v4806_v17, %v4810_v16 }
 0x412   : > { %v4837_v34 = vmax.f32 %v4834_v28, %v4835_v22 }
 0x413   : > { %v4802_v26 = vpop.xlane.xlu0 %4801 }
 0x414   : > { %v4811_v19 = vadd.f32 %v4804_v14, %v4802_v26 }
 0x416   : > { %v4833_v23 = vsel %vm4826_vm0, %v4811_v19, -inf }
 0x417   : > { %v4836_v25 = vmax.f32 %v4807_v20, %v4833_v23  ;;  %v4787_v27 = vpop.xlane.xlu0 %4786 }
 0x418   : > { %v4808_v33 = vadd.f32 %v4804_v14, %v4787_v27 }
 0x41a   : > { %v4838_v39 = vmax.f32 %v4836_v25, %v4808_v33 }
 0x41c   : > { %v4839_v40 = vmax.f32 %v4837_v34, %v4838_v39 }
 0x41e   : > { %v4840_v44 = vrot.slane %v4839_v40, 4 }
 0x420   : > { %v4841_v24 = vmax.f32 %v4839_v40, %v4840_v44 }
 0x422   : > { %v4842_v45 = vrot.slane %v4841_v24, 2 }
 0x424   : > { %v4843_v47 = vmax.f32 %v4841_v24, %v4842_v45 }
 0x426   : > { %v4844_v48 = vrot.slane %v4843_v47, 1 }
 0x428   : > { %v4845_v50 = vmax.f32 %v4843_v47, %v4844_v48 }
 0x42a   : > { %v4846_v51 = vsub.f32 %v4805_v21, %v4845_v50  ;;  %v4847_v54 = vsub.f32 %v4806_v17, %v4845_v50  ;;  %v4848_v55 = vsub.f32 %v4807_v20, %v4845_v50  ;;  %v4849_v56 = vsub.f32 %v4808_v33, %v4845_v50 }
 0x42b   : > { %v4850_v63 = vsub.f32 %v4809_v18, %v4845_v50  ;;  %v4851_v0 = vsub.f32 %v4810_v16, %v4845_v50  ;;  %v4852_v2 = vsub.f32 %v4833_v23, %v4845_v50 }
 0x42c   : > { %v4853_v59 = vmul.f32 1.442695, %v4846_v51  ;;  %v4855_v62 = vmul.f32 1.442695, %v4847_v54  ;;  %v4857_v57 = vmul.f32 1.442695, %v4848_v55 }
 0x42d   : > { %v4859_v58 = vmul.f32 1.442695, %v4849_v56  ;;  %v4861_v3 = vmul.f32 1.442695, %v4850_v63  ;;  %v4863_v4 = vmul.f32 1.442695, %v4851_v0 }
 0x42e   : > { %7359 = vpow2.f32 %v4853_v59  ;;  %v4865_v60 = vmul.f32 1.442695, %v4852_v2  ;;  %v4905_v2 = vld [vmem:[%s7816_s30] sm:$0xff] }
 0x42f   : > { %7361 = vpow2.f32 %v4855_v62 }
 0x430   : > { %7363 = vpow2.f32 %v4857_v57  ;;  %v7584_v57 = vmov 1966171168  }
 0x431   : > { %7365 = vpow2.f32 %v4859_v58  ;;  %v5510_v0 = vunpack.c.l.s4 %v7584_v57 }
 0x432   : > { %7367 = vpow2.f32 %v4861_v3  ;;  %v4906_v3 = vld [vmem:[%s7816_s30 + $0x8] sm:$0xff] }
 0x433   : > { %7369 = vpow2.f32 %v4863_v4  ;;  %v5511_v58 = vunpack.c.0.s8 %v5510_v0  ;;  %v4907_v4 = vld [vmem:[%s7816_s30 + $0x10] sm:$0xff] }
 0x434   : > { %7371 = vpow2.f32 %v4865_v60  ;;  %v4908_v60 = vld [vmem:[%s7816_s30 + $0x18] sm:$0xff] }
 0x438   : > { %v7360_v61 = vpop.eup %7359 }
 0x439   : > { %v7362_v5 = vpop.eup %7361 }
 0x43a   : > { %v4867_v7 = vadd.f32 %v7362_v5, %v7360_v61  ;;  %v7364_v8 = vpop.eup %7363 }
 0x43b   : > { %v7366_v10 = vpop.eup %7365 }
 0x43c   : > { %v4868_v9 = vadd.f32 %v7364_v8, %v4867_v7  ;;  %v7368_v1 = vpop.eup %7367  ;;  %v4910_v7 = vld [vmem:[%s7816_s30 + $0x28] sm:$0xff] }
 0x43d   : > { %v7370_v13 = vpop.eup %7369 }
 0x43e   : > { %v4869_v11 = vadd.f32 %v7366_v10, %v4868_v9  ;;  %v7372_v14 = vpop.eup %7371  ;;  %v4923_v9 = vld [vmem:[%s7816_s30 + $0x90] sm:$0xff] }
 0x440   : > { %v4870_v6 = vadd.f32 %v7368_v1, %v4869_v11  ;;  %v4911_v11 = vld [vmem:[%s7816_s30 + $0x30] sm:$0xff] }
 0x442   : > { %v4871_v15 = vadd.f32 %v7370_v13, %v4870_v6  ;;  %v4913_v6 = vld [vmem:[%s7816_s30 + $0x40] sm:$0xff] }
 0x444   : > { %v4872_v16 = vadd.f32 %v7372_v14, %v4871_v15 }
 0x446   : > { %v4873_v26 = vrot.slane %v4872_v16, 4 }
 0x448   : > { %v4874_v17 = vadd.f32 %v4873_v26, %v4872_v16  ;;  %v4915_v16 = vld [vmem:[%s7816_s30 + $0x50] sm:$0xff]  ;;  %v4916_v26 = vld [vmem:[%s7816_s30 + $0x58] sm:$0xff] }
 0x44a   : > { %v4875_v18 = vrot.slane %v4874_v17, 2 }
 0x44c   : > { %v4876_v19 = vadd.f32 %v4875_v18, %v4874_v17  ;;  %v4917_v18 = vld [vmem:[%s7816_s30 + $0x60] sm:$0xff] }
 0x44e   : > { %v4877_v20 = vrot.slane %v4876_v19, 1 }
 0x450   : > { %v4878_v21 = vadd.f32 %v4877_v20, %v4876_v19  ;;  %v4918_v19 = vld [vmem:[%s7816_s30 + $0x68] sm:$0xff]  ;;  %v4925_v20 = vld [vmem:[%s7816_s30 + $0xa0] sm:$0xff] }
 0x452   : > { %7373 = vrcp.f32 %v4878_v21 }
 0x45c   : > { %v7374_v22 = vpop.eup %7373 }
 0x45d   : > { %v4882_v23 = vmul.f32 %v7374_v22, %v7364_v8  ;;  %v4883_v25 = vmul.f32 %v7374_v22, %v7366_v10  ;;  %v4884_v27 = vmul.f32 %v7374_v22, %v7368_v1  ;;  %v4881_v28 = vmul.f32 %v7374_v22, %v7362_v5  ;;  %v4909_v5 = vld [vmem:[%s7816_s30 + $0x20] sm:$0xff]  ;;  %v4922_v8 = vld [vmem:[%s7816_s30 + $0x88] sm:$0xff]  ;;  %v4924_v10 = vld [vmem:[%s7816_s30 + $0x98] sm:$0xff] }
 0x45e   : > { %v4880_v33 = vmul.f32 %v7374_v22, %v7360_v61  ;;  %v4885_v34 = vmul.f32 %v7374_v22, %v7370_v13  ;;  %v4886_v39 = vmul.f32 %v7374_v22, %v7372_v14  ;;  %v4921_v61 = vld [vmem:[%s7816_s30 + $0x80] sm:$0xff]  ;;  %v4912_v1 = vld [vmem:[%s7816_s30 + $0x38] sm:$0xff]  ;;  %v8091_v13 = vsub.s32 %v5511_v58, %v7986_v49  ;;  %v4914_v14 = vld [vmem:[%s7816_s30 + $0x48] sm:$0xff] }
 0x45f   : > { %v4890_v40 = vadd.f32 1.0, %v4883_v25  ;;  %v4888_v44 = vadd.f32 1.0, %v4881_v28  ;;  %v4889_v24 = vadd.f32 1.0, %v4882_v23  ;;  %v4891_v45 = vadd.f32 1.0, %v4884_v27  ;;  %v4926_v25 = vld [vmem:[%s7816_s30 + $0xa8] sm:$0xff]  ;;  %v4927_v27 = vld [vmem:[%s7816_s30 + $0xb0] sm:$0xff] }
 0x460   : > { %v4887_v47 = vadd.f32 1.0, %v4880_v33  ;;  %v4892_v48 = vadd.f32 1.0, %v4885_v34  ;;  %v4893_v50 = vadd.f32 1.0, %v4886_v39  ;;  %8645 = vst [vmem:[#allocation17_spill] sm:$0xff] %v8091_v13  ;;  %v4928_v28 = vld [vmem:[%s7816_s30 + $0xb8] sm:$0xff]  ;;  %v4937_v58 = vld [vmem:[%s7816_s30 + $0x100] sm:$0xff] }
 0x461   : > { %4898 = vst.msk [vmem:[#allocation2 + $0x18] sm:$0xff] %vm4894_vm1, %v4890_v40  ;;  %4896 = vst.msk [vmem:[#allocation2 + $0x8] sm:$0xff] %vm4894_vm1, %v4888_v44  ;;  %v4929_v44 = vld [vmem:[%s7816_s30 + $0xc0] sm:$0xff] }
 0x462   : > { %4897 = vst.msk [vmem:[#allocation2 + $0x10] sm:$0xff] %vm4894_vm1, %v4889_v24  ;;  %4899 = vst.msk [vmem:[#allocation2 + $0x20] sm:$0xff] %vm4894_vm1, %v4891_v45  ;;  %v4930_v24 = vld [vmem:[%s7816_s30 + $0xc8] sm:$0xff]  ;;  %v4931_v45 = vld [vmem:[%s7816_s30 + $0xd0] sm:$0xff] }
 0x463   : > { %4895 = vst.msk [vmem:[#allocation2] sm:$0xff] %vm4894_vm1, %v4887_v47  ;;  %4900 = vst.msk [vmem:[#allocation2 + $0x28] sm:$0xff] %vm4894_vm1, %v4892_v48 }
 0x464   : > { %4901 = vst.msk [vmem:[#allocation2 + $0x30] sm:$0xff] %vm4894_vm1, %v4893_v50 }
 0x468   : > { %v5018_v51 = vld [vmem:[#allocation2 + $0x8] sm:$0xff]  ;;  %v5020_v56 = vld [vmem:[#allocation2 + $0x18] sm:$0xff] }
 0x469   : > { %5031 = vperm.xlu0 %6590, %v5018_v51   ;;  %v5019_v55 = vld [vmem:[#allocation2 + $0x10] sm:$0xff]  ;;  %v5021_v59 = vld [vmem:[#allocation2 + $0x20] sm:$0xff] }
 0x46a   : > { %v5017_v54 = vld [vmem:[#allocation2] sm:$0xff]  ;;  %v5022_v62 = vld [vmem:[#allocation2 + $0x28] sm:$0xff] }
 0x46b   : > { %5026 = vperm.xlu1 %6589, %v5017_v54   ;;  %v5023_v63 = vld [vmem:[#allocation2 + $0x30] sm:$0xff] }
 0x46c   : > { %v4932_v54 = vld [vmem:[%s7816_s30 + $0xd8] sm:$0xff] }
 0x46f   : > { %5036 = vperm.xlu1 %6589, %v5019_v55   ;;  %v4933_v55 = vld [vmem:[%s7816_s30 + $0xe0] sm:$0xff] }
 0x473   : > { %5041 = vperm.xlu1 %6589, %v5020_v56   ;;  %v4934_v56 = vld [vmem:[%s7816_s30 + $0xe8] sm:$0xff] }
 0x477   : > { %5046 = vperm.xlu1 %6589, %v5021_v59  }
 0x47b   : > { %5051 = vperm.xlu1 %6589, %v5022_v62  }
 0x47f   : > { %5056 = vperm.xlu1 %6589, %v5023_v63  }
 0x4e8   : > { %v5032_v15 = vpop.permute.xlu0 %5031 }
 0x4e9   : > { %v8099_v21 = vmul.f32 %v5032_v15, %v4921_v61  ;;  %v8101_v22 = vmul.f32 %v5032_v15, %v4922_v8  ;;  %v8103_v23 = vmul.f32 %v5032_v15, %v4923_v9  ;;  %v8105_v49 = vmul.f32 %v5032_v15, %v4924_v10  ;;  %v4941_v8 = vld [vmem:[%s7816_s30 + $0x120] sm:$0xff]  ;;  %v4942_v9 = vld [vmem:[%s7816_s30 + $0x128] sm:$0xff] }
 0x4ea   : > { %v5027_v17 = vpop.permute.xlu1 %5026  ;;  %v8156_v10 = vmul.f32 %v5032_v15, %v4925_v20  ;;  %v4947_v20 = vld [vmem:[%s7816_s30 + $0x150] sm:$0xff]  ;;  %v8183_v13 = vmul.f32 %v5032_v15, %v7940_v30  ;;  %v4956_v30 = vld [vmem:[%s7816_s30 + $0x198] sm:$0xff] }
 0x4eb   : > { %v8110_v33 = vmul.f32 %v5027_v17, %v4905_v2  ;;  %v8112_v34 = vmul.f32 %v5027_v17, %v4906_v3  ;;  %v8114_v39 = vmul.f32 %v5027_v17, %v4907_v4  ;;  %v8116_v40 = vmul.f32 %v5027_v17, %v4908_v60  ;;  %v4938_v2 = vld [vmem:[%s7816_s30 + $0x108] sm:$0xff]  ;;  %v4939_v3 = vld [vmem:[%s7816_s30 + $0x110] sm:$0xff] }
 0x4ec   : > { %v8121_v47 = vmul.f32 %v5027_v17, %v4909_v5  ;;  %v8123_v48 = vmul.f32 %v5027_v17, %v4910_v7  ;;  %v8125_v50 = vmul.f32 %v5027_v17, %v4911_v11  ;;  %v8127_v51 = vmul.f32 %v5027_v17, %v4912_v1  ;;  %v4940_v7 = vld [vmem:[%s7816_s30 + $0x118] sm:$0xff]  ;;  %8660 = vst [vmem:[#allocation32_spill] sm:$0xff] %v8183_v13 }
 0x4ed   : > { %v8132_v59 = vmul.f32 %v5027_v17, %v4913_v6  ;;  %v8134_v62 = vmul.f32 %v5027_v17, %v4914_v14  ;;  %v8136_v63 = vmul.f32 %v5027_v17, %v4915_v16  ;;  %v8138_v57 = vmul.f32 %v5027_v17, %v4916_v26  ;;  %v4944_v14 = vld [vmem:[%s7816_s30 + $0x138] sm:$0xff] }
 0x4ee   : > { %v5037_v0 = vpop.permute.xlu1 %5036  ;;  %v8143_v4 = vmul.f32 %v5027_v17, %v4917_v18  ;;  %v8145_v60 = vmul.f32 %v5027_v17, %v4918_v19  ;;  %v8148_v61 = vmul.f32 %v5027_v17, %v7937_v29  ;;  %v8151_v5 = vmul.f32 %v5027_v17, %v7929_v52  ;;  %v4943_v29 = vld [vmem:[%s7816_s30 + $0x130] sm:$0xff]  ;;  %v4945_v52 = vld [vmem:[%s7816_s30 + $0x140] sm:$0xff]  ;;  %v4946_v19 = vld [vmem:[%s7816_s30 + $0x148] sm:$0xff] }
 0x4ef   : > { %8646 = vst [vmem:[#allocation18_spill] sm:$0xff] %v8132_v59  ;;  %8647 = vst [vmem:[#allocation19_spill] sm:$0xff] %v8134_v62  ;;  %v8158_v11 = vmul.f32 %v5032_v15, %v4926_v25  ;;  %v8160_v1 = vmul.f32 %v5032_v15, %v4927_v27  ;;  %v8162_v6 = vmul.f32 %v5032_v15, %v4928_v28  ;;  %v4948_v25 = vld [vmem:[%s7816_s30 + $0x158] sm:$0xff] }
 0x4f0   : > { %8648 = vst [vmem:[#allocation20_spill] sm:$0xff] %v8136_v63  ;;  %8649 = vst [vmem:[#allocation21_spill] sm:$0xff] %v8138_v57  ;;  %v8167_v16 = vmul.f32 %v5032_v15, %v4929_v44  ;;  %v8169_v26 = vmul.f32 %v5032_v15, %v4930_v24  ;;  %v8171_v17 = vmul.f32 %v5032_v15, %v4931_v45  ;;  %v4953_v45 = vld [vmem:[%s7816_s30 + $0x180] sm:$0xff] }
 0x4f1   : > { %8650 = vst [vmem:[#allocation22_spill] sm:$0xff] %v8143_v4  ;;  %8651 = vst [vmem:[#allocation23_spill] sm:$0xff] %v8145_v60  ;;  %v8173_v18 = vmul.f32 %v5032_v15, %v4932_v54  ;;  %v8178_v27 = vmul.f32 %v5032_v15, %v4933_v55  ;;  %v8180_v28 = vmul.f32 %v5032_v15, %v4934_v56  ;;  %v4954_v54 = vld [vmem:[%s7816_s30 + $0x188] sm:$0xff] }
 0x4f2   : > { %8652 = vst [vmem:[#allocation24_spill] sm:$0xff] %v8148_v61  ;;  %8653 = vst [vmem:[#allocation25_spill] sm:$0xff] %v8151_v5  ;;  %v8186_v44 = vmul.f32 %v5032_v15, %v7932_v53  ;;  %v5042_v24 = vpop.permute.xlu1 %5041  ;;  %v4955_v5 = vld [vmem:[%s7816_s30 + $0x190] sm:$0xff]  ;;  %v8191_v61 = vmul.f32 %v5037_v0, %v4937_v58  ;;  %v8193_v60 = vmul.f32 %v5037_v0, %v4938_v2  ;;  %v4957_v53 = vld [vmem:[%s7816_s30 + $0x1a0] sm:$0xff] }
 0x4f3   : > { %8654 = vst [vmem:[#allocation26_spill] sm:$0xff] %v8167_v16  ;;  %8655 = vst [vmem:[#allocation27_spill] sm:$0xff] %v8169_v26  ;;  %v8195_v55 = vmul.f32 %v5037_v0, %v4939_v3  ;;  %v8197_v56 = vmul.f32 %v5037_v0, %v4940_v7  ;;  %v4958_v15 = vld [vmem:[%s7816_s30 + $0x1a8] sm:$0xff]  ;;  %v8204_v13 = vmul.f32 %v5037_v0, %v4942_v9  ;;  %v4959_v3 = vld [vmem:[%s7816_s30 + $0x1b0] sm:$0xff] }
 0x4f4   : > { %8656 = vst [vmem:[#allocation28_spill] sm:$0xff] %v8171_v17  ;;  %8657 = vst [vmem:[#allocation29_spill] sm:$0xff] %v8173_v18  ;;  %v8206_v58 = vmul.f32 %v5037_v0, %v4943_v29  ;;  %v8208_v2 = vmul.f32 %v5037_v0, %v4944_v14  ;;  %v4961_v7 = vld [vmem:[%s7816_s30 + $0x1c0] sm:$0xff]  ;;  %v8213_v4 = vmul.f32 %v5037_v0, %v4945_v52  ;;  %v4962_v9 = vld [vmem:[%s7816_s30 + $0x1c8] sm:$0xff] }
 0x4f5   : > { %8658 = vst [vmem:[#allocation30_spill] sm:$0xff] %v8178_v27  ;;  %8659 = vst [vmem:[#allocation31_spill] sm:$0xff] %v8180_v28  ;;  %v4960_v28 = vld [vmem:[%s7816_s30 + $0x1b8] sm:$0xff]  ;;  %v8215_v27 = vmul.f32 %v5037_v0, %v4946_v19  ;;  %v8217_v57 = vmul.f32 %v5037_v0, %v4947_v20  ;;  %v4963_v18 = vld [vmem:[%s7816_s30 + $0x1d0] sm:$0xff]  ;;  %v8231_v52 = vmul.f32 %v5037_v0, %v7953_v35 }
 0x4f6   : > { %8661 = vst [vmem:[#allocation33_spill] sm:$0xff] %v8186_v44  ;;  %v8202_v44 = vmul.f32 %v5037_v0, %v4941_v8  ;;  %8662 = vst [vmem:[#allocation34_spill] sm:$0xff] %v8213_v4  ;;  %v8219_v8 = vmul.f32 %v5037_v0, %v4948_v25  ;;  %v4964_v29 = vld [vmem:[%s7816_s30 + $0x1d8] sm:$0xff]  ;;  %v7375_v14 = vld [vmem:[%s7816_s30 + $0x160] sm:$0xff]  ;;  %v8234_v19 = vmul.f32 %v5037_v0, %v7943_v31  ;;  %v5047_v20 = vpop.permute.xlu1 %5046 }
 0x4f7   : > { %8663 = vst [vmem:[#allocation35_spill] sm:$0xff] %v8215_v27  ;;  %8664 = vst [vmem:[#allocation36_spill] sm:$0xff] %v8217_v57  ;;  %v8225_v63 = vmul.f32 %v7375_v14, %v5037_v0  ;;  %v7376_v17 = vld [vmem:[%s7816_s30 + $0x168] sm:$0xff]  ;;  %v4969_v25 = vld [vmem:[%s7816_s30 + $0x200] sm:$0xff]  ;;  %v8239_v27 = vmul.f32 %v5042_v24, %v4953_v45  ;;  %v8241_v14 = vmul.f32 %v5042_v24, %v4954_v54 }
 0x4f8   : > { %8665 = vst [vmem:[#allocation37_spill] sm:$0xff] %v8219_v8  ;;  %v8228_v62 = vmul.f32 %v7376_v17, %v5037_v0  ;;  %8668 = vst [vmem:[#allocation40_spill] sm:$0xff] %v8231_v52  ;;  %v4970_v8 = vld [vmem:[%s7816_s30 + $0x208] sm:$0xff]  ;;  %v4971_v57 = vld [vmem:[%s7816_s30 + $0x210] sm:$0xff]  ;;  %v8245_v17 = vmul.f32 %v5042_v24, %v4956_v30  ;;  %v8252_v52 = vmul.f32 %v5042_v24, %v4958_v15 }
 0x4f9   : > { %8666 = vst [vmem:[#allocation38_spill] sm:$0xff] %v8225_v63  ;;  %8669 = vst [vmem:[#allocation41_spill] sm:$0xff] %v8234_v19  ;;  %v8243_v63 = vmul.f32 %v5042_v24, %v4955_v5  ;;  %v4972_v35 = vld [vmem:[%s7816_s30 + $0x218] sm:$0xff]  ;;  %v4973_v31 = vld [vmem:[%s7816_s30 + $0x220] sm:$0xff]  ;;  %v8250_v19 = vmul.f32 %v5042_v24, %v4957_v53  ;;  %v8254_v45 = vmul.f32 %v5042_v24, %v4959_v3 }
 0x4fa   : > { %8667 = vst [vmem:[#allocation39_spill] sm:$0xff] %v8228_v62  ;;  %v4974_v0 = vld [vmem:[%s7816_s30 + $0x228] sm:$0xff]  ;;  %8671 = vst [vmem:[#allocation43_spill] sm:$0xff] %v8252_v52  ;;  %v8256_v54 = vmul.f32 %v5042_v24, %v4960_v28  ;;  %v4975_v5 = vld [vmem:[%s7816_s30 + $0x230] sm:$0xff]  ;;  %v8261_v4 = vmul.f32 %v5042_v24, %v4961_v7  ;;  %v8263_v26 = vmul.f32 %v5042_v24, %v4962_v9  ;;  %v5052_v9 = vpop.permute.xlu1 %5051 }
 0x4fb   : > { %8670 = vst [vmem:[#allocation42_spill] sm:$0xff] %v8250_v19  ;;  %8672 = vst [vmem:[#allocation44_spill] sm:$0xff] %v8254_v45  ;;  %v4976_v62 = vld [vmem:[%s7816_s30 + $0x238] sm:$0xff]  ;;  %v4977_v30 = vld [vmem:[%s7816_s30 + $0x240] sm:$0xff]  ;;  %v8265_v59 = vmul.f32 %v5042_v24, %v4963_v18  ;;  %v8267_v53 = vmul.f32 %v5042_v24, %v4964_v29  ;;  %v8279_v7 = vmul.f32 %v5042_v24, %v7956_v36 }
 0x4fc   : > { %8673 = vst [vmem:[#allocation45_spill] sm:$0xff] %v8256_v54  ;;  %8674 = vst [vmem:[#allocation46_spill] sm:$0xff] %v8261_v4  ;;  %v4978_v15 = vld [vmem:[%s7816_s30 + $0x248] sm:$0xff]  ;;  %v4979_v16 = vld [vmem:[%s7816_s30 + $0x250] sm:$0xff]  ;;  %v8282_v18 = vmul.f32 %v5042_v24, %v7946_v32  ;;  %v8309_v4 = vmul.f32 %v5047_v20, %v4977_v30  ;;  %v8327_v30 = vmul.f32 %v5047_v20, %v7969_v41 }
 0x4fd   : > { %8675 = vst [vmem:[#allocation47_spill] sm:$0xff] %v8263_v26  ;;  %8676 = vst [vmem:[#allocation48_spill] sm:$0xff] %v8265_v59  ;;  %v4980_v3 = vld [vmem:[%s7816_s30 + $0x258] sm:$0xff]  ;;  %v7377_v28 = vld [vmem:[%s7816_s30 + $0x1e0] sm:$0xff]  ;;  %v8287_v26 = vmul.f32 %v5047_v20, %v4969_v25  ;;  %v8302_v25 = vmul.f32 %v5047_v20, %v4975_v5  ;;  %v5357_v12 = vmax.f32 %v8123_v48, %v8158_v11 }
 0x4fe   : > { %8677 = vst [vmem:[#allocation49_spill] sm:$0xff] %v8267_v53  ;;  %v8273_v54 = vmul.f32 %v7377_v28, %v5042_v24  ;;  %v7378_v45 = vld [vmem:[%s7816_s30 + $0x1e8] sm:$0xff]  ;;  %8680 = vst [vmem:[#allocation52_spill] sm:$0xff] %v8279_v7  ;;  %v4985_v29 = vld [vmem:[%s7816_s30 + $0x280] sm:$0xff]  ;;  %v8289_v28 = vmul.f32 %v5047_v20, %v4970_v8  ;;  %v8300_v7 = vmul.f32 %v5047_v20, %v4974_v0  ;;  %v5057_v41 = vpop.permute.xlu1 %5056 }
 0x4ff   : > { %v8276_v52 = vmul.f32 %v7378_v45, %v5042_v24  ;;  %8681 = vst [vmem:[#allocation53_spill] sm:$0xff] %v8282_v18  ;;  %v4986_v53 = vld [vmem:[%s7816_s30 + $0x288] sm:$0xff]  ;;  %v4987_v59 = vld [vmem:[%s7816_s30 + $0x290] sm:$0xff]  ;;  %8682 = vst [vmem:[#allocation54_spill] sm:$0xff] %v8287_v26  ;;  %v8293_v45 = vmul.f32 %v5047_v20, %v4972_v35  ;;  %v8298_v18 = vmul.f32 %v5047_v20, %v4973_v31 }
 0x500   : > { %8678 = vst [vmem:[#allocation50_spill] sm:$0xff] %v8273_v54  ;;  %8683 = vst [vmem:[#allocation55_spill] sm:$0xff] %v8289_v28  ;;  %v8291_v54 = vmul.f32 %v5047_v20, %v4971_v57  ;;  %v4988_v36 = vld [vmem:[%s7816_s30 + $0x298] sm:$0xff]  ;;  %v4989_v32 = vld [vmem:[%s7816_s30 + $0x2a0] sm:$0xff]  ;;  %v8304_v8 = vmul.f32 %v5047_v20, %v4976_v62  ;;  %v8315_v31 = vmul.f32 %v5047_v20, %v4980_v3 }
 0x501   : > { %8679 = vst [vmem:[#allocation51_spill] sm:$0xff] %v8276_v52  ;;  %8685 = vst [vmem:[#allocation57_spill] sm:$0xff] %v8293_v45  ;;  %v4990_v24 = vld [vmem:[%s7816_s30 + $0x2a8] sm:$0xff]  ;;  %v4991_v57 = vld [vmem:[%s7816_s30 + $0x2b0] sm:$0xff]  ;;  %v8311_v45 = vmul.f32 %v5047_v20, %v4978_v15  ;;  %v5169_v19 = vmul.f32 %v5057_v41, %v7982_v46 }
 0x502   : > { %8684 = vst [vmem:[#allocation56_spill] sm:$0xff] %v8291_v54  ;;  %8686 = vst [vmem:[#allocation58_spill] sm:$0xff] %v8298_v18  ;;  %v4992_v52 = vld [vmem:[%s7816_s30 + $0x2b8] sm:$0xff]  ;;  %v4993_v35 = vld [vmem:[%s7816_s30 + $0x2c0] sm:$0xff]  ;;  %v8313_v54 = vmul.f32 %v5047_v20, %v4979_v16  ;;  %v8330_v16 = vmul.f32 %v5047_v20, %v7959_v37 }
 0x503   : > { %8687 = vst [vmem:[#allocation59_spill] sm:$0xff] %v8300_v7  ;;  %8688 = vst [vmem:[#allocation60_spill] sm:$0xff] %v8302_v25  ;;  %v4994_v0 = vld [vmem:[%s7816_s30 + $0x2c8] sm:$0xff]  ;;  %v4995_v7 = vld [vmem:[%s7816_s30 + $0x2d0] sm:$0xff] }
 0x504   : > { %8689 = vst [vmem:[#allocation61_spill] sm:$0xff] %v8304_v8  ;;  %8690 = vst [vmem:[#allocation62_spill] sm:$0xff] %v8309_v4  ;;  %v4996_v5 = vld [vmem:[%s7816_s30 + $0x2d8] sm:$0xff]  ;;  %v7379_v62 = vld [vmem:[%s7816_s30 + $0x260] sm:$0xff]  ;;  %v8357_v4 = vmul.f32 %v5052_v9, %v4993_v35  ;;  %v8378_v35 = vmul.f32 %v5052_v9, %v7962_v38  ;;  %v5170_v38 = vmul.f32 %v5057_v41, %v7975_v43 }
 0x505   : > { %8691 = vst [vmem:[#allocation63_spill] sm:$0xff] %v8311_v45  ;;  %8692 = vst [vmem:[#allocation64_spill] sm:$0xff] %v8313_v54  ;;  %v8321_v8 = vmul.f32 %v7379_v62, %v5047_v20  ;;  %v7380_v25 = vld [vmem:[%s7816_s30 + $0x268] sm:$0xff]  ;;  %v5001_v15 = vld [vmem:[%s7816_s30 + $0x300] sm:$0xff]  ;;  %v8335_v54 = vmul.f32 %v5052_v9, %v4985_v29  ;;  %v8337_v45 = vmul.f32 %v5052_v9, %v4986_v53 }
 0x506   : > { %8693 = vst [vmem:[#allocation65_spill] sm:$0xff] %v8315_v31  ;;  %v8324_v18 = vmul.f32 %v7380_v25, %v5047_v20  ;;  %8696 = vst [vmem:[#allocation68_spill] sm:$0xff] %v8327_v30  ;;  %v5002_v3 = vld [vmem:[%s7816_s30 + $0x308] sm:$0xff]  ;;  %v5003_v31 = vld [vmem:[%s7816_s30 + $0x310] sm:$0xff]  ;;  %v8339_v62 = vmul.f32 %v5052_v9, %v4987_v59  ;;  %v8341_v25 = vmul.f32 %v5052_v9, %v4988_v36 }
 0x507   : > { %8694 = vst [vmem:[#allocation66_spill] sm:$0xff] %v8321_v8  ;;  %8697 = vst [vmem:[#allocation69_spill] sm:$0xff] %v8330_v16  ;;  %v5004_v30 = vld [vmem:[%s7816_s30 + $0x318] sm:$0xff]  ;;  %v5005_v37 = vld [vmem:[%s7816_s30 + $0x320] sm:$0xff]  ;;  %v8346_v16 = vmul.f32 %v5052_v9, %v4989_v32  ;;  %v8350_v29 = vmul.f32 %v5052_v9, %v4991_v57  ;;  %v8352_v53 = vmul.f32 %v5052_v9, %v4992_v52 }
 0x508   : > { %8695 = vst [vmem:[#allocation67_spill] sm:$0xff] %v8324_v18  ;;  %8698 = vst [vmem:[#allocation70_spill] sm:$0xff] %v8335_v54  ;;  %v5006_v20 = vld [vmem:[%s7816_s30 + $0x328] sm:$0xff]  ;;  %v8348_v18 = vmul.f32 %v5052_v9, %v4990_v24  ;;  %v5007_v59 = vld [vmem:[%s7816_s30 + $0x330] sm:$0xff] }
 0x509   : > { %8699 = vst [vmem:[#allocation71_spill] sm:$0xff] %v8337_v45  ;;  %8700 = vst [vmem:[#allocation72_spill] sm:$0xff] %v8339_v62  ;;  %v5008_v36 = vld [vmem:[%s7816_s30 + $0x338] sm:$0xff]  ;;  %v5009_v8 = vld [vmem:[%s7816_s30 + $0x340] sm:$0xff]  ;;  %v8361_v62 = vmul.f32 %v5052_v9, %v4995_v7  ;;  %v8363_v45 = vmul.f32 %v5052_v9, %v4996_v5  ;;  %v5155_v7 = vmul.f32 %v5057_v41, %v5001_v15 }
 0x50a   : > { %8701 = vst [vmem:[#allocation73_spill] sm:$0xff] %v8341_v25  ;;  %8702 = vst [vmem:[#allocation74_spill] sm:$0xff] %v8346_v16  ;;  %v8359_v25 = vmul.f32 %v5052_v9, %v4994_v0  ;;  %v5010_v32 = vld [vmem:[%s7816_s30 + $0x348] sm:$0xff]  ;;  %v5011_v16 = vld [vmem:[%s7816_s30 + $0x350] sm:$0xff]  ;;  %v5156_v0 = vmul.f32 %v5057_v41, %v5002_v3  ;;  %v5157_v5 = vmul.f32 %v5057_v41, %v5003_v31 }
 0x50b   : > { %8703 = vst [vmem:[#allocation75_spill] sm:$0xff] %v8348_v18  ;;  %8704 = vst [vmem:[#allocation76_spill] sm:$0xff] %v8350_v29  ;;  %v5012_v54 = vld [vmem:[%s7816_s30 + $0x358] sm:$0xff]  ;;  %v7381_v24 = vld [vmem:[%s7816_s30 + $0x2e0] sm:$0xff]  ;;  %v5164_v29 = vmul.f32 %v5057_v41, %v5010_v32  ;;  %v5165_v28 = vmul.f32 %v5057_v41, %v5011_v16 }
 0x50c   : > { %8705 = vst [vmem:[#allocation77_spill] sm:$0xff] %v8352_v53  ;;  %8706 = vst [vmem:[#allocation78_spill] sm:$0xff] %v8357_v4  ;;  %v8369_v18 = vmul.f32 %v7381_v24, %v5052_v9  ;;  %v7382_v57 = vld [vmem:[%s7816_s30 + $0x2e8] sm:$0xff]  ;;  %v8375_v53 = vmul.f32 %v5052_v9, %v7972_v42  ;;  %v5161_v4 = vmul.f32 %v5057_v41, %v5007_v59  ;;  %v5282_v31 = vsel %vm4826_vm0, %v5156_v0, -inf  ;;  %v8714_v11 = vld [vmem:[#allocation43_spill] sm:$0xff] }
 0x50d   : > { %8707 = vst [vmem:[#allocation79_spill] sm:$0xff] %v8359_v25  ;;  %8708 = vst [vmem:[#allocation80_spill] sm:$0xff] %v8361_v62  ;;  %v8372_v52 = vmul.f32 %v7382_v57, %v5052_v9  ;;  %v5159_v62 = vmul.f32 %v5057_v41, %v5005_v37  ;;  %v5160_v25 = vmul.f32 %v5057_v41, %v5006_v20  ;;  %v7384_v42 = vld [vmem:[%s7816_s30 + $0x368] sm:$0xff]  ;;  %v5281_v9 = vsel %vm4826_vm0, %v5155_v7, -inf  ;;  %v8719_v59 = vld [vmem:[#allocation56_spill] sm:$0xff] }
 0x50e   : > { %8709 = vst [vmem:[#allocation81_spill] sm:$0xff] %v8363_v45  ;;  %8710 = vst [vmem:[#allocation82_spill] sm:$0xff] %v8369_v18  ;;  %v5158_v45 = vmul.f32 %v5057_v41, %v5004_v30  ;;  %v5162_v24 = vmul.f32 %v5057_v41, %v5008_v36  ;;  %v5163_v18 = vmul.f32 %v5057_v41, %v5009_v8  ;;  %v5283_v8 = vsel %vm4826_vm0, %v5157_v5, -inf  ;;  %v8720_v36 = vld [vmem:[#allocation57_spill] sm:$0xff]  ;;  %v8721_v32 = vld [vmem:[#allocation58_spill] sm:$0xff] }
 0x50f   : > { %8711 = vst [vmem:[#allocation83_spill] sm:$0xff] %v8372_v52  ;;  %8712 = vst [vmem:[#allocation84_spill] sm:$0xff] %v8375_v53  ;;  %v5166_v57 = vmul.f32 %v5057_v41, %v5012_v54  ;;  %v7383_v52 = vld [vmem:[%s7816_s30 + $0x360] sm:$0xff]  ;;  %v5168_v53 = vmul.f32 %v7384_v42, %v5057_v41  ;;  %v5285_v30 = vsel %vm4826_vm0, %v5159_v62, -inf  ;;  %v5286_v46 = vsel %vm4826_vm0, %v5160_v25, -inf  ;;  %v8724_v5 = vld [vmem:[#allocation61_spill] sm:$0xff] }
 0x510   : > { %v5167_v26 = vmul.f32 %v7383_v52, %v5057_v41  ;;  %v5284_v54 = vsel %vm4826_vm0, %v5158_v45, -inf  ;;  %v5287_v43 = vsel %vm4826_vm0, %v5161_v4, -inf  ;;  %v5288_v16 = vsel %vm4826_vm0, %v5162_v24, -inf  ;;  %v8722_v52 = vld [vmem:[#allocation59_spill] sm:$0xff]  ;;  %v8723_v7 = vld [vmem:[#allocation60_spill] sm:$0xff] }
 0x511   : > { %v8402_v15 = vsel %vm4826_vm0, %v5163_v18, -inf  ;;  %v8406_v3 = vsel %vm4826_vm0, %v5164_v29, -inf  ;;  %v8410_v45 = vsel %vm4826_vm0, %v5165_v28, -inf  ;;  %v8414_v62 = vsel %vm4826_vm0, %v5166_v57, -inf  ;;  %v8725_v57 = vld [vmem:[#allocation70_spill] sm:$0xff] }
 0x512   : > { %v8418_v4 = vsel %vm4826_vm0, %v5167_v26, -inf  ;;  %v8422_v18 = vsel %vm4826_vm0, %v5168_v53, -inf  ;;  %v8426_v25 = vsel %vm4826_vm0, %v5169_v19, -inf  ;;  %v8430_v28 = vsel %vm4826_vm0, %v5170_v38, -inf  ;;  %v8718_v53 = vld [vmem:[#allocation55_spill] sm:$0xff] }
 0x513   : > { %v5297_v41 = vmax.f32 %v8110_v33, %v8099_v21  ;;  %v5309_v37 = vmax.f32 %v8112_v34, %v8101_v22  ;;  %v5321_v26 = vmax.f32 %v8114_v39, %v8103_v23  ;;  %v5333_v20 = vmax.f32 %v8116_v40, %v8105_v49  ;;  %v8726_v38 = vld [vmem:[#allocation71_spill] sm:$0xff] }
 0x514   : > { %v5345_v19 = vmax.f32 %v8121_v47, %v8156_v10  ;;  %v5369_v29 = vmax.f32 %v8125_v50, %v8160_v1  ;;  %v5381_v21 = vmax.f32 %v8127_v51, %v8162_v6  ;;  %v5358_v39 = vmax.f32 %v5357_v12, %v8204_v13  ;;  %v8715_v6 = vld [vmem:[#allocation44_spill] sm:$0xff]  ;;  %v8729_v12 = vld [vmem:[#allocation74_spill] sm:$0xff] }
 0x515   : > { %v5298_v22 = vmax.f32 %v5297_v41, %v8191_v61  ;;  %v5310_v33 = vmax.f32 %v5309_v37, %v8193_v60  ;;  %v5322_v23 = vmax.f32 %v5321_v26, %v8195_v55  ;;  %v5334_v49 = vmax.f32 %v5333_v20, %v8197_v56  ;;  %v8713_v61 = vld [vmem:[#allocation42_spill] sm:$0xff]  ;;  %v8716_v55 = vld [vmem:[#allocation45_spill] sm:$0xff]  ;;  %v8727_v37 = vld [vmem:[#allocation72_spill] sm:$0xff] }
 0x516   : > { %v5346_v34 = vmax.f32 %v5345_v19, %v8202_v44  ;;  %v5370_v40 = vmax.f32 %v5369_v29, %v8206_v58  ;;  %v5382_v47 = vmax.f32 %v5381_v21, %v8208_v2  ;;  %v5359_v1 = vmax.f32 %v5358_v39, %v8714_v11  ;;  %v8717_v56 = vld [vmem:[#allocation54_spill] sm:$0xff]  ;;  %v8728_v20 = vld [vmem:[#allocation73_spill] sm:$0xff]  ;;  %v8730_v21 = vld [vmem:[#allocation75_spill] sm:$0xff] }
 0x517   : > { %v5299_v48 = vmax.f32 %v5298_v22, %v8239_v27  ;;  %v5311_v50 = vmax.f32 %v5310_v33, %v8241_v14  ;;  %v5323_v51 = vmax.f32 %v5322_v23, %v8243_v63  ;;  %v5335_v60 = vmax.f32 %v5334_v49, %v8245_v17  ;;  %v8731_v33 = vld [vmem:[#allocation76_spill] sm:$0xff]  ;;  %v8732_v49 = vld [vmem:[#allocation77_spill] sm:$0xff] }
 0x518   : > { %v5347_v10 = vmax.f32 %v5346_v34, %v8713_v61  ;;  %v5371_v44 = vmax.f32 %v5370_v40, %v8715_v6  ;;  %v5383_v13 = vmax.f32 %v5382_v47, %v8716_v55  ;;  %v5360_v17 = vmax.f32 %v5359_v1, %v8722_v52 }
 0x519   : > { %v5300_v58 = vmax.f32 %v5299_v48, %v8717_v56  ;;  %v5312_v2 = vmax.f32 %v5311_v50, %v8718_v53  ;;  %v5324_v27 = vmax.f32 %v5323_v51, %v8719_v59  ;;  %v5336_v14 = vmax.f32 %v5335_v60, %v8720_v36 }
 0x51a   : > { %v5348_v63 = vmax.f32 %v5347_v10, %v8721_v32  ;;  %v5372_v0 = vmax.f32 %v5371_v44, %v8723_v7  ;;  %v5384_v24 = vmax.f32 %v5383_v13, %v8724_v5  ;;  %v5361_v22 = vmax.f32 %v5360_v17, %v8730_v21 }
 0x51b   : > { %v5301_v42 = vmax.f32 %v5300_v58, %v8725_v57  ;;  %v5313_v41 = vmax.f32 %v5312_v2, %v8726_v38  ;;  %v5325_v26 = vmax.f32 %v5324_v27, %v8727_v37  ;;  %v5337_v19 = vmax.f32 %v5336_v14, %v8728_v20 }
 0x51c   : > { %v5349_v29 = vmax.f32 %v5348_v63, %v8729_v12  ;;  %v5373_v23 = vmax.f32 %v5372_v0, %v8731_v33  ;;  %v5385_v34 = vmax.f32 %v5384_v24, %v8732_v49  ;;  %v5362_v51 = vmax.f32 %v5361_v22, %v5286_v46 }
 0x51d   : > { %v5302_v39 = vmax.f32 %v5301_v42, %v5281_v9  ;;  %v5314_v40 = vmax.f32 %v5313_v41, %v5282_v31  ;;  %v5326_v47 = vmax.f32 %v5325_v26, %v5283_v8  ;;  %v5338_v48 = vmax.f32 %v5337_v19, %v5284_v54 }
 0x51e   : > { %v5350_v50 = vmax.f32 %v5349_v29, %v5285_v30  ;;  %v5374_v60 = vmax.f32 %v5373_v23, %v5287_v43  ;;  %v5386_v61 = vmax.f32 %v5385_v34, %v5288_v16  ;;  %v5363_v55 = vrot.slane %v5362_v51, 4 }
 0x51f   : > { %v5303_v10 = vrot.slane %v5302_v39, 4  ;;  %v5315_v11 = vrot.slane %v5314_v40, 4  ;;  %v5327_v1 = vrot.slane %v5326_v47, 4  ;;  %v5339_v6 = vrot.slane %v5338_v48, 4 }
 0x520   : > { %v5351_v44 = vrot.slane %v5350_v50, 4  ;;  %v5375_v13 = vrot.slane %v5374_v60, 4  ;;  %v5387_v56 = vrot.slane %v5386_v61, 4  ;;  %v5364_v31 = vmax.f32 %v5362_v51, %v5363_v55  ;;  %v8736_v51 = vld [vmem:[#allocation19_spill] sm:$0xff]  ;;  %v8741_v55 = vld [vmem:[#allocation30_spill] sm:$0xff] }
 0x521   : > { %v5304_v58 = vmax.f32 %v5302_v39, %v5303_v10  ;;  %v5316_v53 = vmax.f32 %v5314_v40, %v5315_v11  ;;  %v5328_v2 = vmax.f32 %v5326_v47, %v5327_v1  ;;  %v5340_v59 = vmax.f32 %v5338_v48, %v5339_v6  ;;  %v8733_v40 = vld [vmem:[#allocation26_spill] sm:$0xff]  ;;  %v8738_v10 = vld [vmem:[#allocation20_spill] sm:$0xff]  ;;  %v8739_v1 = vld [vmem:[#allocation29_spill] sm:$0xff] }
 0x522   : > { %v5352_v9 = vmax.f32 %v5350_v50, %v5351_v44  ;;  %v5376_v8 = vmax.f32 %v5374_v60, %v5375_v13  ;;  %v5388_v54 = vmax.f32 %v5386_v61, %v5387_v56  ;;  %v5365_v36 = vrot.slane %v5364_v31, 2  ;;  %v8734_v47 = vld [vmem:[#allocation18_spill] sm:$0xff]  ;;  %v8735_v50 = vld [vmem:[#allocation27_spill] sm:$0xff]  ;;  %v8737_v61 = vld [vmem:[#allocation28_spill] sm:$0xff] }
 0x523   : > { %v5305_v30 = vrot.slane %v5304_v58, 2  ;;  %v5317_v46 = vrot.slane %v5316_v53, 2  ;;  %v5329_v43 = vrot.slane %v5328_v2, 2  ;;  %v5341_v16 = vrot.slane %v5340_v59, 2  ;;  %v8740_v6 = vld [vmem:[#allocation21_spill] sm:$0xff]  ;;  %v8742_v13 = vld [vmem:[#allocation22_spill] sm:$0xff] }
 0x524   : > { %v5353_v27 = vrot.slane %v5352_v9, 2  ;;  %v5377_v14 = vrot.slane %v5376_v8, 2  ;;  %v5389_v32 = vrot.slane %v5388_v54, 2  ;;  %v5366_v5 = vmax.f32 %v5364_v31, %v5365_v36  ;;  %v8751_v36 = vld [vmem:[#allocation36_spill] sm:$0xff] }
 0x525   : > { %v5306_v63 = vmax.f32 %v5304_v58, %v5305_v30  ;;  %v5318_v52 = vmax.f32 %v5316_v53, %v5317_v46  ;;  %v5330_v17 = vmax.f32 %v5328_v2, %v5329_v43  ;;  %v5342_v7 = vmax.f32 %v5340_v59, %v5341_v16  ;;  %v8743_v58 = vld [vmem:[#allocation31_spill] sm:$0xff]  ;;  %v8745_v59 = vld [vmem:[#allocation32_spill] sm:$0xff]  ;;  %v8749_v46 = vld [vmem:[#allocation34_spill] sm:$0xff] }
 0x526   : > { %v5354_v0 = vmax.f32 %v5352_v9, %v5353_v27  ;;  %v5378_v24 = vmax.f32 %v5376_v8, %v5377_v14  ;;  %v5390_v57 = vmax.f32 %v5388_v54, %v5389_v32  ;;  %v5367_v20 = vrot.slane %v5366_v5, 1  ;;  %v8744_v53 = vld [vmem:[#allocation23_spill] sm:$0xff]  ;;  %v8746_v9 = vld [vmem:[#allocation24_spill] sm:$0xff]  ;;  %v8747_v8 = vld [vmem:[#allocation33_spill] sm:$0xff] }
 0x527   : > { %v5307_v42 = vrot.slane %v5306_v63, 1  ;;  %v5319_v38 = vrot.slane %v5318_v52, 1  ;;  %v5331_v41 = vrot.slane %v5330_v17, 1  ;;  %v5343_v37 = vrot.slane %v5342_v7, 1  ;;  %v8748_v54 = vld [vmem:[#allocation25_spill] sm:$0xff]  ;;  %v8750_v16 = vld [vmem:[#allocation35_spill] sm:$0xff] }
 0x528   : > { %v5355_v26 = vrot.slane %v5354_v0, 1  ;;  %v5379_v19 = vrot.slane %v5378_v24, 1  ;;  %v5391_v12 = vrot.slane %v5390_v57, 1  ;;  %v8490_v49 = vmax.f32 %v5366_v5, %v5367_v20  ;;  %v8752_v32 = vld [vmem:[#allocation37_spill] sm:$0xff]  ;;  %v8755_v5 = vld [vmem:[#allocation40_spill] sm:$0xff] }
 0x529   : > { %v8480_v29 = vmax.f32 %v5306_v63, %v5307_v42  ;;  %v8482_v21 = vmax.f32 %v5318_v52, %v5319_v38  ;;  %v8484_v22 = vmax.f32 %v5330_v17, %v5331_v41  ;;  %v8486_v33 = vmax.f32 %v5342_v7, %v5343_v37  ;;  %v8753_v52 = vld [vmem:[#allocation38_spill] sm:$0xff]  ;;  %v8754_v7 = vld [vmem:[#allocation39_spill] sm:$0xff]  ;;  %v8759_v20 = vld [vmem:[#allocation48_spill] sm:$0xff] }
 0x52a   : > { %v8488_v23 = vmax.f32 %v5354_v0, %v5355_v26  ;;  %v8492_v34 = vmax.f32 %v5378_v24, %v5379_v19  ;;  %v8494_v39 = vmax.f32 %v5390_v57, %v5391_v12  ;;  %v5393_v48 = vmax.f32 %v8734_v47, %v8733_v40  ;;  %v8756_v57 = vld [vmem:[#allocation41_spill] sm:$0xff]  ;;  %v8757_v38 = vld [vmem:[#allocation46_spill] sm:$0xff]  ;;  %v8758_v37 = vld [vmem:[#allocation47_spill] sm:$0xff] }
 0x52b   : > { %v5405_v60 = vmax.f32 %v8736_v51, %v8735_v50  ;;  %v5417_v11 = vmax.f32 %v8738_v10, %v8737_v61  ;;  %v5429_v44 = vmax.f32 %v8740_v6, %v8739_v1  ;;  %v5441_v56 = vmax.f32 %v8742_v13, %v8741_v55  ;;  %v8760_v12 = vld [vmem:[#allocation49_spill] sm:$0xff]  ;;  %v8761_v47 = vld [vmem:[#allocation50_spill] sm:$0xff]  ;;  %v8762_v50 = vld [vmem:[#allocation51_spill] sm:$0xff] }
 0x52c   : > { %v5453_v2 = vmax.f32 %v8744_v53, %v8743_v58  ;;  %v5465_v31 = vmax.f32 %v8746_v9, %v8745_v59  ;;  %v5477_v30 = vmax.f32 %v8748_v54, %v8747_v8  ;;  %v5394_v43 = vmax.f32 %v5393_v48, %v8749_v46  ;;  %v8764_v10 = vld [vmem:[#allocation53_spill] sm:$0xff]  ;;  %v8765_v1 = vld [vmem:[#allocation62_spill] sm:$0xff]  ;;  %v8767_v13 = vld [vmem:[#allocation64_spill] sm:$0xff] }
 0x52d   : > { %v5406_v27 = vmax.f32 %v5405_v60, %v8750_v16  ;;  %v5418_v14 = vmax.f32 %v5417_v11, %v8751_v36  ;;  %v5430_v63 = vmax.f32 %v5429_v44, %v8752_v32  ;;  %v5442_v17 = vmax.f32 %v5441_v56, %v8753_v52  ;;  %v8763_v60 = vld [vmem:[#allocation52_spill] sm:$0xff]  ;;  %v8766_v44 = vld [vmem:[#allocation63_spill] sm:$0xff]  ;;  %v8768_v58 = vld [vmem:[#allocation65_spill] sm:$0xff] }
 0x52e   : > { %v5454_v0 = vmax.f32 %v5453_v2, %v8754_v7  ;;  %v5466_v24 = vmax.f32 %v5465_v31, %v8755_v5  ;;  %v5478_v42 = vmax.f32 %v5477_v30, %v8756_v57  ;;  %v5395_v41 = vmax.f32 %v5394_v43, %v8757_v38  ;;  %v8769_v2 = vld [vmem:[#allocation66_spill] sm:$0xff]  ;;  %v8770_v9 = vld [vmem:[#allocation67_spill] sm:$0xff]  ;;  %v8771_v8 = vld [vmem:[#allocation68_spill] sm:$0xff] }
 0x52f   : > { %v5407_v26 = vmax.f32 %v5406_v27, %v8758_v37  ;;  %v5419_v19 = vmax.f32 %v5418_v14, %v8759_v20  ;;  %v5431_v40 = vmax.f32 %v5430_v63, %v8760_v12  ;;  %v5443_v48 = vmax.f32 %v5442_v17, %v8761_v47  ;;  %v8772_v30 = vld [vmem:[#allocation69_spill] sm:$0xff]  ;;  %v8773_v43 = vld [vmem:[#allocation78_spill] sm:$0xff]  ;;  %v8774_v27 = vld [vmem:[#allocation79_spill] sm:$0xff] }
 0x530   : > { %v5455_v51 = vmax.f32 %v5454_v0, %v8762_v50  ;;  %v5467_v61 = vmax.f32 %v5466_v24, %v8763_v60  ;;  %v5479_v11 = vmax.f32 %v5478_v42, %v8764_v10  ;;  %v5396_v6 = vmax.f32 %v5395_v41, %v8765_v1  ;;  %v8775_v14 = vld [vmem:[#allocation80_spill] sm:$0xff]  ;;  %v8776_v63 = vld [vmem:[#allocation81_spill] sm:$0xff]  ;;  %v8777_v17 = vld [vmem:[#allocation82_spill] sm:$0xff] }
 0x531   : > { %v5408_v55 = vmax.f32 %v5407_v26, %v8766_v44  ;;  %v5420_v56 = vmax.f32 %v5419_v19, %v8767_v13  ;;  %v5432_v53 = vmax.f32 %v5431_v40, %v8768_v58  ;;  %v5444_v59 = vmax.f32 %v5443_v48, %v8769_v2  ;;  %v8778_v0 = vld [vmem:[#allocation83_spill] sm:$0xff]  ;;  %v8779_v24 = vld [vmem:[#allocation84_spill] sm:$0xff] }
 0x532   : > { %v5456_v31 = vmax.f32 %v5455_v51, %v8770_v9  ;;  %v5468_v54 = vmax.f32 %v5467_v61, %v8771_v8  ;;  %v5480_v46 = vmax.f32 %v5479_v11, %v8772_v30  ;;  %v5397_v16 = vmax.f32 %v5396_v6, %v8773_v43 }
 0x533   : > { %v5409_v36 = vmax.f32 %v5408_v55, %v8774_v27  ;;  %v5421_v32 = vmax.f32 %v5420_v56, %v8775_v14  ;;  %v5433_v52 = vmax.f32 %v5432_v53, %v8776_v63  ;;  %v5445_v7 = vmax.f32 %v5444_v59, %v8777_v17 }
 0x534   : > { %v5457_v5 = vmax.f32 %v5456_v31, %v8778_v0  ;;  %v5469_v57 = vmax.f32 %v5468_v54, %v8779_v24  ;;  %v5481_v42 = vmax.f32 %v5480_v46, %v8378_v35  ;;  %v5398_v38 = vmax.f32 %v5397_v16, %v8402_v15 }
 0x535   : > { %v5410_v41 = vmax.f32 %v5409_v36, %v8406_v3  ;;  %v5422_v37 = vmax.f32 %v5421_v32, %v8410_v45  ;;  %v5434_v26 = vmax.f32 %v5433_v52, %v8414_v62  ;;  %v5446_v20 = vmax.f32 %v5445_v7, %v8418_v4 }
 0x536   : > { %v5458_v19 = vmax.f32 %v5457_v5, %v8422_v18  ;;  %v5470_v12 = vmax.f32 %v5469_v57, %v8426_v25  ;;  %v5482_v40 = vmax.f32 %v5481_v42, %v8430_v28  ;;  %v5399_v47 = vrot.slane %v5398_v38, 4 }
 0x537   : > { %v5411_v48 = vrot.slane %v5410_v41, 4  ;;  %v5423_v50 = vrot.slane %v5422_v37, 4  ;;  %v5435_v35 = vrot.slane %v5434_v26, 4  ;;  %v5447_v51 = vrot.slane %v5446_v20, 4 }
 0x538   : > { %v5459_v15 = vrot.slane %v5458_v19, 4  ;;  %v5471_v60 = vrot.slane %v5470_v12, 4  ;;  %v5483_v3 = vrot.slane %v5482_v40, 4  ;;  %v5400_v61 = vmax.f32 %v5398_v38, %v5399_v47  ;;  %v8780_v47 = vld [vmem:[#allocation17_spill] sm:$0xff] }
 0x539   : > { %v5412_v45 = vmax.f32 %v5410_v41, %v5411_v48  ;;  %v5424_v10 = vmax.f32 %v5422_v37, %v5423_v50  ;;  %v5436_v62 = vmax.f32 %v5434_v26, %v5435_v35  ;;  %v5448_v11 = vmax.f32 %v5446_v20, %v5447_v51 }
 0x53a   : > { %v5460_v4 = vmax.f32 %v5458_v19, %v5459_v15  ;;  %v5472_v1 = vmax.f32 %v5470_v12, %v5471_v60  ;;  %v5484_v18 = vmax.f32 %v5482_v40, %v5483_v3  ;;  %v5401_v6 = vrot.slane %v5400_v61, 2 }
 0x53b   : > { %v5413_v25 = vrot.slane %v5412_v45, 2  ;;  %v5425_v44 = vrot.slane %v5424_v10, 2  ;;  %v5437_v28 = vrot.slane %v5436_v62, 2  ;;  %v5449_v55 = vrot.slane %v5448_v11, 2 }
 0x53c   : > { %v5461_v13 = vrot.slane %v5460_v4, 2  ;;  %v5473_v56 = vrot.slane %v5472_v1, 2  ;;  %v5485_v58 = vrot.slane %v5484_v18, 2  ;;  %v5402_v53 = vmax.f32 %v5400_v61, %v5401_v6 }
 0x53d   : > { %v5414_v2 = vmax.f32 %v5412_v45, %v5413_v25  ;;  %v5426_v59 = vmax.f32 %v5424_v10, %v5425_v44  ;;  %v5438_v9 = vmax.f32 %v5436_v62, %v5437_v28  ;;  %v5450_v31 = vmax.f32 %v5448_v11, %v5449_v55 }
 0x53e   : > { %v5462_v8 = vmax.f32 %v5460_v4, %v5461_v13  ;;  %v5474_v54 = vmax.f32 %v5472_v1, %v5473_v56  ;;  %v5486_v30 = vmax.f32 %v5484_v18, %v5485_v58  ;;  %v5403_v46 = vrot.slane %v5402_v53, 1 }
 0x53f   : > { %v5415_v43 = vrot.slane %v5414_v2, 1  ;;  %v5427_v16 = vrot.slane %v5426_v59, 1  ;;  %v5439_v27 = vrot.slane %v5438_v9, 1  ;;  %v5451_v36 = vrot.slane %v5450_v31, 1 }
 0x540   : > { %v5463_v14 = vrot.slane %v5462_v8, 1  ;;  %v5475_v32 = vrot.slane %v5474_v54, 1  ;;  %v5487_v63 = vrot.slane %v5486_v30, 1  ;;  %v5404_v52 = vmax.f32 %v5402_v53, %v5403_v46 }
 0x541   : > { %v5416_v17 = vmax.f32 %v5414_v2, %v5415_v43  ;;  %v5428_v7 = vmax.f32 %v5426_v59, %v5427_v16  ;;  %v5440_v0 = vmax.f32 %v5438_v9, %v5439_v27  ;;  %v5452_v5 = vmax.f32 %v5450_v31, %v5451_v36 }
 0x542   : > { %v5464_v24 = vmax.f32 %v5462_v8, %v5463_v14  ;;  %v5476_v57 = vmax.f32 %v5474_v54, %v5475_v32  ;;  %v5488_v42 = vmax.f32 %v5486_v30, %v5487_v63  ;;  %v5505_v38 = vcombine.low %v8480_v29, %v8482_v21 }
 0x543   : > { %v5506_v41 = vcombine.low %v8484_v22, %v8486_v33  ;;  %v5507_v37 = vcombine.low %v8488_v23, %v8490_v49  ;;  %v5508_v26 = vcombine.low %v8492_v34, %v8494_v39  ;;  %v5554_v20 = vcombine.low %v5404_v52, %v5416_v17 }
 0x544   : > { %v5555_v19 = vcombine.low %v5428_v7, %v5440_v0  ;;  %v5556_v12 = vcombine.low %v5452_v5, %v5464_v24  ;;  %v5557_v40 = vcombine.low %v5476_v57, %v5488_v42  ;;  %v5515_v48 = vrot.slane %v5505_v38, %v8780_v47 }
 0x545   : > { %v5522_v50 = vrot.slane %v5506_v41, %v8780_v47  ;;  %v5529_v29 = vrot.slane %v5507_v37, %v8780_v47  ;;  %v5536_v21 = vrot.slane %v5508_v26, %v8780_v47  ;;  %v5564_v22 = vrot.slane %v5554_v20, %v8780_v47 }
 0x546   : > { %v5571_v33 = vrot.slane %v5555_v19, %v8780_v47  ;;  %v5578_v23 = vrot.slane %v5556_v12, %v8780_v47  ;;  %v5585_v49 = vrot.slane %v5557_v40, %v8780_v47 }
 0x547   : > { %v5537_v34 = vcombine.low %v5515_v48, %v5522_v50  ;;  %v5538_v39 = vcombine.low %v5529_v29, %v5536_v21 }
 0x548   : > { %v5586_v35 = vcombine.low %v5564_v22, %v5571_v33  ;;  %v5587_v51 = vcombine.low %v5578_v23, %v5585_v49 }
 0x549   : > { %v5545_v15 = vrot.slane %v5537_v34, %v8780_v47  ;;  %v5552_v60 = vrot.slane %v5538_v39, %v8780_v47 }
 0x54a   : > { %v5594_v3 = vrot.slane %v5586_v35, %v8780_v47  ;;  %v5601_v61 = vrot.slane %v5587_v51, %v8780_v47 }
 0x54b   : > { %v5553_v45 = vcombine.low %v5545_v15, %v5552_v60 }
 0x54c   : > { %v5602_v10 = vcombine.low %v5594_v3, %v5601_v61 }
 0x54d   : > { %5605 = vst [vmem:[%s283_s6] sm:$0xff] %v5553_v45 }
 0x54e   : > { %5606 = vst [vmem:[%s283_s6 + $0x8] sm:$0xff] %v5602_v10 }
 0x54f   : > { %7512 = shalt.err (!%p7509_p4)
}
 0x550   : > { %s7513_s12 = scalar_lea.hbm %s8577_s17, 256  ;;  %s7517_s14 = scalar_lea.hbm %s8626_s5, 512 }
 0x551   : > { %p7514_p9 = scmp.ne.s32.totalorder %s8577_s17, %s7513_s12  ;;  %p7518_p8 = scmp.lt.u32.totalorder %s8577_s17, %s8626_s5 }
 0x552   : > { %p7519_p13 = scmp.lt.u32.totalorder %s7517_s14, %s7513_s12  ;;  %p7521_p10 = scmp.lt.u32.totalorder %s7513_s12, %s8577_s17 }
 0x553   : > { %p7515_p0 = pnand %p7514_p9, %p7764_p5 }
 0x554   : > { %p7520_p6 = por %p7519_p13, %p7518_p8 }
 0x555   : > { %p7516_p11 = pneg %p7515_p0 }
 0x556   : > { %p7522_p3 = por %p7521_p10, %p7520_p6 }
 0x558   : > { %p7523_p7 = pnand %p7522_p3, %p7516_p11 }
 0x55a   : > { %7526 = shalt.err (!%p7523_p7)
}
 0x55b   : > { %6520 = dma.vmem_to_hbm [thread:$0]  (%p7764_p5), %s8579_s10, 256, %s8577_s17, %s5608_s4  }
 0x55c PF: > { %s5634_s27 = sand.u32 1, %s7561_s20   ;;  %p8781_p12 = scmp.ne.s32.totalorder %s8632_s26, 0 }
 0x55d   : > { %p8782_p2 = scmp.ge.s32.totalorder %s7573_s23, 2  ;;  %s5635_s28 = scalar_lea.sflag [#allocation6], %s5634_s27 }
 0x55f   : > { %p6537_p1 = pnand %p8782_p2, %p8781_p12 }
 0x561   : > { %7556 = dma.done.wait (!%p6537_p1), %s5635_s28, 256  }
 0x562   : > { %7558 = vsyncadd (!%p6537_p1), %s5635_s28, 4294967040  ;;  %p21_p4 = scmp.ge.s32.totalorder %s7750_s15, 4   ;;  %s8783_s20 = smov %s7565_s21 }
 0x563   : > { %s8784_s21 = smov %s7569_s22  ;;  %s8785_s22 = smov %s7760_s16 }
 0x564   : > { %s8786_s23 = smov %s7750_s15  ;;  %23 = sbr.rel (!%p21_p4) target bundleno = 9 (0x9), region = 98 }
 0x56b   :  { %5640 = vsyncpa [#allocation5], 1 }
 0x56c   :  { %5642 = vsyncpa [#allocation5 + $0x1], 1 }
 0x56d   :  { %5643 = vsyncpa [#allocation8], 1 }
 0x56e   :  { %5644 = vsyncpa [#allocation11], 1 }
 0x56f   :  { %5645 = vsyncpa [#allocation6], 1 }
 0x570   :  { %5647 = vsyncpa [#allocation6 + $0x1], 1 }

// kernel: tpu_custom_call.1
= control target key start
LH: loop header
LB: loop body
LE: loop exit
PB: predicated region body
PF: predicated region fallthrough
CT: control target
= control target key end

     0   :  { %s8621_s0 = inlined_call_operand.hbm [shape: f32[2,56,2048], index: 0, kind: input, shape index: {}]   ;;  %s8622_s1 = inlined_call_operand.hbm [shape: bf16[2048,512], index: 1, kind: input, shape index: {}]   ;;  %s8623_s2 = inlined_call_operand.hbm [shape: f32[1,512], index: 2, kind: input, shape index: {}]   ;;  %s8624_s3 = inlined_call_operand.hbm [shape: f32[1,512], index: 3, kind: input, shape index: {}]   ;;  %s8625_s4 = inlined_call_operand.<no memory space> [shape: f32[1], index: 4, kind: input, shape index: {}]   ;;  %s8626_s5 = inlined_call_operand.hbm [shape: f32[2,1,2048], index: 5, kind: output, shape index: {}]  }
   0x1   :  { %10 = sst [smem:[#allocation3]] %s8625_s4 }
   0x2   :  { %11 = vsyncpa [#allocation5], 0 }
   0x3   :  { %13 = vsyncpa [#allocation5 + $0x1], 0 }
   0x4   :  { %14 = vsyncpa [#allocation8], 0 }
   0x5   :  { %15 = vsyncpa [#allocation11], 0 }
   0x6   :  { %16 = vsyncpa [#allocation6], 0 }
   0x7   :  { %18 = vsyncpa [#allocation6 + $0x1], 0  ;;  %s7619_s20 = smov 0   ;;  %s7621_s21 = smov 0  }
   0x8   :  { %s7623_s22 = smov 0   ;;  %s7625_s23 = smov 0  }
   0x9 LB: > { %s7640_s4 = sadd.s32 4294967295, %s7573_s23   ;;  %s5721_s24 = sadd.s32 4294967294, %s7573_s23   ;;  %s7573_s23 = sphi %s7625_s23, %s8786_s23   ;;  %s7569_s22 = sphi %s7623_s22, %s8785_s22   ;;  %s7565_s21 = sphi %s7621_s21, %s8784_s21   ;;  %s7561_s20 = sphi %s7619_s20, %s8783_s20  }
   0xa   : > { %p44_p0 = scmp.ne.s32.totalorder %s7565_s21, %s7561_s20  ;;  %p8627_p1 = scmp.eq.s32.totalorder %s7640_s4, 0 }
   0xb   : > { %p158_p3 = scmp.eq.s32.totalorder %s5721_s24, 1  ;;  %p5722_p5 = scmp.ge.s32.totalorder %s7573_s23, 1 }
   0xc   : > { %p7649_p4 = por %p8627_p1, %p44_p0  ;;  %p165_p7 = scmp.lt.s32.totalorder %s7573_s23, 3 }
   0xd   : > { %p7654_p6 = por %p158_p3, %p44_p0  ;;  %s7575_s28 = smov [#allocation7]  }
   0xe   : > { %s8631_s25 = scalar_select %p7649_p4, 1, 0 }
   0xf   : > { %s8632_s26 = scalar_select %p7654_p6, 1, 0 }
  0x10   : > { %p7659_p8 = pnand %p5722_p5, %p165_p7  ;;  %s177_s29 = sshll.u32 %s7575_s28, 4  ;;  %s7663_s29 = int_to_ptr.vmem [resolvable:$true] %s177_s29 }
  0x11   : > { %s7576_s6 = smov [#allocation9]   ;;  %s7577_s8 = smov [#allocation10]  }
  0x12   : > { %s8633_s27 = scalar_select %p7659_p8, 1, 0 }
  0x13   : > { %p6522_p9 = pneg %p7659_p8  ;;  %s191_s7 = sshll.u32 %s7576_s6, 4  ;;  %s7674_s7 = int_to_ptr.vmem [resolvable:$true] %s191_s7 }
  0x14   : > { %s7676_s9 = sshll.u32 %s7577_s8, 4  ;;  %s7385_s12 = scalar_lea.hbm %s8622_s1, 65536  ;;  %s203_s9 = int_to_ptr.vmem [resolvable:$true] %s7676_s9 }
  0x15   : > { %p7670_p11 = pnand %p6522_p9, %p8627_p1  ;;  %p7386_p12 = scmp.ne.s32.totalorder %s8622_s1, %s7385_s12 }
  0x16   : > { %p7392_p5 = scmp.lt.u32.totalorder %s7385_s12, %s8622_s1 }
  0x17   : > { %p7686_p13 = pneg %p7670_p11 }
  0x19   : > { %p7388_p0 = pnand %p7686_p13, %p7386_p12 }
  0x1b   : > { %p7389_p3 = pneg %p7388_p0 }
  0x1d   : > { %p7394_p7 = pnand %p7392_p5, %p7389_p3 }
  0x1f   : > { %7397 = shalt.err (!%p7394_p7)
}
  0x20   : > { %s7398_s18 = scalar_lea.vmem %s7663_s29, 65536  ;;  %p7406_p2 = scmp.lt.s32.totalorder %s7663_s29, %s7663_s29 }
  0x21   : > { %p7399_p9 = scmp.ne.s32.totalorder %s7663_s29, %s7398_s18  ;;  %p7407_p6 = scmp.lt.s32.totalorder %s7398_s18, %s7398_s18 }
  0x23   : > { %p7401_p10 = pnand %p7399_p9, %p7686_p13  ;;  %p7408_p12 = por %p7407_p6, %p7406_p2 }
  0x25   : > { %p7402_p1 = pneg %p7401_p10 }
  0x27   : > { %p7409_p0 = pnand %p7408_p12, %p7402_p1 }
  0x29   : > { %7412 = shalt.err (!%p7409_p0)
}
  0x2a   : > { %s7578_s19 = smov 256   ;;  %s7579_s24 = smov 16  }
  0x2b   : > { %6525 = dma.hbm_to_vmem [thread:$0]  (!%p7670_p11), %s8622_s1, 65536, %s7663_s29, [#allocation8], %s7578_s19, %s7578_s19, %s7579_s24  }
  0x2c   : > { %s7413_s11 = scalar_lea.hbm %s8623_s2, 64 }
  0x2d   : > { %p7414_p2 = scmp.ne.s32.totalorder %s8623_s2, %s7413_s11  ;;  %p7420_p10 = scmp.lt.u32.totalorder %s7413_s11, %s8623_s2 }
  0x2f   : > { %p7416_p1 = pnand %p7414_p2, %p7686_p13 }
  0x31   : > { %p7417_p6 = pneg %p7416_p1 }
  0x33   : > { %p7422_p3 = pnand %p7420_p10, %p7417_p6 }
  0x35   : > { %7425 = shalt.err (!%p7422_p3)
}
  0x36   : > { %s7426_s29 = scalar_lea.vmem %s7674_s7, 64  ;;  %p7434_p12 = scmp.lt.s32.totalorder %s7674_s7, %s7674_s7 }
  0x37   : > { %p7427_p5 = scmp.ne.s32.totalorder %s7674_s7, %s7426_s29  ;;  %p7435_p0 = scmp.lt.s32.totalorder %s7426_s29, %s7426_s29 }
  0x39   : > { %p7429_p7 = pnand %p7427_p5, %p7686_p13  ;;  %p7436_p2 = por %p7435_p0, %p7434_p12 }
  0x3b   : > { %p7430_p9 = pneg %p7429_p7 }
  0x3d   : > { %p7437_p1 = pnand %p7436_p2, %p7430_p9 }
  0x3f   : > { %7440 = shalt.err (!%p7437_p1)
}
  0x40   : > { %6528 = dma.hbm_to_vmem [thread:$0]  (!%p7670_p11), %s8623_s2, 64, %s7674_s7, [#allocation8]  }
  0x41   : > { %s7441_s28 = scalar_lea.hbm %s8624_s3, 64 }
  0x42   : > { %p7442_p6 = scmp.ne.s32.totalorder %s8624_s3, %s7441_s28  ;;  %p7448_p5 = scmp.lt.u32.totalorder %s7441_s28, %s8624_s3 }
  0x44   : > { %p7444_p10 = pnand %p7442_p6, %p7686_p13 }
  0x46   : > { %p7445_p3 = pneg %p7444_p10 }
  0x48   : > { %p7450_p7 = pnand %p7448_p5, %p7445_p3 }
  0x4a   : > { %7453 = shalt.err (!%p7450_p7)
}
  0x4b   : > { %s7454_s12 = scalar_lea.vmem %s203_s9, 64  ;;  %p7462_p2 = scmp.lt.s32.totalorder %s203_s9, %s203_s9 }
  0x4c   : > { %p7455_p9 = scmp.ne.s32.totalorder %s203_s9, %s7454_s12  ;;  %p7463_p1 = scmp.lt.s32.totalorder %s7454_s12, %s7454_s12 }
  0x4e   : > { %p7457_p12 = pnand %p7455_p9, %p7686_p13  ;;  %p7464_p4 = por %p7463_p1, %p7462_p2 }
  0x50   : > { %p7458_p0 = pneg %p7457_p12 }
  0x52   : > { %p7465_p8 = pnand %p7464_p4, %p7458_p0 }
  0x54   : > { %7468 = shalt.err (!%p7465_p8)
}
  0x55   : > { %6531 = dma.hbm_to_vmem [thread:$0]  (!%p7670_p11), %s8624_s3, 64, %s203_s9, [#allocation11]  }
  0x56   : > { %s7750_s15 = sadd.s32 1, %s7573_s23   ;;  %s31_s30 = sadd.s32 1, %s7569_s22 }
  0x57   : > { %s28_s14 = ssub.s32 %s7573_s23, %s7750_s15  ;;  %p38_p8 = scmp.ne.s32.totalorder %s7569_s22, %s7565_s21 }
  0x58   : > { %p29_p4 = scmp.eq.s32.totalorder %s28_s14, 0  ;;  %p39_p13 = scmp.eq.s32.totalorder %s7573_s23, 0 }
  0x59   : > { %p6543_p6 = scmp.lt.s32.totalorder %s7573_s23, 2  ;;  %p8636_p3 = scmp.eq.s32.totalorder %s7640_s4, 1 }
  0x5a   : > { %s7760_s16 = scalar_select %p29_p4, %s7569_s22, %s31_s30  }
  0x5b   : > { %p40_p10 = por %p39_p13, %p38_p8  ;;  %p7764_p5 = por %p8636_p3, %p38_p8 }
  0x5c   : > { %s216_s17 = sand.u32 1, %s7569_s22   ;;  %s6504_s18 = smul.u32 14336, %s7573_s23 }
  0x5d   : > { %s6503_s9 = smul.u32 896, %s216_s17  ;;  %p7775_p11 = pnand %p6543_p6, %p40_p10 }
  0x5e   : > { %s7773_s28 = scalar_lea.hbm %s8621_s0, %s6504_s18  ;;  %s7781_s11 = scalar_lea.sflag [#allocation5], %s216_s17 }
  0x5f   : > { %s220_s8 = scalar_lea.vmem [#allocation4], %s6503_s9  ;;  %s7469_s12 = scalar_lea.hbm %s7773_s28, 14336 }
  0x60   : > { %s227_s10 = sshll.u32 %s220_s8, 4  ;;  %p7470_p7 = scmp.ne.s32.totalorder %s7773_s28, %s7469_s12  ;;  %s7779_s10 = int_to_ptr.vmem [resolvable:$true] %s227_s10 }
  0x61   : > { %p7471_p9 = pneg %p7775_p11  ;;  %s7474_s14 = scalar_lea.hbm %s8621_s0, 28672 }
  0x62   : > { %p7475_p2 = scmp.lt.u32.totalorder %s7773_s28, %s8621_s0  ;;  %p7476_p1 = scmp.lt.u32.totalorder %s7474_s14, %s7469_s12 }
  0x63   : > { %p7472_p12 = pnand %p7471_p9, %p7470_p7  ;;  %p7478_p8 = scmp.lt.u32.totalorder %s7469_s12, %s7773_s28 }
  0x64   : > { %p7477_p4 = por %p7476_p1, %p7475_p2 }
  0x65   : > { %p7473_p0 = pneg %p7472_p12 }
  0x66   : > { %p7479_p13 = por %p7478_p8, %p7477_p4 }
  0x68   : > { %p7480_p6 = pnand %p7479_p13, %p7473_p0 }
  0x6a   : > { %7483 = shalt.err (!%p7480_p6)
}
  0x6b   : > { %s7484_s17 = scalar_lea.vmem %s7779_s10, 14336  ;;  %s7580_s9 = smov [#allocation4]  }
  0x6c   : > { %p7485_p10 = scmp.ne.s32.totalorder %s7779_s10, %s7484_s17  ;;  %s7489_s19 = sshll.u32 %s7580_s9, 4  ;;  %s7490_s19 = int_to_ptr.vmem [resolvable:$false] %s7489_s19 }
  0x6d   : > { %s7491_s24 = scalar_lea.vmem %s7490_s19, 28672  ;;  %p7492_p12 = scmp.lt.s32.totalorder %s7779_s10, %s7490_s19 }
  0x6e   : > { %p7487_p3 = pnand %p7485_p10, %p7471_p9  ;;  %p7493_p2 = scmp.lt.s32.totalorder %s7491_s24, %s7484_s17 }
  0x70   : > { %p7488_p7 = pneg %p7487_p3  ;;  %p7494_p1 = por %p7493_p2, %p7492_p12 }
  0x72   : > { %p7495_p4 = pnand %p7494_p1, %p7488_p7 }
  0x74   : > { %7498 = shalt.err (!%p7495_p4)
}
  0x75   : > { %s7581_s8 = smov 2048   ;;  %s7582_s12 = smov 128  }
  0x76   : > { %6535 = dma.hbm_to_vmem [thread:$0]  (!%p7775_p11), %s7773_s28, 14336, %s7779_s10, %s7781_s11, %s7581_s8, %s7581_s8, %s7582_s12  }
  0x77   : > { %p8639_p9 = scmp.ne.s32.totalorder %s8633_s27, 0 }
  0x79   : > { %239 = sbr.rel (%p8639_p9) target bundleno = 1372 (0x55c), region = 40 }
  0x80   : > { %s7812_s7 = sand.u32 1, %s7565_s21   ;;  %p8640_p0 = scmp.ne.s32.totalorder %s8631_s25, 0 }
  0x81   : > { %s6505_s13 = smul.u32 896, %s7812_s7  ;;  %s242_s14 = scalar_lea.sflag [#allocation5], %s7812_s7 }
  0x83   : > { %s7816_s30 = scalar_lea.vmem [#allocation4], %s6505_s13 }
  0x84   : > { %7544 = dma.done.wait (%p8640_p0), %s242_s14, 14336  }
  0x85   : > { %7546 = vsyncadd (%p8640_p0), %s242_s14, 4294952960  ;;  %p8641_p11 = scmp.eq.s32.totalorder %s7640_s4, 0 }
  0x87   : > { %7548 = dma.done.wait (%p8641_p11), [#allocation8], 65600   ;;  %p8642_p8 = pmov %p8641_p11 }
  0x89   : > { %7550 = vsyncadd (%p8642_p8), [#allocation8], 4294901696  ;;  %p8643_p13 = pmov %p8642_p8 }
  0x8a   : > { %p8644_p6 = pmov %p8642_p8 }
  0x8b   : > { %7552 = dma.done.wait (%p8643_p13), [#allocation11], 64  }
  0x8c   : > { %7554 = vsyncadd (%p8644_p6), [#allocation11], 4294967232  ;;  %v6591_v0 = vld [vmem:[#allocation7 + $0x4] ss:$16 sps:$4 sm:$0xff]   ;;  %v6593_v1 = vld [vmem:[#allocation7 + $0xc] ss:$16 sps:$4 sm:$0xff]  }
  0x8d   : > { %3554 = vmatprep.subr.bf16.mxu0 %v6591_v0  ;;  %v6595_v2 = vld [vmem:[#allocation7] ss:$16 sps:$4 sm:$0xff]   ;;  %v6596_v3 = vld [vmem:[#allocation7 + $0x8] ss:$16 sps:$4 sm:$0xff]   ;;  %4122 = vmatprep.subr.bf16.mxu1 %v6593_v1  ;;  %v6597_v4 = vld [vmem:[#allocation7 + $0x24] ss:$16 sps:$4 sm:$0xff]  }
  0x8e   : > { %3555 = vmatpush1.bf16.msra.mxu0 %v6595_v2  ;;  %4123 = vmatpush1.bf16.msra.mxu1 %v6596_v3  ;;  %v6599_v5 = vld [vmem:[#allocation7 + $0x2c] ss:$16 sps:$4 sm:$0xff]   ;;  %v6601_v6 = vld [vmem:[#allocation7 + $0x20] ss:$16 sps:$4 sm:$0xff]   ;;  %v6602_v7 = vld [vmem:[#allocation7 + $0x28] ss:$16 sps:$4 sm:$0xff]  }
  0x8f   : > { %3556 = vmatprep.subr.bf16.mxu0 %v6597_v4  ;;  %4124 = vmatprep.subr.bf16.mxu1 %v6599_v5  ;;  %v6603_v8 = vld [vmem:[#allocation7 + $0x44] ss:$16 sps:$4 sm:$0xff]   ;;  %v6605_v9 = vld [vmem:[#allocation7 + $0x4c] ss:$16 sps:$4 sm:$0xff]   ;;  %v6607_v10 = vld [vmem:[#allocation7 + $0x40] ss:$16 sps:$4 sm:$0xff]  }
  0x90   : > { %v6608_v11 = vld [vmem:[#allocation7 + $0x48] ss:$16 sps:$4 sm:$0xff]   ;;  %v6609_v12 = vld [vmem:[#allocation7 + $0x64] ss:$16 sps:$4 sm:$0xff]   ;;  %v6611_v13 = vld [vmem:[#allocation7 + $0x6c] ss:$16 sps:$4 sm:$0xff]  }
  0x91   : > { %v6613_v14 = vld [vmem:[#allocation7 + $0x60] ss:$16 sps:$4 sm:$0xff]   ;;  %v6614_v15 = vld [vmem:[#allocation7 + $0x68] ss:$16 sps:$4 sm:$0xff]   ;;  %v6615_v16 = vld [vmem:[#allocation7 + $0x84] ss:$16 sps:$4 sm:$0xff]  }
  0x92   : > { %3557 = vmatpush1.bf16.msra.mxu0 %v6601_v6  ;;  %4125 = vmatpush1.bf16.msra.mxu1 %v6602_v7  ;;  %v6617_v17 = vld [vmem:[#allocation7 + $0x8c] ss:$16 sps:$4 sm:$0xff]   ;;  %v6619_v18 = vld [vmem:[#allocation7 + $0x80] ss:$16 sps:$4 sm:$0xff]   ;;  %v6620_v19 = vld [vmem:[#allocation7 + $0x88] ss:$16 sps:$4 sm:$0xff]  }
  0x93   : > { %3558 = vmatprep.subr.bf16.mxu0 %v6603_v8  ;;  %4126 = vmatprep.subr.bf16.mxu1 %v6605_v9  ;;  %v6621_v20 = vld [vmem:[#allocation7 + $0xa4] ss:$16 sps:$4 sm:$0xff]   ;;  %v6623_v21 = vld [vmem:[#allocation7 + $0xac] ss:$16 sps:$4 sm:$0xff]   ;;  %v6625_v22 = vld [vmem:[#allocation7 + $0xa0] ss:$16 sps:$4 sm:$0xff]  }
  0x94   : > { %v6626_v23 = vld [vmem:[#allocation7 + $0xa8] ss:$16 sps:$4 sm:$0xff]   ;;  %v6627_v24 = vld [vmem:[#allocation7 + $0xc4] ss:$16 sps:$4 sm:$0xff]   ;;  %v6629_v25 = vld [vmem:[#allocation7 + $0xcc] ss:$16 sps:$4 sm:$0xff]  }
  0x95   : > { %v6631_v26 = vld [vmem:[#allocation7 + $0xc0] ss:$16 sps:$4 sm:$0xff]   ;;  %v6632_v27 = vld [vmem:[#allocation7 + $0xc8] ss:$16 sps:$4 sm:$0xff]   ;;  %v6633_v28 = vld [vmem:[#allocation7 + $0xe4] ss:$16 sps:$4 sm:$0xff]  }
  0x96   : > { %3559 = vmatpush1.bf16.msra.mxu0 %v6607_v10  ;;  %4127 = vmatpush1.bf16.msra.mxu1 %v6608_v11  ;;  %v6635_v29 = vld [vmem:[#allocation7 + $0xec] ss:$16 sps:$4 sm:$0xff]   ;;  %v6637_v30 = vld [vmem:[#allocation7 + $0xe0] ss:$16 sps:$4 sm:$0xff]   ;;  %v6638_v31 = vld [vmem:[#allocation7 + $0xe8] ss:$16 sps:$4 sm:$0xff]  }
  0x97   : > { %3560 = vmatprep.subr.bf16.mxu0 %v6609_v12  ;;  %4128 = vmatprep.subr.bf16.mxu1 %v6611_v13  ;;  %v6639_v32 = vld [vmem:[#allocation7 + $0x104] ss:$16 sps:$4 sm:$0xff]   ;;  %v6641_v33 = vld [vmem:[#allocation7 + $0x10c] ss:$16 sps:$4 sm:$0xff]   ;;  %v6643_v34 = vld [vmem:[#allocation7 + $0x100] ss:$16 sps:$4 sm:$0xff]  }
  0x98   : > { %v6644_v35 = vld [vmem:[#allocation7 + $0x108] ss:$16 sps:$4 sm:$0xff]   ;;  %v6645_v36 = vld [vmem:[#allocation7 + $0x124] ss:$16 sps:$4 sm:$0xff]   ;;  %v6647_v37 = vld [vmem:[#allocation7 + $0x12c] ss:$16 sps:$4 sm:$0xff]  }
  0x99   : > { %v6649_v38 = vld [vmem:[#allocation7 + $0x120] ss:$16 sps:$4 sm:$0xff]   ;;  %v6650_v39 = vld [vmem:[#allocation7 + $0x128] ss:$16 sps:$4 sm:$0xff]   ;;  %v6651_v40 = vld [vmem:[#allocation7 + $0x144] ss:$16 sps:$4 sm:$0xff]  }
  0x9a   : > { %3561 = vmatpush1.bf16.msra.mxu0 %v6613_v14  ;;  %4129 = vmatpush1.bf16.msra.mxu1 %v6614_v15  ;;  %v6653_v41 = vld [vmem:[#allocation7 + $0x14c] ss:$16 sps:$4 sm:$0xff]   ;;  %v6655_v42 = vld [vmem:[#allocation7 + $0x140] ss:$16 sps:$4 sm:$0xff]   ;;  %v6656_v43 = vld [vmem:[#allocation7 + $0x148] ss:$16 sps:$4 sm:$0xff]  }
  0x9b   : > { %3562 = vmatprep.subr.bf16.mxu0 %v6615_v16  ;;  %4130 = vmatprep.subr.bf16.mxu1 %v6617_v17  ;;  %v6657_v44 = vld [vmem:[#allocation7 + $0x164] ss:$16 sps:$4 sm:$0xff]   ;;  %v6659_v45 = vld [vmem:[#allocation7 + $0x16c] ss:$16 sps:$4 sm:$0xff]   ;;  %v6661_v48 = vld [vmem:[#allocation7 + $0x160] ss:$16 sps:$4 sm:$0xff]  }
  0x9c   : > { %v285_v46 = vld [vmem:[%s7816_s30 + $0x8] sm:$0xff]  ;;  %v6663_v51 = vld [vmem:[#allocation7 + $0x184] ss:$16 sps:$4 sm:$0xff]   ;;  %v6667_v53 = vld [vmem:[#allocation7 + $0x180] ss:$16 sps:$4 sm:$0xff]   ;;  %s4803_s25 = sld [smem:[#allocation3]] }
  0x9d   : > { %v301_v47 = vld [vmem:[%s7816_s30 + $0x88] sm:$0xff]  ;;  %v6669_v55 = vld [vmem:[#allocation7 + $0x1a4] ss:$16 sps:$4 sm:$0xff]   ;;  %v6673_v57 = vld [vmem:[#allocation7 + $0x1a0] ss:$16 sps:$4 sm:$0xff]   ;;  %vm4894_vm1 = vcmask 7168  }
  0x9e   : > { %3563 = vmatpush1.bf16.msra.mxu0 %v6619_v18  ;;  %4131 = vmatpush1.bf16.msra.mxu1 %v6620_v19  ;;  %v6662_v49 = vld [vmem:[#allocation7 + $0x168] ss:$16 sps:$4 sm:$0xff]   ;;  %v397_v50 = vpack.c.bf16 %v301_v47, %v285_v46  ;;  %v6665_v52 = vld [vmem:[#allocation7 + $0x18c] ss:$16 sps:$4 sm:$0xff]   ;;  %v6675_v59 = vld [vmem:[#allocation7 + $0x1c4] ss:$16 sps:$4 sm:$0xff]  }
  0x9f   : > { %3564 = vmatprep.subr.bf16.mxu0 %v6621_v20  ;;  %4132 = vmatprep.subr.bf16.mxu1 %v6623_v21  ;;  %v6668_v54 = vld [vmem:[#allocation7 + $0x188] ss:$16 sps:$4 sm:$0xff]   ;;  %v6671_v56 = vld [vmem:[#allocation7 + $0x1ac] ss:$16 sps:$4 sm:$0xff]   ;;  %v6679_v61 = vld [vmem:[#allocation7 + $0x1c0] ss:$16 sps:$4 sm:$0xff]  }
  0xa0   : > { %3586 = vmatprep.mubr.bf16.mxu0 %v397_v50  ;;  %4154 = vmatprep.mubr.bf16.mxu1 %v397_v50  ;;  %v6674_v58 = vld [vmem:[#allocation7 + $0x1a8] ss:$16 sps:$4 sm:$0xff]   ;;  %v6677_v60 = vld [vmem:[#allocation7 + $0x1cc] ss:$16 sps:$4 sm:$0xff]   ;;  %v6681_v63 = vld [vmem:[#allocation7 + $0x1e4] ss:$16 sps:$4 sm:$0xff]  }
  0xa1   : > { %v6680_v62 = vld [vmem:[#allocation7 + $0x1c8] ss:$16 sps:$4 sm:$0xff]   ;;  %v6683_v0 = vld [vmem:[#allocation7 + $0x1ec] ss:$16 sps:$4 sm:$0xff]   ;;  %v6685_v1 = vld [vmem:[#allocation7 + $0x1e0] ss:$16 sps:$4 sm:$0xff]  }
  0xa2   : > { %3565 = vmatpush1.bf16.msra.mxu0 %v6625_v22  ;;  %4133 = vmatpush1.bf16.msra.mxu1 %v6626_v23  ;;  %v6686_v2 = vld [vmem:[#allocation7 + $0x1e8] ss:$16 sps:$4 sm:$0xff]   ;;  %v6689_v3 = vld [vmem:[#allocation7 + $0x204] ss:$16 sps:$4 sm:$0xff]   ;;  %v6692_v6 = vld [vmem:[#allocation7 + $0x20c] ss:$16 sps:$4 sm:$0xff]  }
  0xa3   : > { %3566 = vmatprep.subr.bf16.mxu0 %v6627_v24  ;;  %4134 = vmatprep.subr.bf16.mxu1 %v6629_v25  ;;  %v284_v4 = vld [vmem:[%s7816_s30] sm:$0xff]  ;;  %v6690_v8 = vld [vmem:[#allocation7 + $0x208] ss:$16 sps:$4 sm:$0xff]   ;;  %v6698_v11 = vld [vmem:[#allocation7 + $0x22c] ss:$16 sps:$4 sm:$0xff]   ;;  %s5732_s27 = sshll.u32 %s7812_s7, 4 }
  0xa4   : > { %v300_v5 = vld [vmem:[%s7816_s30 + $0x80] sm:$0xff]  ;;  %v6696_v13 = vld [vmem:[#allocation7 + $0x228] ss:$16 sps:$4 sm:$0xff]   ;;  %v6704_v15 = vld [vmem:[#allocation7 + $0x24c] ss:$16 sps:$4 sm:$0xff]   ;;  %s6250_s28 = sshll.u32 %s7640_s4, 8 }
  0xa5   : > { %v6687_v7 = vld [vmem:[#allocation7 + $0x200] ss:$16 sps:$4 sm:$0xff]   ;;  %v396_v9 = vpack.c.bf16 %v300_v5, %v284_v4  ;;  %v6695_v10 = vld [vmem:[#allocation7 + $0x224] ss:$16 sps:$4 sm:$0xff]   ;;  %v317_v16 = vld [vmem:[%s7816_s30 + $0x108] sm:$0xff]  ;;  %s283_s6 = scalar_lea.vmem [#allocation12], %s5732_s27  ;;  %s8577_s17 = scalar_lea.hbm %s8626_s5, %s6250_s28 }
  0xa6   : > { %3567 = vmatpush1.bf16.msra.mxu0 %v6631_v26  ;;  %4135 = vmatpush1.bf16.msra.mxu1 %v6632_v27  ;;  %v6693_v12 = vld [vmem:[#allocation7 + $0x220] ss:$16 sps:$4 sm:$0xff]   ;;  %v6701_v14 = vld [vmem:[#allocation7 + $0x244] ss:$16 sps:$4 sm:$0xff]   ;;  %v333_v17 = vld [vmem:[%s7816_s30 + $0x188] sm:$0xff]  ;;  %s5622_s10 = sshll.u32 %s283_s6, 4  ;;  %s8579_s10 = int_to_ptr.vmem [resolvable:$true] %s5622_s10 }
  0xa7   : > { %3568 = vmatprep.subr.bf16.mxu0 %v6633_v28  ;;  %4136 = vmatprep.subr.bf16.mxu1 %v6635_v29  ;;  %v6699_v18 = vld [vmem:[#allocation7 + $0x240] ss:$16 sps:$4 sm:$0xff]   ;;  %v6702_v19 = vld [vmem:[#allocation7 + $0x248] ss:$16 sps:$4 sm:$0xff]   ;;  %v413_v20 = vpack.c.bf16 %v333_v17, %v317_v16  ;;  %v6707_v21 = vld [vmem:[#allocation7 + $0x264] ss:$16 sps:$4 sm:$0xff]  }
  0xa8   : > { %v6710_v22 = vld [vmem:[#allocation7 + $0x26c] ss:$16 sps:$4 sm:$0xff]   ;;  %v316_v23 = vld [vmem:[%s7816_s30 + $0x100] sm:$0xff]  ;;  %v6708_v26 = vld [vmem:[#allocation7 + $0x268] ss:$16 sps:$4 sm:$0xff]   ;;  %s5608_s4 = scalar_lea.sflag [#allocation6], %s7812_s7 }
  0xa9   : > { %v332_v24 = vld [vmem:[%s7816_s30 + $0x180] sm:$0xff]  ;;  %v6716_v29 = vld [vmem:[#allocation7 + $0x28c] ss:$16 sps:$4 sm:$0xff]   ;;  %v6750_v4 = vld [vmem:[#allocation7 + $0x348] ss:$16 sps:$4 sm:$0xff]   ;;  %s7499_s9 = scalar_lea.vmem %s8579_s10, 256 }
  0xaa   : > { %3569 = vmatpush1.bf16.msra.mxu0 %v6637_v30  ;;  %4137 = vmatpush1.bf16.msra.mxu1 %v6638_v31  ;;  %v6705_v25 = vld [vmem:[#allocation7 + $0x260] ss:$16 sps:$4 sm:$0xff]   ;;  %v412_v27 = vpack.c.bf16 %v332_v24, %v316_v23  ;;  %v6713_v28 = vld [vmem:[#allocation7 + $0x284] ss:$16 sps:$4 sm:$0xff]   ;;  %v349_v30 = vld [vmem:[%s7816_s30 + $0x208] sm:$0xff]  ;;  %p7500_p10 = scmp.ne.s32.totalorder %s8579_s10, %s7499_s9  ;;  %s7585_s19 = smov [#allocation12]  }
  0xab   : > { %3570 = vmatprep.subr.bf16.mxu0 %v6639_v32  ;;  %4138 = vmatprep.subr.bf16.mxu1 %v6641_v33  ;;  %v365_v31 = vld [vmem:[%s7816_s30 + $0x288] sm:$0xff]  ;;  %v6711_v32 = vld [vmem:[#allocation7 + $0x280] ss:$16 sps:$4 sm:$0xff]   ;;  %v6755_v5 = vld [vmem:[#allocation7 + $0x364] ss:$16 sps:$4 sm:$0xff]   ;;  %s7503_s24 = sshll.u32 %s7585_s19, 4  ;;  %s7504_s24 = int_to_ptr.vmem [resolvable:$false] %s7503_s24 }
  0xac   : > { %v429_v33 = vpack.c.bf16 %v365_v31, %v349_v30  ;;  %v380_v46 = vld [vmem:[%s7816_s30 + $0x300] sm:$0xff]  ;;  %v6734_v50 = vld [vmem:[#allocation7 + $0x2ec] ss:$16 sps:$4 sm:$0xff]   ;;  %v6768_v16 = vld [vmem:[#allocation7 + $0x3a8] ss:$16 sps:$4 sm:$0xff]   ;;  %p7501_p3 = pnand %p7500_p10, %p7764_p5  ;;  %s7505_s8 = scalar_lea.vmem %s7504_s24, 512 }
  0xad   : > { %v6723_v47 = vld [vmem:[#allocation7 + $0x2c0] ss:$16 sps:$4 sm:$0xff]   ;;  %v6773_v17 = vld [vmem:[#allocation7 + $0x3c4] ss:$16 sps:$4 sm:$0xff]   ;;  %v6780_v24 = vld [vmem:[#allocation7 + $0x3e8] ss:$16 sps:$4 sm:$0xff]   ;;  %p7506_p12 = scmp.lt.s32.totalorder %s8579_s10, %s7504_s24  ;;  %p7507_p2 = scmp.lt.s32.totalorder %s7505_s8, %s7499_s9 }
  0xae   : > { %3571 = vmatpush1.bf16.msra.mxu0 %v6643_v34  ;;  %4139 = vmatpush1.bf16.msra.mxu1 %v6644_v35  ;;  %v6714_v34 = vld [vmem:[#allocation7 + $0x288] ss:$16 sps:$4 sm:$0xff]   ;;  %v6719_v35 = vld [vmem:[#allocation7 + $0x2a4] ss:$16 sps:$4 sm:$0xff]   ;;  %v6777_v23 = vld [vmem:[#allocation7 + $0x3e0] ss:$16 sps:$4 sm:$0xff]   ;;  %p7502_p7 = pneg %p7501_p3 }
  0xaf   : > { %3572 = vmatprep.subr.bf16.mxu0 %v6645_v36  ;;  %4140 = vmatprep.subr.bf16.mxu1 %v6647_v37  ;;  %v6722_v36 = vld [vmem:[#allocation7 + $0x2ac] ss:$16 sps:$4 sm:$0xff]   ;;  %v348_v37 = vld [vmem:[%s7816_s30 + $0x200] sm:$0xff]  ;;  %p7508_p1 = por %p7507_p2, %p7506_p12 }
  0xb0   : > { %v319_v30 = vld [vmem:[%s7816_s30 + $0x118] sm:$0xff] }
  0xb1   : > { %v335_v31 = vld [vmem:[%s7816_s30 + $0x198] sm:$0xff]  ;;  %p7509_p4 = pnand %p7508_p1, %p7502_p7 }
  0xb2   : > { %3573 = vmatpush1.bf16.msra.mxu0 %v6649_v38  ;;  %4141 = vmatpush1.bf16.msra.mxu1 %v6650_v39  ;;  %v364_v38 = vld [vmem:[%s7816_s30 + $0x280] sm:$0xff] }
  0xb3   : > { %3574 = vmatprep.subr.bf16.mxu0 %v6651_v40  ;;  %4142 = vmatprep.subr.bf16.mxu1 %v6653_v41  ;;  %v428_v39 = vpack.c.bf16 %v364_v38, %v348_v37  ;;  %v6717_v40 = vld [vmem:[#allocation7 + $0x2a0] ss:$16 sps:$4 sm:$0xff]   ;;  %v6720_v41 = vld [vmem:[#allocation7 + $0x2a8] ss:$16 sps:$4 sm:$0xff]   ;;  %v415_v37 = vpack.c.bf16 %v335_v31, %v319_v30  ;;  %v6857_v31 = vld [vmem:[#allocation7 + $0x584] ss:$16 sps:$4 sm:$0xff]  }
  0xb4   : > { %v6792_v38 = vld [vmem:[#allocation7 + $0x428] ss:$16 sps:$4 sm:$0xff]  }
  0xb5   : > { %v6852_v30 = vld [vmem:[#allocation7 + $0x568] ss:$16 sps:$4 sm:$0xff]  }
  0xb6   : > { %3575 = vmatpush1.bf16.msra.mxu0 %v6655_v42  ;;  %4143 = vmatpush1.bf16.msra.mxu1 %v6656_v43  ;;  %v381_v42 = vld [vmem:[%s7816_s30 + $0x308] sm:$0xff]  ;;  %v6725_v43 = vld [vmem:[#allocation7 + $0x2c4] ss:$16 sps:$4 sm:$0xff]  }
  0xb7   : > { %3576 = vmatprep.subr.bf16.mxu0 %v6657_v44  ;;  %4144 = vmatprep.subr.bf16.mxu1 %v6659_v45  ;;  %v6728_v44 = vld [vmem:[#allocation7 + $0x2cc] ss:$16 sps:$4 sm:$0xff]   ;;  %v445_v45 = vpack.c.bf16 %v381_v42, %v381_v42 }
  0xb8   : > { %v6800_v42 = vld [vmem:[#allocation7 + $0x44c] ss:$16 sps:$4 sm:$0xff]  }
  0xba   : > { %3577 = vmatpush1.bf16.msra.mxu0 %v6661_v48  ;;  %4145 = vmatpush1.bf16.msra.mxu1 %v6662_v49  ;;  %v6726_v48 = vld [vmem:[#allocation7 + $0x2c8] ss:$16 sps:$4 sm:$0xff]   ;;  %v6731_v49 = vld [vmem:[#allocation7 + $0x2e4] ss:$16 sps:$4 sm:$0xff]  }
  0xbb   : > { %3578 = vmatprep.subr.bf16.mxu0 %v6663_v51  ;;  %4146 = vmatprep.subr.bf16.mxu1 %v6665_v52  ;;  %v444_v51 = vpack.c.bf16 %v380_v46, %v380_v46  ;;  %v287_v52 = vld [vmem:[%s7816_s30 + $0x18] sm:$0xff] }
  0xbc   : > { %v367_v46 = vld [vmem:[%s7816_s30 + $0x298] sm:$0xff] }
  0xbe   : > { %3579 = vmatpush1.bf16.msra.mxu0 %v6667_v53  ;;  %4147 = vmatpush1.bf16.msra.mxu1 %v6668_v54  ;;  %v303_v53 = vld [vmem:[%s7816_s30 + $0x98] sm:$0xff]  ;;  %v6729_v54 = vld [vmem:[#allocation7 + $0x2e0] ss:$16 sps:$4 sm:$0xff]  }
  0xbf   : > { %3580 = vmatprep.subr.bf16.mxu0 %v6669_v55  ;;  %4148 = vmatprep.subr.bf16.mxu1 %v6671_v56  ;;  %v399_v55 = vpack.c.bf16 %v303_v53, %v287_v52  ;;  %v6732_v56 = vld [vmem:[#allocation7 + $0x2e8] ss:$16 sps:$4 sm:$0xff]   ;;  %v6809_v53 = vld [vmem:[#allocation7 + $0x484] ss:$16 sps:$4 sm:$0xff]  }
  0xc0   : > { %v6804_v52 = vld [vmem:[#allocation7 + $0x468] ss:$16 sps:$4 sm:$0xff]  }
  0xc2   : > { %3581 = vmatpush1.bf16.msra.mxu0 %v6673_v57  ;;  %4149 = vmatpush1.bf16.msra.mxu1 %v6674_v58  ;;  %v6737_v57 = vld [vmem:[#allocation7 + $0x304] ss:$16 sps:$4 sm:$0xff]   ;;  %v6740_v58 = vld [vmem:[#allocation7 + $0x30c] ss:$16 sps:$4 sm:$0xff]  }
  0xc3   : > { %3582 = vmatprep.subr.bf16.mxu0 %v6675_v59  ;;  %4150 = vmatprep.subr.bf16.mxu1 %v6677_v60  ;;  %v6735_v59 = vld [vmem:[#allocation7 + $0x300] ss:$16 sps:$4 sm:$0xff]   ;;  %v6738_v60 = vld [vmem:[#allocation7 + $0x308] ss:$16 sps:$4 sm:$0xff]  }
  0xc6   : > { %3583 = vmatpush1.bf16.msra.mxu0 %v6679_v61  ;;  %4151 = vmatpush1.bf16.msra.mxu1 %v6680_v62  ;;  %v6743_v61 = vld [vmem:[#allocation7 + $0x324] ss:$16 sps:$4 sm:$0xff]   ;;  %v6746_v62 = vld [vmem:[#allocation7 + $0x32c] ss:$16 sps:$4 sm:$0xff]  }
  0xc7   : > { %3584 = vmatprep.subr.bf16.mxu0 %v6681_v63  ;;  %4152 = vmatprep.subr.bf16.mxu1 %v6683_v0  ;;  %v6741_v63 = vld [vmem:[#allocation7 + $0x320] ss:$16 sps:$4 sm:$0xff]   ;;  %v6744_v0 = vld [vmem:[#allocation7 + $0x328] ss:$16 sps:$4 sm:$0xff]  }
  0xca   : > { %3585 = vmatpush1.bf16.msra.mxu0 %v6685_v1  ;;  %4153 = vmatpush1.bf16.msra.mxu1 %v6686_v2  ;;  %v6749_v1 = vld [vmem:[#allocation7 + $0x344] ss:$16 sps:$4 sm:$0xff]   ;;  %v6752_v2 = vld [vmem:[#allocation7 + $0x34c] ss:$16 sps:$4 sm:$0xff]  }
  0xcb   : > { %3625 = vmatprep.subr.bf16.mxu0 %v6689_v3  ;;  %4193 = vmatprep.subr.bf16.mxu1 %v6692_v6  ;;  %v6747_v3 = vld [vmem:[#allocation7 + $0x340] ss:$16 sps:$4 sm:$0xff]   ;;  %v6758_v6 = vld [vmem:[#allocation7 + $0x36c] ss:$16 sps:$4 sm:$0xff]  }
  0xcd   : > { %3587 = vmatmul.mubr.bf16.vlgmr.msra.gmra.mrb[0].mxu0 %v396_v9  ;;  %4155 = vmatmul.mubr.bf16.vlgmr.msra.gmra.mrb[0].mxu1 %v396_v9  ;;  %v6761_v9 = vld [vmem:[#allocation7 + $0x384] ss:$16 sps:$4 sm:$0xff]  }
  0xce   : > { %3626 = vmatpush1.bf16.msra.mxu0 %v6687_v7  ;;  %4194 = vmatpush1.bf16.msra.mxu1 %v6690_v8  ;;  %v6753_v7 = vld [vmem:[#allocation7 + $0x360] ss:$16 sps:$4 sm:$0xff]   ;;  %v6756_v8 = vld [vmem:[#allocation7 + $0x368] ss:$16 sps:$4 sm:$0xff]  }
  0xcf   : > { %3627 = vmatprep.subr.bf16.mxu0 %v6695_v10  ;;  %4195 = vmatprep.subr.bf16.mxu1 %v6698_v11  ;;  %v6764_v10 = vld [vmem:[#allocation7 + $0x38c] ss:$16 sps:$4 sm:$0xff]   ;;  %v6759_v11 = vld [vmem:[#allocation7 + $0x380] ss:$16 sps:$4 sm:$0xff]  }
  0xd0   : > { %3596 = vmatprep.mubr.bf16.mxu0 %v413_v20  ;;  %4164 = vmatprep.mubr.bf16.mxu1 %v413_v20  ;;  %v6774_v20 = vld [vmem:[#allocation7 + $0x3c8] ss:$16 sps:$4 sm:$0xff]  }
  0xd2   : > { %3628 = vmatpush1.bf16.msra.mxu0 %v6693_v12  ;;  %4196 = vmatpush1.bf16.msra.mxu1 %v6696_v13  ;;  %v6762_v12 = vld [vmem:[#allocation7 + $0x388] ss:$16 sps:$4 sm:$0xff]   ;;  %v6767_v13 = vld [vmem:[#allocation7 + $0x3a4] ss:$16 sps:$4 sm:$0xff]  }
  0xd3   : > { %3629 = vmatprep.subr.bf16.mxu0 %v6701_v14  ;;  %4197 = vmatprep.subr.bf16.mxu1 %v6704_v15  ;;  %v6770_v14 = vld [vmem:[#allocation7 + $0x3ac] ss:$16 sps:$4 sm:$0xff]   ;;  %v6765_v15 = vld [vmem:[#allocation7 + $0x3a0] ss:$16 sps:$4 sm:$0xff]  }
  0xd5   : > { %3597 = vmatmul.mubr.bf16.gmra.mrb[4].mxu0 %v412_v27  ;;  %4165 = vmatmul.mubr.bf16.gmra.mrb[4].mxu1 %v412_v27  ;;  %v302_v27 = vld [vmem:[%s7816_s30 + $0x90] sm:$0xff] }
  0xd6   : > { %3630 = vmatpush1.bf16.msra.mxu0 %v6699_v18  ;;  %4198 = vmatpush1.bf16.msra.mxu1 %v6702_v19  ;;  %v6776_v18 = vld [vmem:[#allocation7 + $0x3cc] ss:$16 sps:$4 sm:$0xff]   ;;  %v6771_v19 = vld [vmem:[#allocation7 + $0x3c0] ss:$16 sps:$4 sm:$0xff]  }
  0xd7   : > { %3631 = vmatprep.subr.bf16.mxu0 %v6707_v21  ;;  %4199 = vmatprep.subr.bf16.mxu1 %v6710_v22  ;;  %v6779_v21 = vld [vmem:[#allocation7 + $0x3e4] ss:$16 sps:$4 sm:$0xff]   ;;  %v6782_v22 = vld [vmem:[#allocation7 + $0x3ec] ss:$16 sps:$4 sm:$0xff]  }
  0xd8   : > { %3606 = vmatprep.mubr.bf16.mxu0 %v429_v33  ;;  %4174 = vmatprep.mubr.bf16.mxu1 %v429_v33  ;;  %v6786_v33 = vld [vmem:[#allocation7 + $0x408] ss:$16 sps:$4 sm:$0xff]  }
  0xda   : > { %3632 = vmatpush1.bf16.msra.mxu0 %v6705_v25  ;;  %4200 = vmatpush1.bf16.msra.mxu1 %v6708_v26  ;;  %v6785_v25 = vld [vmem:[#allocation7 + $0x404] ss:$16 sps:$4 sm:$0xff]  }
  0xdb   : > { %3633 = vmatprep.subr.bf16.mxu0 %v6713_v28  ;;  %4201 = vmatprep.subr.bf16.mxu1 %v6716_v29  ;;  %v286_v26 = vld [vmem:[%s7816_s30 + $0x10] sm:$0xff]  ;;  %v6788_v28 = vld [vmem:[#allocation7 + $0x40c] ss:$16 sps:$4 sm:$0xff]  }
  0xdc   : > { %v398_v29 = vpack.c.bf16 %v302_v27, %v286_v26  ;;  %v6846_v26 = vld [vmem:[#allocation7 + $0x548] ss:$16 sps:$4 sm:$0xff]   ;;  %v6851_v27 = vld [vmem:[#allocation7 + $0x564] ss:$16 sps:$4 sm:$0xff]  }
  0xdd   : > { %3607 = vmatmul.mubr.bf16.gmra.mrb[8].mxu0 %v428_v39  ;;  %4175 = vmatmul.mubr.bf16.gmra.mrb[8].mxu1 %v428_v39  ;;  %v6797_v39 = vld [vmem:[#allocation7 + $0x444] ss:$16 sps:$4 sm:$0xff]  }
  0xde   : > { %3634 = vmatpush1.bf16.msra.mxu0 %v6711_v32  ;;  %4202 = vmatpush1.bf16.msra.mxu1 %v6714_v34  ;;  %v6783_v32 = vld [vmem:[#allocation7 + $0x400] ss:$16 sps:$4 sm:$0xff]   ;;  %v6791_v34 = vld [vmem:[#allocation7 + $0x424] ss:$16 sps:$4 sm:$0xff]  }
  0xdf   : > { %3635 = vmatprep.subr.bf16.mxu0 %v6719_v35  ;;  %4203 = vmatprep.subr.bf16.mxu1 %v6722_v36  ;;  %v6794_v35 = vld [vmem:[#allocation7 + $0x42c] ss:$16 sps:$4 sm:$0xff]   ;;  %v6789_v36 = vld [vmem:[#allocation7 + $0x420] ss:$16 sps:$4 sm:$0xff]  }
  0xe0   : > { %3616 = vmatprep.mubr.bf16.mxu0 %v445_v45  ;;  %4184 = vmatprep.mubr.bf16.mxu1 %v445_v45  ;;  %v351_v45 = vld [vmem:[%s7816_s30 + $0x218] sm:$0xff] }
  0xe2   : > { %3636 = vmatpush1.bf16.msra.mxu0 %v6717_v40  ;;  %4204 = vmatpush1.bf16.msra.mxu1 %v6720_v41  ;;  %v318_v40 = vld [vmem:[%s7816_s30 + $0x110] sm:$0xff] }
  0xe3   : > { %3637 = vmatprep.subr.bf16.mxu0 %v6725_v43  ;;  %4205 = vmatprep.subr.bf16.mxu1 %v6728_v44  ;;  %v334_v41 = vld [vmem:[%s7816_s30 + $0x190] sm:$0xff] }
  0xe4   : > { %v6795_v43 = vld [vmem:[#allocation7 + $0x440] ss:$16 sps:$4 sm:$0xff]   ;;  %v414_v44 = vpack.c.bf16 %v334_v41, %v318_v40  ;;  %v6872_v40 = vld [vmem:[#allocation7 + $0x5cc] ss:$16 sps:$4 sm:$0xff]  }
  0xe5   : > { %3617 = vmatmul.mubr.bf16.gmra.mrb[12].mxu0 %v444_v51  ;;  %4185 = vmatmul.mubr.bf16.gmra.mrb[12].mxu1 %v444_v51  ;;  %v431_v51 = vpack.c.bf16 %v367_v46, %v351_v45  ;;  %v6867_v41 = vld [vmem:[#allocation7 + $0x5c0] ss:$16 sps:$4 sm:$0xff]   ;;  %v6876_v46 = vld [vmem:[#allocation7 + $0x5e8] ss:$16 sps:$4 sm:$0xff]  }
  0xe6   : > { %3638 = vmatpush1.bf16.msra.mxu0 %v6723_v47  ;;  %4206 = vmatpush1.bf16.msra.mxu1 %v6726_v48  ;;  %v6798_v47 = vld [vmem:[#allocation7 + $0x448] ss:$16 sps:$4 sm:$0xff]   ;;  %v6803_v48 = vld [vmem:[#allocation7 + $0x464] ss:$16 sps:$4 sm:$0xff]   ;;  %v6873_v45 = vld [vmem:[#allocation7 + $0x5e0] ss:$16 sps:$4 sm:$0xff]  }
  0xe7   : > { %3639 = vmatprep.subr.bf16.mxu0 %v6731_v49  ;;  %4207 = vmatprep.subr.bf16.mxu1 %v6734_v50  ;;  %v6806_v49 = vld [vmem:[#allocation7 + $0x46c] ss:$16 sps:$4 sm:$0xff]   ;;  %v6801_v50 = vld [vmem:[#allocation7 + $0x460] ss:$16 sps:$4 sm:$0xff]  }
  0xe8   : > { %3657 = vmatprep.mubr.bf16.mxu0 %v399_v55  ;;  %4225 = vmatprep.mubr.bf16.mxu1 %v399_v55  ;;  %v366_v55 = vld [vmem:[%s7816_s30 + $0x290] sm:$0xff] }
  0xea   : > { %3640 = vmatpush1.bf16.msra.mxu0 %v6729_v54  ;;  %4208 = vmatpush1.bf16.msra.mxu1 %v6732_v56  ;;  %v350_v54 = vld [vmem:[%s7816_s30 + $0x210] sm:$0xff]  ;;  %v6812_v56 = vld [vmem:[#allocation7 + $0x48c] ss:$16 sps:$4 sm:$0xff]  }
  0xeb   : > { %3641 = vmatprep.subr.bf16.mxu0 %v6737_v57  ;;  %4209 = vmatprep.subr.bf16.mxu1 %v6740_v58  ;;  %v6807_v57 = vld [vmem:[#allocation7 + $0x480] ss:$16 sps:$4 sm:$0xff]   ;;  %v6810_v58 = vld [vmem:[#allocation7 + $0x488] ss:$16 sps:$4 sm:$0xff]  }
  0xee   : > { %3642 = vmatpush1.bf16.msra.mxu0 %v6735_v59  ;;  %4210 = vmatpush1.bf16.msra.mxu1 %v6738_v60  ;;  %v430_v59 = vpack.c.bf16 %v366_v55, %v350_v54  ;;  %v383_v60 = vld [vmem:[%s7816_s30 + $0x318] sm:$0xff]  ;;  %v6879_v54 = vld [vmem:[#allocation7 + $0x600] ss:$16 sps:$4 sm:$0xff]  }
  0xef   : > { %3643 = vmatprep.subr.bf16.mxu0 %v6743_v61  ;;  %4211 = vmatprep.subr.bf16.mxu1 %v6746_v62  ;;  %v6815_v61 = vld [vmem:[#allocation7 + $0x4a4] ss:$16 sps:$4 sm:$0xff]   ;;  %v6818_v62 = vld [vmem:[#allocation7 + $0x4ac] ss:$16 sps:$4 sm:$0xff]   ;;  %v6882_v55 = vld [vmem:[#allocation7 + $0x608] ss:$16 sps:$4 sm:$0xff]  }
  0xf2   : > { %3644 = vmatpush1.bf16.msra.mxu0 %v6741_v63  ;;  %4212 = vmatpush1.bf16.msra.mxu1 %v6744_v0  ;;  %v6813_v63 = vld [vmem:[#allocation7 + $0x4a0] ss:$16 sps:$4 sm:$0xff]   ;;  %v447_v0 = vpack.c.bf16 %v383_v60, %v383_v60  ;;  %v6888_v60 = vld [vmem:[#allocation7 + $0x628] ss:$16 sps:$4 sm:$0xff]  }
  0xf3   : > { %3645 = vmatprep.subr.bf16.mxu0 %v6749_v1  ;;  %4213 = vmatprep.subr.bf16.mxu1 %v6752_v2  ;;  %v6816_v1 = vld [vmem:[#allocation7 + $0x4a8] ss:$16 sps:$4 sm:$0xff]   ;;  %v6821_v2 = vld [vmem:[#allocation7 + $0x4c4] ss:$16 sps:$4 sm:$0xff]  }
  0xf6   : > { %3646 = vmatpush1.bf16.msra.mxu0 %v6747_v3  ;;  %4214 = vmatpush1.bf16.msra.mxu1 %v6750_v4  ;;  %v382_v3 = vld [vmem:[%s7816_s30 + $0x310] sm:$0xff]  ;;  %v6824_v4 = vld [vmem:[#allocation7 + $0x4cc] ss:$16 sps:$4 sm:$0xff]  }
  0xf7   : > { %3647 = vmatprep.subr.bf16.mxu0 %v6755_v5  ;;  %4215 = vmatprep.subr.bf16.mxu1 %v6758_v6  ;;  %v6819_v5 = vld [vmem:[#allocation7 + $0x4c0] ss:$16 sps:$4 sm:$0xff]   ;;  %v6822_v6 = vld [vmem:[#allocation7 + $0x4c8] ss:$16 sps:$4 sm:$0xff]  }
  0xfa   : > { %3648 = vmatpush1.bf16.msra.mxu0 %v6753_v7  ;;  %4216 = vmatpush1.bf16.msra.mxu1 %v6756_v8  ;;  %v446_v7 = vpack.c.bf16 %v382_v3, %v382_v3  ;;  %v289_v8 = vld [vmem:[%s7816_s30 + $0x28] sm:$0xff] }
  0xfb   : > { %3649 = vmatprep.subr.bf16.mxu0 %v6761_v9  ;;  %4217 = vmatprep.subr.bf16.mxu1 %v6764_v10  ;;  %v305_v9 = vld [vmem:[%s7816_s30 + $0xa8] sm:$0xff]  ;;  %v6827_v10 = vld [vmem:[#allocation7 + $0x4e4] ss:$16 sps:$4 sm:$0xff]  }
  0xfc   : > { %v369_v3 = vld [vmem:[%s7816_s30 + $0x2a8] sm:$0xff] }
  0xfe   : > { %3650 = vmatpush1.bf16.msra.mxu0 %v6759_v11  ;;  %4218 = vmatpush1.bf16.msra.mxu1 %v6762_v12  ;;  %v6830_v11 = vld [vmem:[#allocation7 + $0x4ec] ss:$16 sps:$4 sm:$0xff]   ;;  %v401_v12 = vpack.c.bf16 %v305_v9, %v289_v8  ;;  %v6897_v8 = vld [vmem:[#allocation7 + $0x660] ss:$16 sps:$4 sm:$0xff]  }
  0xff   : > { %3651 = vmatprep.subr.bf16.mxu0 %v6767_v13  ;;  %4219 = vmatprep.subr.bf16.mxu1 %v6770_v14  ;;  %v6825_v13 = vld [vmem:[#allocation7 + $0x4e0] ss:$16 sps:$4 sm:$0xff]   ;;  %v6828_v14 = vld [vmem:[#allocation7 + $0x4e8] ss:$16 sps:$4 sm:$0xff]  }
 0x102   : > { %3652 = vmatpush1.bf16.msra.mxu0 %v6765_v15  ;;  %4220 = vmatpush1.bf16.msra.mxu1 %v6768_v16  ;;  %v6833_v15 = vld [vmem:[#allocation7 + $0x504] ss:$16 sps:$4 sm:$0xff]   ;;  %v6836_v16 = vld [vmem:[#allocation7 + $0x50c] ss:$16 sps:$4 sm:$0xff]  }
 0x103   : > { %3653 = vmatprep.subr.bf16.mxu0 %v6773_v17  ;;  %4221 = vmatprep.subr.bf16.mxu1 %v6776_v18  ;;  %v6831_v17 = vld [vmem:[#allocation7 + $0x500] ss:$16 sps:$4 sm:$0xff]   ;;  %v6834_v18 = vld [vmem:[#allocation7 + $0x508] ss:$16 sps:$4 sm:$0xff]  }
 0x106   : > { %3654 = vmatpush1.bf16.msra.mxu0 %v6771_v19  ;;  %4222 = vmatpush1.bf16.msra.mxu1 %v6774_v20  ;;  %v6839_v19 = vld [vmem:[#allocation7 + $0x524] ss:$16 sps:$4 sm:$0xff]   ;;  %v6842_v20 = vld [vmem:[#allocation7 + $0x52c] ss:$16 sps:$4 sm:$0xff]  }
 0x107   : > { %3655 = vmatprep.subr.bf16.mxu0 %v6779_v21  ;;  %4223 = vmatprep.subr.bf16.mxu1 %v6782_v22  ;;  %v6837_v21 = vld [vmem:[#allocation7 + $0x520] ss:$16 sps:$4 sm:$0xff]   ;;  %v6840_v22 = vld [vmem:[#allocation7 + $0x528] ss:$16 sps:$4 sm:$0xff]  }
 0x10a   : > { %3656 = vmatpush1.bf16.msra.mxu0 %v6777_v23  ;;  %4224 = vmatpush1.bf16.msra.mxu1 %v6780_v24  ;;  %v6845_v23 = vld [vmem:[#allocation7 + $0x544] ss:$16 sps:$4 sm:$0xff]   ;;  %v6848_v24 = vld [vmem:[#allocation7 + $0x54c] ss:$16 sps:$4 sm:$0xff]  }
 0x10b   : > { %3696 = vmatprep.subr.bf16.mxu0 %v6785_v25  ;;  %4264 = vmatprep.subr.bf16.mxu1 %v6788_v28  ;;  %v6843_v25 = vld [vmem:[#allocation7 + $0x540] ss:$16 sps:$4 sm:$0xff]   ;;  %v6854_v28 = vld [vmem:[#allocation7 + $0x56c] ss:$16 sps:$4 sm:$0xff]  }
 0x10d   : > { %3658 = vmatmul.mubr.bf16.vlgmr.msra.gmra.mrb[0].mxu0 %v398_v29  ;;  %4226 = vmatmul.mubr.bf16.vlgmr.msra.gmra.mrb[0].mxu1 %v398_v29  ;;  %v6849_v29 = vld [vmem:[#allocation7 + $0x560] ss:$16 sps:$4 sm:$0xff]  }
 0x10e   : > { %3697 = vmatpush1.bf16.msra.mxu0 %v6783_v32  ;;  %4265 = vmatpush1.bf16.msra.mxu1 %v6786_v33  ;;  %v6860_v32 = vld [vmem:[#allocation7 + $0x58c] ss:$16 sps:$4 sm:$0xff]   ;;  %v6855_v33 = vld [vmem:[#allocation7 + $0x580] ss:$16 sps:$4 sm:$0xff]  }
 0x10f   : > { %3698 = vmatprep.subr.bf16.mxu0 %v6791_v34  ;;  %4266 = vmatprep.subr.bf16.mxu1 %v6794_v35  ;;  %v6858_v34 = vld [vmem:[#allocation7 + $0x588] ss:$16 sps:$4 sm:$0xff]   ;;  %v6863_v35 = vld [vmem:[#allocation7 + $0x5a4] ss:$16 sps:$4 sm:$0xff]  }
 0x110   : > { %3667 = vmatprep.mubr.bf16.mxu0 %v415_v37  ;;  %4235 = vmatprep.mubr.bf16.mxu1 %v415_v37  ;;  %v6861_v37 = vld [vmem:[#allocation7 + $0x5a0] ss:$16 sps:$4 sm:$0xff]  }
 0x112   : > { %3699 = vmatpush1.bf16.msra.mxu0 %v6789_v36  ;;  %4267 = vmatpush1.bf16.msra.mxu1 %v6792_v38  ;;  %v6866_v36 = vld [vmem:[#allocation7 + $0x5ac] ss:$16 sps:$4 sm:$0xff]   ;;  %v6864_v38 = vld [vmem:[#allocation7 + $0x5a8] ss:$16 sps:$4 sm:$0xff]  }
 0x113   : > { %3700 = vmatprep.subr.bf16.mxu0 %v6797_v39  ;;  %4268 = vmatprep.subr.bf16.mxu1 %v6800_v42  ;;  %v6869_v39 = vld [vmem:[#allocation7 + $0x5c4] ss:$16 sps:$4 sm:$0xff]   ;;  %v6870_v42 = vld [vmem:[#allocation7 + $0x5c8] ss:$16 sps:$4 sm:$0xff]  }
 0x115   : > { %3668 = vmatmul.mubr.bf16.gmra.mrb[4].mxu0 %v414_v44  ;;  %4236 = vmatmul.mubr.bf16.gmra.mrb[4].mxu1 %v414_v44  ;;  %v6878_v44 = vld [vmem:[#allocation7 + $0x5ec] ss:$16 sps:$4 sm:$0xff]  }
 0x116   : > { %3701 = vmatpush1.bf16.msra.mxu0 %v6795_v43  ;;  %4269 = vmatpush1.bf16.msra.mxu1 %v6798_v47  ;;  %v6875_v43 = vld [vmem:[#allocation7 + $0x5e4] ss:$16 sps:$4 sm:$0xff]  }
 0x117   : > { %3702 = vmatprep.subr.bf16.mxu0 %v6803_v48  ;;  %4270 = vmatprep.subr.bf16.mxu1 %v6806_v49  ;;  %v288_v47 = vld [vmem:[%s7816_s30 + $0x20] sm:$0xff] }
 0x118   : > { %3677 = vmatprep.mubr.bf16.mxu0 %v431_v51  ;;  %4245 = vmatprep.mubr.bf16.mxu1 %v431_v51  ;;  %v304_v48 = vld [vmem:[%s7816_s30 + $0xa0] sm:$0xff]  ;;  %v321_v51 = vld [vmem:[%s7816_s30 + $0x128] sm:$0xff] }
 0x119   : > { %v6881_v49 = vld [vmem:[#allocation7 + $0x604] ss:$16 sps:$4 sm:$0xff]  }
 0x11a   : > { %3703 = vmatpush1.bf16.msra.mxu0 %v6801_v50  ;;  %4271 = vmatpush1.bf16.msra.mxu1 %v6804_v52  ;;  %v6884_v50 = vld [vmem:[#allocation7 + $0x60c] ss:$16 sps:$4 sm:$0xff]   ;;  %v400_v52 = vpack.c.bf16 %v304_v48, %v288_v47  ;;  %v6939_v47 = vld [vmem:[#allocation7 + $0x740] ss:$16 sps:$4 sm:$0xff]   ;;  %v6942_v48 = vld [vmem:[#allocation7 + $0x748] ss:$16 sps:$4 sm:$0xff]  }
 0x11b   : > { %3704 = vmatprep.subr.bf16.mxu0 %v6809_v53  ;;  %4272 = vmatprep.subr.bf16.mxu1 %v6812_v56  ;;  %v337_v53 = vld [vmem:[%s7816_s30 + $0x1a8] sm:$0xff]  ;;  %v6887_v56 = vld [vmem:[#allocation7 + $0x624] ss:$16 sps:$4 sm:$0xff]  }
 0x11d   : > { %3678 = vmatmul.mubr.bf16.gmra.mrb[8].mxu0 %v430_v59  ;;  %4246 = vmatmul.mubr.bf16.gmra.mrb[8].mxu1 %v430_v59  ;;  %v417_v59 = vpack.c.bf16 %v337_v53, %v321_v51  ;;  %v6945_v51 = vld [vmem:[#allocation7 + $0x760] ss:$16 sps:$4 sm:$0xff]   ;;  %v6953_v53 = vld [vmem:[#allocation7 + $0x784] ss:$16 sps:$4 sm:$0xff]  }
 0x11e   : > { %3705 = vmatpush1.bf16.msra.mxu0 %v6807_v57  ;;  %4273 = vmatpush1.bf16.msra.mxu1 %v6810_v58  ;;  %v6890_v57 = vld [vmem:[#allocation7 + $0x62c] ss:$16 sps:$4 sm:$0xff]   ;;  %v6885_v58 = vld [vmem:[#allocation7 + $0x620] ss:$16 sps:$4 sm:$0xff]  }
 0x11f   : > { %3706 = vmatprep.subr.bf16.mxu0 %v6815_v61  ;;  %4274 = vmatprep.subr.bf16.mxu1 %v6818_v62  ;;  %v320_v61 = vld [vmem:[%s7816_s30 + $0x120] sm:$0xff] }
 0x120   : > { %3687 = vmatprep.mubr.bf16.mxu0 %v447_v0  ;;  %4255 = vmatprep.mubr.bf16.mxu1 %v447_v0  ;;  %v336_v62 = vld [vmem:[%s7816_s30 + $0x1a0] sm:$0xff]  ;;  %v6896_v0 = vld [vmem:[#allocation7 + $0x64c] ss:$16 sps:$4 sm:$0xff]  }
 0x122   : > { %3707 = vmatpush1.bf16.msra.mxu0 %v6813_v63  ;;  %4275 = vmatpush1.bf16.msra.mxu1 %v6816_v1  ;;  %v6893_v63 = vld [vmem:[#allocation7 + $0x644] ss:$16 sps:$4 sm:$0xff]   ;;  %v353_v1 = vld [vmem:[%s7816_s30 + $0x228] sm:$0xff] }
 0x123   : > { %3708 = vmatprep.subr.bf16.mxu0 %v6821_v2  ;;  %4276 = vmatprep.subr.bf16.mxu1 %v6824_v4  ;;  %v416_v2 = vpack.c.bf16 %v336_v62, %v320_v61  ;;  %v6891_v4 = vld [vmem:[#allocation7 + $0x640] ss:$16 sps:$4 sm:$0xff]   ;;  %v433_v9 = vpack.c.bf16 %v369_v3, %v353_v1  ;;  %v6965_v61 = vld [vmem:[#allocation7 + $0x7c4] ss:$16 sps:$4 sm:$0xff]   ;;  %v6968_v62 = vld [vmem:[#allocation7 + $0x7cc] ss:$16 sps:$4 sm:$0xff]  }
 0x124   : > { %v6971_v1 = vld [vmem:[#allocation7 + $0x7e4] ss:$16 sps:$4 sm:$0xff]   ;;  %v6969_v3 = vld [vmem:[#allocation7 + $0x7e0] ss:$16 sps:$4 sm:$0xff]  }
 0x125   : > { %3688 = vmatmul.mubr.bf16.gmra.mrb[12].mxu0 %v446_v7  ;;  %4256 = vmatmul.mubr.bf16.gmra.mrb[12].mxu1 %v446_v7  ;;  %v6902_v7 = vld [vmem:[#allocation7 + $0x66c] ss:$16 sps:$4 sm:$0xff]  }
 0x126   : > { %3709 = vmatpush1.bf16.msra.mxu0 %v6819_v5  ;;  %4277 = vmatpush1.bf16.msra.mxu1 %v6822_v6  ;;  %v6894_v5 = vld [vmem:[#allocation7 + $0x648] ss:$16 sps:$4 sm:$0xff]   ;;  %v6899_v6 = vld [vmem:[#allocation7 + $0x664] ss:$16 sps:$4 sm:$0xff]  }
 0x127   : > { %3710 = vmatprep.subr.bf16.mxu0 %v6827_v10  ;;  %4278 = vmatprep.subr.bf16.mxu1 %v6830_v11  ;;  %v6900_v10 = vld [vmem:[#allocation7 + $0x668] ss:$16 sps:$4 sm:$0xff]   ;;  %v352_v11 = vld [vmem:[%s7816_s30 + $0x220] sm:$0xff] }
 0x128   : > { %3728 = vmatprep.mubr.bf16.mxu0 %v401_v12  ;;  %4296 = vmatprep.mubr.bf16.mxu1 %v401_v12  ;;  %v368_v12 = vld [vmem:[%s7816_s30 + $0x2a0] sm:$0xff] }
 0x12a   : > { %3711 = vmatpush1.bf16.msra.mxu0 %v6825_v13  ;;  %4279 = vmatpush1.bf16.msra.mxu1 %v6828_v14  ;;  %v6905_v13 = vld [vmem:[#allocation7 + $0x684] ss:$16 sps:$4 sm:$0xff]   ;;  %v6908_v14 = vld [vmem:[#allocation7 + $0x68c] ss:$16 sps:$4 sm:$0xff]  }
 0x12b   : > { %3712 = vmatprep.subr.bf16.mxu0 %v6833_v15  ;;  %4280 = vmatprep.subr.bf16.mxu1 %v6836_v16  ;;  %v432_v15 = vpack.c.bf16 %v368_v12, %v352_v11  ;;  %v385_v16 = vld [vmem:[%s7816_s30 + $0x328] sm:$0xff]  ;;  %v323_v12 = vld [vmem:[%s7816_s30 + $0x138] sm:$0xff] }
 0x12e   : > { %3713 = vmatpush1.bf16.msra.mxu0 %v6831_v17  ;;  %4281 = vmatpush1.bf16.msra.mxu1 %v6834_v18  ;;  %v6903_v17 = vld [vmem:[#allocation7 + $0x680] ss:$16 sps:$4 sm:$0xff]   ;;  %v6906_v18 = vld [vmem:[#allocation7 + $0x688] ss:$16 sps:$4 sm:$0xff]  }
 0x12f   : > { %3714 = vmatprep.subr.bf16.mxu0 %v6839_v19  ;;  %4282 = vmatprep.subr.bf16.mxu1 %v6842_v20  ;;  %v6911_v19 = vld [vmem:[#allocation7 + $0x6a4] ss:$16 sps:$4 sm:$0xff]   ;;  %v6914_v20 = vld [vmem:[#allocation7 + $0x6ac] ss:$16 sps:$4 sm:$0xff]  }
 0x132   : > { %3715 = vmatpush1.bf16.msra.mxu0 %v6837_v21  ;;  %4283 = vmatpush1.bf16.msra.mxu1 %v6840_v22  ;;  %v449_v21 = vpack.c.bf16 %v385_v16, %v385_v16  ;;  %v6909_v22 = vld [vmem:[#allocation7 + $0x6a0] ss:$16 sps:$4 sm:$0xff]  }
 0x133   : > { %3716 = vmatprep.subr.bf16.mxu0 %v6845_v23  ;;  %4284 = vmatprep.subr.bf16.mxu1 %v6848_v24  ;;  %v6912_v23 = vld [vmem:[#allocation7 + $0x6a8] ss:$16 sps:$4 sm:$0xff]   ;;  %v6917_v24 = vld [vmem:[#allocation7 + $0x6c4] ss:$16 sps:$4 sm:$0xff]  }
 0x136   : > { %3717 = vmatpush1.bf16.msra.mxu0 %v6843_v25  ;;  %4285 = vmatpush1.bf16.msra.mxu1 %v6846_v26  ;;  %v384_v25 = vld [vmem:[%s7816_s30 + $0x320] sm:$0xff]  ;;  %v6920_v26 = vld [vmem:[#allocation7 + $0x6cc] ss:$16 sps:$4 sm:$0xff]  }
 0x137   : > { %3718 = vmatprep.subr.bf16.mxu0 %v6851_v27  ;;  %4286 = vmatprep.subr.bf16.mxu1 %v6854_v28  ;;  %v448_v27 = vpack.c.bf16 %v384_v25, %v384_v25  ;;  %v291_v28 = vld [vmem:[%s7816_s30 + $0x38] sm:$0xff] }
 0x13a   : > { %3719 = vmatpush1.bf16.msra.mxu0 %v6849_v29  ;;  %4287 = vmatpush1.bf16.msra.mxu1 %v6852_v30  ;;  %v307_v29 = vld [vmem:[%s7816_s30 + $0xb8] sm:$0xff]  ;;  %v6915_v30 = vld [vmem:[#allocation7 + $0x6c0] ss:$16 sps:$4 sm:$0xff]  }
 0x13b   : > { %3720 = vmatprep.subr.bf16.mxu0 %v6857_v31  ;;  %4288 = vmatprep.subr.bf16.mxu1 %v6860_v32  ;;  %v6918_v31 = vld [vmem:[#allocation7 + $0x6c8] ss:$16 sps:$4 sm:$0xff]   ;;  %v6923_v32 = vld [vmem:[#allocation7 + $0x6e4] ss:$16 sps:$4 sm:$0xff]  }
 0x13e   : > { %3721 = vmatpush1.bf16.msra.mxu0 %v6855_v33  ;;  %4289 = vmatpush1.bf16.msra.mxu1 %v6858_v34  ;;  %v6926_v33 = vld [vmem:[#allocation7 + $0x6ec] ss:$16 sps:$4 sm:$0xff]   ;;  %v403_v34 = vpack.c.bf16 %v307_v29, %v291_v28  ;;  %v6995_v28 = vld [vmem:[#allocation7 + $0x864] ss:$16 sps:$4 sm:$0xff]  }
 0x13f   : > { %3722 = vmatprep.subr.bf16.mxu0 %v6863_v35  ;;  %4290 = vmatprep.subr.bf16.mxu1 %v6866_v36  ;;  %v6921_v35 = vld [vmem:[#allocation7 + $0x6e0] ss:$16 sps:$4 sm:$0xff]   ;;  %v6924_v36 = vld [vmem:[#allocation7 + $0x6e8] ss:$16 sps:$4 sm:$0xff]   ;;  %v6998_v29 = vld [vmem:[#allocation7 + $0x86c] ss:$16 sps:$4 sm:$0xff]  }
 0x142   : > { %3723 = vmatpush1.bf16.msra.mxu0 %v6861_v37  ;;  %4291 = vmatpush1.bf16.msra.mxu1 %v6864_v38  ;;  %v6929_v37 = vld [vmem:[#allocation7 + $0x704] ss:$16 sps:$4 sm:$0xff]   ;;  %v6932_v38 = vld [vmem:[#allocation7 + $0x70c] ss:$16 sps:$4 sm:$0xff]  }
 0x143   : > { %3724 = vmatprep.subr.bf16.mxu0 %v6869_v39  ;;  %4292 = vmatprep.subr.bf16.mxu1 %v6872_v40  ;;  %v6927_v39 = vld [vmem:[#allocation7 + $0x700] ss:$16 sps:$4 sm:$0xff]   ;;  %v6930_v40 = vld [vmem:[#allocation7 + $0x708] ss:$16 sps:$4 sm:$0xff]  }
 0x146   : > { %3725 = vmatpush1.bf16.msra.mxu0 %v6867_v41  ;;  %4293 = vmatpush1.bf16.msra.mxu1 %v6870_v42  ;;  %v6935_v41 = vld [vmem:[#allocation7 + $0x724] ss:$16 sps:$4 sm:$0xff]   ;;  %v6938_v42 = vld [vmem:[#allocation7 + $0x72c] ss:$16 sps:$4 sm:$0xff]  }
 0x147   : > { %3726 = vmatprep.subr.bf16.mxu0 %v6875_v43  ;;  %4294 = vmatprep.subr.bf16.mxu1 %v6878_v44  ;;  %v6933_v43 = vld [vmem:[#allocation7 + $0x720] ss:$16 sps:$4 sm:$0xff]   ;;  %v6936_v44 = vld [vmem:[#allocation7 + $0x728] ss:$16 sps:$4 sm:$0xff]  }
 0x14a   : > { %3727 = vmatpush1.bf16.msra.mxu0 %v6873_v45  ;;  %4295 = vmatpush1.bf16.msra.mxu1 %v6876_v46  ;;  %v6941_v45 = vld [vmem:[#allocation7 + $0x744] ss:$16 sps:$4 sm:$0xff]   ;;  %v6944_v46 = vld [vmem:[#allocation7 + $0x74c] ss:$16 sps:$4 sm:$0xff]  }
 0x14b   : > { %3767 = vmatprep.subr.bf16.mxu0 %v6881_v49  ;;  %4335 = vmatprep.subr.bf16.mxu1 %v6884_v50  ;;  %v6947_v49 = vld [vmem:[#allocation7 + $0x764] ss:$16 sps:$4 sm:$0xff]   ;;  %v6950_v50 = vld [vmem:[#allocation7 + $0x76c] ss:$16 sps:$4 sm:$0xff]  }
 0x14d   : > { %3729 = vmatmul.mubr.bf16.vlgmr.msra.gmra.mrb[0].mxu0 %v400_v52  ;;  %4297 = vmatmul.mubr.bf16.vlgmr.msra.gmra.mrb[0].mxu1 %v400_v52  ;;  %v6948_v52 = vld [vmem:[#allocation7 + $0x768] ss:$16 sps:$4 sm:$0xff]  }
 0x14e   : > { %3768 = vmatpush1.bf16.msra.mxu0 %v6879_v54  ;;  %4336 = vmatpush1.bf16.msra.mxu1 %v6882_v55  ;;  %v6956_v54 = vld [vmem:[#allocation7 + $0x78c] ss:$16 sps:$4 sm:$0xff]   ;;  %v6951_v55 = vld [vmem:[#allocation7 + $0x780] ss:$16 sps:$4 sm:$0xff]  }
 0x14f   : > { %3769 = vmatprep.subr.bf16.mxu0 %v6887_v56  ;;  %4337 = vmatprep.subr.bf16.mxu1 %v6890_v57  ;;  %v6954_v56 = vld [vmem:[#allocation7 + $0x788] ss:$16 sps:$4 sm:$0xff]   ;;  %v6959_v57 = vld [vmem:[#allocation7 + $0x7a4] ss:$16 sps:$4 sm:$0xff]  }
 0x150   : > { %3738 = vmatprep.mubr.bf16.mxu0 %v417_v59  ;;  %4306 = vmatprep.mubr.bf16.mxu1 %v417_v59  ;;  %v6957_v59 = vld [vmem:[#allocation7 + $0x7a0] ss:$16 sps:$4 sm:$0xff]  }
 0x152   : > { %3770 = vmatpush1.bf16.msra.mxu0 %v6885_v58  ;;  %4338 = vmatpush1.bf16.msra.mxu1 %v6888_v60  ;;  %v6962_v58 = vld [vmem:[#allocation7 + $0x7ac] ss:$16 sps:$4 sm:$0xff]   ;;  %v6960_v60 = vld [vmem:[#allocation7 + $0x7a8] ss:$16 sps:$4 sm:$0xff]  }
 0x153   : > { %3771 = vmatprep.subr.bf16.mxu0 %v6893_v63  ;;  %4339 = vmatprep.subr.bf16.mxu1 %v6896_v0  ;;  %v6963_v63 = vld [vmem:[#allocation7 + $0x7c0] ss:$16 sps:$4 sm:$0xff]   ;;  %v6966_v0 = vld [vmem:[#allocation7 + $0x7c8] ss:$16 sps:$4 sm:$0xff]  }
 0x155   : > { %3739 = vmatmul.mubr.bf16.gmra.mrb[4].mxu0 %v416_v2  ;;  %4307 = vmatmul.mubr.bf16.gmra.mrb[4].mxu1 %v416_v2  ;;  %v6974_v2 = vld [vmem:[#allocation7 + $0x7ec] ss:$16 sps:$4 sm:$0xff]  }
 0x156   : > { %3772 = vmatpush1.bf16.msra.mxu0 %v6891_v4  ;;  %4340 = vmatpush1.bf16.msra.mxu1 %v6894_v5  ;;  %v6972_v4 = vld [vmem:[#allocation7 + $0x7e8] ss:$16 sps:$4 sm:$0xff]   ;;  %v6977_v5 = vld [vmem:[#allocation7 + $0x804] ss:$16 sps:$4 sm:$0xff]  }
 0x157   : > { %3773 = vmatprep.subr.bf16.mxu0 %v6899_v6  ;;  %4341 = vmatprep.subr.bf16.mxu1 %v6902_v7  ;;  %v290_v6 = vld [vmem:[%s7816_s30 + $0x30] sm:$0xff] }
 0x158   : > { %3748 = vmatprep.mubr.bf16.mxu0 %v433_v9  ;;  %4316 = vmatprep.mubr.bf16.mxu1 %v433_v9  ;;  %v306_v7 = vld [vmem:[%s7816_s30 + $0xb0] sm:$0xff] }
 0x159   : > { %v6975_v9 = vld [vmem:[#allocation7 + $0x800] ss:$16 sps:$4 sm:$0xff]   ;;  %v402_v11 = vpack.c.bf16 %v306_v7, %v290_v6  ;;  %v7038_v6 = vld [vmem:[#allocation7 + $0x948] ss:$16 sps:$4 sm:$0xff]   ;;  %v7043_v7 = vld [vmem:[#allocation7 + $0x964] ss:$16 sps:$4 sm:$0xff]  }
 0x15a   : > { %3774 = vmatpush1.bf16.msra.mxu0 %v6897_v8  ;;  %4342 = vmatpush1.bf16.msra.mxu1 %v6900_v10  ;;  %v6980_v8 = vld [vmem:[#allocation7 + $0x80c] ss:$16 sps:$4 sm:$0xff]   ;;  %v6978_v10 = vld [vmem:[#allocation7 + $0x808] ss:$16 sps:$4 sm:$0xff]  }
 0x15b   : > { %3775 = vmatprep.subr.bf16.mxu0 %v6905_v13  ;;  %4343 = vmatprep.subr.bf16.mxu1 %v6908_v14  ;;  %v339_v13 = vld [vmem:[%s7816_s30 + $0x1b8] sm:$0xff]  ;;  %v6983_v14 = vld [vmem:[#allocation7 + $0x824] ss:$16 sps:$4 sm:$0xff]  }
 0x15c   : > { %v419_v16 = vpack.c.bf16 %v339_v13, %v323_v12  ;;  %v7052_v12 = vld [vmem:[#allocation7 + $0x98c] ss:$16 sps:$4 sm:$0xff]   ;;  %v7047_v13 = vld [vmem:[#allocation7 + $0x980] ss:$16 sps:$4 sm:$0xff]  }
 0x15d   : > { %3749 = vmatmul.mubr.bf16.gmra.mrb[8].mxu0 %v432_v15  ;;  %4317 = vmatmul.mubr.bf16.gmra.mrb[8].mxu1 %v432_v15  ;;  %v6986_v15 = vld [vmem:[#allocation7 + $0x82c] ss:$16 sps:$4 sm:$0xff]  }
 0x15e   : > { %3776 = vmatpush1.bf16.msra.mxu0 %v6903_v17  ;;  %4344 = vmatpush1.bf16.msra.mxu1 %v6906_v18  ;;  %v6981_v17 = vld [vmem:[#allocation7 + $0x820] ss:$16 sps:$4 sm:$0xff]   ;;  %v6984_v18 = vld [vmem:[#allocation7 + $0x828] ss:$16 sps:$4 sm:$0xff]  }
 0x15f   : > { %3777 = vmatprep.subr.bf16.mxu0 %v6911_v19  ;;  %4345 = vmatprep.subr.bf16.mxu1 %v6914_v20  ;;  %v322_v19 = vld [vmem:[%s7816_s30 + $0x130] sm:$0xff] }
 0x160   : > { %3758 = vmatprep.mubr.bf16.mxu0 %v449_v21  ;;  %4326 = vmatprep.mubr.bf16.mxu1 %v449_v21  ;;  %v338_v20 = vld [vmem:[%s7816_s30 + $0x1b0] sm:$0xff] }
 0x161   : > { %v6989_v21 = vld [vmem:[#allocation7 + $0x844] ss:$16 sps:$4 sm:$0xff]   ;;  %v418_v25 = vpack.c.bf16 %v338_v20, %v322_v19  ;;  %v7064_v20 = vld [vmem:[#allocation7 + $0x9cc] ss:$16 sps:$4 sm:$0xff]  }
 0x162   : > { %3778 = vmatpush1.bf16.msra.mxu0 %v6909_v22  ;;  %4346 = vmatpush1.bf16.msra.mxu1 %v6912_v23  ;;  %v6992_v22 = vld [vmem:[#allocation7 + $0x84c] ss:$16 sps:$4 sm:$0xff]   ;;  %v6987_v23 = vld [vmem:[#allocation7 + $0x840] ss:$16 sps:$4 sm:$0xff]   ;;  %v7061_v19 = vld [vmem:[#allocation7 + $0x9c4] ss:$16 sps:$4 sm:$0xff]  }
 0x163   : > { %3779 = vmatprep.subr.bf16.mxu0 %v6917_v24  ;;  %4347 = vmatprep.subr.bf16.mxu1 %v6920_v26  ;;  %v6990_v24 = vld [vmem:[#allocation7 + $0x848] ss:$16 sps:$4 sm:$0xff]  }
 0x164   : > { %v355_v26 = vld [vmem:[%s7816_s30 + $0x238] sm:$0xff] }
 0x165   : > { %3759 = vmatmul.mubr.bf16.gmra.mrb[12].mxu0 %v448_v27  ;;  %4327 = vmatmul.mubr.bf16.gmra.mrb[12].mxu1 %v448_v27  ;;  %v371_v27 = vld [vmem:[%s7816_s30 + $0x2b8] sm:$0xff] }
 0x166   : > { %3780 = vmatpush1.bf16.msra.mxu0 %v6915_v30  ;;  %4348 = vmatpush1.bf16.msra.mxu1 %v6918_v31  ;;  %v6993_v30 = vld [vmem:[#allocation7 + $0x860] ss:$16 sps:$4 sm:$0xff]   ;;  %v435_v31 = vpack.c.bf16 %v371_v27, %v355_v26  ;;  %v7068_v26 = vld [vmem:[#allocation7 + $0x9e8] ss:$16 sps:$4 sm:$0xff]  }
 0x167   : > { %3781 = vmatprep.subr.bf16.mxu0 %v6923_v32  ;;  %4349 = vmatprep.subr.bf16.mxu1 %v6926_v33  ;;  %v6996_v32 = vld [vmem:[#allocation7 + $0x868] ss:$16 sps:$4 sm:$0xff]   ;;  %v354_v33 = vld [vmem:[%s7816_s30 + $0x230] sm:$0xff]  ;;  %v292_v27 = vld [vmem:[%s7816_s30 + $0x40] sm:$0xff] }
 0x168   : > { %3799 = vmatprep.mubr.bf16.mxu0 %v403_v34  ;;  %4367 = vmatprep.mubr.bf16.mxu1 %v403_v34  ;;  %v370_v34 = vld [vmem:[%s7816_s30 + $0x2b0] sm:$0xff] }
 0x16a   : > { %3782 = vmatpush1.bf16.msra.mxu0 %v6921_v35  ;;  %4350 = vmatpush1.bf16.msra.mxu1 %v6924_v36  ;;  %v7001_v35 = vld [vmem:[#allocation7 + $0x884] ss:$16 sps:$4 sm:$0xff]   ;;  %v7004_v36 = vld [vmem:[#allocation7 + $0x88c] ss:$16 sps:$4 sm:$0xff]  }
 0x16b   : > { %3783 = vmatprep.subr.bf16.mxu0 %v6929_v37  ;;  %4351 = vmatprep.subr.bf16.mxu1 %v6932_v38  ;;  %v6999_v37 = vld [vmem:[#allocation7 + $0x880] ss:$16 sps:$4 sm:$0xff]   ;;  %v434_v38 = vpack.c.bf16 %v370_v34, %v354_v33  ;;  %v341_v33 = vld [vmem:[%s7816_s30 + $0x1c8] sm:$0xff] }
 0x16c   : > { %v7071_v34 = vld [vmem:[#allocation7 + $0xa00] ss:$16 sps:$4 sm:$0xff]  }
 0x16e   : > { %3784 = vmatpush1.bf16.msra.mxu0 %v6927_v39  ;;  %4352 = vmatpush1.bf16.msra.mxu1 %v6930_v40  ;;  %v387_v39 = vld [vmem:[%s7816_s30 + $0x338] sm:$0xff] }
 0x16f   : > { %3785 = vmatprep.subr.bf16.mxu0 %v6935_v41  ;;  %4353 = vmatprep.subr.bf16.mxu1 %v6938_v42  ;;  %v7002_v40 = vld [vmem:[#allocation7 + $0x888] ss:$16 sps:$4 sm:$0xff]   ;;  %v7007_v41 = vld [vmem:[#allocation7 + $0x8a4] ss:$16 sps:$4 sm:$0xff]   ;;  %v7010_v42 = vld [vmem:[#allocation7 + $0x8ac] ss:$16 sps:$4 sm:$0xff]  }
 0x172   : > { %3786 = vmatpush1.bf16.msra.mxu0 %v6933_v43  ;;  %4354 = vmatpush1.bf16.msra.mxu1 %v6936_v44  ;;  %v451_v43 = vpack.c.bf16 %v387_v39, %v387_v39  ;;  %v7005_v44 = vld [vmem:[#allocation7 + $0x8a0] ss:$16 sps:$4 sm:$0xff]  }
 0x173   : > { %3787 = vmatprep.subr.bf16.mxu0 %v6941_v45  ;;  %4355 = vmatprep.subr.bf16.mxu1 %v6944_v46  ;;  %v7008_v45 = vld [vmem:[#allocation7 + $0x8a8] ss:$16 sps:$4 sm:$0xff]   ;;  %v386_v46 = vld [vmem:[%s7816_s30 + $0x330] sm:$0xff] }
 0x176   : > { %3788 = vmatpush1.bf16.msra.mxu0 %v6939_v47  ;;  %4356 = vmatpush1.bf16.msra.mxu1 %v6942_v48  ;;  %v7013_v47 = vld [vmem:[#allocation7 + $0x8c4] ss:$16 sps:$4 sm:$0xff]   ;;  %v7016_v48 = vld [vmem:[#allocation7 + $0x8cc] ss:$16 sps:$4 sm:$0xff]  }
 0x177   : > { %3789 = vmatprep.subr.bf16.mxu0 %v6947_v49  ;;  %4357 = vmatprep.subr.bf16.mxu1 %v6950_v50  ;;  %v7011_v49 = vld [vmem:[#allocation7 + $0x8c0] ss:$16 sps:$4 sm:$0xff]   ;;  %v7014_v50 = vld [vmem:[#allocation7 + $0x8c8] ss:$16 sps:$4 sm:$0xff]  }
 0x17a   : > { %3790 = vmatpush1.bf16.msra.mxu0 %v6945_v51  ;;  %4358 = vmatpush1.bf16.msra.mxu1 %v6948_v52  ;;  %v450_v51 = vpack.c.bf16 %v386_v46, %v386_v46  ;;  %v293_v52 = vld [vmem:[%s7816_s30 + $0x48] sm:$0xff] }
 0x17b   : > { %3791 = vmatprep.subr.bf16.mxu0 %v6953_v53  ;;  %4359 = vmatprep.subr.bf16.mxu1 %v6956_v54  ;;  %v309_v53 = vld [vmem:[%s7816_s30 + $0xc8] sm:$0xff]  ;;  %v7019_v54 = vld [vmem:[#allocation7 + $0x8e4] ss:$16 sps:$4 sm:$0xff]  }
 0x17e   : > { %3792 = vmatpush1.bf16.msra.mxu0 %v6951_v55  ;;  %4360 = vmatpush1.bf16.msra.mxu1 %v6954_v56  ;;  %v7022_v55 = vld [vmem:[#allocation7 + $0x8ec] ss:$16 sps:$4 sm:$0xff]   ;;  %v405_v56 = vpack.c.bf16 %v309_v53, %v293_v52  ;;  %v7089_v52 = vld [vmem:[#allocation7 + $0xa60] ss:$16 sps:$4 sm:$0xff]   ;;  %v7092_v53 = vld [vmem:[#allocation7 + $0xa68] ss:$16 sps:$4 sm:$0xff]  }
 0x17f   : > { %3793 = vmatprep.subr.bf16.mxu0 %v6959_v57  ;;  %4361 = vmatprep.subr.bf16.mxu1 %v6962_v58  ;;  %v7017_v57 = vld [vmem:[#allocation7 + $0x8e0] ss:$16 sps:$4 sm:$0xff]   ;;  %v7020_v58 = vld [vmem:[#allocation7 + $0x8e8] ss:$16 sps:$4 sm:$0xff]  }
 0x182   : > { %3794 = vmatpush1.bf16.msra.mxu0 %v6957_v59  ;;  %4362 = vmatpush1.bf16.msra.mxu1 %v6960_v60  ;;  %v7025_v59 = vld [vmem:[#allocation7 + $0x904] ss:$16 sps:$4 sm:$0xff]   ;;  %v7028_v60 = vld [vmem:[#allocation7 + $0x90c] ss:$16 sps:$4 sm:$0xff]  }
 0x183   : > { %3795 = vmatprep.subr.bf16.mxu0 %v6965_v61  ;;  %4363 = vmatprep.subr.bf16.mxu1 %v6968_v62  ;;  %v7023_v61 = vld [vmem:[#allocation7 + $0x900] ss:$16 sps:$4 sm:$0xff]   ;;  %v7026_v62 = vld [vmem:[#allocation7 + $0x908] ss:$16 sps:$4 sm:$0xff]  }
 0x186   : > { %3796 = vmatpush1.bf16.msra.mxu0 %v6963_v63  ;;  %4364 = vmatpush1.bf16.msra.mxu1 %v6966_v0  ;;  %v7031_v63 = vld [vmem:[#allocation7 + $0x924] ss:$16 sps:$4 sm:$0xff]   ;;  %v7034_v0 = vld [vmem:[#allocation7 + $0x92c] ss:$16 sps:$4 sm:$0xff]  }
 0x187   : > { %3797 = vmatprep.subr.bf16.mxu0 %v6971_v1  ;;  %4365 = vmatprep.subr.bf16.mxu1 %v6974_v2  ;;  %v7029_v1 = vld [vmem:[#allocation7 + $0x920] ss:$16 sps:$4 sm:$0xff]   ;;  %v7032_v2 = vld [vmem:[#allocation7 + $0x928] ss:$16 sps:$4 sm:$0xff]  }
 0x18a   : > { %3798 = vmatpush1.bf16.msra.mxu0 %v6969_v3  ;;  %4366 = vmatpush1.bf16.msra.mxu1 %v6972_v4  ;;  %v7037_v3 = vld [vmem:[#allocation7 + $0x944] ss:$16 sps:$4 sm:$0xff]   ;;  %v7040_v4 = vld [vmem:[#allocation7 + $0x94c] ss:$16 sps:$4 sm:$0xff]  }
 0x18b   : > { %3838 = vmatprep.subr.bf16.mxu0 %v6977_v5  ;;  %4406 = vmatprep.subr.bf16.mxu1 %v6980_v8  ;;  %v7035_v5 = vld [vmem:[#allocation7 + $0x940] ss:$16 sps:$4 sm:$0xff]   ;;  %v7046_v8 = vld [vmem:[#allocation7 + $0x96c] ss:$16 sps:$4 sm:$0xff]  }
 0x18d   : > { %3800 = vmatmul.mubr.bf16.vlgmr.msra.gmra.mrb[0].mxu0 %v402_v11  ;;  %4368 = vmatmul.mubr.bf16.vlgmr.msra.gmra.mrb[0].mxu1 %v402_v11  ;;  %v7049_v11 = vld [vmem:[#allocation7 + $0x984] ss:$16 sps:$4 sm:$0xff]  }
 0x18e   : > { %3839 = vmatpush1.bf16.msra.mxu0 %v6975_v9  ;;  %4407 = vmatpush1.bf16.msra.mxu1 %v6978_v10  ;;  %v7041_v9 = vld [vmem:[#allocation7 + $0x960] ss:$16 sps:$4 sm:$0xff]   ;;  %v7044_v10 = vld [vmem:[#allocation7 + $0x968] ss:$16 sps:$4 sm:$0xff]  }
 0x18f   : > { %3840 = vmatprep.subr.bf16.mxu0 %v6983_v14  ;;  %4408 = vmatprep.subr.bf16.mxu1 %v6986_v15  ;;  %v7050_v14 = vld [vmem:[#allocation7 + $0x988] ss:$16 sps:$4 sm:$0xff]   ;;  %v7055_v15 = vld [vmem:[#allocation7 + $0x9a4] ss:$16 sps:$4 sm:$0xff]  }
 0x190   : > { %3809 = vmatprep.mubr.bf16.mxu0 %v419_v16  ;;  %4377 = vmatprep.mubr.bf16.mxu1 %v419_v16  ;;  %v7058_v16 = vld [vmem:[#allocation7 + $0x9ac] ss:$16 sps:$4 sm:$0xff]  }
 0x192   : > { %3841 = vmatpush1.bf16.msra.mxu0 %v6981_v17  ;;  %4409 = vmatpush1.bf16.msra.mxu1 %v6984_v18  ;;  %v7053_v17 = vld [vmem:[#allocation7 + $0x9a0] ss:$16 sps:$4 sm:$0xff]   ;;  %v7056_v18 = vld [vmem:[#allocation7 + $0x9a8] ss:$16 sps:$4 sm:$0xff]  }
 0x193   : > { %3842 = vmatprep.subr.bf16.mxu0 %v6989_v21  ;;  %4410 = vmatprep.subr.bf16.mxu1 %v6992_v22  ;;  %v7059_v21 = vld [vmem:[#allocation7 + $0x9c0] ss:$16 sps:$4 sm:$0xff]   ;;  %v7062_v22 = vld [vmem:[#allocation7 + $0x9c8] ss:$16 sps:$4 sm:$0xff]  }
 0x195   : > { %3810 = vmatmul.mubr.bf16.gmra.mrb[4].mxu0 %v418_v25  ;;  %4378 = vmatmul.mubr.bf16.gmra.mrb[4].mxu1 %v418_v25  ;;  %v7065_v25 = vld [vmem:[#allocation7 + $0x9e0] ss:$16 sps:$4 sm:$0xff]  }
 0x196   : > { %3843 = vmatpush1.bf16.msra.mxu0 %v6987_v23  ;;  %4411 = vmatpush1.bf16.msra.mxu1 %v6990_v24  ;;  %v7067_v23 = vld [vmem:[#allocation7 + $0x9e4] ss:$16 sps:$4 sm:$0xff]   ;;  %v7070_v24 = vld [vmem:[#allocation7 + $0x9ec] ss:$16 sps:$4 sm:$0xff]  }
 0x197   : > { %3844 = vmatprep.subr.bf16.mxu0 %v6995_v28  ;;  %4412 = vmatprep.subr.bf16.mxu1 %v6998_v29  ;;  %v308_v28 = vld [vmem:[%s7816_s30 + $0xc0] sm:$0xff] }
 0x198   : > { %3819 = vmatprep.mubr.bf16.mxu0 %v435_v31  ;;  %4387 = vmatprep.mubr.bf16.mxu1 %v435_v31  ;;  %v7073_v29 = vld [vmem:[#allocation7 + $0xa04] ss:$16 sps:$4 sm:$0xff]   ;;  %v325_v31 = vld [vmem:[%s7816_s30 + $0x148] sm:$0xff] }
 0x199   : > { %v421_v39 = vpack.c.bf16 %v341_v33, %v325_v31  ;;  %v7137_v31 = vld [vmem:[#allocation7 + $0xb60] ss:$16 sps:$4 sm:$0xff]   ;;  %v7145_v33 = vld [vmem:[#allocation7 + $0xb84] ss:$16 sps:$4 sm:$0xff]  }
 0x19a   : > { %3845 = vmatpush1.bf16.msra.mxu0 %v6993_v30  ;;  %4413 = vmatpush1.bf16.msra.mxu1 %v6996_v32  ;;  %v7076_v30 = vld [vmem:[#allocation7 + $0xa0c] ss:$16 sps:$4 sm:$0xff]   ;;  %v404_v32 = vpack.c.bf16 %v308_v28, %v292_v27  ;;  %v7131_v27 = vld [vmem:[#allocation7 + $0xb40] ss:$16 sps:$4 sm:$0xff]   ;;  %v7134_v28 = vld [vmem:[#allocation7 + $0xb48] ss:$16 sps:$4 sm:$0xff]  }
 0x19b   : > { %3846 = vmatprep.subr.bf16.mxu0 %v7001_v35  ;;  %4414 = vmatprep.subr.bf16.mxu1 %v7004_v36  ;;  %v7074_v35 = vld [vmem:[#allocation7 + $0xa08] ss:$16 sps:$4 sm:$0xff]   ;;  %v7079_v36 = vld [vmem:[#allocation7 + $0xa24] ss:$16 sps:$4 sm:$0xff]  }
 0x19d   : > { %3820 = vmatmul.mubr.bf16.gmra.mrb[8].mxu0 %v434_v38  ;;  %4388 = vmatmul.mubr.bf16.gmra.mrb[8].mxu1 %v434_v38  ;;  %v7077_v38 = vld [vmem:[#allocation7 + $0xa20] ss:$16 sps:$4 sm:$0xff]  }
 0x19e   : > { %3847 = vmatpush1.bf16.msra.mxu0 %v6999_v37  ;;  %4415 = vmatpush1.bf16.msra.mxu1 %v7002_v40  ;;  %v7082_v37 = vld [vmem:[#allocation7 + $0xa2c] ss:$16 sps:$4 sm:$0xff]   ;;  %v7080_v40 = vld [vmem:[#allocation7 + $0xa28] ss:$16 sps:$4 sm:$0xff]  }
 0x19f   : > { %3848 = vmatprep.subr.bf16.mxu0 %v7007_v41  ;;  %4416 = vmatprep.subr.bf16.mxu1 %v7010_v42  ;;  %v7085_v41 = vld [vmem:[#allocation7 + $0xa44] ss:$16 sps:$4 sm:$0xff]  }
 0x1a0   : > { %3829 = vmatprep.mubr.bf16.mxu0 %v451_v43  ;;  %4397 = vmatprep.mubr.bf16.mxu1 %v451_v43  ;;  %v324_v42 = vld [vmem:[%s7816_s30 + $0x140] sm:$0xff] }
 0x1a1   : > { %v340_v43 = vld [vmem:[%s7816_s30 + $0x1c0] sm:$0xff] }
 0x1a2   : > { %3849 = vmatpush1.bf16.msra.mxu0 %v7005_v44  ;;  %4417 = vmatpush1.bf16.msra.mxu1 %v7008_v45  ;;  %v7088_v44 = vld [vmem:[#allocation7 + $0xa4c] ss:$16 sps:$4 sm:$0xff]   ;;  %v420_v46 = vpack.c.bf16 %v340_v43, %v324_v42  ;;  %v7155_v43 = vld [vmem:[#allocation7 + $0xbc0] ss:$16 sps:$4 sm:$0xff]  }
 0x1a3   : > { %3850 = vmatprep.subr.bf16.mxu0 %v7013_v47  ;;  %4418 = vmatprep.subr.bf16.mxu1 %v7016_v48  ;;  %v357_v45 = vld [vmem:[%s7816_s30 + $0x248] sm:$0xff]  ;;  %v7083_v48 = vld [vmem:[#allocation7 + $0xa40] ss:$16 sps:$4 sm:$0xff]  }
 0x1a4   : > { %v373_v47 = vld [vmem:[%s7816_s30 + $0x2c8] sm:$0xff] }
 0x1a5   : > { %3830 = vmatmul.mubr.bf16.gmra.mrb[12].mxu0 %v450_v51  ;;  %4398 = vmatmul.mubr.bf16.gmra.mrb[12].mxu1 %v450_v51  ;;  %v7094_v51 = vld [vmem:[#allocation7 + $0xa6c] ss:$16 sps:$4 sm:$0xff]  }
 0x1a6   : > { %3851 = vmatpush1.bf16.msra.mxu0 %v7011_v49  ;;  %4419 = vmatpush1.bf16.msra.mxu1 %v7014_v50  ;;  %v7086_v49 = vld [vmem:[#allocation7 + $0xa48] ss:$16 sps:$4 sm:$0xff]   ;;  %v7091_v50 = vld [vmem:[#allocation7 + $0xa64] ss:$16 sps:$4 sm:$0xff]   ;;  %v7160_v42 = vld [vmem:[#allocation7 + $0xbcc] ss:$16 sps:$4 sm:$0xff]  }
 0x1a7   : > { %3852 = vmatprep.subr.bf16.mxu0 %v7019_v54  ;;  %4420 = vmatprep.subr.bf16.mxu1 %v7022_v55  ;;  %v437_v54 = vpack.c.bf16 %v373_v47, %v357_v45  ;;  %v7097_v55 = vld [vmem:[#allocation7 + $0xa84] ss:$16 sps:$4 sm:$0xff]   ;;  %v7161_v47 = vld [vmem:[#allocation7 + $0xbe0] ss:$16 sps:$4 sm:$0xff]  }
 0x1a8   : > { %3870 = vmatprep.mubr.bf16.mxu0 %v405_v56  ;;  %4438 = vmatprep.mubr.bf16.mxu1 %v405_v56  ;;  %v356_v56 = vld [vmem:[%s7816_s30 + $0x240] sm:$0xff] }
 0x1a9   : > { %v7163_v45 = vld [vmem:[#allocation7 + $0xbe4] ss:$16 sps:$4 sm:$0xff]  }
 0x1aa   : > { %3853 = vmatpush1.bf16.msra.mxu0 %v7017_v57  ;;  %4421 = vmatpush1.bf16.msra.mxu1 %v7020_v58  ;;  %v372_v57 = vld [vmem:[%s7816_s30 + $0x2c0] sm:$0xff]  ;;  %v7100_v58 = vld [vmem:[#allocation7 + $0xa8c] ss:$16 sps:$4 sm:$0xff]  }
 0x1ab   : > { %3854 = vmatprep.subr.bf16.mxu0 %v7025_v59  ;;  %4422 = vmatprep.subr.bf16.mxu1 %v7028_v60  ;;  %v7095_v59 = vld [vmem:[#allocation7 + $0xa80] ss:$16 sps:$4 sm:$0xff]   ;;  %v7098_v60 = vld [vmem:[#allocation7 + $0xa88] ss:$16 sps:$4 sm:$0xff]  }
 0x1ae   : > { %3855 = vmatpush1.bf16.msra.mxu0 %v7023_v61  ;;  %4423 = vmatpush1.bf16.msra.mxu1 %v7026_v62  ;;  %v436_v61 = vpack.c.bf16 %v372_v57, %v356_v56  ;;  %v389_v62 = vld [vmem:[%s7816_s30 + $0x348] sm:$0xff]  ;;  %v7167_v56 = vld [vmem:[#allocation7 + $0xc00] ss:$16 sps:$4 sm:$0xff]  }
 0x1af   : > { %3856 = vmatprep.subr.bf16.mxu0 %v7031_v63  ;;  %4424 = vmatprep.subr.bf16.mxu1 %v7034_v0  ;;  %v7103_v63 = vld [vmem:[#allocation7 + $0xaa4] ss:$16 sps:$4 sm:$0xff]   ;;  %v7106_v0 = vld [vmem:[#allocation7 + $0xaac] ss:$16 sps:$4 sm:$0xff]   ;;  %v7170_v57 = vld [vmem:[#allocation7 + $0xc08] ss:$16 sps:$4 sm:$0xff]  }
 0x1b2   : > { %3857 = vmatpush1.bf16.msra.mxu0 %v7029_v1  ;;  %4425 = vmatpush1.bf16.msra.mxu1 %v7032_v2  ;;  %v7101_v1 = vld [vmem:[#allocation7 + $0xaa0] ss:$16 sps:$4 sm:$0xff]   ;;  %v453_v2 = vpack.c.bf16 %v389_v62, %v389_v62  ;;  %v7176_v62 = vld [vmem:[#allocation7 + $0xc28] ss:$16 sps:$4 sm:$0xff]  }
 0x1b3   : > { %3858 = vmatprep.subr.bf16.mxu0 %v7037_v3  ;;  %4426 = vmatprep.subr.bf16.mxu1 %v7040_v4  ;;  %v7104_v3 = vld [vmem:[#allocation7 + $0xaa8] ss:$16 sps:$4 sm:$0xff]   ;;  %v7109_v4 = vld [vmem:[#allocation7 + $0xac4] ss:$16 sps:$4 sm:$0xff]  }
 0x1b6   : > { %3859 = vmatpush1.bf16.msra.mxu0 %v7035_v5  ;;  %4427 = vmatpush1.bf16.msra.mxu1 %v7038_v6  ;;  %v388_v5 = vld [vmem:[%s7816_s30 + $0x340] sm:$0xff]  ;;  %v7112_v6 = vld [vmem:[#allocation7 + $0xacc] ss:$16 sps:$4 sm:$0xff]  }
 0x1b7   : > { %3860 = vmatprep.subr.bf16.mxu0 %v7043_v7  ;;  %4428 = vmatprep.subr.bf16.mxu1 %v7046_v8  ;;  %v7107_v7 = vld [vmem:[#allocation7 + $0xac0] ss:$16 sps:$4 sm:$0xff]   ;;  %v7110_v8 = vld [vmem:[#allocation7 + $0xac8] ss:$16 sps:$4 sm:$0xff]  }
 0x1ba   : > { %3861 = vmatpush1.bf16.msra.mxu0 %v7041_v9  ;;  %4429 = vmatpush1.bf16.msra.mxu1 %v7044_v10  ;;  %v452_v9 = vpack.c.bf16 %v388_v5, %v388_v5  ;;  %v295_v10 = vld [vmem:[%s7816_s30 + $0x58] sm:$0xff] }
 0x1bb   : > { %3862 = vmatprep.subr.bf16.mxu0 %v7049_v11  ;;  %4430 = vmatprep.subr.bf16.mxu1 %v7052_v12  ;;  %v311_v11 = vld [vmem:[%s7816_s30 + $0xd8] sm:$0xff]  ;;  %v7115_v12 = vld [vmem:[#allocation7 + $0xae4] ss:$16 sps:$4 sm:$0xff]  }
 0x1bc   : > { %v375_v5 = vld [vmem:[%s7816_s30 + $0x2d8] sm:$0xff] }
 0x1be   : > { %3863 = vmatpush1.bf16.msra.mxu0 %v7047_v13  ;;  %4431 = vmatpush1.bf16.msra.mxu1 %v7050_v14  ;;  %v7118_v13 = vld [vmem:[#allocation7 + $0xaec] ss:$16 sps:$4 sm:$0xff]   ;;  %v407_v14 = vpack.c.bf16 %v311_v11, %v295_v10  ;;  %v7185_v11 = vld [vmem:[#allocation7 + $0xc60] ss:$16 sps:$4 sm:$0xff]  }
 0x1bf   : > { %3864 = vmatprep.subr.bf16.mxu0 %v7055_v15  ;;  %4432 = vmatprep.subr.bf16.mxu1 %v7058_v16  ;;  %v7113_v15 = vld [vmem:[#allocation7 + $0xae0] ss:$16 sps:$4 sm:$0xff]   ;;  %v7116_v16 = vld [vmem:[#allocation7 + $0xae8] ss:$16 sps:$4 sm:$0xff]  }
 0x1c2   : > { %3865 = vmatpush1.bf16.msra.mxu0 %v7053_v17  ;;  %4433 = vmatpush1.bf16.msra.mxu1 %v7056_v18  ;;  %v7121_v17 = vld [vmem:[#allocation7 + $0xb04] ss:$16 sps:$4 sm:$0xff]   ;;  %v7124_v18 = vld [vmem:[#allocation7 + $0xb0c] ss:$16 sps:$4 sm:$0xff]  }
 0x1c3   : > { %3866 = vmatprep.subr.bf16.mxu0 %v7061_v19  ;;  %4434 = vmatprep.subr.bf16.mxu1 %v7064_v20  ;;  %v7119_v19 = vld [vmem:[#allocation7 + $0xb00] ss:$16 sps:$4 sm:$0xff]   ;;  %v7122_v20 = vld [vmem:[#allocation7 + $0xb08] ss:$16 sps:$4 sm:$0xff]  }
 0x1c6   : > { %3867 = vmatpush1.bf16.msra.mxu0 %v7059_v21  ;;  %4435 = vmatpush1.bf16.msra.mxu1 %v7062_v22  ;;  %v7127_v21 = vld [vmem:[#allocation7 + $0xb24] ss:$16 sps:$4 sm:$0xff]   ;;  %v7130_v22 = vld [vmem:[#allocation7 + $0xb2c] ss:$16 sps:$4 sm:$0xff]  }
 0x1c7   : > { %3868 = vmatprep.subr.bf16.mxu0 %v7067_v23  ;;  %4436 = vmatprep.subr.bf16.mxu1 %v7070_v24  ;;  %v7125_v23 = vld [vmem:[#allocation7 + $0xb20] ss:$16 sps:$4 sm:$0xff]   ;;  %v7128_v24 = vld [vmem:[#allocation7 + $0xb28] ss:$16 sps:$4 sm:$0xff]  }
 0x1ca   : > { %3869 = vmatpush1.bf16.msra.mxu0 %v7065_v25  ;;  %4437 = vmatpush1.bf16.msra.mxu1 %v7068_v26  ;;  %v7133_v25 = vld [vmem:[#allocation7 + $0xb44] ss:$16 sps:$4 sm:$0xff]   ;;  %v7136_v26 = vld [vmem:[#allocation7 + $0xb4c] ss:$16 sps:$4 sm:$0xff]  }
 0x1cb   : > { %3909 = vmatprep.subr.bf16.mxu0 %v7073_v29  ;;  %4477 = vmatprep.subr.bf16.mxu1 %v7076_v30  ;;  %v7139_v29 = vld [vmem:[#allocation7 + $0xb64] ss:$16 sps:$4 sm:$0xff]   ;;  %v7142_v30 = vld [vmem:[#allocation7 + $0xb6c] ss:$16 sps:$4 sm:$0xff]  }
 0x1cd   : > { %3871 = vmatmul.mubr.bf16.vlgmr.msra.gmra.mrb[0].mxu0 %v404_v32  ;;  %4439 = vmatmul.mubr.bf16.vlgmr.msra.gmra.mrb[0].mxu1 %v404_v32  ;;  %v7140_v32 = vld [vmem:[#allocation7 + $0xb68] ss:$16 sps:$4 sm:$0xff]  }
 0x1ce   : > { %3910 = vmatpush1.bf16.msra.mxu0 %v7071_v34  ;;  %4478 = vmatpush1.bf16.msra.mxu1 %v7074_v35  ;;  %v7148_v34 = vld [vmem:[#allocation7 + $0xb8c] ss:$16 sps:$4 sm:$0xff]   ;;  %v7143_v35 = vld [vmem:[#allocation7 + $0xb80] ss:$16 sps:$4 sm:$0xff]  }
 0x1cf   : > { %3911 = vmatprep.subr.bf16.mxu0 %v7079_v36  ;;  %4479 = vmatprep.subr.bf16.mxu1 %v7082_v37  ;;  %v7146_v36 = vld [vmem:[#allocation7 + $0xb88] ss:$16 sps:$4 sm:$0xff]   ;;  %v7151_v37 = vld [vmem:[#allocation7 + $0xba4] ss:$16 sps:$4 sm:$0xff]  }
 0x1d0   : > { %3880 = vmatprep.mubr.bf16.mxu0 %v421_v39  ;;  %4448 = vmatprep.mubr.bf16.mxu1 %v421_v39  ;;  %v7149_v39 = vld [vmem:[#allocation7 + $0xba0] ss:$16 sps:$4 sm:$0xff]  }
 0x1d2   : > { %3912 = vmatpush1.bf16.msra.mxu0 %v7077_v38  ;;  %4480 = vmatpush1.bf16.msra.mxu1 %v7080_v40  ;;  %v7154_v38 = vld [vmem:[#allocation7 + $0xbac] ss:$16 sps:$4 sm:$0xff]   ;;  %v7152_v40 = vld [vmem:[#allocation7 + $0xba8] ss:$16 sps:$4 sm:$0xff]  }
 0x1d3   : > { %3913 = vmatprep.subr.bf16.mxu0 %v7085_v41  ;;  %4481 = vmatprep.subr.bf16.mxu1 %v7088_v44  ;;  %v7157_v41 = vld [vmem:[#allocation7 + $0xbc4] ss:$16 sps:$4 sm:$0xff]   ;;  %v7158_v44 = vld [vmem:[#allocation7 + $0xbc8] ss:$16 sps:$4 sm:$0xff]  }
 0x1d5   : > { %3881 = vmatmul.mubr.bf16.gmra.mrb[4].mxu0 %v420_v46  ;;  %4449 = vmatmul.mubr.bf16.gmra.mrb[4].mxu1 %v420_v46  ;;  %v7166_v46 = vld [vmem:[#allocation7 + $0xbec] ss:$16 sps:$4 sm:$0xff]  }
 0x1d6   : > { %3914 = vmatpush1.bf16.msra.mxu0 %v7083_v48  ;;  %4482 = vmatpush1.bf16.msra.mxu1 %v7086_v49  ;;  %v7164_v48 = vld [vmem:[#allocation7 + $0xbe8] ss:$16 sps:$4 sm:$0xff]   ;;  %v294_v49 = vld [vmem:[%s7816_s30 + $0x50] sm:$0xff] }
 0x1d7   : > { %3915 = vmatprep.subr.bf16.mxu0 %v7091_v50  ;;  %4483 = vmatprep.subr.bf16.mxu1 %v7094_v51  ;;  %v310_v50 = vld [vmem:[%s7816_s30 + $0xd0] sm:$0xff] }
 0x1d8   : > { %3890 = vmatprep.mubr.bf16.mxu0 %v437_v54  ;;  %4458 = vmatprep.mubr.bf16.mxu1 %v437_v54  ;;  %v7169_v51 = vld [vmem:[#allocation7 + $0xc04] ss:$16 sps:$4 sm:$0xff]   ;;  %v327_v54 = vld [vmem:[%s7816_s30 + $0x158] sm:$0xff] }
 0x1da   : > { %3916 = vmatpush1.bf16.msra.mxu0 %v7089_v52  ;;  %4484 = vmatpush1.bf16.msra.mxu1 %v7092_v53  ;;  %v7172_v52 = vld [vmem:[#allocation7 + $0xc0c] ss:$16 sps:$4 sm:$0xff]   ;;  %v406_v53 = vpack.c.bf16 %v310_v50, %v294_v49  ;;  %v7227_v49 = vld [vmem:[#allocation7 + $0xd40] ss:$16 sps:$4 sm:$0xff]   ;;  %v7230_v50 = vld [vmem:[#allocation7 + $0xd48] ss:$16 sps:$4 sm:$0xff]  }
 0x1db   : > { %3917 = vmatprep.subr.bf16.mxu0 %v7097_v55  ;;  %4485 = vmatprep.subr.bf16.mxu1 %v7100_v58  ;;  %v343_v55 = vld [vmem:[%s7816_s30 + $0x1d8] sm:$0xff]  ;;  %v7175_v58 = vld [vmem:[#allocation7 + $0xc24] ss:$16 sps:$4 sm:$0xff]  }
 0x1dd   : > { %3891 = vmatmul.mubr.bf16.gmra.mrb[8].mxu0 %v436_v61  ;;  %4459 = vmatmul.mubr.bf16.gmra.mrb[8].mxu1 %v436_v61  ;;  %v7173_v61 = vld [vmem:[#allocation7 + $0xc20] ss:$16 sps:$4 sm:$0xff]  }
 0x1de   : > { %3918 = vmatpush1.bf16.msra.mxu0 %v7095_v59  ;;  %4486 = vmatpush1.bf16.msra.mxu1 %v7098_v60  ;;  %v7178_v59 = vld [vmem:[#allocation7 + $0xc2c] ss:$16 sps:$4 sm:$0xff]   ;;  %v423_v60 = vpack.c.bf16 %v343_v55, %v327_v54  ;;  %v7236_v54 = vld [vmem:[#allocation7 + $0xd68] ss:$16 sps:$4 sm:$0xff]   ;;  %v7241_v55 = vld [vmem:[#allocation7 + $0xd84] ss:$16 sps:$4 sm:$0xff]  }
 0x1df   : > { %3919 = vmatprep.subr.bf16.mxu0 %v7103_v63  ;;  %4487 = vmatprep.subr.bf16.mxu1 %v7106_v0  ;;  %v326_v63 = vld [vmem:[%s7816_s30 + $0x150] sm:$0xff] }
 0x1e0   : > { %3900 = vmatprep.mubr.bf16.mxu0 %v453_v2  ;;  %4468 = vmatprep.mubr.bf16.mxu1 %v453_v2  ;;  %v342_v0 = vld [vmem:[%s7816_s30 + $0x1d0] sm:$0xff]  ;;  %v7184_v2 = vld [vmem:[#allocation7 + $0xc4c] ss:$16 sps:$4 sm:$0xff]  }
 0x1e2   : > { %3920 = vmatpush1.bf16.msra.mxu0 %v7101_v1  ;;  %4488 = vmatpush1.bf16.msra.mxu1 %v7104_v3  ;;  %v7181_v1 = vld [vmem:[#allocation7 + $0xc44] ss:$16 sps:$4 sm:$0xff]   ;;  %v422_v3 = vpack.c.bf16 %v342_v0, %v326_v63  ;;  %v7256_v0 = vld [vmem:[#allocation7 + $0xdcc] ss:$16 sps:$4 sm:$0xff]  }
 0x1e3   : > { %3921 = vmatprep.subr.bf16.mxu0 %v7109_v4  ;;  %4489 = vmatprep.subr.bf16.mxu1 %v7112_v6  ;;  %v359_v4 = vld [vmem:[%s7816_s30 + $0x258] sm:$0xff]  ;;  %v7179_v6 = vld [vmem:[#allocation7 + $0xc40] ss:$16 sps:$4 sm:$0xff]   ;;  %v7253_v63 = vld [vmem:[#allocation7 + $0xdc4] ss:$16 sps:$4 sm:$0xff]  }
 0x1e4   : > { %v439_v10 = vpack.c.bf16 %v375_v5, %v359_v4  ;;  %v7262_v4 = vld [vmem:[#allocation7 + $0xdec] ss:$16 sps:$4 sm:$0xff]   ;;  %v7257_v5 = vld [vmem:[#allocation7 + $0xde0] ss:$16 sps:$4 sm:$0xff]  }
 0x1e5   : > { %3901 = vmatmul.mubr.bf16.gmra.mrb[12].mxu0 %v452_v9  ;;  %4469 = vmatmul.mubr.bf16.gmra.mrb[12].mxu1 %v452_v9  ;;  %v7190_v9 = vld [vmem:[#allocation7 + $0xc6c] ss:$16 sps:$4 sm:$0xff]  }
 0x1e6   : > { %3922 = vmatpush1.bf16.msra.mxu0 %v7107_v7  ;;  %4490 = vmatpush1.bf16.msra.mxu1 %v7110_v8  ;;  %v7182_v7 = vld [vmem:[#allocation7 + $0xc48] ss:$16 sps:$4 sm:$0xff]   ;;  %v7187_v8 = vld [vmem:[#allocation7 + $0xc64] ss:$16 sps:$4 sm:$0xff]  }
 0x1e7   : > { %3923 = vmatprep.subr.bf16.mxu0 %v7115_v12  ;;  %4491 = vmatprep.subr.bf16.mxu1 %v7118_v13  ;;  %v7188_v12 = vld [vmem:[#allocation7 + $0xc68] ss:$16 sps:$4 sm:$0xff]   ;;  %v358_v13 = vld [vmem:[%s7816_s30 + $0x250] sm:$0xff] }
 0x1e8   : > { %3941 = vmatprep.mubr.bf16.mxu0 %v407_v14  ;;  %4509 = vmatprep.mubr.bf16.mxu1 %v407_v14  ;;  %v374_v14 = vld [vmem:[%s7816_s30 + $0x2d0] sm:$0xff] }
 0x1ea   : > { %3924 = vmatpush1.bf16.msra.mxu0 %v7113_v15  ;;  %4492 = vmatpush1.bf16.msra.mxu1 %v7116_v16  ;;  %v7193_v15 = vld [vmem:[#allocation7 + $0xc84] ss:$16 sps:$4 sm:$0xff]   ;;  %v7196_v16 = vld [vmem:[#allocation7 + $0xc8c] ss:$16 sps:$4 sm:$0xff]  }
 0x1eb   : > { %3925 = vmatprep.subr.bf16.mxu0 %v7121_v17  ;;  %4493 = vmatprep.subr.bf16.mxu1 %v7124_v18  ;;  %v438_v17 = vpack.c.bf16 %v374_v14, %v358_v13  ;;  %v391_v18 = vld [vmem:[%s7816_s30 + $0x358] sm:$0xff]  ;;  %v345_v13 = vld [vmem:[%s7816_s30 + $0x1e8] sm:$0xff]  ;;  %v7263_v14 = vld [vmem:[#allocation7 + $0xe00] ss:$16 sps:$4 sm:$0xff]  }
 0x1ee   : > { %3926 = vmatpush1.bf16.msra.mxu0 %v7119_v19  ;;  %4494 = vmatpush1.bf16.msra.mxu1 %v7122_v20  ;;  %v7191_v19 = vld [vmem:[#allocation7 + $0xc80] ss:$16 sps:$4 sm:$0xff]   ;;  %v7194_v20 = vld [vmem:[#allocation7 + $0xc88] ss:$16 sps:$4 sm:$0xff]  }
 0x1ef   : > { %3927 = vmatprep.subr.bf16.mxu0 %v7127_v21  ;;  %4495 = vmatprep.subr.bf16.mxu1 %v7130_v22  ;;  %v7199_v21 = vld [vmem:[#allocation7 + $0xca4] ss:$16 sps:$4 sm:$0xff]   ;;  %v7202_v22 = vld [vmem:[#allocation7 + $0xcac] ss:$16 sps:$4 sm:$0xff]  }
 0x1f2   : > { %3928 = vmatpush1.bf16.msra.mxu0 %v7125_v23  ;;  %4496 = vmatpush1.bf16.msra.mxu1 %v7128_v24  ;;  %v455_v23 = vpack.c.bf16 %v391_v18, %v391_v18  ;;  %v7197_v24 = vld [vmem:[#allocation7 + $0xca0] ss:$16 sps:$4 sm:$0xff]  }
 0x1f3   : > { %3929 = vmatprep.subr.bf16.mxu0 %v7133_v25  ;;  %4497 = vmatprep.subr.bf16.mxu1 %v7136_v26  ;;  %v7200_v25 = vld [vmem:[#allocation7 + $0xca8] ss:$16 sps:$4 sm:$0xff]   ;;  %v390_v26 = vld [vmem:[%s7816_s30 + $0x350] sm:$0xff] }
 0x1f6   : > { %3930 = vmatpush1.bf16.msra.mxu0 %v7131_v27  ;;  %4498 = vmatpush1.bf16.msra.mxu1 %v7134_v28  ;;  %v7205_v27 = vld [vmem:[#allocation7 + $0xcc4] ss:$16 sps:$4 sm:$0xff]   ;;  %v7208_v28 = vld [vmem:[#allocation7 + $0xccc] ss:$16 sps:$4 sm:$0xff]  }
 0x1f7   : > { %3931 = vmatprep.subr.bf16.mxu0 %v7139_v29  ;;  %4499 = vmatprep.subr.bf16.mxu1 %v7142_v30  ;;  %v454_v29 = vpack.c.bf16 %v390_v26, %v390_v26  ;;  %v297_v30 = vld [vmem:[%s7816_s30 + $0x68] sm:$0xff] }
 0x1f8   : > { %v361_v26 = vld [vmem:[%s7816_s30 + $0x268] sm:$0xff] }
 0x1fa   : > { %3932 = vmatpush1.bf16.msra.mxu0 %v7137_v31  ;;  %4500 = vmatpush1.bf16.msra.mxu1 %v7140_v32  ;;  %v313_v31 = vld [vmem:[%s7816_s30 + $0xe8] sm:$0xff]  ;;  %v7203_v32 = vld [vmem:[#allocation7 + $0xcc0] ss:$16 sps:$4 sm:$0xff]  }
 0x1fb   : > { %3933 = vmatprep.subr.bf16.mxu0 %v7145_v33  ;;  %4501 = vmatprep.subr.bf16.mxu1 %v7148_v34  ;;  %v7206_v33 = vld [vmem:[#allocation7 + $0xcc8] ss:$16 sps:$4 sm:$0xff]   ;;  %v7211_v34 = vld [vmem:[#allocation7 + $0xce4] ss:$16 sps:$4 sm:$0xff]  }
 0x1fe   : > { %3934 = vmatpush1.bf16.msra.mxu0 %v7143_v35  ;;  %4502 = vmatpush1.bf16.msra.mxu1 %v7146_v36  ;;  %v7214_v35 = vld [vmem:[#allocation7 + $0xcec] ss:$16 sps:$4 sm:$0xff]   ;;  %v409_v36 = vpack.c.bf16 %v313_v31, %v297_v30  ;;  %v7283_v30 = vld [vmem:[#allocation7 + $0xe64] ss:$16 sps:$4 sm:$0xff]  }
 0x1ff   : > { %3935 = vmatprep.subr.bf16.mxu0 %v7151_v37  ;;  %4503 = vmatprep.subr.bf16.mxu1 %v7154_v38  ;;  %v7209_v37 = vld [vmem:[#allocation7 + $0xce0] ss:$16 sps:$4 sm:$0xff]   ;;  %v7212_v38 = vld [vmem:[#allocation7 + $0xce8] ss:$16 sps:$4 sm:$0xff]   ;;  %v7286_v31 = vld [vmem:[#allocation7 + $0xe6c] ss:$16 sps:$4 sm:$0xff]  }
 0x202   : > { %3936 = vmatpush1.bf16.msra.mxu0 %v7149_v39  ;;  %4504 = vmatpush1.bf16.msra.mxu1 %v7152_v40  ;;  %v7217_v39 = vld [vmem:[#allocation7 + $0xd04] ss:$16 sps:$4 sm:$0xff]   ;;  %v7220_v40 = vld [vmem:[#allocation7 + $0xd0c] ss:$16 sps:$4 sm:$0xff]  }
 0x203   : > { %3937 = vmatprep.subr.bf16.mxu0 %v7157_v41  ;;  %4505 = vmatprep.subr.bf16.mxu1 %v7160_v42  ;;  %v7215_v41 = vld [vmem:[#allocation7 + $0xd00] ss:$16 sps:$4 sm:$0xff]   ;;  %v7218_v42 = vld [vmem:[#allocation7 + $0xd08] ss:$16 sps:$4 sm:$0xff]  }
 0x206   : > { %3938 = vmatpush1.bf16.msra.mxu0 %v7155_v43  ;;  %4506 = vmatpush1.bf16.msra.mxu1 %v7158_v44  ;;  %v7223_v43 = vld [vmem:[#allocation7 + $0xd24] ss:$16 sps:$4 sm:$0xff]   ;;  %v7226_v44 = vld [vmem:[#allocation7 + $0xd2c] ss:$16 sps:$4 sm:$0xff]  }
 0x207   : > { %3939 = vmatprep.subr.bf16.mxu0 %v7163_v45  ;;  %4507 = vmatprep.subr.bf16.mxu1 %v7166_v46  ;;  %v7221_v45 = vld [vmem:[#allocation7 + $0xd20] ss:$16 sps:$4 sm:$0xff]   ;;  %v7224_v46 = vld [vmem:[#allocation7 + $0xd28] ss:$16 sps:$4 sm:$0xff]  }
 0x20a   : > { %3940 = vmatpush1.bf16.msra.mxu0 %v7161_v47  ;;  %4508 = vmatpush1.bf16.msra.mxu1 %v7164_v48  ;;  %v7229_v47 = vld [vmem:[#allocation7 + $0xd44] ss:$16 sps:$4 sm:$0xff]   ;;  %v7232_v48 = vld [vmem:[#allocation7 + $0xd4c] ss:$16 sps:$4 sm:$0xff]  }
 0x20b   : > { %3980 = vmatprep.subr.bf16.mxu0 %v7169_v51  ;;  %4548 = vmatprep.subr.bf16.mxu1 %v7172_v52  ;;  %v7235_v51 = vld [vmem:[#allocation7 + $0xd64] ss:$16 sps:$4 sm:$0xff]   ;;  %v7238_v52 = vld [vmem:[#allocation7 + $0xd6c] ss:$16 sps:$4 sm:$0xff]  }
 0x20d   : > { %3942 = vmatmul.mubr.bf16.vlgmr.msra.gmra.mrb[0].mxu0 %v406_v53  ;;  %4510 = vmatmul.mubr.bf16.vlgmr.msra.gmra.mrb[0].mxu1 %v406_v53  ;;  %v7233_v53 = vld [vmem:[#allocation7 + $0xd60] ss:$16 sps:$4 sm:$0xff]  }
 0x20e   : > { %3981 = vmatpush1.bf16.msra.mxu0 %v7167_v56  ;;  %4549 = vmatpush1.bf16.msra.mxu1 %v7170_v57  ;;  %v7244_v56 = vld [vmem:[#allocation7 + $0xd8c] ss:$16 sps:$4 sm:$0xff]   ;;  %v7239_v57 = vld [vmem:[#allocation7 + $0xd80] ss:$16 sps:$4 sm:$0xff]  }
 0x20f   : > { %3982 = vmatprep.subr.bf16.mxu0 %v7175_v58  ;;  %4550 = vmatprep.subr.bf16.mxu1 %v7178_v59  ;;  %v7242_v58 = vld [vmem:[#allocation7 + $0xd88] ss:$16 sps:$4 sm:$0xff]   ;;  %v7247_v59 = vld [vmem:[#allocation7 + $0xda4] ss:$16 sps:$4 sm:$0xff]  }
 0x210   : > { %3951 = vmatprep.mubr.bf16.mxu0 %v423_v60  ;;  %4519 = vmatprep.mubr.bf16.mxu1 %v423_v60  ;;  %v7250_v60 = vld [vmem:[#allocation7 + $0xdac] ss:$16 sps:$4 sm:$0xff]  }
 0x212   : > { %3983 = vmatpush1.bf16.msra.mxu0 %v7173_v61  ;;  %4551 = vmatpush1.bf16.msra.mxu1 %v7176_v62  ;;  %v7245_v61 = vld [vmem:[#allocation7 + $0xda0] ss:$16 sps:$4 sm:$0xff]   ;;  %v7248_v62 = vld [vmem:[#allocation7 + $0xda8] ss:$16 sps:$4 sm:$0xff]  }
 0x213   : > { %3984 = vmatprep.subr.bf16.mxu0 %v7181_v1  ;;  %4552 = vmatprep.subr.bf16.mxu1 %v7184_v2  ;;  %v7251_v1 = vld [vmem:[#allocation7 + $0xdc0] ss:$16 sps:$4 sm:$0xff]   ;;  %v7254_v2 = vld [vmem:[#allocation7 + $0xdc8] ss:$16 sps:$4 sm:$0xff]  }
 0x215   : > { %3952 = vmatmul.mubr.bf16.gmra.mrb[4].mxu0 %v422_v3  ;;  %4520 = vmatmul.mubr.bf16.gmra.mrb[4].mxu1 %v422_v3  ;;  %v7259_v3 = vld [vmem:[#allocation7 + $0xde4] ss:$16 sps:$4 sm:$0xff]  }
 0x216   : > { %3985 = vmatpush1.bf16.msra.mxu0 %v7179_v6  ;;  %4553 = vmatpush1.bf16.msra.mxu1 %v7182_v7  ;;  %v7260_v6 = vld [vmem:[#allocation7 + $0xde8] ss:$16 sps:$4 sm:$0xff]   ;;  %v296_v7 = vld [vmem:[%s7816_s30 + $0x60] sm:$0xff] }
 0x217   : > { %3986 = vmatprep.subr.bf16.mxu0 %v7187_v8  ;;  %4554 = vmatprep.subr.bf16.mxu1 %v7190_v9  ;;  %v312_v8 = vld [vmem:[%s7816_s30 + $0xe0] sm:$0xff] }
 0x218   : > { %3961 = vmatprep.mubr.bf16.mxu0 %v439_v10  ;;  %4529 = vmatprep.mubr.bf16.mxu1 %v439_v10  ;;  %v7265_v9 = vld [vmem:[#allocation7 + $0xe04] ss:$16 sps:$4 sm:$0xff]   ;;  %v7268_v10 = vld [vmem:[#allocation7 + $0xe0c] ss:$16 sps:$4 sm:$0xff]  }
 0x21a   : > { %3987 = vmatpush1.bf16.msra.mxu0 %v7185_v11  ;;  %4555 = vmatpush1.bf16.msra.mxu1 %v7188_v12  ;;  %v408_v11 = vpack.c.bf16 %v312_v8, %v296_v7  ;;  %v329_v12 = vld [vmem:[%s7816_s30 + $0x168] sm:$0xff]  ;;  %v7323_v7 = vld [vmem:[#allocation7 + $0xf40] ss:$16 sps:$4 sm:$0xff]  }
 0x21b   : > { %3988 = vmatprep.subr.bf16.mxu0 %v7193_v15  ;;  %4556 = vmatprep.subr.bf16.mxu1 %v7196_v16  ;;  %v7266_v15 = vld [vmem:[#allocation7 + $0xe08] ss:$16 sps:$4 sm:$0xff]   ;;  %v7271_v16 = vld [vmem:[#allocation7 + $0xe24] ss:$16 sps:$4 sm:$0xff]   ;;  %v425_v18 = vpack.c.bf16 %v345_v13, %v329_v12 }
 0x21c   : > { %v7326_v8 = vld [vmem:[#allocation7 + $0xf48] ss:$16 sps:$4 sm:$0xff]   ;;  %v7337_v13 = vld [vmem:[#allocation7 + $0xf84] ss:$16 sps:$4 sm:$0xff]  }
 0x21d   : > { %3962 = vmatmul.mubr.bf16.gmra.mrb[8].mxu0 %v438_v17  ;;  %4530 = vmatmul.mubr.bf16.gmra.mrb[8].mxu1 %v438_v17  ;;  %v7274_v17 = vld [vmem:[#allocation7 + $0xe2c] ss:$16 sps:$4 sm:$0xff]   ;;  %v7332_v12 = vld [vmem:[#allocation7 + $0xf68] ss:$16 sps:$4 sm:$0xff]  }
 0x21e   : > { %3989 = vmatpush1.bf16.msra.mxu0 %v7191_v19  ;;  %4557 = vmatpush1.bf16.msra.mxu1 %v7194_v20  ;;  %v7269_v19 = vld [vmem:[#allocation7 + $0xe20] ss:$16 sps:$4 sm:$0xff]   ;;  %v7272_v20 = vld [vmem:[#allocation7 + $0xe28] ss:$16 sps:$4 sm:$0xff]  }
 0x21f   : > { %3990 = vmatprep.subr.bf16.mxu0 %v7199_v21  ;;  %4558 = vmatprep.subr.bf16.mxu1 %v7202_v22  ;;  %v328_v21 = vld [vmem:[%s7816_s30 + $0x160] sm:$0xff] }
 0x220   : > { %3971 = vmatprep.mubr.bf16.mxu0 %v455_v23  ;;  %4539 = vmatprep.mubr.bf16.mxu1 %v455_v23  ;;  %v344_v22 = vld [vmem:[%s7816_s30 + $0x1e0] sm:$0xff] }
 0x221   : > { %v7277_v23 = vld [vmem:[#allocation7 + $0xe44] ss:$16 sps:$4 sm:$0xff]  }
 0x222   : > { %3991 = vmatpush1.bf16.msra.mxu0 %v7197_v24  ;;  %4559 = vmatpush1.bf16.msra.mxu1 %v7200_v25  ;;  %v7280_v24 = vld [vmem:[#allocation7 + $0xe4c] ss:$16 sps:$4 sm:$0xff]   ;;  %v424_v25 = vpack.c.bf16 %v344_v22, %v328_v21  ;;  %v7349_v21 = vld [vmem:[#allocation7 + $0xfc4] ss:$16 sps:$4 sm:$0xff]  }
 0x223   : > { %3992 = vmatprep.subr.bf16.mxu0 %v7205_v27  ;;  %4560 = vmatprep.subr.bf16.mxu1 %v7208_v28  ;;  %v377_v27 = vld [vmem:[%s7816_s30 + $0x2e8] sm:$0xff]  ;;  %v7275_v28 = vld [vmem:[#allocation7 + $0xe40] ss:$16 sps:$4 sm:$0xff]  }
 0x224   : > { %v7352_v22 = vld [vmem:[#allocation7 + $0xfcc] ss:$16 sps:$4 sm:$0xff]  }
 0x225   : > { %3972 = vmatmul.mubr.bf16.gmra.mrb[12].mxu0 %v454_v29  ;;  %4540 = vmatmul.mubr.bf16.gmra.mrb[12].mxu1 %v454_v29  ;;  %v7278_v29 = vld [vmem:[#allocation7 + $0xe48] ss:$16 sps:$4 sm:$0xff]  }
 0x226   : > { %3993 = vmatpush1.bf16.msra.mxu0 %v7203_v32  ;;  %4561 = vmatpush1.bf16.msra.mxu1 %v7206_v33  ;;  %v441_v32 = vpack.c.bf16 %v377_v27, %v361_v26  ;;  %v7281_v33 = vld [vmem:[#allocation7 + $0xe60] ss:$16 sps:$4 sm:$0xff]   ;;  %v7358_v26 = vld [vmem:[#allocation7 + $0xfec] ss:$16 sps:$4 sm:$0xff]  }
 0x227   : > { %3994 = vmatprep.subr.bf16.mxu0 %v7211_v34  ;;  %4562 = vmatprep.subr.bf16.mxu1 %v7214_v35  ;;  %v7284_v34 = vld [vmem:[#allocation7 + $0xe68] ss:$16 sps:$4 sm:$0xff]   ;;  %v360_v35 = vld [vmem:[%s7816_s30 + $0x260] sm:$0xff] }
 0x228   : > { %4012 = vmatprep.mubr.bf16.mxu0 %v409_v36  ;;  %4580 = vmatprep.mubr.bf16.mxu1 %v409_v36  ;;  %v376_v36 = vld [vmem:[%s7816_s30 + $0x2e0] sm:$0xff] }
 0x229   : > { %v7353_v27 = vld [vmem:[#allocation7 + $0xfe0] ss:$16 sps:$4 sm:$0xff]  }
 0x22a   : > { %3995 = vmatpush1.bf16.msra.mxu0 %v7209_v37  ;;  %4563 = vmatpush1.bf16.msra.mxu1 %v7212_v38  ;;  %v7289_v37 = vld [vmem:[#allocation7 + $0xe84] ss:$16 sps:$4 sm:$0xff]   ;;  %v7292_v38 = vld [vmem:[#allocation7 + $0xe8c] ss:$16 sps:$4 sm:$0xff]  }
 0x22b   : > { %3996 = vmatprep.subr.bf16.mxu0 %v7217_v39  ;;  %4564 = vmatprep.subr.bf16.mxu1 %v7220_v40  ;;  %v440_v39 = vpack.c.bf16 %v376_v36, %v360_v35  ;;  %v393_v40 = vld [vmem:[%s7816_s30 + $0x368] sm:$0xff]  ;;  %v7953_v35 = vld [vmem:[%s7816_s30 + $0x170] sm:$0xff] }
 0x22c   : > { %v7956_v36 = vld [vmem:[%s7816_s30 + $0x1f0] sm:$0xff] }
 0x22e   : > { %3997 = vmatpush1.bf16.msra.mxu0 %v7215_v41  ;;  %4565 = vmatpush1.bf16.msra.mxu1 %v7218_v42  ;;  %v7287_v41 = vld [vmem:[#allocation7 + $0xe80] ss:$16 sps:$4 sm:$0xff]   ;;  %v7290_v42 = vld [vmem:[#allocation7 + $0xe88] ss:$16 sps:$4 sm:$0xff]  }
 0x22f   : > { %3998 = vmatprep.subr.bf16.mxu0 %v7223_v43  ;;  %4566 = vmatprep.subr.bf16.mxu1 %v7226_v44  ;;  %v7295_v43 = vld [vmem:[#allocation7 + $0xea4] ss:$16 sps:$4 sm:$0xff]   ;;  %v7298_v44 = vld [vmem:[#allocation7 + $0xeac] ss:$16 sps:$4 sm:$0xff]  }
 0x232   : > { %3999 = vmatpush1.bf16.msra.mxu0 %v7221_v45  ;;  %4567 = vmatpush1.bf16.msra.mxu1 %v7224_v46  ;;  %v457_v45 = vpack.c.bf16 %v393_v40, %v393_v40  ;;  %v7293_v46 = vld [vmem:[#allocation7 + $0xea0] ss:$16 sps:$4 sm:$0xff]  }
 0x233   : > { %4000 = vmatprep.subr.bf16.mxu0 %v7229_v47  ;;  %4568 = vmatprep.subr.bf16.mxu1 %v7232_v48  ;;  %v7296_v47 = vld [vmem:[#allocation7 + $0xea8] ss:$16 sps:$4 sm:$0xff]   ;;  %v392_v48 = vld [vmem:[%s7816_s30 + $0x360] sm:$0xff] }
 0x236   : > { %4001 = vmatpush1.bf16.msra.mxu0 %v7227_v49  ;;  %4569 = vmatpush1.bf16.msra.mxu1 %v7230_v50  ;;  %v7301_v49 = vld [vmem:[#allocation7 + $0xec4] ss:$16 sps:$4 sm:$0xff]   ;;  %v7304_v50 = vld [vmem:[#allocation7 + $0xecc] ss:$16 sps:$4 sm:$0xff]  }
 0x237   : > { %4002 = vmatprep.subr.bf16.mxu0 %v7235_v51  ;;  %4570 = vmatprep.subr.bf16.mxu1 %v7238_v52  ;;  %v456_v51 = vpack.c.bf16 %v392_v48, %v392_v48  ;;  %v7929_v52 = vld [vmem:[%s7816_s30 + $0x78] sm:$0xff]  ;;  %v974_v48 = vlaneseq }
 0x23a   : > { %4003 = vmatpush1.bf16.msra.mxu0 %v7233_v53  ;;  %4571 = vmatpush1.bf16.msra.mxu1 %v7236_v54  ;;  %v7932_v53 = vld [vmem:[%s7816_s30 + $0xf8] sm:$0xff]  ;;  %v7299_v54 = vld [vmem:[#allocation7 + $0xec0] ss:$16 sps:$4 sm:$0xff]  }
 0x23b   : > { %4004 = vmatprep.subr.bf16.mxu0 %v7241_v55  ;;  %4572 = vmatprep.subr.bf16.mxu1 %v7244_v56  ;;  %v7302_v55 = vld [vmem:[#allocation7 + $0xec8] ss:$16 sps:$4 sm:$0xff]   ;;  %v7307_v56 = vld [vmem:[#allocation7 + $0xee4] ss:$16 sps:$4 sm:$0xff]  }
 0x23e   : > { %4005 = vmatpush1.bf16.msra.mxu0 %v7239_v57  ;;  %4573 = vmatpush1.bf16.msra.mxu1 %v7242_v58  ;;  %v7310_v57 = vld [vmem:[#allocation7 + $0xeec] ss:$16 sps:$4 sm:$0xff]   ;;  %v411_v58 = vpack.c.bf16 %v7932_v53, %v7929_v52 }
 0x23f   : > { %4006 = vmatprep.subr.bf16.mxu0 %v7247_v59  ;;  %4574 = vmatprep.subr.bf16.mxu1 %v7250_v60  ;;  %v7305_v59 = vld [vmem:[#allocation7 + $0xee0] ss:$16 sps:$4 sm:$0xff]   ;;  %v7308_v60 = vld [vmem:[#allocation7 + $0xee8] ss:$16 sps:$4 sm:$0xff]  }
 0x242   : > { %4007 = vmatpush1.bf16.msra.mxu0 %v7245_v61  ;;  %4575 = vmatpush1.bf16.msra.mxu1 %v7248_v62  ;;  %v7313_v61 = vld [vmem:[#allocation7 + $0xf04] ss:$16 sps:$4 sm:$0xff]   ;;  %v7316_v62 = vld [vmem:[#allocation7 + $0xf0c] ss:$16 sps:$4 sm:$0xff]  }
 0x243   : > { %4008 = vmatprep.subr.bf16.mxu0 %v7253_v63  ;;  %4576 = vmatprep.subr.bf16.mxu1 %v7256_v0  ;;  %v7311_v63 = vld [vmem:[#allocation7 + $0xf00] ss:$16 sps:$4 sm:$0xff]   ;;  %v7314_v0 = vld [vmem:[#allocation7 + $0xf08] ss:$16 sps:$4 sm:$0xff]  }
 0x246   : > { %4009 = vmatpush1.bf16.msra.mxu0 %v7251_v1  ;;  %4577 = vmatpush1.bf16.msra.mxu1 %v7254_v2  ;;  %v7319_v1 = vld [vmem:[#allocation7 + $0xf24] ss:$16 sps:$4 sm:$0xff]   ;;  %v7322_v2 = vld [vmem:[#allocation7 + $0xf2c] ss:$16 sps:$4 sm:$0xff]  }
 0x247   : > { %4010 = vmatprep.subr.bf16.mxu0 %v7259_v3  ;;  %4578 = vmatprep.subr.bf16.mxu1 %v7262_v4  ;;  %v7317_v3 = vld [vmem:[#allocation7 + $0xf20] ss:$16 sps:$4 sm:$0xff]   ;;  %v7320_v4 = vld [vmem:[#allocation7 + $0xf28] ss:$16 sps:$4 sm:$0xff]  }
 0x24a   : > { %4011 = vmatpush1.bf16.msra.mxu0 %v7257_v5  ;;  %4579 = vmatpush1.bf16.msra.mxu1 %v7260_v6  ;;  %v7325_v5 = vld [vmem:[#allocation7 + $0xf44] ss:$16 sps:$4 sm:$0xff]   ;;  %v7328_v6 = vld [vmem:[#allocation7 + $0xf4c] ss:$16 sps:$4 sm:$0xff]  }
 0x24b   : > { %4051 = vmatprep.subr.bf16.mxu0 %v7265_v9  ;;  %4619 = vmatprep.subr.bf16.mxu1 %v7268_v10  ;;  %v7331_v9 = vld [vmem:[#allocation7 + $0xf64] ss:$16 sps:$4 sm:$0xff]   ;;  %v7334_v10 = vld [vmem:[#allocation7 + $0xf6c] ss:$16 sps:$4 sm:$0xff]  }
 0x24d   : > { %4013 = vmatmul.mubr.bf16.vlgmr.msra.gmra.mrb[0].mxu0 %v408_v11  ;;  %4581 = vmatmul.mubr.bf16.vlgmr.msra.gmra.mrb[0].mxu1 %v408_v11  ;;  %v7329_v11 = vld [vmem:[#allocation7 + $0xf60] ss:$16 sps:$4 sm:$0xff]  }
 0x24e   : > { %4052 = vmatpush1.bf16.msra.mxu0 %v7263_v14  ;;  %4620 = vmatpush1.bf16.msra.mxu1 %v7266_v15  ;;  %v7340_v14 = vld [vmem:[#allocation7 + $0xf8c] ss:$16 sps:$4 sm:$0xff]   ;;  %v7335_v15 = vld [vmem:[#allocation7 + $0xf80] ss:$16 sps:$4 sm:$0xff]  }
 0x24f   : > { %4053 = vmatprep.subr.bf16.mxu0 %v7271_v16  ;;  %4621 = vmatprep.subr.bf16.mxu1 %v7274_v17  ;;  %v7338_v16 = vld [vmem:[#allocation7 + $0xf88] ss:$16 sps:$4 sm:$0xff]   ;;  %v7343_v17 = vld [vmem:[#allocation7 + $0xfa4] ss:$16 sps:$4 sm:$0xff]  }
 0x250   : > { %4022 = vmatprep.mubr.bf16.mxu0 %v425_v18  ;;  %4590 = vmatprep.mubr.bf16.mxu1 %v425_v18  ;;  %v7346_v18 = vld [vmem:[#allocation7 + $0xfac] ss:$16 sps:$4 sm:$0xff]  }
 0x252   : > { %4054 = vmatpush1.bf16.msra.mxu0 %v7269_v19  ;;  %4622 = vmatpush1.bf16.msra.mxu1 %v7272_v20  ;;  %v7341_v19 = vld [vmem:[#allocation7 + $0xfa0] ss:$16 sps:$4 sm:$0xff]   ;;  %v7344_v20 = vld [vmem:[#allocation7 + $0xfa8] ss:$16 sps:$4 sm:$0xff]  }
 0x253   : > { %4055 = vmatprep.subr.bf16.mxu0 %v7277_v23  ;;  %4623 = vmatprep.subr.bf16.mxu1 %v7280_v24  ;;  %v7347_v23 = vld [vmem:[#allocation7 + $0xfc0] ss:$16 sps:$4 sm:$0xff]   ;;  %v7350_v24 = vld [vmem:[#allocation7 + $0xfc8] ss:$16 sps:$4 sm:$0xff]  }
 0x255   : > { %4023 = vmatmul.mubr.bf16.gmra.mrb[4].mxu0 %v424_v25  ;;  %4591 = vmatmul.mubr.bf16.gmra.mrb[4].mxu1 %v424_v25  ;;  %v7355_v25 = vld [vmem:[#allocation7 + $0xfe4] ss:$16 sps:$4 sm:$0xff]  }
 0x256   : > { %4056 = vmatpush1.bf16.msra.mxu0 %v7275_v28  ;;  %4624 = vmatpush1.bf16.msra.mxu1 %v7278_v29  ;;  %v7356_v28 = vld [vmem:[#allocation7 + $0xfe8] ss:$16 sps:$4 sm:$0xff]   ;;  %v7937_v29 = vld [vmem:[%s7816_s30 + $0x70] sm:$0xff] }
 0x257   : > { %4057 = vmatprep.subr.bf16.mxu0 %v7283_v30  ;;  %4625 = vmatprep.subr.bf16.mxu1 %v7286_v31  ;;  %v7940_v30 = vld [vmem:[%s7816_s30 + $0xf0] sm:$0xff]  ;;  %v7943_v31 = vld [vmem:[%s7816_s30 + $0x178] sm:$0xff] }
 0x258   : > { %4032 = vmatprep.mubr.bf16.mxu0 %v441_v32  ;;  %4600 = vmatprep.mubr.bf16.mxu1 %v441_v32  ;;  %v7946_v32 = vld [vmem:[%s7816_s30 + $0x1f8] sm:$0xff] }
 0x25a   : > { %4058 = vmatpush1.bf16.msra.mxu0 %v7281_v33  ;;  %4626 = vmatpush1.bf16.msra.mxu1 %v7284_v34  ;;  %v410_v33 = vpack.c.bf16 %v7940_v30, %v7937_v29  ;;  %v427_v34 = vpack.c.bf16 %v7946_v32, %v7943_v31 }
 0x25b   : > { %4059 = vmatprep.subr.bf16.mxu0 %v7289_v37  ;;  %4627 = vmatprep.subr.bf16.mxu1 %v7292_v38  ;;  %v7959_v37 = vld [vmem:[%s7816_s30 + $0x278] sm:$0xff] }
 0x25c   : > { %v7962_v38 = vld [vmem:[%s7816_s30 + $0x2f8] sm:$0xff] }
 0x25d   : > { %4033 = vmatmul.mubr.bf16.gmra.mrb[8].mxu0 %v440_v39  ;;  %4601 = vmatmul.mubr.bf16.gmra.mrb[8].mxu1 %v440_v39  ;;  %v426_v39 = vpack.c.bf16 %v7956_v36, %v7953_v35  ;;  %v443_v40 = vpack.c.bf16 %v7962_v38, %v7959_v37 }
 0x25e   : > { %4060 = vmatpush1.bf16.msra.mxu0 %v7287_v41  ;;  %4628 = vmatpush1.bf16.msra.mxu1 %v7290_v42  ;;  %v7969_v41 = vld [vmem:[%s7816_s30 + $0x270] sm:$0xff] }
 0x25f   : > { %4061 = vmatprep.subr.bf16.mxu0 %v7295_v43  ;;  %4629 = vmatprep.subr.bf16.mxu1 %v7298_v44  ;;  %v7972_v42 = vld [vmem:[%s7816_s30 + $0x2f0] sm:$0xff]  ;;  %v7975_v43 = vld [vmem:[%s7816_s30 + $0x378] sm:$0xff] }
 0x260   : > { %4042 = vmatprep.mubr.bf16.mxu0 %v457_v45  ;;  %4610 = vmatprep.mubr.bf16.mxu1 %v457_v45  ;;  %v442_v44 = vpack.c.bf16 %v7972_v42, %v7969_v41  ;;  %v459_v45 = vpack.c.bf16 %v7975_v43, %v7975_v43 }
 0x262   : > { %4062 = vmatpush1.bf16.msra.mxu0 %v7293_v46  ;;  %4630 = vmatpush1.bf16.msra.mxu1 %v7296_v47  ;;  %v7982_v46 = vld [vmem:[%s7816_s30 + $0x370] sm:$0xff] }
 0x263   : > { %4063 = vmatprep.subr.bf16.mxu0 %v7301_v49  ;;  %4631 = vmatprep.subr.bf16.mxu1 %v7304_v50  ;;  %v458_v47 = vpack.c.bf16 %v7982_v46, %v7982_v46  ;;  %v7986_v49 = vshrl.u32 %v974_v48, 7 }
 0x265   : > { %4043 = vmatmul.mubr.bf16.gmra.mrb[12].mxu0 %v456_v51  ;;  %4611 = vmatmul.mubr.bf16.gmra.mrb[12].mxu1 %v456_v51  ;;  %v976_v50 = vsub.s32 0, %v7986_v49  ;;  %v984_v51 = vsub.s32 2, %v7986_v49 }
 0x266   : > { %4064 = vmatpush1.bf16.msra.mxu0 %v7299_v54  ;;  %4632 = vmatpush1.bf16.msra.mxu1 %v7302_v55  ;;  %v972_v54 = vld [vmem:[#allocation9] sm:$0xf]  ;;  %v980_v55 = vsub.s32 1, %v7986_v49 }
 0x267   : > { %4065 = vmatprep.subr.bf16.mxu0 %v7307_v56  ;;  %4633 = vmatprep.subr.bf16.mxu1 %v7310_v57  ;;  %v988_v56 = vsub.s32 3, %v7986_v49  ;;  %v7992_v57 = vrot.slane %v972_v54, %v976_v50 }
 0x268   : > { %4083 = vmatprep.mubr.bf16.mxu0 %v411_v58  ;;  %4651 = vmatprep.mubr.bf16.mxu1 %v411_v58  ;;  %v7994_v58 = vrot.slane %v972_v54, %v984_v51 }
 0x26a   : > { %4066 = vmatpush1.bf16.msra.mxu0 %v7305_v59  ;;  %4634 = vmatpush1.bf16.msra.mxu1 %v7308_v60  ;;  %v4718_v59 = vld [vmem:[#allocation10] sm:$0xf]  ;;  %v7996_v60 = vrot.slane %v972_v54, %v980_v55 }
 0x26b   : > { %4067 = vmatprep.subr.bf16.mxu0 %v7313_v61  ;;  %4635 = vmatprep.subr.bf16.mxu1 %v7316_v62  ;;  %v7998_v61 = vrot.slane %v972_v54, %v988_v56 }
 0x26e   : > { %4068 = vmatpush1.bf16.msra.mxu0 %v7311_v63  ;;  %4636 = vmatpush1.bf16.msra.mxu1 %v7314_v0 }
 0x26f   : > { %4069 = vmatprep.subr.bf16.mxu0 %v7319_v1  ;;  %4637 = vmatprep.subr.bf16.mxu1 %v7322_v2  ;;  %v8001_v1 = vrot.slane %v4718_v59, %v976_v50 }
 0x272   : > { %4070 = vmatpush1.bf16.msra.mxu0 %v7317_v3  ;;  %4638 = vmatpush1.bf16.msra.mxu1 %v7320_v4 }
 0x273   : > { %4071 = vmatprep.subr.bf16.mxu0 %v7325_v5  ;;  %4639 = vmatprep.subr.bf16.mxu1 %v7328_v6  ;;  %v8005_v6 = vrot.slane %v4718_v59, %v980_v55 }
 0x276   : > { %4072 = vmatpush1.bf16.msra.mxu0 %v7323_v7  ;;  %4640 = vmatpush1.bf16.msra.mxu1 %v7326_v8 }
 0x277   : > { %4073 = vmatprep.subr.bf16.mxu0 %v7331_v9  ;;  %4641 = vmatprep.subr.bf16.mxu1 %v7334_v10 }
 0x27a   : > { %4074 = vmatpush1.bf16.msra.mxu0 %v7329_v11  ;;  %4642 = vmatpush1.bf16.msra.mxu1 %v7332_v12 }
 0x27b   : > { %4075 = vmatprep.subr.bf16.mxu0 %v7337_v13  ;;  %4643 = vmatprep.subr.bf16.mxu1 %v7340_v14 }
 0x27e   : > { %4076 = vmatpush1.bf16.msra.mxu0 %v7335_v15  ;;  %4644 = vmatpush1.bf16.msra.mxu1 %v7338_v16  ;;  %v8009_v15 = vrot.slane %v4718_v59, %v984_v51 }
 0x27f   : > { %4077 = vmatprep.subr.bf16.mxu0 %v7343_v17  ;;  %4645 = vmatprep.subr.bf16.mxu1 %v7346_v18 }
 0x282   : > { %4078 = vmatpush1.bf16.msra.mxu0 %v7341_v19  ;;  %4646 = vmatpush1.bf16.msra.mxu1 %v7344_v20 }
 0x283   : > { %4079 = vmatprep.subr.bf16.mxu0 %v7349_v21  ;;  %4647 = vmatprep.subr.bf16.mxu1 %v7352_v22 }
 0x286   : > { %4080 = vmatpush1.bf16.msra.mxu0 %v7347_v23  ;;  %4648 = vmatpush1.bf16.msra.mxu1 %v7350_v24 }
 0x287   : > { %4081 = vmatprep.subr.bf16.mxu0 %v7355_v25  ;;  %4649 = vmatprep.subr.bf16.mxu1 %v7358_v26  ;;  %v8017_v26 = vrot.slane %v4718_v59, %v988_v56 }
 0x28a   : > { %4082 = vmatpush1.bf16.msra.mxu0 %v7353_v27  ;;  %4650 = vmatpush1.bf16.msra.mxu1 %v7356_v28 }
 0x28d   : > { %4084 = vmatmul.mubr.bf16.vlgmr.msra.gmra.mrb[0].mxu0 %v410_v33  ;;  %4652 = vmatmul.mubr.bf16.vlgmr.msra.gmra.mrb[0].mxu1 %v410_v33 }
 0x28e   : > { %4093 = vmatprep.mubr.bf16.mxu0 %v427_v34  ;;  %4661 = vmatprep.mubr.bf16.mxu1 %v427_v34 }
 0x295   : > { %4094 = vmatmul.mubr.bf16.gmra.mrb[4].mxu0 %v426_v39  ;;  %4662 = vmatmul.mubr.bf16.gmra.mrb[4].mxu1 %v426_v39 }
 0x296   : > { %4103 = vmatprep.mubr.bf16.mxu0 %v443_v40  ;;  %4671 = vmatprep.mubr.bf16.mxu1 %v443_v40 }
 0x29d   : > { %4104 = vmatmul.mubr.bf16.gmra.mrb[8].mxu0 %v442_v44  ;;  %4672 = vmatmul.mubr.bf16.gmra.mrb[8].mxu1 %v442_v44 }
 0x29e   : > { %4113 = vmatprep.mubr.bf16.mxu0 %v459_v45  ;;  %4681 = vmatprep.mubr.bf16.mxu1 %v459_v45 }
 0x2a5   : > { %4114 = vmatmul.mubr.bf16.gmra.mrb[12].mxu0 %v458_v47  ;;  %4682 = vmatmul.mubr.bf16.gmra.mrb[12].mxu1 %v458_v47 }
 0x360   : > { %v4085_v62 = vpop.f32.mrb[0].mxu0  ;;  %v4653_v63 = vpop.f32.mrb[0].mxu1 }
 0x361   : > { %v6251_v0 = vadd.f32 %v4085_v62, %v7992_v57  ;;  %v6265_v2 = vadd.f32 %v4653_v63, %v7994_v58  ;;  %v4087_v3 = vpop.f32.mrb[1].mxu0  ;;  %v4655_v4 = vpop.f32.mrb[1].mxu1 }
 0x362   : > { %v6252_v5 = vadd.f32 %v4087_v3, %v7996_v60  ;;  %v4089_v7 = vpop.f32.mrb[2].mxu0  ;;  %v4657_v8 = vpop.f32.mrb[2].mxu1  ;;  %v6266_v10 = vadd.f32 %v4655_v4, %v7998_v61 }
 0x363   : > { %v4690_v9 = vmax.f32 %v6251_v0, 0.0  ;;  %v6253_v11 = vadd.f32 %v4089_v7, %v7992_v57  ;;  %v4091_v12 = vpop.f32.mrb[3].mxu0  ;;  %v4659_v13 = vpop.f32.mrb[3].mxu1  ;;  %v4692_v14 = vmax.f32 %v6265_v2, 0.0  ;;  %v6267_v20 = vadd.f32 %v4657_v8, %v7994_v58 }
 0x364   : > { %v4691_v16 = vmax.f32 %v6252_v5, 0.0  ;;  %v6254_v17 = vadd.f32 %v4091_v12, %v7996_v60  ;;  %v6268_v21 = vadd.f32 %v4659_v13, %v7998_v61  ;;  %v4693_v24 = vmax.f32 %v6266_v10, 0.0 }
 0x365   : > { %v4740_v18 = vmul.f32 %v8001_v1, %v4690_v9  ;;  %v4694_v19 = vmax.f32 %v6253_v11, 0.0  ;;  %v4742_v27 = vmul.f32 %v8009_v15, %v4692_v14  ;;  %v4696_v40 = vmax.f32 %v6267_v20, 0.0 }
 0x366   : > { %v4741_v22 = vmul.f32 %v8005_v6, %v4691_v16  ;;  %v4695_v23 = vmax.f32 %v6254_v17, 0.0  ;;  %v4697_v44 = vmax.f32 %v6268_v21, 0.0  ;;  %v4743_v5 = vmul.f32 %v8017_v26, %v4693_v24 }
 0x367   : > { %v4744_v25 = vmul.f32 %v8001_v1, %v4694_v19  ;;  %v4746_v11 = vmul.f32 %v8009_v15, %v4696_v40 }
 0x368   : > { %v4745_v28 = vmul.f32 %v8005_v6, %v4695_v23  ;;  %v4095_v33 = vpop.f32.mrb[4].mxu0  ;;  %v4663_v34 = vpop.f32.mrb[4].mxu1  ;;  %v4768_v39 = vadd.f32 %v4741_v22, %v4740_v18  ;;  %v4747_v18 = vmul.f32 %v8017_v26, %v4697_v44 }
 0x369   : > { %v6255_v45 = vadd.f32 %v4095_v33, %v7992_v57  ;;  %v6269_v47 = vadd.f32 %v4663_v34, %v7994_v58  ;;  %v4097_v48 = vpop.f32.mrb[5].mxu0  ;;  %v4665_v50 = vpop.f32.mrb[5].mxu1 }
 0x36a   : > { %v6256_v51 = vadd.f32 %v4097_v48, %v7996_v60  ;;  %v6270_v54 = vadd.f32 %v4665_v50, %v7998_v61  ;;  %v4099_v55 = vpop.f32.mrb[6].mxu0  ;;  %v4667_v56 = vpop.f32.mrb[6].mxu1  ;;  %v4769_v59 = vadd.f32 %v4768_v39, %v4742_v27  ;;  %v4773_v62 = vadd.f32 %v4745_v28, %v4744_v25 }
 0x36b   : > { %v4698_v63 = vmax.f32 %v6255_v45, 0.0  ;;  %v4700_v0 = vmax.f32 %v6269_v47, 0.0  ;;  %v6257_v2 = vadd.f32 %v4099_v55, %v7992_v57  ;;  %v4101_v3 = vpop.f32.mrb[7].mxu0  ;;  %v4669_v4 = vpop.f32.mrb[7].mxu1  ;;  %v6271_v9 = vadd.f32 %v4667_v56, %v7994_v58 }
 0x36c   : > { %v4699_v7 = vmax.f32 %v6256_v51, 0.0  ;;  %v4701_v8 = vmax.f32 %v6270_v54, 0.0  ;;  %v6258_v10 = vadd.f32 %v4101_v3, %v7996_v60  ;;  %v6272_v14 = vadd.f32 %v4669_v4, %v7998_v61 }
 0x36d   : > { %v4748_v12 = vmul.f32 %v8001_v1, %v4698_v63  ;;  %v4702_v13 = vmax.f32 %v6257_v2, 0.0  ;;  %v4750_v19 = vmul.f32 %v8009_v15, %v4700_v0  ;;  %v4770_v21 = vadd.f32 %v4769_v59, %v4743_v5 }
 0x36e   : > { %v4749_v16 = vmul.f32 %v8005_v6, %v4699_v7  ;;  %v4703_v17 = vmax.f32 %v6258_v10, 0.0  ;;  %v4774_v22 = vadd.f32 %v4773_v62, %v4746_v11  ;;  %v4751_v24 = vmul.f32 %v8017_v26, %v4701_v8 }
 0x36f   : > { %v4752_v20 = vmul.f32 %v8001_v1, %v4702_v13  ;;  %v4704_v25 = vmax.f32 %v6271_v9, 0.0  ;;  %v4705_v34 = vmax.f32 %v6272_v14, 0.0  ;;  %4771 = vadd.xlane.f32.xlu0 %v4770_v21 }
 0x370   : > { %v4778_v23 = vadd.f32 %v4749_v16, %v4748_v12  ;;  %v4753_v27 = vmul.f32 %v8005_v6, %v4703_v17  ;;  %v4105_v28 = vpop.f32.mrb[8].mxu0  ;;  %v4673_v33 = vpop.f32.mrb[8].mxu1  ;;  %v4775_v44 = vadd.f32 %v4774_v22, %v4747_v18 }
 0x371   : > { %v6259_v39 = vadd.f32 %v4105_v28, %v7992_v57  ;;  %v6273_v40 = vadd.f32 %v4673_v33, %v7994_v58  ;;  %v4107_v45 = vpop.f32.mrb[9].mxu0  ;;  %v4675_v47 = vpop.f32.mrb[9].mxu1  ;;  %v4754_v9 = vmul.f32 %v8009_v15, %v4704_v25  ;;  %v4755_v13 = vmul.f32 %v8017_v26, %v4705_v34 }
 0x372   : > { %v4783_v48 = vadd.f32 %v4753_v27, %v4752_v20  ;;  %v6260_v50 = vadd.f32 %v4107_v45, %v7996_v60  ;;  %v6274_v51 = vadd.f32 %v4675_v47, %v7998_v61  ;;  %v4109_v54 = vpop.f32.mrb[10].mxu0  ;;  %v4677_v55 = vpop.f32.mrb[10].mxu1  ;;  %v4779_v56 = vadd.f32 %v4778_v23, %v4750_v19  ;;  %4776 = vadd.xlane.f32.xlu1 %v4775_v44 }
 0x373   : > { %v4706_v59 = vmax.f32 %v6259_v39, 0.0  ;;  %v4708_v62 = vmax.f32 %v6273_v40, 0.0  ;;  %v6261_v63 = vadd.f32 %v4109_v54, %v7992_v57  ;;  %v6275_v0 = vadd.f32 %v4677_v55, %v7994_v58  ;;  %v4111_v2 = vpop.f32.mrb[11].mxu0  ;;  %v4679_v3 = vpop.f32.mrb[11].mxu1 }
 0x374   : > { %v4707_v4 = vmax.f32 %v6260_v50, 0.0  ;;  %v4709_v5 = vmax.f32 %v6274_v51, 0.0  ;;  %v6262_v7 = vadd.f32 %v4111_v2, %v7996_v60  ;;  %v6276_v8 = vadd.f32 %v4679_v3, %v7998_v61 }
 0x375   : > { %v4756_v10 = vmul.f32 %v8001_v1, %v4706_v59  ;;  %v4710_v11 = vmax.f32 %v6261_v63, 0.0  ;;  %v4712_v12 = vmax.f32 %v6275_v0, 0.0  ;;  %v4780_v19 = vadd.f32 %v4779_v56, %v4751_v24 }
 0x376   : > { %v4757_v14 = vmul.f32 %v8005_v6, %v4707_v4  ;;  %v4711_v16 = vmax.f32 %v6262_v7, 0.0  ;;  %v4713_v18 = vmax.f32 %v6276_v8, 0.0  ;;  %v4784_v20 = vadd.f32 %v4783_v48, %v4754_v9 }
 0x377   : > { %v4760_v17 = vmul.f32 %v8001_v1, %v4710_v11  ;;  %v4758_v21 = vmul.f32 %v8009_v15, %v4708_v62  ;;  %v4759_v23 = vmul.f32 %v8017_v26, %v4709_v5  ;;  %v4762_v33 = vmul.f32 %v8009_v15, %v4712_v12  ;;  %4781 = vadd.xlane.f32.xlu1 %v4780_v19 }
 0x378   : > { %v4788_v22 = vadd.f32 %v4757_v14, %v4756_v10  ;;  %v4761_v25 = vmul.f32 %v8005_v6, %v4711_v16  ;;  %v4115_v27 = vpop.f32.mrb[12].mxu0  ;;  %v4683_v28 = vpop.f32.mrb[12].mxu1  ;;  %v4785_v24 = vadd.f32 %v4784_v20, %v4755_v13  ;;  %v4763_v55 = vmul.f32 %v8017_v26, %v4713_v18 }
 0x379   : > { %v6263_v34 = vadd.f32 %v4115_v27, %v7992_v57  ;;  %v6277_v39 = vadd.f32 %v4683_v28, %v7994_v58  ;;  %v4117_v40 = vpop.f32.mrb[13].mxu0  ;;  %v4685_v44 = vpop.f32.mrb[13].mxu1  ;;  %v7583_v10 = vmov 0   ;;  %v8065_v12 = vadd.s32 48, %v7986_v49 }
 0x37a   : > { %v4793_v45 = vadd.f32 %v4761_v25, %v4760_v17  ;;  %v6264_v47 = vadd.f32 %v4117_v40, %v7996_v60  ;;  %v6278_v48 = vadd.f32 %v4685_v44, %v7998_v61  ;;  %v4119_v50 = vpop.f32.mrb[14].mxu0  ;;  %v4687_v51 = vpop.f32.mrb[14].mxu1  ;;  %v4789_v54 = vadd.f32 %v4788_v22, %v4758_v21  ;;  %6590 = vset.pattern.permute.xlu0 %v7583_v10 }
 0x37b   : > { %v4714_v56 = vmax.f32 %v6263_v34, 0.0  ;;  %v4120_v59 = vpop.f32.mrb[15].mxu0  ;;  %v4688_v62 = vpop.f32.mrb[15].mxu1  ;;  %v4716_v63 = vmax.f32 %v6277_v39, 0.0  ;;  %6589 = vset.pattern.permute.xlu1 %v7583_v10  ;;  %v4804_v14 = vstv %s4803_s25  ;;  %vm4826_vm0 = vcmp.lt.s32.totalorder %v8065_v12, 49 }
 0x37c   : > { %v4715_v57 = vmax.f32 %v6264_v47, 0.0  ;;  %v4790_v0 = vadd.f32 %v4789_v54, %v4759_v23  ;;  %v4794_v58 = vadd.f32 %v4793_v45, %v4762_v33  ;;  %v4717_v4 = vmax.f32 %v6278_v48, 0.0 }
 0x37d   : > { %v4764_v2 = vmul.f32 %v8001_v1, %v4714_v56  ;;  %v4766_v61 = vmul.f32 %v8009_v15, %v4716_v63 }
 0x37e   : > { %v4765_v3 = vmul.f32 %v8005_v6, %v4715_v57  ;;  %4791 = vadd.xlane.f32.xlu0 %v4790_v0  ;;  %v4795_v60 = vadd.f32 %v4794_v58, %v4763_v55  ;;  %v4767_v7 = vmul.f32 %v8017_v26, %v4717_v4 }
 0x380   : > { %v4798_v5 = vadd.f32 %v4765_v3, %v4764_v2  ;;  %4796 = vadd.xlane.f32.xlu1 %v4795_v60 }
 0x382   : > { %v4799_v8 = vadd.f32 %v4798_v5, %v4766_v61 }
 0x384   : > { %v4800_v9 = vadd.f32 %v4799_v8, %v4767_v7 }
 0x386   : > { %4801 = vadd.xlane.f32.xlu0 %v4800_v9 }
 0x38a   : > { %4786 = vadd.xlane.f32.xlu0 %v4785_v24 }
 0x3fc   : > { %v4772_v1 = vpop.xlane.xlu0 %4771 }
 0x3fd   : > { %v4805_v21 = vadd.f32 %v4804_v14, %v4772_v1 }
 0x3ff   : > { %v4777_v11 = vpop.xlane.xlu1 %4776 }
 0x400   : > { %v4806_v17 = vadd.f32 %v4804_v14, %v4777_v11 }
 0x404   : > { %v4782_v6 = vpop.xlane.xlu1 %4781 }
 0x405   : > { %v4807_v20 = vadd.f32 %v4804_v14, %v4782_v6 }
 0x40b   : > { %v4792_v13 = vpop.xlane.xlu0 %4791 }
 0x40c   : > { %v4809_v18 = vadd.f32 %v4804_v14, %v4792_v13 }
 0x40d   : > { %v4797_v15 = vpop.xlane.xlu1 %4796 }
 0x40e   : > { %v4810_v16 = vadd.f32 %v4804_v14, %v4797_v15  ;;  %v4834_v28 = vmax.f32 %v4805_v21, %v4809_v18 }
 0x410   : > { %v4835_v22 = vmax.f32 %v4806_v17, %v4810_v16 }
 0x412   : > { %v4837_v34 = vmax.f32 %v4834_v28, %v4835_v22 }
 0x413   : > { %v4802_v26 = vpop.xlane.xlu0 %4801 }
 0x414   : > { %v4811_v19 = vadd.f32 %v4804_v14, %v4802_v26 }
 0x416   : > { %v4833_v23 = vsel %vm4826_vm0, %v4811_v19, -inf }
 0x417   : > { %v4836_v25 = vmax.f32 %v4807_v20, %v4833_v23  ;;  %v4787_v27 = vpop.xlane.xlu0 %4786 }
 0x418   : > { %v4808_v33 = vadd.f32 %v4804_v14, %v4787_v27 }
 0x41a   : > { %v4838_v39 = vmax.f32 %v4836_v25, %v4808_v33 }
 0x41c   : > { %v4839_v40 = vmax.f32 %v4837_v34, %v4838_v39 }
 0x41e   : > { %v4840_v44 = vrot.slane %v4839_v40, 4 }
 0x420   : > { %v4841_v24 = vmax.f32 %v4839_v40, %v4840_v44 }
 0x422   : > { %v4842_v45 = vrot.slane %v4841_v24, 2 }
 0x424   : > { %v4843_v47 = vmax.f32 %v4841_v24, %v4842_v45 }
 0x426   : > { %v4844_v48 = vrot.slane %v4843_v47, 1 }
 0x428   : > { %v4845_v50 = vmax.f32 %v4843_v47, %v4844_v48 }
 0x42a   : > { %v4846_v51 = vsub.f32 %v4805_v21, %v4845_v50  ;;  %v4847_v54 = vsub.f32 %v4806_v17, %v4845_v50  ;;  %v4848_v55 = vsub.f32 %v4807_v20, %v4845_v50  ;;  %v4849_v56 = vsub.f32 %v4808_v33, %v4845_v50 }
 0x42b   : > { %v4850_v63 = vsub.f32 %v4809_v18, %v4845_v50  ;;  %v4851_v0 = vsub.f32 %v4810_v16, %v4845_v50  ;;  %v4852_v2 = vsub.f32 %v4833_v23, %v4845_v50 }
 0x42c   : > { %v4853_v59 = vmul.f32 1.442695, %v4846_v51  ;;  %v4855_v62 = vmul.f32 1.442695, %v4847_v54  ;;  %v4857_v57 = vmul.f32 1.442695, %v4848_v55 }
 0x42d   : > { %v4859_v58 = vmul.f32 1.442695, %v4849_v56  ;;  %v4861_v3 = vmul.f32 1.442695, %v4850_v63  ;;  %v4863_v4 = vmul.f32 1.442695, %v4851_v0 }
 0x42e   : > { %7359 = vpow2.f32 %v4853_v59  ;;  %v4865_v60 = vmul.f32 1.442695, %v4852_v2  ;;  %v4905_v2 = vld [vmem:[%s7816_s30] sm:$0xff] }
 0x42f   : > { %7361 = vpow2.f32 %v4855_v62 }
 0x430   : > { %7363 = vpow2.f32 %v4857_v57  ;;  %v7584_v57 = vmov 1966171168  }
 0x431   : > { %7365 = vpow2.f32 %v4859_v58  ;;  %v5510_v0 = vunpack.c.l.s4 %v7584_v57 }
 0x432   : > { %7367 = vpow2.f32 %v4861_v3  ;;  %v4906_v3 = vld [vmem:[%s7816_s30 + $0x8] sm:$0xff] }
 0x433   : > { %7369 = vpow2.f32 %v4863_v4  ;;  %v5511_v58 = vunpack.c.0.s8 %v5510_v0  ;;  %v4907_v4 = vld [vmem:[%s7816_s30 + $0x10] sm:$0xff] }
 0x434   : > { %7371 = vpow2.f32 %v4865_v60  ;;  %v4908_v60 = vld [vmem:[%s7816_s30 + $0x18] sm:$0xff] }
 0x438   : > { %v7360_v61 = vpop.eup %7359 }
 0x439   : > { %v7362_v5 = vpop.eup %7361 }
 0x43a   : > { %v4867_v7 = vadd.f32 %v7362_v5, %v7360_v61  ;;  %v7364_v8 = vpop.eup %7363 }
 0x43b   : > { %v7366_v10 = vpop.eup %7365 }
 0x43c   : > { %v4868_v9 = vadd.f32 %v7364_v8, %v4867_v7  ;;  %v7368_v1 = vpop.eup %7367  ;;  %v4910_v7 = vld [vmem:[%s7816_s30 + $0x28] sm:$0xff] }
 0x43d   : > { %v7370_v13 = vpop.eup %7369 }
 0x43e   : > { %v4869_v11 = vadd.f32 %v7366_v10, %v4868_v9  ;;  %v7372_v14 = vpop.eup %7371  ;;  %v4923_v9 = vld [vmem:[%s7816_s30 + $0x90] sm:$0xff] }
 0x440   : > { %v4870_v6 = vadd.f32 %v7368_v1, %v4869_v11  ;;  %v4911_v11 = vld [vmem:[%s7816_s30 + $0x30] sm:$0xff] }
 0x442   : > { %v4871_v15 = vadd.f32 %v7370_v13, %v4870_v6  ;;  %v4913_v6 = vld [vmem:[%s7816_s30 + $0x40] sm:$0xff] }
 0x444   : > { %v4872_v16 = vadd.f32 %v7372_v14, %v4871_v15 }
 0x446   : > { %v4873_v26 = vrot.slane %v4872_v16, 4 }
 0x448   : > { %v4874_v17 = vadd.f32 %v4873_v26, %v4872_v16  ;;  %v4915_v16 = vld [vmem:[%s7816_s30 + $0x50] sm:$0xff]  ;;  %v4916_v26 = vld [vmem:[%s7816_s30 + $0x58] sm:$0xff] }
 0x44a   : > { %v4875_v18 = vrot.slane %v4874_v17, 2 }
 0x44c   : > { %v4876_v19 = vadd.f32 %v4875_v18, %v4874_v17  ;;  %v4917_v18 = vld [vmem:[%s7816_s30 + $0x60] sm:$0xff] }
 0x44e   : > { %v4877_v20 = vrot.slane %v4876_v19, 1 }
 0x450   : > { %v4878_v21 = vadd.f32 %v4877_v20, %v4876_v19  ;;  %v4918_v19 = vld [vmem:[%s7816_s30 + $0x68] sm:$0xff]  ;;  %v4925_v20 = vld [vmem:[%s7816_s30 + $0xa0] sm:$0xff] }
 0x452   : > { %7373 = vrcp.f32 %v4878_v21 }
 0x45c   : > { %v7374_v22 = vpop.eup %7373 }
 0x45d   : > { %v4882_v23 = vmul.f32 %v7374_v22, %v7364_v8  ;;  %v4883_v25 = vmul.f32 %v7374_v22, %v7366_v10  ;;  %v4884_v27 = vmul.f32 %v7374_v22, %v7368_v1  ;;  %v4881_v28 = vmul.f32 %v7374_v22, %v7362_v5  ;;  %v4909_v5 = vld [vmem:[%s7816_s30 + $0x20] sm:$0xff]  ;;  %v4922_v8 = vld [vmem:[%s7816_s30 + $0x88] sm:$0xff]  ;;  %v4924_v10 = vld [vmem:[%s7816_s30 + $0x98] sm:$0xff] }
 0x45e   : > { %v4880_v33 = vmul.f32 %v7374_v22, %v7360_v61  ;;  %v4885_v34 = vmul.f32 %v7374_v22, %v7370_v13  ;;  %v4886_v39 = vmul.f32 %v7374_v22, %v7372_v14  ;;  %v4921_v61 = vld [vmem:[%s7816_s30 + $0x80] sm:$0xff]  ;;  %v4912_v1 = vld [vmem:[%s7816_s30 + $0x38] sm:$0xff]  ;;  %v8091_v13 = vsub.s32 %v5511_v58, %v7986_v49  ;;  %v4914_v14 = vld [vmem:[%s7816_s30 + $0x48] sm:$0xff] }
 0x45f   : > { %v4890_v40 = vadd.f32 1.0, %v4883_v25  ;;  %v4888_v44 = vadd.f32 1.0, %v4881_v28  ;;  %v4889_v24 = vadd.f32 1.0, %v4882_v23  ;;  %v4891_v45 = vadd.f32 1.0, %v4884_v27  ;;  %v4926_v25 = vld [vmem:[%s7816_s30 + $0xa8] sm:$0xff]  ;;  %v4927_v27 = vld [vmem:[%s7816_s30 + $0xb0] sm:$0xff] }
 0x460   : > { %v4887_v47 = vadd.f32 1.0, %v4880_v33  ;;  %v4892_v48 = vadd.f32 1.0, %v4885_v34  ;;  %v4893_v50 = vadd.f32 1.0, %v4886_v39  ;;  %8645 = vst [vmem:[#allocation17_spill] sm:$0xff] %v8091_v13  ;;  %v4928_v28 = vld [vmem:[%s7816_s30 + $0xb8] sm:$0xff]  ;;  %v4937_v58 = vld [vmem:[%s7816_s30 + $0x100] sm:$0xff] }
 0x461   : > { %4898 = vst.msk [vmem:[#allocation2 + $0x18] sm:$0xff] %vm4894_vm1, %v4890_v40  ;;  %4896 = vst.msk [vmem:[#allocation2 + $0x8] sm:$0xff] %vm4894_vm1, %v4888_v44  ;;  %v4929_v44 = vld [vmem:[%s7816_s30 + $0xc0] sm:$0xff] }
 0x462   : > { %4897 = vst.msk [vmem:[#allocation2 + $0x10] sm:$0xff] %vm4894_vm1, %v4889_v24  ;;  %4899 = vst.msk [vmem:[#allocation2 + $0x20] sm:$0xff] %vm4894_vm1, %v4891_v45  ;;  %v4930_v24 = vld [vmem:[%s7816_s30 + $0xc8] sm:$0xff]  ;;  %v4931_v45 = vld [vmem:[%s7816_s30 + $0xd0] sm:$0xff] }
 0x463   : > { %4895 = vst.msk [vmem:[#allocation2] sm:$0xff] %vm4894_vm1, %v4887_v47  ;;  %4900 = vst.msk [vmem:[#allocation2 + $0x28] sm:$0xff] %vm4894_vm1, %v4892_v48 }
 0x464   : > { %4901 = vst.msk [vmem:[#allocation2 + $0x30] sm:$0xff] %vm4894_vm1, %v4893_v50 }
 0x468   : > { %v5018_v51 = vld [vmem:[#allocation2 + $0x8] sm:$0xff]  ;;  %v5020_v56 = vld [vmem:[#allocation2 + $0x18] sm:$0xff] }
 0x469   : > { %5031 = vperm.xlu0 %6590, %v5018_v51   ;;  %v5019_v55 = vld [vmem:[#allocation2 + $0x10] sm:$0xff]  ;;  %v5021_v59 = vld [vmem:[#allocation2 + $0x20] sm:$0xff] }
 0x46a   : > { %v5017_v54 = vld [vmem:[#allocation2] sm:$0xff]  ;;  %v5022_v62 = vld [vmem:[#allocation2 + $0x28] sm:$0xff] }
 0x46b   : > { %5026 = vperm.xlu1 %6589, %v5017_v54   ;;  %v5023_v63 = vld [vmem:[#allocation2 + $0x30] sm:$0xff] }
 0x46c   : > { %v4932_v54 = vld [vmem:[%s7816_s30 + $0xd8] sm:$0xff] }
 0x46f   : > { %5036 = vperm.xlu1 %6589, %v5019_v55   ;;  %v4933_v55 = vld [vmem:[%s7816_s30 + $0xe0] sm:$0xff] }
 0x473   : > { %5041 = vperm.xlu1 %6589, %v5020_v56   ;;  %v4934_v56 = vld [vmem:[%s7816_s30 + $0xe8] sm:$0xff] }
 0x477   : > { %5046 = vperm.xlu1 %6589, %v5021_v59  }
 0x47b   : > { %5051 = vperm.xlu1 %6589, %v5022_v62  }
 0x47f   : > { %5056 = vperm.xlu1 %6589, %v5023_v63  }
 0x4e8   : > { %v5032_v15 = vpop.permute.xlu0 %5031 }
 0x4e9   : > { %v8099_v21 = vmul.f32 %v5032_v15, %v4921_v61  ;;  %v8101_v22 = vmul.f32 %v5032_v15, %v4922_v8  ;;  %v8103_v23 = vmul.f32 %v5032_v15, %v4923_v9  ;;  %v8105_v49 = vmul.f32 %v5032_v15, %v4924_v10  ;;  %v4941_v8 = vld [vmem:[%s7816_s30 + $0x120] sm:$0xff]  ;;  %v4942_v9 = vld [vmem:[%s7816_s30 + $0x128] sm:$0xff] }
 0x4ea   : > { %v5027_v17 = vpop.permute.xlu1 %5026  ;;  %v8156_v10 = vmul.f32 %v5032_v15, %v4925_v20  ;;  %v4947_v20 = vld [vmem:[%s7816_s30 + $0x150] sm:$0xff]  ;;  %v8183_v13 = vmul.f32 %v5032_v15, %v7940_v30  ;;  %v4956_v30 = vld [vmem:[%s7816_s30 + $0x198] sm:$0xff] }
 0x4eb   : > { %v8110_v33 = vmul.f32 %v5027_v17, %v4905_v2  ;;  %v8112_v34 = vmul.f32 %v5027_v17, %v4906_v3  ;;  %v8114_v39 = vmul.f32 %v5027_v17, %v4907_v4  ;;  %v8116_v40 = vmul.f32 %v5027_v17, %v4908_v60  ;;  %v4938_v2 = vld [vmem:[%s7816_s30 + $0x108] sm:$0xff]  ;;  %v4939_v3 = vld [vmem:[%s7816_s30 + $0x110] sm:$0xff] }
 0x4ec   : > { %v8121_v47 = vmul.f32 %v5027_v17, %v4909_v5  ;;  %v8123_v48 = vmul.f32 %v5027_v17, %v4910_v7  ;;  %v8125_v50 = vmul.f32 %v5027_v17, %v4911_v11  ;;  %v8127_v51 = vmul.f32 %v5027_v17, %v4912_v1  ;;  %v4940_v7 = vld [vmem:[%s7816_s30 + $0x118] sm:$0xff]  ;;  %8660 = vst [vmem:[#allocation32_spill] sm:$0xff] %v8183_v13 }
 0x4ed   : > { %v8132_v59 = vmul.f32 %v5027_v17, %v4913_v6  ;;  %v8134_v62 = vmul.f32 %v5027_v17, %v4914_v14  ;;  %v8136_v63 = vmul.f32 %v5027_v17, %v4915_v16  ;;  %v8138_v57 = vmul.f32 %v5027_v17, %v4916_v26  ;;  %v4944_v14 = vld [vmem:[%s7816_s30 + $0x138] sm:$0xff] }
 0x4ee   : > { %v5037_v0 = vpop.permute.xlu1 %5036  ;;  %v8143_v4 = vmul.f32 %v5027_v17, %v4917_v18  ;;  %v8145_v60 = vmul.f32 %v5027_v17, %v4918_v19  ;;  %v8148_v61 = vmul.f32 %v5027_v17, %v7937_v29  ;;  %v8151_v5 = vmul.f32 %v5027_v17, %v7929_v52  ;;  %v4943_v29 = vld [vmem:[%s7816_s30 + $0x130] sm:$0xff]  ;;  %v4945_v52 = vld [vmem:[%s7816_s30 + $0x140] sm:$0xff]  ;;  %v4946_v19 = vld [vmem:[%s7816_s30 + $0x148] sm:$0xff] }
 0x4ef   : > { %8646 = vst [vmem:[#allocation18_spill] sm:$0xff] %v8132_v59  ;;  %8647 = vst [vmem:[#allocation19_spill] sm:$0xff] %v8134_v62  ;;  %v8158_v11 = vmul.f32 %v5032_v15, %v4926_v25  ;;  %v8160_v1 = vmul.f32 %v5032_v15, %v4927_v27  ;;  %v8162_v6 = vmul.f32 %v5032_v15, %v4928_v28  ;;  %v4948_v25 = vld [vmem:[%s7816_s30 + $0x158] sm:$0xff] }
 0x4f0   : > { %8648 = vst [vmem:[#allocation20_spill] sm:$0xff] %v8136_v63  ;;  %8649 = vst [vmem:[#allocation21_spill] sm:$0xff] %v8138_v57  ;;  %v8167_v16 = vmul.f32 %v5032_v15, %v4929_v44  ;;  %v8169_v26 = vmul.f32 %v5032_v15, %v4930_v24  ;;  %v8171_v17 = vmul.f32 %v5032_v15, %v4931_v45  ;;  %v4953_v45 = vld [vmem:[%s7816_s30 + $0x180] sm:$0xff] }
 0x4f1   : > { %8650 = vst [vmem:[#allocation22_spill] sm:$0xff] %v8143_v4  ;;  %8651 = vst [vmem:[#allocation23_spill] sm:$0xff] %v8145_v60  ;;  %v8173_v18 = vmul.f32 %v5032_v15, %v4932_v54  ;;  %v8178_v27 = vmul.f32 %v5032_v15, %v4933_v55  ;;  %v8180_v28 = vmul.f32 %v5032_v15, %v4934_v56  ;;  %v4954_v54 = vld [vmem:[%s7816_s30 + $0x188] sm:$0xff] }
 0x4f2   : > { %8652 = vst [vmem:[#allocation24_spill] sm:$0xff] %v8148_v61  ;;  %8653 = vst [vmem:[#allocation25_spill] sm:$0xff] %v8151_v5  ;;  %v8186_v44 = vmul.f32 %v5032_v15, %v7932_v53  ;;  %v5042_v24 = vpop.permute.xlu1 %5041  ;;  %v4955_v5 = vld [vmem:[%s7816_s30 + $0x190] sm:$0xff]  ;;  %v8191_v61 = vmul.f32 %v5037_v0, %v4937_v58  ;;  %v8193_v60 = vmul.f32 %v5037_v0, %v4938_v2  ;;  %v4957_v53 = vld [vmem:[%s7816_s30 + $0x1a0] sm:$0xff] }
 0x4f3   : > { %8654 = vst [vmem:[#allocation26_spill] sm:$0xff] %v8167_v16  ;;  %8655 = vst [vmem:[#allocation27_spill] sm:$0xff] %v8169_v26  ;;  %v8195_v55 = vmul.f32 %v5037_v0, %v4939_v3  ;;  %v8197_v56 = vmul.f32 %v5037_v0, %v4940_v7  ;;  %v4958_v15 = vld [vmem:[%s7816_s30 + $0x1a8] sm:$0xff]  ;;  %v8204_v13 = vmul.f32 %v5037_v0, %v4942_v9  ;;  %v4959_v3 = vld [vmem:[%s7816_s30 + $0x1b0] sm:$0xff] }
 0x4f4   : > { %8656 = vst [vmem:[#allocation28_spill] sm:$0xff] %v8171_v17  ;;  %8657 = vst [vmem:[#allocation29_spill] sm:$0xff] %v8173_v18  ;;  %v8206_v58 = vmul.f32 %v5037_v0, %v4943_v29  ;;  %v8208_v2 = vmul.f32 %v5037_v0, %v4944_v14  ;;  %v4961_v7 = vld [vmem:[%s7816_s30 + $0x1c0] sm:$0xff]  ;;  %v8213_v4 = vmul.f32 %v5037_v0, %v4945_v52  ;;  %v4962_v9 = vld [vmem:[%s7816_s30 + $0x1c8] sm:$0xff] }
 0x4f5   : > { %8658 = vst [vmem:[#allocation30_spill] sm:$0xff] %v8178_v27  ;;  %8659 = vst [vmem:[#allocation31_spill] sm:$0xff] %v8180_v28  ;;  %v4960_v28 = vld [vmem:[%s7816_s30 + $0x1b8] sm:$0xff]  ;;  %v8215_v27 = vmul.f32 %v5037_v0, %v4946_v19  ;;  %v8217_v57 = vmul.f32 %v5037_v0, %v4947_v20  ;;  %v4963_v18 = vld [vmem:[%s7816_s30 + $0x1d0] sm:$0xff]  ;;  %v8231_v52 = vmul.f32 %v5037_v0, %v7953_v35 }
 0x4f6   : > { %8661 = vst [vmem:[#allocation33_spill] sm:$0xff] %v8186_v44  ;;  %v8202_v44 = vmul.f32 %v5037_v0, %v4941_v8  ;;  %8662 = vst [vmem:[#allocation34_spill] sm:$0xff] %v8213_v4  ;;  %v8219_v8 = vmul.f32 %v5037_v0, %v4948_v25  ;;  %v4964_v29 = vld [vmem:[%s7816_s30 + $0x1d8] sm:$0xff]  ;;  %v7375_v14 = vld [vmem:[%s7816_s30 + $0x160] sm:$0xff]  ;;  %v8234_v19 = vmul.f32 %v5037_v0, %v7943_v31  ;;  %v5047_v20 = vpop.permute.xlu1 %5046 }
 0x4f7   : > { %8663 = vst [vmem:[#allocation35_spill] sm:$0xff] %v8215_v27  ;;  %8664 = vst [vmem:[#allocation36_spill] sm:$0xff] %v8217_v57  ;;  %v8225_v63 = vmul.f32 %v7375_v14, %v5037_v0  ;;  %v7376_v17 = vld [vmem:[%s7816_s30 + $0x168] sm:$0xff]  ;;  %v4969_v25 = vld [vmem:[%s7816_s30 + $0x200] sm:$0xff]  ;;  %v8239_v27 = vmul.f32 %v5042_v24, %v4953_v45  ;;  %v8241_v14 = vmul.f32 %v5042_v24, %v4954_v54 }
 0x4f8   : > { %8665 = vst [vmem:[#allocation37_spill] sm:$0xff] %v8219_v8  ;;  %v8228_v62 = vmul.f32 %v7376_v17, %v5037_v0  ;;  %8668 = vst [vmem:[#allocation40_spill] sm:$0xff] %v8231_v52  ;;  %v4970_v8 = vld [vmem:[%s7816_s30 + $0x208] sm:$0xff]  ;;  %v4971_v57 = vld [vmem:[%s7816_s30 + $0x210] sm:$0xff]  ;;  %v8245_v17 = vmul.f32 %v5042_v24, %v4956_v30  ;;  %v8252_v52 = vmul.f32 %v5042_v24, %v4958_v15 }
 0x4f9   : > { %8666 = vst [vmem:[#allocation38_spill] sm:$0xff] %v8225_v63  ;;  %8669 = vst [vmem:[#allocation41_spill] sm:$0xff] %v8234_v19  ;;  %v8243_v63 = vmul.f32 %v5042_v24, %v4955_v5  ;;  %v4972_v35 = vld [vmem:[%s7816_s30 + $0x218] sm:$0xff]  ;;  %v4973_v31 = vld [vmem:[%s7816_s30 + $0x220] sm:$0xff]  ;;  %v8250_v19 = vmul.f32 %v5042_v24, %v4957_v53  ;;  %v8254_v45 = vmul.f32 %v5042_v24, %v4959_v3 }
 0x4fa   : > { %8667 = vst [vmem:[#allocation39_spill] sm:$0xff] %v8228_v62  ;;  %v4974_v0 = vld [vmem:[%s7816_s30 + $0x228] sm:$0xff]  ;;  %8671 = vst [vmem:[#allocation43_spill] sm:$0xff] %v8252_v52  ;;  %v8256_v54 = vmul.f32 %v5042_v24, %v4960_v28  ;;  %v4975_v5 = vld [vmem:[%s7816_s30 + $0x230] sm:$0xff]  ;;  %v8261_v4 = vmul.f32 %v5042_v24, %v4961_v7  ;;  %v8263_v26 = vmul.f32 %v5042_v24, %v4962_v9  ;;  %v5052_v9 = vpop.permute.xlu1 %5051 }
 0x4fb   : > { %8670 = vst [vmem:[#allocation42_spill] sm:$0xff] %v8250_v19  ;;  %8672 = vst [vmem:[#allocation44_spill] sm:$0xff] %v8254_v45  ;;  %v4976_v62 = vld [vmem:[%s7816_s30 + $0x238] sm:$0xff]  ;;  %v4977_v30 = vld [vmem:[%s7816_s30 + $0x240] sm:$0xff]  ;;  %v8265_v59 = vmul.f32 %v5042_v24, %v4963_v18  ;;  %v8267_v53 = vmul.f32 %v5042_v24, %v4964_v29  ;;  %v8279_v7 = vmul.f32 %v5042_v24, %v7956_v36 }
 0x4fc   : > { %8673 = vst [vmem:[#allocation45_spill] sm:$0xff] %v8256_v54  ;;  %8674 = vst [vmem:[#allocation46_spill] sm:$0xff] %v8261_v4  ;;  %v4978_v15 = vld [vmem:[%s7816_s30 + $0x248] sm:$0xff]  ;;  %v4979_v16 = vld [vmem:[%s7816_s30 + $0x250] sm:$0xff]  ;;  %v8282_v18 = vmul.f32 %v5042_v24, %v7946_v32  ;;  %v8309_v4 = vmul.f32 %v5047_v20, %v4977_v30  ;;  %v8327_v30 = vmul.f32 %v5047_v20, %v7969_v41 }
 0x4fd   : > { %8675 = vst [vmem:[#allocation47_spill] sm:$0xff] %v8263_v26  ;;  %8676 = vst [vmem:[#allocation48_spill] sm:$0xff] %v8265_v59  ;;  %v4980_v3 = vld [vmem:[%s7816_s30 + $0x258] sm:$0xff]  ;;  %v7377_v28 = vld [vmem:[%s7816_s30 + $0x1e0] sm:$0xff]  ;;  %v8287_v26 = vmul.f32 %v5047_v20, %v4969_v25  ;;  %v8302_v25 = vmul.f32 %v5047_v20, %v4975_v5  ;;  %v5357_v12 = vmax.f32 %v8123_v48, %v8158_v11 }
 0x4fe   : > { %8677 = vst [vmem:[#allocation49_spill] sm:$0xff] %v8267_v53  ;;  %v8273_v54 = vmul.f32 %v7377_v28, %v5042_v24  ;;  %v7378_v45 = vld [vmem:[%s7816_s30 + $0x1e8] sm:$0xff]  ;;  %8680 = vst [vmem:[#allocation52_spill] sm:$0xff] %v8279_v7  ;;  %v4985_v29 = vld [vmem:[%s7816_s30 + $0x280] sm:$0xff]  ;;  %v8289_v28 = vmul.f32 %v5047_v20, %v4970_v8  ;;  %v8300_v7 = vmul.f32 %v5047_v20, %v4974_v0  ;;  %v5057_v41 = vpop.permute.xlu1 %5056 }
 0x4ff   : > { %v8276_v52 = vmul.f32 %v7378_v45, %v5042_v24  ;;  %8681 = vst [vmem:[#allocation53_spill] sm:$0xff] %v8282_v18  ;;  %v4986_v53 = vld [vmem:[%s7816_s30 + $0x288] sm:$0xff]  ;;  %v4987_v59 = vld [vmem:[%s7816_s30 + $0x290] sm:$0xff]  ;;  %8682 = vst [vmem:[#allocation54_spill] sm:$0xff] %v8287_v26  ;;  %v8293_v45 = vmul.f32 %v5047_v20, %v4972_v35  ;;  %v8298_v18 = vmul.f32 %v5047_v20, %v4973_v31 }
 0x500   : > { %8678 = vst [vmem:[#allocation50_spill] sm:$0xff] %v8273_v54  ;;  %8683 = vst [vmem:[#allocation55_spill] sm:$0xff] %v8289_v28  ;;  %v8291_v54 = vmul.f32 %v5047_v20, %v4971_v57  ;;  %v4988_v36 = vld [vmem:[%s7816_s30 + $0x298] sm:$0xff]  ;;  %v4989_v32 = vld [vmem:[%s7816_s30 + $0x2a0] sm:$0xff]  ;;  %v8304_v8 = vmul.f32 %v5047_v20, %v4976_v62  ;;  %v8315_v31 = vmul.f32 %v5047_v20, %v4980_v3 }
 0x501   : > { %8679 = vst [vmem:[#allocation51_spill] sm:$0xff] %v8276_v52  ;;  %8685 = vst [vmem:[#allocation57_spill] sm:$0xff] %v8293_v45  ;;  %v4990_v24 = vld [vmem:[%s7816_s30 + $0x2a8] sm:$0xff]  ;;  %v4991_v57 = vld [vmem:[%s7816_s30 + $0x2b0] sm:$0xff]  ;;  %v8311_v45 = vmul.f32 %v5047_v20, %v4978_v15  ;;  %v5169_v19 = vmul.f32 %v5057_v41, %v7982_v46 }
 0x502   : > { %8684 = vst [vmem:[#allocation56_spill] sm:$0xff] %v8291_v54  ;;  %8686 = vst [vmem:[#allocation58_spill] sm:$0xff] %v8298_v18  ;;  %v4992_v52 = vld [vmem:[%s7816_s30 + $0x2b8] sm:$0xff]  ;;  %v4993_v35 = vld [vmem:[%s7816_s30 + $0x2c0] sm:$0xff]  ;;  %v8313_v54 = vmul.f32 %v5047_v20, %v4979_v16  ;;  %v8330_v16 = vmul.f32 %v5047_v20, %v7959_v37 }
 0x503   : > { %8687 = vst [vmem:[#allocation59_spill] sm:$0xff] %v8300_v7  ;;  %8688 = vst [vmem:[#allocation60_spill] sm:$0xff] %v8302_v25  ;;  %v4994_v0 = vld [vmem:[%s7816_s30 + $0x2c8] sm:$0xff]  ;;  %v4995_v7 = vld [vmem:[%s7816_s30 + $0x2d0] sm:$0xff] }
 0x504   : > { %8689 = vst [vmem:[#allocation61_spill] sm:$0xff] %v8304_v8  ;;  %8690 = vst [vmem:[#allocation62_spill] sm:$0xff] %v8309_v4  ;;  %v4996_v5 = vld [vmem:[%s7816_s30 + $0x2d8] sm:$0xff]  ;;  %v7379_v62 = vld [vmem:[%s7816_s30 + $0x260] sm:$0xff]  ;;  %v8357_v4 = vmul.f32 %v5052_v9, %v4993_v35  ;;  %v8378_v35 = vmul.f32 %v5052_v9, %v7962_v38  ;;  %v5170_v38 = vmul.f32 %v5057_v41, %v7975_v43 }
 0x505   : > { %8691 = vst [vmem:[#allocation63_spill] sm:$0xff] %v8311_v45  ;;  %8692 = vst [vmem:[#allocation64_spill] sm:$0xff] %v8313_v54  ;;  %v8321_v8 = vmul.f32 %v7379_v62, %v5047_v20  ;;  %v7380_v25 = vld [vmem:[%s7816_s30 + $0x268] sm:$0xff]  ;;  %v5001_v15 = vld [vmem:[%s7816_s30 + $0x300] sm:$0xff]  ;;  %v8335_v54 = vmul.f32 %v5052_v9, %v4985_v29  ;;  %v8337_v45 = vmul.f32 %v5052_v9, %v4986_v53 }
 0x506   : > { %8693 = vst [vmem:[#allocation65_spill] sm:$0xff] %v8315_v31  ;;  %v8324_v18 = vmul.f32 %v7380_v25, %v5047_v20  ;;  %8696 = vst [vmem:[#allocation68_spill] sm:$0xff] %v8327_v30  ;;  %v5002_v3 = vld [vmem:[%s7816_s30 + $0x308] sm:$0xff]  ;;  %v5003_v31 = vld [vmem:[%s7816_s30 + $0x310] sm:$0xff]  ;;  %v8339_v62 = vmul.f32 %v5052_v9, %v4987_v59  ;;  %v8341_v25 = vmul.f32 %v5052_v9, %v4988_v36 }
 0x507   : > { %8694 = vst [vmem:[#allocation66_spill] sm:$0xff] %v8321_v8  ;;  %8697 = vst [vmem:[#allocation69_spill] sm:$0xff] %v8330_v16  ;;  %v5004_v30 = vld [vmem:[%s7816_s30 + $0x318] sm:$0xff]  ;;  %v5005_v37 = vld [vmem:[%s7816_s30 + $0x320] sm:$0xff]  ;;  %v8346_v16 = vmul.f32 %v5052_v9, %v4989_v32  ;;  %v8350_v29 = vmul.f32 %v5052_v9, %v4991_v57  ;;  %v8352_v53 = vmul.f32 %v5052_v9, %v4992_v52 }
 0x508   : > { %8695 = vst [vmem:[#allocation67_spill] sm:$0xff] %v8324_v18  ;;  %8698 = vst [vmem:[#allocation70_spill] sm:$0xff] %v8335_v54  ;;  %v5006_v20 = vld [vmem:[%s7816_s30 + $0x328] sm:$0xff]  ;;  %v8348_v18 = vmul.f32 %v5052_v9, %v4990_v24  ;;  %v5007_v59 = vld [vmem:[%s7816_s30 + $0x330] sm:$0xff] }
 0x509   : > { %8699 = vst [vmem:[#allocation71_spill] sm:$0xff] %v8337_v45  ;;  %8700 = vst [vmem:[#allocation72_spill] sm:$0xff] %v8339_v62  ;;  %v5008_v36 = vld [vmem:[%s7816_s30 + $0x338] sm:$0xff]  ;;  %v5009_v8 = vld [vmem:[%s7816_s30 + $0x340] sm:$0xff]  ;;  %v8361_v62 = vmul.f32 %v5052_v9, %v4995_v7  ;;  %v8363_v45 = vmul.f32 %v5052_v9, %v4996_v5  ;;  %v5155_v7 = vmul.f32 %v5057_v41, %v5001_v15 }
 0x50a   : > { %8701 = vst [vmem:[#allocation73_spill] sm:$0xff] %v8341_v25  ;;  %8702 = vst [vmem:[#allocation74_spill] sm:$0xff] %v8346_v16  ;;  %v8359_v25 = vmul.f32 %v5052_v9, %v4994_v0  ;;  %v5010_v32 = vld [vmem:[%s7816_s30 + $0x348] sm:$0xff]  ;;  %v5011_v16 = vld [vmem:[%s7816_s30 + $0x350] sm:$0xff]  ;;  %v5156_v0 = vmul.f32 %v5057_v41, %v5002_v3  ;;  %v5157_v5 = vmul.f32 %v5057_v41, %v5003_v31 }
 0x50b   : > { %8703 = vst [vmem:[#allocation75_spill] sm:$0xff] %v8348_v18  ;;  %8704 = vst [vmem:[#allocation76_spill] sm:$0xff] %v8350_v29  ;;  %v5012_v54 = vld [vmem:[%s7816_s30 + $0x358] sm:$0xff]  ;;  %v7381_v24 = vld [vmem:[%s7816_s30 + $0x2e0] sm:$0xff]  ;;  %v5164_v29 = vmul.f32 %v5057_v41, %v5010_v32  ;;  %v5165_v28 = vmul.f32 %v5057_v41, %v5011_v16 }
 0x50c   : > { %8705 = vst [vmem:[#allocation77_spill] sm:$0xff] %v8352_v53  ;;  %8706 = vst [vmem:[#allocation78_spill] sm:$0xff] %v8357_v4  ;;  %v8369_v18 = vmul.f32 %v7381_v24, %v5052_v9  ;;  %v7382_v57 = vld [vmem:[%s7816_s30 + $0x2e8] sm:$0xff]  ;;  %v8375_v53 = vmul.f32 %v5052_v9, %v7972_v42  ;;  %v5161_v4 = vmul.f32 %v5057_v41, %v5007_v59  ;;  %v5282_v31 = vsel %vm4826_vm0, %v5156_v0, -inf  ;;  %v8714_v11 = vld [vmem:[#allocation43_spill] sm:$0xff] }
 0x50d   : > { %8707 = vst [vmem:[#allocation79_spill] sm:$0xff] %v8359_v25  ;;  %8708 = vst [vmem:[#allocation80_spill] sm:$0xff] %v8361_v62  ;;  %v8372_v52 = vmul.f32 %v7382_v57, %v5052_v9  ;;  %v5159_v62 = vmul.f32 %v5057_v41, %v5005_v37  ;;  %v5160_v25 = vmul.f32 %v5057_v41, %v5006_v20  ;;  %v7384_v42 = vld [vmem:[%s7816_s30 + $0x368] sm:$0xff]  ;;  %v5281_v9 = vsel %vm4826_vm0, %v5155_v7, -inf  ;;  %v8719_v59 = vld [vmem:[#allocation56_spill] sm:$0xff] }
 0x50e   : > { %8709 = vst [vmem:[#allocation81_spill] sm:$0xff] %v8363_v45  ;;  %8710 = vst [vmem:[#allocation82_spill] sm:$0xff] %v8369_v18  ;;  %v5158_v45 = vmul.f32 %v5057_v41, %v5004_v30  ;;  %v5162_v24 = vmul.f32 %v5057_v41, %v5008_v36  ;;  %v5163_v18 = vmul.f32 %v5057_v41, %v5009_v8  ;;  %v5283_v8 = vsel %vm4826_vm0, %v5157_v5, -inf  ;;  %v8720_v36 = vld [vmem:[#allocation57_spill] sm:$0xff]  ;;  %v8721_v32 = vld [vmem:[#allocation58_spill] sm:$0xff] }
 0x50f   : > { %8711 = vst [vmem:[#allocation83_spill] sm:$0xff] %v8372_v52  ;;  %8712 = vst [vmem:[#allocation84_spill] sm:$0xff] %v8375_v53  ;;  %v5166_v57 = vmul.f32 %v5057_v41, %v5012_v54  ;;  %v7383_v52 = vld [vmem:[%s7816_s30 + $0x360] sm:$0xff]  ;;  %v5168_v53 = vmul.f32 %v7384_v42, %v5057_v41  ;;  %v5285_v30 = vsel %vm4826_vm0, %v5159_v62, -inf  ;;  %v5286_v46 = vsel %vm4826_vm0, %v5160_v25, -inf  ;;  %v8724_v5 = vld [vmem:[#allocation61_spill] sm:$0xff] }
 0x510   : > { %v5167_v26 = vmul.f32 %v7383_v52, %v5057_v41  ;;  %v5284_v54 = vsel %vm4826_vm0, %v5158_v45, -inf  ;;  %v5287_v43 = vsel %vm4826_vm0, %v5161_v4, -inf  ;;  %v5288_v16 = vsel %vm4826_vm0, %v5162_v24, -inf  ;;  %v8722_v52 = vld [vmem:[#allocation59_spill] sm:$0xff]  ;;  %v8723_v7 = vld [vmem:[#allocation60_spill] sm:$0xff] }
 0x511   : > { %v8402_v15 = vsel %vm4826_vm0, %v5163_v18, -inf  ;;  %v8406_v3 = vsel %vm4826_vm0, %v5164_v29, -inf  ;;  %v8410_v45 = vsel %vm4826_vm0, %v5165_v28, -inf  ;;  %v8414_v62 = vsel %vm4826_vm0, %v5166_v57, -inf  ;;  %v8725_v57 = vld [vmem:[#allocation70_spill] sm:$0xff] }
 0x512   : > { %v8418_v4 = vsel %vm4826_vm0, %v5167_v26, -inf  ;;  %v8422_v18 = vsel %vm4826_vm0, %v5168_v53, -inf  ;;  %v8426_v25 = vsel %vm4826_vm0, %v5169_v19, -inf  ;;  %v8430_v28 = vsel %vm4826_vm0, %v5170_v38, -inf  ;;  %v8718_v53 = vld [vmem:[#allocation55_spill] sm:$0xff] }
 0x513   : > { %v5297_v41 = vmax.f32 %v8110_v33, %v8099_v21  ;;  %v5309_v37 = vmax.f32 %v8112_v34, %v8101_v22  ;;  %v5321_v26 = vmax.f32 %v8114_v39, %v8103_v23  ;;  %v5333_v20 = vmax.f32 %v8116_v40, %v8105_v49  ;;  %v8726_v38 = vld [vmem:[#allocation71_spill] sm:$0xff] }
 0x514   : > { %v5345_v19 = vmax.f32 %v8121_v47, %v8156_v10  ;;  %v5369_v29 = vmax.f32 %v8125_v50, %v8160_v1  ;;  %v5381_v21 = vmax.f32 %v8127_v51, %v8162_v6  ;;  %v5358_v39 = vmax.f32 %v5357_v12, %v8204_v13  ;;  %v8715_v6 = vld [vmem:[#allocation44_spill] sm:$0xff]  ;;  %v8729_v12 = vld [vmem:[#allocation74_spill] sm:$0xff] }
 0x515   : > { %v5298_v22 = vmax.f32 %v5297_v41, %v8191_v61  ;;  %v5310_v33 = vmax.f32 %v5309_v37, %v8193_v60  ;;  %v5322_v23 = vmax.f32 %v5321_v26, %v8195_v55  ;;  %v5334_v49 = vmax.f32 %v5333_v20, %v8197_v56  ;;  %v8713_v61 = vld [vmem:[#allocation42_spill] sm:$0xff]  ;;  %v8716_v55 = vld [vmem:[#allocation45_spill] sm:$0xff]  ;;  %v8727_v37 = vld [vmem:[#allocation72_spill] sm:$0xff] }
 0x516   : > { %v5346_v34 = vmax.f32 %v5345_v19, %v8202_v44  ;;  %v5370_v40 = vmax.f32 %v5369_v29, %v8206_v58  ;;  %v5382_v47 = vmax.f32 %v5381_v21, %v8208_v2  ;;  %v5359_v1 = vmax.f32 %v5358_v39, %v8714_v11  ;;  %v8717_v56 = vld [vmem:[#allocation54_spill] sm:$0xff]  ;;  %v8728_v20 = vld [vmem:[#allocation73_spill] sm:$0xff]  ;;  %v8730_v21 = vld [vmem:[#allocation75_spill] sm:$0xff] }
 0x517   : > { %v5299_v48 = vmax.f32 %v5298_v22, %v8239_v27  ;;  %v5311_v50 = vmax.f32 %v5310_v33, %v8241_v14  ;;  %v5323_v51 = vmax.f32 %v5322_v23, %v8243_v63  ;;  %v5335_v60 = vmax.f32 %v5334_v49, %v8245_v17  ;;  %v8731_v33 = vld [vmem:[#allocation76_spill] sm:$0xff]  ;;  %v8732_v49 = vld [vmem:[#allocation77_spill] sm:$0xff] }
 0x518   : > { %v5347_v10 = vmax.f32 %v5346_v34, %v8713_v61  ;;  %v5371_v44 = vmax.f32 %v5370_v40, %v8715_v6  ;;  %v5383_v13 = vmax.f32 %v5382_v47, %v8716_v55  ;;  %v5360_v17 = vmax.f32 %v5359_v1, %v8722_v52 }
 0x519   : > { %v5300_v58 = vmax.f32 %v5299_v48, %v8717_v56  ;;  %v5312_v2 = vmax.f32 %v5311_v50, %v8718_v53  ;;  %v5324_v27 = vmax.f32 %v5323_v51, %v8719_v59  ;;  %v5336_v14 = vmax.f32 %v5335_v60, %v8720_v36 }
 0x51a   : > { %v5348_v63 = vmax.f32 %v5347_v10, %v8721_v32  ;;  %v5372_v0 = vmax.f32 %v5371_v44, %v8723_v7  ;;  %v5384_v24 = vmax.f32 %v5383_v13, %v8724_v5  ;;  %v5361_v22 = vmax.f32 %v5360_v17, %v8730_v21 }
 0x51b   : > { %v5301_v42 = vmax.f32 %v5300_v58, %v8725_v57  ;;  %v5313_v41 = vmax.f32 %v5312_v2, %v8726_v38  ;;  %v5325_v26 = vmax.f32 %v5324_v27, %v8727_v37  ;;  %v5337_v19 = vmax.f32 %v5336_v14, %v8728_v20 }
 0x51c   : > { %v5349_v29 = vmax.f32 %v5348_v63, %v8729_v12  ;;  %v5373_v23 = vmax.f32 %v5372_v0, %v8731_v33  ;;  %v5385_v34 = vmax.f32 %v5384_v24, %v8732_v49  ;;  %v5362_v51 = vmax.f32 %v5361_v22, %v5286_v46 }
 0x51d   : > { %v5302_v39 = vmax.f32 %v5301_v42, %v5281_v9  ;;  %v5314_v40 = vmax.f32 %v5313_v41, %v5282_v31  ;;  %v5326_v47 = vmax.f32 %v5325_v26, %v5283_v8  ;;  %v5338_v48 = vmax.f32 %v5337_v19, %v5284_v54 }
 0x51e   : > { %v5350_v50 = vmax.f32 %v5349_v29, %v5285_v30  ;;  %v5374_v60 = vmax.f32 %v5373_v23, %v5287_v43  ;;  %v5386_v61 = vmax.f32 %v5385_v34, %v5288_v16  ;;  %v5363_v55 = vrot.slane %v5362_v51, 4 }
 0x51f   : > { %v5303_v10 = vrot.slane %v5302_v39, 4  ;;  %v5315_v11 = vrot.slane %v5314_v40, 4  ;;  %v5327_v1 = vrot.slane %v5326_v47, 4  ;;  %v5339_v6 = vrot.slane %v5338_v48, 4 }
 0x520   : > { %v5351_v44 = vrot.slane %v5350_v50, 4  ;;  %v5375_v13 = vrot.slane %v5374_v60, 4  ;;  %v5387_v56 = vrot.slane %v5386_v61, 4  ;;  %v5364_v31 = vmax.f32 %v5362_v51, %v5363_v55  ;;  %v8736_v51 = vld [vmem:[#allocation19_spill] sm:$0xff]  ;;  %v8741_v55 = vld [vmem:[#allocation30_spill] sm:$0xff] }
 0x521   : > { %v5304_v58 = vmax.f32 %v5302_v39, %v5303_v10  ;;  %v5316_v53 = vmax.f32 %v5314_v40, %v5315_v11  ;;  %v5328_v2 = vmax.f32 %v5326_v47, %v5327_v1  ;;  %v5340_v59 = vmax.f32 %v5338_v48, %v5339_v6  ;;  %v8733_v40 = vld [vmem:[#allocation26_spill] sm:$0xff]  ;;  %v8738_v10 = vld [vmem:[#allocation20_spill] sm:$0xff]  ;;  %v8739_v1 = vld [vmem:[#allocation29_spill] sm:$0xff] }
 0x522   : > { %v5352_v9 = vmax.f32 %v5350_v50, %v5351_v44  ;;  %v5376_v8 = vmax.f32 %v5374_v60, %v5375_v13  ;;  %v5388_v54 = vmax.f32 %v5386_v61, %v5387_v56  ;;  %v5365_v36 = vrot.slane %v5364_v31, 2  ;;  %v8734_v47 = vld [vmem:[#allocation18_spill] sm:$0xff]  ;;  %v8735_v50 = vld [vmem:[#allocation27_spill] sm:$0xff]  ;;  %v8737_v61 = vld [vmem:[#allocation28_spill] sm:$0xff] }
 0x523   : > { %v5305_v30 = vrot.slane %v5304_v58, 2  ;;  %v5317_v46 = vrot.slane %v5316_v53, 2  ;;  %v5329_v43 = vrot.slane %v5328_v2, 2  ;;  %v5341_v16 = vrot.slane %v5340_v59, 2  ;;  %v8740_v6 = vld [vmem:[#allocation21_spill] sm:$0xff]  ;;  %v8742_v13 = vld [vmem:[#allocation22_spill] sm:$0xff] }
 0x524   : > { %v5353_v27 = vrot.slane %v5352_v9, 2  ;;  %v5377_v14 = vrot.slane %v5376_v8, 2  ;;  %v5389_v32 = vrot.slane %v5388_v54, 2  ;;  %v5366_v5 = vmax.f32 %v5364_v31, %v5365_v36  ;;  %v8751_v36 = vld [vmem:[#allocation36_spill] sm:$0xff] }
 0x525   : > { %v5306_v63 = vmax.f32 %v5304_v58, %v5305_v30  ;;  %v5318_v52 = vmax.f32 %v5316_v53, %v5317_v46  ;;  %v5330_v17 = vmax.f32 %v5328_v2, %v5329_v43  ;;  %v5342_v7 = vmax.f32 %v5340_v59, %v5341_v16  ;;  %v8743_v58 = vld [vmem:[#allocation31_spill] sm:$0xff]  ;;  %v8745_v59 = vld [vmem:[#allocation32_spill] sm:$0xff]  ;;  %v8749_v46 = vld [vmem:[#allocation34_spill] sm:$0xff] }
 0x526   : > { %v5354_v0 = vmax.f32 %v5352_v9, %v5353_v27  ;;  %v5378_v24 = vmax.f32 %v5376_v8, %v5377_v14  ;;  %v5390_v57 = vmax.f32 %v5388_v54, %v5389_v32  ;;  %v5367_v20 = vrot.slane %v5366_v5, 1  ;;  %v8744_v53 = vld [vmem:[#allocation23_spill] sm:$0xff]  ;;  %v8746_v9 = vld [vmem:[#allocation24_spill] sm:$0xff]  ;;  %v8747_v8 = vld [vmem:[#allocation33_spill] sm:$0xff] }
 0x527   : > { %v5307_v42 = vrot.slane %v5306_v63, 1  ;;  %v5319_v38 = vrot.slane %v5318_v52, 1  ;;  %v5331_v41 = vrot.slane %v5330_v17, 1  ;;  %v5343_v37 = vrot.slane %v5342_v7, 1  ;;  %v8748_v54 = vld [vmem:[#allocation25_spill] sm:$0xff]  ;;  %v8750_v16 = vld [vmem:[#allocation35_spill] sm:$0xff] }
 0x528   : > { %v5355_v26 = vrot.slane %v5354_v0, 1  ;;  %v5379_v19 = vrot.slane %v5378_v24, 1  ;;  %v5391_v12 = vrot.slane %v5390_v57, 1  ;;  %v8490_v49 = vmax.f32 %v5366_v5, %v5367_v20  ;;  %v8752_v32 = vld [vmem:[#allocation37_spill] sm:$0xff]  ;;  %v8755_v5 = vld [vmem:[#allocation40_spill] sm:$0xff] }
 0x529   : > { %v8480_v29 = vmax.f32 %v5306_v63, %v5307_v42  ;;  %v8482_v21 = vmax.f32 %v5318_v52, %v5319_v38  ;;  %v8484_v22 = vmax.f32 %v5330_v17, %v5331_v41  ;;  %v8486_v33 = vmax.f32 %v5342_v7, %v5343_v37  ;;  %v8753_v52 = vld [vmem:[#allocation38_spill] sm:$0xff]  ;;  %v8754_v7 = vld [vmem:[#allocation39_spill] sm:$0xff]  ;;  %v8759_v20 = vld [vmem:[#allocation48_spill] sm:$0xff] }
 0x52a   : > { %v8488_v23 = vmax.f32 %v5354_v0, %v5355_v26  ;;  %v8492_v34 = vmax.f32 %v5378_v24, %v5379_v19  ;;  %v8494_v39 = vmax.f32 %v5390_v57, %v5391_v12  ;;  %v5393_v48 = vmax.f32 %v8734_v47, %v8733_v40  ;;  %v8756_v57 = vld [vmem:[#allocation41_spill] sm:$0xff]  ;;  %v8757_v38 = vld [vmem:[#allocation46_spill] sm:$0xff]  ;;  %v8758_v37 = vld [vmem:[#allocation47_spill] sm:$0xff] }
 0x52b   : > { %v5405_v60 = vmax.f32 %v8736_v51, %v8735_v50  ;;  %v5417_v11 = vmax.f32 %v8738_v10, %v8737_v61  ;;  %v5429_v44 = vmax.f32 %v8740_v6, %v8739_v1  ;;  %v5441_v56 = vmax.f32 %v8742_v13, %v8741_v55  ;;  %v8760_v12 = vld [vmem:[#allocation49_spill] sm:$0xff]  ;;  %v8761_v47 = vld [vmem:[#allocation50_spill] sm:$0xff]  ;;  %v8762_v50 = vld [vmem:[#allocation51_spill] sm:$0xff] }
 0x52c   : > { %v5453_v2 = vmax.f32 %v8744_v53, %v8743_v58  ;;  %v5465_v31 = vmax.f32 %v8746_v9, %v8745_v59  ;;  %v5477_v30 = vmax.f32 %v8748_v54, %v8747_v8  ;;  %v5394_v43 = vmax.f32 %v5393_v48, %v8749_v46  ;;  %v8764_v10 = vld [vmem:[#allocation53_spill] sm:$0xff]  ;;  %v8765_v1 = vld [vmem:[#allocation62_spill] sm:$0xff]  ;;  %v8767_v13 = vld [vmem:[#allocation64_spill] sm:$0xff] }
 0x52d   : > { %v5406_v27 = vmax.f32 %v5405_v60, %v8750_v16  ;;  %v5418_v14 = vmax.f32 %v5417_v11, %v8751_v36  ;;  %v5430_v63 = vmax.f32 %v5429_v44, %v8752_v32  ;;  %v5442_v17 = vmax.f32 %v5441_v56, %v8753_v52  ;;  %v8763_v60 = vld [vmem:[#allocation52_spill] sm:$0xff]  ;;  %v8766_v44 = vld [vmem:[#allocation63_spill] sm:$0xff]  ;;  %v8768_v58 = vld [vmem:[#allocation65_spill] sm:$0xff] }
 0x52e   : > { %v5454_v0 = vmax.f32 %v5453_v2, %v8754_v7  ;;  %v5466_v24 = vmax.f32 %v5465_v31, %v8755_v5  ;;  %v5478_v42 = vmax.f32 %v5477_v30, %v8756_v57  ;;  %v5395_v41 = vmax.f32 %v5394_v43, %v8757_v38  ;;  %v8769_v2 = vld [vmem:[#allocation66_spill] sm:$0xff]  ;;  %v8770_v9 = vld [vmem:[#allocation67_spill] sm:$0xff]  ;;  %v8771_v8 = vld [vmem:[#allocation68_spill] sm:$0xff] }
 0x52f   : > { %v5407_v26 = vmax.f32 %v5406_v27, %v8758_v37  ;;  %v5419_v19 = vmax.f32 %v5418_v14, %v8759_v20  ;;  %v5431_v40 = vmax.f32 %v5430_v63, %v8760_v12  ;;  %v5443_v48 = vmax.f32 %v5442_v17, %v8761_v47  ;;  %v8772_v30 = vld [vmem:[#allocation69_spill] sm:$0xff]  ;;  %v8773_v43 = vld [vmem:[#allocation78_spill] sm:$0xff]  ;;  %v8774_v27 = vld [vmem:[#allocation79_spill] sm:$0xff] }
 0x530   : > { %v5455_v51 = vmax.f32 %v5454_v0, %v8762_v50  ;;  %v5467_v61 = vmax.f32 %v5466_v24, %v8763_v60  ;;  %v5479_v11 = vmax.f32 %v5478_v42, %v8764_v10  ;;  %v5396_v6 = vmax.f32 %v5395_v41, %v8765_v1  ;;  %v8775_v14 = vld [vmem:[#allocation80_spill] sm:$0xff]  ;;  %v8776_v63 = vld [vmem:[#allocation81_spill] sm:$0xff]  ;;  %v8777_v17 = vld [vmem:[#allocation82_spill] sm:$0xff] }
 0x531   : > { %v5408_v55 = vmax.f32 %v5407_v26, %v8766_v44  ;;  %v5420_v56 = vmax.f32 %v5419_v19, %v8767_v13  ;;  %v5432_v53 = vmax.f32 %v5431_v40, %v8768_v58  ;;  %v5444_v59 = vmax.f32 %v5443_v48, %v8769_v2  ;;  %v8778_v0 = vld [vmem:[#allocation83_spill] sm:$0xff]  ;;  %v8779_v24 = vld [vmem:[#allocation84_spill] sm:$0xff] }
 0x532   : > { %v5456_v31 = vmax.f32 %v5455_v51, %v8770_v9  ;;  %v5468_v54 = vmax.f32 %v5467_v61, %v8771_v8  ;;  %v5480_v46 = vmax.f32 %v5479_v11, %v8772_v30  ;;  %v5397_v16 = vmax.f32 %v5396_v6, %v8773_v43 }
 0x533   : > { %v5409_v36 = vmax.f32 %v5408_v55, %v8774_v27  ;;  %v5421_v32 = vmax.f32 %v5420_v56, %v8775_v14  ;;  %v5433_v52 = vmax.f32 %v5432_v53, %v8776_v63  ;;  %v5445_v7 = vmax.f32 %v5444_v59, %v8777_v17 }
 0x534   : > { %v5457_v5 = vmax.f32 %v5456_v31, %v8778_v0  ;;  %v5469_v57 = vmax.f32 %v5468_v54, %v8779_v24  ;;  %v5481_v42 = vmax.f32 %v5480_v46, %v8378_v35  ;;  %v5398_v38 = vmax.f32 %v5397_v16, %v8402_v15 }
 0x535   : > { %v5410_v41 = vmax.f32 %v5409_v36, %v8406_v3  ;;  %v5422_v37 = vmax.f32 %v5421_v32, %v8410_v45  ;;  %v5434_v26 = vmax.f32 %v5433_v52, %v8414_v62  ;;  %v5446_v20 = vmax.f32 %v5445_v7, %v8418_v4 }
 0x536   : > { %v5458_v19 = vmax.f32 %v5457_v5, %v8422_v18  ;;  %v5470_v12 = vmax.f32 %v5469_v57, %v8426_v25  ;;  %v5482_v40 = vmax.f32 %v5481_v42, %v8430_v28  ;;  %v5399_v47 = vrot.slane %v5398_v38, 4 }
 0x537   : > { %v5411_v48 = vrot.slane %v5410_v41, 4  ;;  %v5423_v50 = vrot.slane %v5422_v37, 4  ;;  %v5435_v35 = vrot.slane %v5434_v26, 4  ;;  %v5447_v51 = vrot.slane %v5446_v20, 4 }
 0x538   : > { %v5459_v15 = vrot.slane %v5458_v19, 4  ;;  %v5471_v60 = vrot.slane %v5470_v12, 4  ;;  %v5483_v3 = vrot.slane %v5482_v40, 4  ;;  %v5400_v61 = vmax.f32 %v5398_v38, %v5399_v47  ;;  %v8780_v47 = vld [vmem:[#allocation17_spill] sm:$0xff] }
 0x539   : > { %v5412_v45 = vmax.f32 %v5410_v41, %v5411_v48  ;;  %v5424_v10 = vmax.f32 %v5422_v37, %v5423_v50  ;;  %v5436_v62 = vmax.f32 %v5434_v26, %v5435_v35  ;;  %v5448_v11 = vmax.f32 %v5446_v20, %v5447_v51 }
 0x53a   : > { %v5460_v4 = vmax.f32 %v5458_v19, %v5459_v15  ;;  %v5472_v1 = vmax.f32 %v5470_v12, %v5471_v60  ;;  %v5484_v18 = vmax.f32 %v5482_v40, %v5483_v3  ;;  %v5401_v6 = vrot.slane %v5400_v61, 2 }
 0x53b   : > { %v5413_v25 = vrot.slane %v5412_v45, 2  ;;  %v5425_v44 = vrot.slane %v5424_v10, 2  ;;  %v5437_v28 = vrot.slane %v5436_v62, 2  ;;  %v5449_v55 = vrot.slane %v5448_v11, 2 }
 0x53c   : > { %v5461_v13 = vrot.slane %v5460_v4, 2  ;;  %v5473_v56 = vrot.slane %v5472_v1, 2  ;;  %v5485_v58 = vrot.slane %v5484_v18, 2  ;;  %v5402_v53 = vmax.f32 %v5400_v61, %v5401_v6 }
 0x53d   : > { %v5414_v2 = vmax.f32 %v5412_v45, %v5413_v25  ;;  %v5426_v59 = vmax.f32 %v5424_v10, %v5425_v44  ;;  %v5438_v9 = vmax.f32 %v5436_v62, %v5437_v28  ;;  %v5450_v31 = vmax.f32 %v5448_v11, %v5449_v55 }
 0x53e   : > { %v5462_v8 = vmax.f32 %v5460_v4, %v5461_v13  ;;  %v5474_v54 = vmax.f32 %v5472_v1, %v5473_v56  ;;  %v5486_v30 = vmax.f32 %v5484_v18, %v5485_v58  ;;  %v5403_v46 = vrot.slane %v5402_v53, 1 }
 0x53f   : > { %v5415_v43 = vrot.slane %v5414_v2, 1  ;;  %v5427_v16 = vrot.slane %v5426_v59, 1  ;;  %v5439_v27 = vrot.slane %v5438_v9, 1  ;;  %v5451_v36 = vrot.slane %v5450_v31, 1 }
 0x540   : > { %v5463_v14 = vrot.slane %v5462_v8, 1  ;;  %v5475_v32 = vrot.slane %v5474_v54, 1  ;;  %v5487_v63 = vrot.slane %v5486_v30, 1  ;;  %v5404_v52 = vmax.f32 %v5402_v53, %v5403_v46 }
 0x541   : > { %v5416_v17 = vmax.f32 %v5414_v2, %v5415_v43  ;;  %v5428_v7 = vmax.f32 %v5426_v59, %v5427_v16  ;;  %v5440_v0 = vmax.f32 %v5438_v9, %v5439_v27  ;;  %v5452_v5 = vmax.f32 %v5450_v31, %v5451_v36 }
 0x542   : > { %v5464_v24 = vmax.f32 %v5462_v8, %v5463_v14  ;;  %v5476_v57 = vmax.f32 %v5474_v54, %v5475_v32  ;;  %v5488_v42 = vmax.f32 %v5486_v30, %v5487_v63  ;;  %v5505_v38 = vcombine.low %v8480_v29, %v8482_v21 }
 0x543   : > { %v5506_v41 = vcombine.low %v8484_v22, %v8486_v33  ;;  %v5507_v37 = vcombine.low %v8488_v23, %v8490_v49  ;;  %v5508_v26 = vcombine.low %v8492_v34, %v8494_v39  ;;  %v5554_v20 = vcombine.low %v5404_v52, %v5416_v17 }
 0x544   : > { %v5555_v19 = vcombine.low %v5428_v7, %v5440_v0  ;;  %v5556_v12 = vcombine.low %v5452_v5, %v5464_v24  ;;  %v5557_v40 = vcombine.low %v5476_v57, %v5488_v42  ;;  %v5515_v48 = vrot.slane %v5505_v38, %v8780_v47 }
 0x545   : > { %v5522_v50 = vrot.slane %v5506_v41, %v8780_v47  ;;  %v5529_v29 = vrot.slane %v5507_v37, %v8780_v47  ;;  %v5536_v21 = vrot.slane %v5508_v26, %v8780_v47  ;;  %v5564_v22 = vrot.slane %v5554_v20, %v8780_v47 }
 0x546   : > { %v5571_v33 = vrot.slane %v5555_v19, %v8780_v47  ;;  %v5578_v23 = vrot.slane %v5556_v12, %v8780_v47  ;;  %v5585_v49 = vrot.slane %v5557_v40, %v8780_v47 }
 0x547   : > { %v5537_v34 = vcombine.low %v5515_v48, %v5522_v50  ;;  %v5538_v39 = vcombine.low %v5529_v29, %v5536_v21 }
 0x548   : > { %v5586_v35 = vcombine.low %v5564_v22, %v5571_v33  ;;  %v5587_v51 = vcombine.low %v5578_v23, %v5585_v49 }
 0x549   : > { %v5545_v15 = vrot.slane %v5537_v34, %v8780_v47  ;;  %v5552_v60 = vrot.slane %v5538_v39, %v8780_v47 }
 0x54a   : > { %v5594_v3 = vrot.slane %v5586_v35, %v8780_v47  ;;  %v5601_v61 = vrot.slane %v5587_v51, %v8780_v47 }
 0x54b   : > { %v5553_v45 = vcombine.low %v5545_v15, %v5552_v60 }
 0x54c   : > { %v5602_v10 = vcombine.low %v5594_v3, %v5601_v61 }
 0x54d   : > { %5605 = vst [vmem:[%s283_s6] sm:$0xff] %v5553_v45 }
 0x54e   : > { %5606 = vst [vmem:[%s283_s6 + $0x8] sm:$0xff] %v5602_v10 }
 0x54f   : > { %7512 = shalt.err (!%p7509_p4)
}
 0x550   : > { %s7513_s12 = scalar_lea.hbm %s8577_s17, 256  ;;  %s7517_s14 = scalar_lea.hbm %s8626_s5, 512 }
 0x551   : > { %p7514_p9 = scmp.ne.s32.totalorder %s8577_s17, %s7513_s12  ;;  %p7518_p8 = scmp.lt.u32.totalorder %s8577_s17, %s8626_s5 }
 0x552   : > { %p7519_p13 = scmp.lt.u32.totalorder %s7517_s14, %s7513_s12  ;;  %p7521_p10 = scmp.lt.u32.totalorder %s7513_s12, %s8577_s17 }
 0x553   : > { %p7515_p0 = pnand %p7514_p9, %p7764_p5 }
 0x554   : > { %p7520_p6 = por %p7519_p13, %p7518_p8 }
 0x555   : > { %p7516_p11 = pneg %p7515_p0 }
 0x556   : > { %p7522_p3 = por %p7521_p10, %p7520_p6 }
 0x558   : > { %p7523_p7 = pnand %p7522_p3, %p7516_p11 }
 0x55a   : > { %7526 = shalt.err (!%p7523_p7)
}
 0x55b   : > { %6520 = dma.vmem_to_hbm [thread:$0]  (%p7764_p5), %s8579_s10, 256, %s8577_s17, %s5608_s4  }
 0x55c PF: > { %s5634_s27 = sand.u32 1, %s7561_s20   ;;  %p8781_p12 = scmp.ne.s32.totalorder %s8632_s26, 0 }
 0x55d   : > { %p8782_p2 = scmp.ge.s32.totalorder %s7573_s23, 2  ;;  %s5635_s28 = scalar_lea.sflag [#allocation6], %s5634_s27 }
 0x55f   : > { %p6537_p1 = pnand %p8782_p2, %p8781_p12 }
 0x561   : > { %7556 = dma.done.wait (!%p6537_p1), %s5635_s28, 256  }
 0x562   : > { %7558 = vsyncadd (!%p6537_p1), %s5635_s28, 4294967040  ;;  %p21_p4 = scmp.ge.s32.totalorder %s7750_s15, 4   ;;  %s8783_s20 = smov %s7565_s21 }
 0x563   : > { %s8784_s21 = smov %s7569_s22  ;;  %s8785_s22 = smov %s7760_s16 }
 0x564   : > { %s8786_s23 = smov %s7750_s15  ;;  %23 = sbr.rel (!%p21_p4) target bundleno = 9 (0x9), region = 98 }
 0x56b   :  { %5640 = vsyncpa [#allocation5], 1 }
 0x56c   :  { %5642 = vsyncpa [#allocation5 + $0x1], 1 }
 0x56d   :  { %5643 = vsyncpa [#allocation8], 1 }
 0x56e   :  { %5644 = vsyncpa [#allocation11], 1 }
 0x56f   :  { %5645 = vsyncpa [#allocation6], 1 }
 0x570   :  { %5647 = vsyncpa [#allocation6 + $0x1], 1 }

</bundles_post_ra>
